<compile_context>
chip_gen: v5e
topology: v5e:2x2
jax: 0.10.0
libtpu: 0.0.40
codegen_flags: <defaults>
</compile_context>

<pallas_src>
import numpy as np
import jax
import jax.numpy as jnp
from jax import lax
from jax.experimental import pallas as pl
from jax.experimental.pallas import tpu as pltpu

# ----------------------------- module hyper-parameters -----------------------------
FIELD_DIMS = np.array([10, 12, 8, 10, 6, 9, 11, 7], dtype=np.int64)  # 8 fields
F = len(FIELD_DIMS)            # num_fields
D = 16                         # embed_dim
INNER_STEP = 1
INNER_STEP_SIZE = 0.001
LMBD = 1.0
HIDDEN = 100
BN_EPS = 1e-5

P = F * (F - 1) // 2           # 28 cross pairs
M = F * F - F                  # 56 off-diagonal w entries
IN_DIM = P + M                 # 84 clf input dim
IN_PAD = 128                   # lane-padded feature width
H_PAD = 128                    # lane-padded hidden width
FD = F * D                     # 128
PD = P * D                     # 448

# static cross indices (row/col) exactly as in __init__
_ROW, _COL = [], []
for _i in range(F - 1):
    for _j in range(_i + 1, F):
        _ROW.append(_i)
        _COL.append(_j)
ROW = np.array(_ROW, dtype=np.int32)
COL = np.array(_COL, dtype=np.int32)

OFFSETS = np.concatenate([[0], np.cumsum(FIELD_DIMS)[:-1]]).astype(np.int32)

# SELT2D_T[m, i*F+j] = 1 iff (i, j) is the m-th off-diagonal pair in row-major order
# (same entries the torch reshape trick extracts).  One-hot -> exact on the MXU.
SELT2D_T = np.zeros((M, F * F), dtype=np.float32)
_m = 0
for _i in range(F):
    for _j in range(F):
        if _i != _j:
            SELT2D_T[_m, _i * F + _j] = 1.0
            _m += 1

# ROW one-hot: folds the static row gather into the kernel-interaction matrix.
ROW_OH = np.zeros((P, F), dtype=np.float32)
ROW_OH[np.arange(P), ROW] = 1.0

# SELC_T[p*D+e, f*D+d] = 1 iff f == COL[p] and d == e (column gather as a 0/1 matmul)
SELC_T = np.zeros((PD, FD), dtype=np.float32)
for _p in range(P):
    for _e in range(D):
        SELC_T[_p * D + _e, COL[_p] * D + _e] = 1.0

# RSUM_T[p, p*D+e] = 1   (within-pair reduction over embed dim as a matmul)
RSUM_T = np.zeros((P, PD), dtype=np.float32)
for _p in range(P):
    RSUM_T[_p, _p * D:(_p + 1) * D] = 1.0

# small (F,F) masks passed as (F*F, 1) columns (avoids iota-over-leading-dim lowering)
EYE_FLAT = np.eye(F, dtype=np.float32).reshape(F * F, 1)                  # [i*F+j] = (i==j)
LT_FLAT = np.tril(np.ones((F, F), np.float32), k=-1).reshape(F * F, 1)    # [i*F+j] = (j<i)


# --------------------------------- kernel helpers ----------------------------------
def _sparse_proj(z, eye3, lt3, lmbd):
    """sparse_proj.forward, batch on lanes.  z: (F, 1, BT); eye3/lt3: (F, F, 1).

    Sorted order is recovered via pairwise comparisons:
      prec[i,j,b] = 1 iff element j is ranked strictly before element i (descending,
      ties broken by index).  c[i] = 1-based sorted position of i, s[i] = cumsum of the
      sorted values at that position.  tau is read off at position kcnt."""
    BT = z.shape[2]
    zj = z.reshape(1, F, BT)                                   # z[j] along sublanes
    gt = zj > z                                                # (F, F, BT): z[j] > z[i]
    tie = jnp.logical_and(zj == z, lt3 > 0.0)                  # tie-break: j < i
    prec = jnp.logical_or(gt, tie).astype(z.dtype)
    preceq = prec + eye3                                       # at-or-before (disjoint add)
    c = jnp.sum(prec, axis=1, keepdims=True) + 1.0             # (F, 1, BT)
    s = jnp.sum(preceq * zj, axis=1, keepdims=True)            # (F, 1, BT)
    zmax = jnp.max(z, axis=0, keepdims=True)                   # (1, 1, BT)
    taus = (s - c * zmax - lmbd) / c                           # taus at i's sorted position
    cond = ((z - zmax) > taus).astype(z.dtype)
    kcnt = jnp.sum(cond, axis=0, keepdims=True)                # (1, 1, BT), >= 1
    pick = (c == kcnt).astype(z.dtype)                         # exactly one per column
    tau = jnp.sum(pick * taus, axis=0, keepdims=True)
    return jnp.maximum(z - zmax - tau, 0.0)


def _bn_train(x, gamma, beta):
    """BatchNorm1d in training mode (batch statistics, biased variance), rsqrt on EUP."""
    m = jnp.mean(x, axis=0, keepdims=True)
    v = jnp.mean((x - m) ** 2, axis=0, keepdims=True)
    return (x - m) * lax.rsqrt(v + BN_EPS) * gamma + beta


# ------------------------- kernel 1: batch-tiled feature kernel ----------------------
def feat_kernel(vx_ref, w0_ref, mu0_ref, uvt_ref, rsumt_ref, seltt_ref,
                eye_ref, lt_ref, feat_ref):
    vxT = vx_ref[...]                                          # (F*D, BT), batch on lanes
    BT = vxT.shape[1]
    vx3 = vxT.reshape(F, D, BT)                                # [j, d, b]

    eye3 = eye_ref[...].reshape(F, F, 1)                       # [i, j] = (i == j)
    lt3 = lt_ref[...].reshape(F, F, 1)                         # [i, j] = (j < i)

    w3 = jnp.broadcast_to(w0_ref[...].reshape(F, F, 1), (F, F, BT))    # [i, j, b]
    mu = jnp.broadcast_to(mu0_ref[...].reshape(F, 1, 1), (F, 1, BT))   # [i, -, b]

    def w_bmm_vx(w3_):
        # wv[i,d,b] = sum_j w[i,j,b] * vx[j,d,b]  (F-term unrolled, full-lane VPU FMAs)
        acc = w3_[:, 0:1, :] * vx3[0:1, :, :]
        for j in range(1, F):
            acc = acc + w3_[:, j:j + 1, :] * vx3[j:j + 1, :, :]
        return acc                                             # (F, D, BT)

    wv3 = w_bmm_vx(w3)

    # ----- meta-learning inner steps -----
    for _ in range(INNER_STEP):
        cols = [jnp.sum(wv3 * vx3[j:j + 1, :, :], axis=1, keepdims=True)
                for j in range(F)]                             # dw[:, j, :] pieces
        dw3 = jnp.concatenate(cols, axis=1)                    # (F, F, BT)
        dw3 = dw3 * (mu * (1.0 / LMBD))                        # scale rows by mu[i]/lmbd
        w3 = jnp.where(eye3 > 0.0, -1.0, w3 - INNER_STEP_SIZE * dw3)   # proj_w
        wv3 = w_bmm_vx(w3)
        dmu = 0.5 * jnp.sum(wv3 * wv3, axis=1, keepdims=True)  # (F, 1, BT)
        mu = mu - INNER_STEP_SIZE * dmu
        mu = _sparse_proj(mu, eye3, lt3, LMBD)

    # ----- mu-scaled w, off-diagonal entries via an exact one-hot MXU matmul -----
    w_scaled = (mu * w3).reshape(F * F, BT)                    # row i*F+j
    w_off = jnp.dot(seltt_ref[...], w_scaled,
                    preferred_element_type=jnp.float32)        # (M, BT)

    # ----- pairwise kernel interactions: one fused [KR;SELC] matmul + 0/1 reduce -----
    uv = jnp.dot(uvt_ref[...], vxT, preferred_element_type=jnp.float32)   # (2*PD, BT)
    ox = jnp.dot(rsumt_ref[...], uv[0:PD, :] * uv[PD:2 * PD, :],
                 preferred_element_type=jnp.float32)                      # (P, BT)

    # single fully lane-dense store: rows [0:56]=w_off, [56:84]=ox, rest zero padding
    feat_ref[...] = jnp.concatenate(
        [w_off, ox, jnp.zeros((IN_PAD - IN_DIM, BT), jnp.float32)], axis=0)


# -------------------- kernel 2: gridless MLP head (full-batch BN) --------------------
def head_kernel(feat_ref, lin_ref, g1_ref, b1_ref, w1_ref, c1_ref,
                g2_ref, b2_ref, w2_ref, c2_ref, w3_ref, c3_ref, out_ref):
    h = _bn_train(feat_ref[...], g1_ref[...], b1_ref[...])
    h = jnp.maximum(
        jnp.dot(h, w1_ref[...], preferred_element_type=jnp.float32) + c1_ref[...], 0.0)
    h = _bn_train(h, g2_ref[...], b2_ref[...])
    h = jnp.maximum(
        jnp.dot(h, w2_ref[...], preferred_element_type=jnp.float32) + c2_ref[...], 0.0)
    o = jnp.dot(h, w3_ref[...], preferred_element_type=jnp.float32) + c3_ref[...]
    out_ref[...] = o + lin_ref[...]


# ---------------------------------- python wrapper -----------------------------------
def _round_up(v, m):
    return ((v + m - 1) // m) * m


def _choose_tile(B, batch_tile):
    bt = min(int(batch_tile), _round_up(B, 128))
    bt = max(128, _round_up(bt, 128))
    # keep at least 2 grid steps when the batch allows it so both TensorCores on v7x
    # get work via dimension_semantics=("parallel",)
    if B > 128 and pl.cdiv(B, bt) < 2:
        bt = max(128, _round_up(pl.cdiv(B, 2), 128))
    return bt, pl.cdiv(B, bt)


def corr_meta_learning_forward(x, params, *, batch_tile=256):
    """x: int32 (B, F) field indices."""
    B = x.shape[0]
    idx = x + jnp.asarray(OFFSETS)[None, :]                    # FeaturesEmbedding offsets
    vx = params['emb'][idx]                                    # (B, F, D) -- glue gather
    lin_sum = jnp.sum(params['lin_emb'][idx][..., 0], axis=1, keepdims=True)   # (B, 1)

    # KR[f*D+d, p*D+e] = [f == ROW[p]] * kernel[p, d, e]; fuse with SELC into one RHS.
    kr = jnp.asarray(ROW_OH)[:, :, None, None] * params['kern'][:, None, :, :]  # (P,F,D,D)
    kr = jnp.transpose(kr, (1, 2, 0, 3)).reshape(FD, PD)
    uvt = jnp.concatenate([kr.T, jnp.asarray(SELC_T)], axis=0)  # (2*PD, FD)

    bt, nb = _choose_tile(B, batch_tile)
    b_pad = nb * bt
    vxT = vx.reshape(B, FD).T                                   # (FD, B): batch on lanes
    if b_pad != B:
        vxT = jnp.pad(vxT, ((0, 0), (0, b_pad - B)))

    const = lambda i: (0, 0)
    featT = pl.pallas_call(
        feat_kernel,
        out_shape=jax.ShapeDtypeStruct((IN_PAD, b_pad), jnp.float32),
        grid_spec=pltpu.PrefetchScalarGridSpec(
            num_scalar_prefetch=0,
            grid=(nb,),
            in_specs=[
                pl.BlockSpec((FD, bt), lambda i: (0, i)),      # vxT (tiled over batch lanes)
                pl.BlockSpec((F * F, 1), const),               # w0 (resident)
                pl.BlockSpec((F, 1), const),                   # mu0
                pl.BlockSpec((2 * PD, FD), const),             # [KR ; SELC]
                pl.BlockSpec((P, PD), const),                  # RSUM^T
                pl.BlockSpec((M, F * F), const),               # SELT2D^T (off-diag one-hot)
                pl.BlockSpec((F * F, 1), const),               # (i==j) mask
                pl.BlockSpec((F * F, 1), const),               # (j<i) mask
            ],
            out_specs=pl.BlockSpec((IN_PAD, bt), lambda i: (0, i)),
        ),
        compiler_params=pltpu.CompilerParams(
            dimension_semantics=("parallel",)),
    )(vxT, params['w0'].reshape(F * F, 1), params['mu0'].reshape(F, 1),
      uvt, jnp.asarray(RSUM_T), jnp.asarray(SELT2D_T),
      jnp.asarray(EYE_FLAT), jnp.asarray(LT_FLAT))

    feat = featT[:, :B].T                                       # (B, IN_PAD), pad rows gone

    # Zero-pad the tiny MLP head to lane-dense 128-wide matmuls (exact: pads are zero).
    g1 = jnp.pad(params['g1'], ((0, 0), (0, IN_PAD - IN_DIM)))
    b1 = jnp.pad(params['b1'], ((0, 0), (0, IN_PAD - IN_DIM)))
    w1 = jnp.pad(params['l1_w'], ((0, IN_PAD - IN_DIM), (0, H_PAD - HIDDEN)))
    c1 = jnp.pad(params['l1_b'], ((0, 0), (0, H_PAD - HIDDEN)))
    g2 = jnp.pad(params['g2'], ((0, 0), (0, H_PAD - HIDDEN)))
    b2 = jnp.pad(params['b2'], ((0, 0), (0, H_PAD - HIDDEN)))
    w2 = jnp.pad(params['l2_w'], ((0, H_PAD - HIDDEN), (0, H_PAD - HIDDEN)))
    c2 = jnp.pad(params['l2_b'], ((0, 0), (0, H_PAD - HIDDEN)))
    w3 = jnp.pad(params['l3_w'], ((0, H_PAD - HIDDEN), (0, 0)))

    # MLP head on the whole batch so BatchNorm uses full-batch (training) statistics.
    # TODO(synk): could be fused into the last grid step of kernel 1 via a VMEM scratch,
    # but that conflicts with the "parallel" batch grid and padded-row-free BN stats.
    vmem = pl.BlockSpec(memory_space=pltpu.MemorySpace.VMEM)
    head_args = (feat, lin_sum, g1, b1, w1, c1, g2, b2, w2, c2, w3, params['l3_b'])
    out = pl.pallas_call(
        head_kernel,
        out_shape=jax.ShapeDtypeStruct((B, 1), jnp.float32),
        in_specs=[vmem] * len(head_args),
        out_specs=vmem,
    )(*head_args)
    return out[:, 0]


# --------------------------------- parameter init ------------------------------------
def init_params(key):
    ks = jax.random.split(key, 8)
    V = int(FIELD_DIMS.sum())
    a_e = float(np.sqrt(6.0 / (V + D)))                    # xavier_uniform (embedding)
    emb = jax.random.uniform(ks[0], (V, D), jnp.float32, -a_e, a_e)
    a_l = float(np.sqrt(6.0 / (V + 1)))
    lin_emb = jax.random.uniform(ks[1], (V, 1), jnp.float32, -a_l, a_l)
    a_k = float(np.sqrt(6.0 / (D + D)))                    # xavier_uniform (kernel)
    kern = jax.random.uniform(ks[2], (P, D, D), jnp.float32, -a_k, a_k)

    w0 = np.full((F, F), 1.0 / (F - 1), dtype=np.float32)
    np.fill_diagonal(w0, -1.0)
    mu0 = np.full((1, F), LMBD / F, dtype=np.float32)

    b1 = float(1.0 / np.sqrt(IN_DIM))
    W1 = jax.random.uniform(ks[3], (IN_DIM, HIDDEN), jnp.float32, -b1, b1)
    c1 = jax.random.uniform(ks[4], (1, HIDDEN), jnp.float32, -b1, b1)
    b2 = float(1.0 / np.sqrt(HIDDEN))
    W2 = jax.random.uniform(ks[5], (HIDDEN, HIDDEN), jnp.float32, -b2, b2)
    c2 = jax.random.uniform(ks[6], (1, HIDDEN), jnp.float32, -b2, b2)
    W3 = jax.random.uniform(ks[7], (HIDDEN, 1), jnp.float32, -b2, b2)
    c3 = jnp.zeros((1, 1), jnp.float32)

    return dict(
        emb=emb, lin_emb=lin_emb, kern=kern,
        w0=jnp.asarray(w0), mu0=jnp.asarray(mu0),
        g1=jnp.ones((1, IN_DIM), jnp.float32), b1=jnp.zeros((1, IN_DIM), jnp.float32),
        l1_w=W1, l1_b=c1,
        g2=jnp.ones((1, HIDDEN), jnp.float32), b2=jnp.zeros((1, HIDDEN), jnp.float32),
        l2_w=W2, l2_b=c2, l3_w=W3, l3_b=c3,
    )


# ----------------------------- pure-JAX reference (check) ----------------------------
def forward_reference(x, params):
    idx = x + jnp.asarray(OFFSETS)[None, :]
    vx = params['emb'][idx]
    B = vx.shape[0]
    hp = dict(precision=jax.lax.Precision.HIGHEST, preferred_element_type=jnp.float32)
    w = jnp.broadcast_to(params['w0'], (B, F, F))
    mu = jnp.broadcast_to(params['mu0'], (B, F))
    wv = jnp.einsum('bij,bjd->bid', w, vx, **hp)
    eye = jnp.eye(F, dtype=bool)[None]
    for _ in range(INNER_STEP):
        dw = jnp.einsum('bid,bjd->bij', wv, vx, **hp)
        dw = (mu / LMBD)[:, :, None] * dw
        w = jnp.where(eye, -1.0, w - INNER_STEP_SIZE * dw)
        wv = jnp.einsum('bij,bjd->bid', w, vx, **hp)
        mu = mu - INNER_STEP_SIZE * (0.5 * jnp.sum(wv ** 2, axis=2))
        z = mu
        z_s = -jnp.sort(-z, axis=1)
        z = z - z_s[:, :1]
        z_s = z_s - z_s[:, :1]
        taus = (jnp.cumsum(z_s, axis=1) - LMBD) / jnp.arange(1, F + 1, dtype=jnp.float32)
        k = jnp.sum((z_s > taus).astype(jnp.int32), axis=1, keepdims=True)
        tau = jnp.take_along_axis(taus, k - 1, axis=1)
        mu = jnp.maximum(z - tau, 0.0)
    ox = jnp.einsum('bpd,pde->bpe', vx[:, ROW, :], params['kern'], **hp)
    ox = jnp.sum(ox * vx[:, COL, :], axis=2)
    w2 = mu[:, :, None] * w
    wflat = w2.reshape(B, F * F)[:, 1:].reshape(B, F - 1, F + 1)[:, :, :-1].reshape(B, -1)
    feat = jnp.concatenate([wflat, ox], axis=1)

    def bn(xx, g, b):
        m_ = jnp.mean(xx, axis=0, keepdims=True)
        v_ = jnp.mean((xx - m_) ** 2, axis=0, keepdims=True)
        return (xx - m_) / jnp.sqrt(v_ + BN_EPS) * g + b

    h = jnp.maximum(jnp.dot(bn(feat, params['g1'], params['b1']),
                            params['l1_w'], **hp) + params['l1_b'], 0.0)
    h = jnp.maximum(jnp.dot(bn(h, params['g2'], params['b2']),
                            params['l2_w'], **hp) + params['l2_b'], 0.0)
    o = jnp.dot(h, params['l3_w'], **hp) + params['l3_b']
    lin = params['lin_emb'][idx][..., 0]
    return o[:, 0] + jnp.sum(lin, axis=-1)


# --------------------------------------- main ---------------------------------------
if __name__ == "__main__":
    key = jax.random.PRNGKey(0)
    kp, kx = jax.random.split(key)
    params = init_params(kp)

    BATCH = 64
    # x: long tensor (batch, num_fields), each entry < field_dims[f]
    x = jax.random.randint(kx, (BATCH, F), 0,
                           jnp.asarray(FIELD_DIMS.astype(np.int32))[None, :],
                           dtype=jnp.int32)

    fwd = jax.jit(lambda xx: corr_meta_learning_forward(xx, params))
    out = jax.block_until_ready(fwd(x))
    ref = jax.block_until_ready(forward_reference(x, params))
    assert out.shape == (BATCH,)
    assert bool(jnp.allclose(out, ref, rtol=1e-2, atol=1e-2)), (out, ref)

    print("KERNEL_OK")
</pallas_src>

<mosaic_0001>
module attributes {stable_mosaic.version = 11 : i64} {
  func.func @feat_kernel(%arg0: i32, %arg1: memref<128x128xf32, #tpu.memory_space<vmem>>, %arg2: memref<64x1xf32, #tpu.memory_space<vmem>>, %arg3: memref<8x1xf32, #tpu.memory_space<vmem>>, %arg4: memref<896x128xf32, #tpu.memory_space<vmem>>, %arg5: memref<28x448xf32, #tpu.memory_space<vmem>>, %arg6: memref<56x64xf32, #tpu.memory_space<vmem>>, %arg7: memref<64x1xf32, #tpu.memory_space<vmem>>, %arg8: memref<64x1xf32, #tpu.memory_space<vmem>>, %arg9: memref<128x128xf32, #tpu.memory_space<vmem>>) attributes {dimension_semantics = [#tpu.dimension_semantics<parallel>], iteration_bounds = array<i64: 1>, scalar_prefetch = 0 : i64, scratch_operands = 0 : i64, tpu.core_type = #tpu.core_type<tc>, window_params = [{transform_indices = @transform_0, window_bounds = array<i64: 128, 128>}, {pipeline_mode = #tpu.pipeline_mode<synchronous>, transform_indices = @transform_1, window_bounds = array<i64: 64, 1>}, {pipeline_mode = #tpu.pipeline_mode<synchronous>, transform_indices = @transform_2, window_bounds = array<i64: 8, 1>}, {pipeline_mode = #tpu.pipeline_mode<synchronous>, transform_indices = @transform_3, window_bounds = array<i64: 896, 128>}, {pipeline_mode = #tpu.pipeline_mode<synchronous>, transform_indices = @transform_4, window_bounds = array<i64: 28, 448>}, {pipeline_mode = #tpu.pipeline_mode<synchronous>, transform_indices = @transform_5, window_bounds = array<i64: 56, 64>}, {pipeline_mode = #tpu.pipeline_mode<synchronous>, transform_indices = @transform_6, window_bounds = array<i64: 64, 1>}, {pipeline_mode = #tpu.pipeline_mode<synchronous>, transform_indices = @transform_7, window_bounds = array<i64: 64, 1>}, {transform_indices = @transform_8, window_bounds = array<i64: 128, 128>}]} {
    %c0 = arith.constant 0 : index
    %c0_0 = arith.constant 0 : index
    %0 = vector.load %arg1[%c0, %c0_0] : memref<128x128xf32, #tpu.memory_space<vmem>>, vector<128x128xf32>
    %1 = vector.shape_cast %0 : vector<128x128xf32> to vector<8x16x128xf32>
    %c0_1 = arith.constant 0 : index
    %c0_2 = arith.constant 0 : index
    %2 = vector.load %arg7[%c0_1, %c0_2] : memref<64x1xf32, #tpu.memory_space<vmem>>, vector<64x1xf32>
    %3 = vector.shape_cast %2 : vector<64x1xf32> to vector<8x8x1xf32>
    %c0_3 = arith.constant 0 : index
    %c0_4 = arith.constant 0 : index
    %4 = vector.load %arg8[%c0_3, %c0_4] : memref<64x1xf32, #tpu.memory_space<vmem>>, vector<64x1xf32>
    %5 = vector.shape_cast %4 : vector<64x1xf32> to vector<8x8x1xf32>
    %c0_5 = arith.constant 0 : index
    %c0_6 = arith.constant 0 : index
    %6 = vector.load %arg2[%c0_5, %c0_6] : memref<64x1xf32, #tpu.memory_space<vmem>>, vector<64x1xf32>
    %7 = vector.shape_cast %6 : vector<64x1xf32> to vector<8x8x1xf32>
    %8 = vector.shape_cast %7 : vector<8x8x1xf32> to vector<8x8x1xf32>
    %9 = vector.broadcast %8 : vector<8x8x1xf32> to vector<8x8x128xf32>
    %c0_7 = arith.constant 0 : index
    %c0_8 = arith.constant 0 : index
    %10 = vector.load %arg3[%c0_7, %c0_8] : memref<8x1xf32, #tpu.memory_space<vmem>>, vector<8x1xf32>
    %11 = vector.shape_cast %10 : vector<8x1xf32> to vector<8x1x1xf32>
    %12 = vector.shape_cast %11 : vector<8x1x1xf32> to vector<8x1x1xf32>
    %13 = vector.broadcast %12 : vector<8x1x1xf32> to vector<8x1x128xf32>
    %14 = vector.extract_strided_slice %9 {offsets = [0, 0, 0], sizes = [8, 1, 128], strides = [1, 1, 1]} : vector<8x8x128xf32> to vector<8x1x128xf32>
    %15 = vector.extract_strided_slice %1 {offsets = [0, 0, 0], sizes = [1, 16, 128], strides = [1, 1, 1]} : vector<8x16x128xf32> to vector<1x16x128xf32>
    %16 = vector.broadcast %14 : vector<8x1x128xf32> to vector<8x16x128xf32>
    %17 = vector.broadcast %15 : vector<1x16x128xf32> to vector<8x16x128xf32>
    %18 = arith.mulf %16, %17 : vector<8x16x128xf32>
    %19 = vector.extract_strided_slice %9 {offsets = [0, 1, 0], sizes = [8, 1, 128], strides = [1, 1, 1]} : vector<8x8x128xf32> to vector<8x1x128xf32>
    %20 = vector.extract_strided_slice %1 {offsets = [1, 0, 0], sizes = [1, 16, 128], strides = [1, 1, 1]} : vector<8x16x128xf32> to vector<1x16x128xf32>
    %21 = vector.broadcast %19 : vector<8x1x128xf32> to vector<8x16x128xf32>
    %22 = vector.broadcast %20 : vector<1x16x128xf32> to vector<8x16x128xf32>
    %23 = arith.mulf %21, %22 : vector<8x16x128xf32>
    %24 = arith.addf %18, %23 : vector<8x16x128xf32>
    %25 = vector.extract_strided_slice %9 {offsets = [0, 2, 0], sizes = [8, 1, 128], strides = [1, 1, 1]} : vector<8x8x128xf32> to vector<8x1x128xf32>
    %26 = vector.extract_strided_slice %1 {offsets = [2, 0, 0], sizes = [1, 16, 128], strides = [1, 1, 1]} : vector<8x16x128xf32> to vector<1x16x128xf32>
    %27 = vector.broadcast %25 : vector<8x1x128xf32> to vector<8x16x128xf32>
    %28 = vector.broadcast %26 : vector<1x16x128xf32> to vector<8x16x128xf32>
    %29 = arith.mulf %27, %28 : vector<8x16x128xf32>
    %30 = arith.addf %24, %29 : vector<8x16x128xf32>
    %31 = vector.extract_strided_slice %9 {offsets = [0, 3, 0], sizes = [8, 1, 128], strides = [1, 1, 1]} : vector<8x8x128xf32> to vector<8x1x128xf32>
    %32 = vector.extract_strided_slice %1 {offsets = [3, 0, 0], sizes = [1, 16, 128], strides = [1, 1, 1]} : vector<8x16x128xf32> to vector<1x16x128xf32>
    %33 = vector.broadcast %31 : vector<8x1x128xf32> to vector<8x16x128xf32>
    %34 = vector.broadcast %32 : vector<1x16x128xf32> to vector<8x16x128xf32>
    %35 = arith.mulf %33, %34 : vector<8x16x128xf32>
    %36 = arith.addf %30, %35 : vector<8x16x128xf32>
    %37 = vector.extract_strided_slice %9 {offsets = [0, 4, 0], sizes = [8, 1, 128], strides = [1, 1, 1]} : vector<8x8x128xf32> to vector<8x1x128xf32>
    %38 = vector.extract_strided_slice %1 {offsets = [4, 0, 0], sizes = [1, 16, 128], strides = [1, 1, 1]} : vector<8x16x128xf32> to vector<1x16x128xf32>
    %39 = vector.broadcast %37 : vector<8x1x128xf32> to vector<8x16x128xf32>
    %40 = vector.broadcast %38 : vector<1x16x128xf32> to vector<8x16x128xf32>
    %41 = arith.mulf %39, %40 : vector<8x16x128xf32>
    %42 = arith.addf %36, %41 : vector<8x16x128xf32>
    %43 = vector.extract_strided_slice %9 {offsets = [0, 5, 0], sizes = [8, 1, 128], strides = [1, 1, 1]} : vector<8x8x128xf32> to vector<8x1x128xf32>
    %44 = vector.extract_strided_slice %1 {offsets = [5, 0, 0], sizes = [1, 16, 128], strides = [1, 1, 1]} : vector<8x16x128xf32> to vector<1x16x128xf32>
    %45 = vector.broadcast %43 : vector<8x1x128xf32> to vector<8x16x128xf32>
    %46 = vector.broadcast %44 : vector<1x16x128xf32> to vector<8x16x128xf32>
    %47 = arith.mulf %45, %46 : vector<8x16x128xf32>
    %48 = arith.addf %42, %47 : vector<8x16x128xf32>
    %49 = vector.extract_strided_slice %9 {offsets = [0, 6, 0], sizes = [8, 1, 128], strides = [1, 1, 1]} : vector<8x8x128xf32> to vector<8x1x128xf32>
    %50 = vector.extract_strided_slice %1 {offsets = [6, 0, 0], sizes = [1, 16, 128], strides = [1, 1, 1]} : vector<8x16x128xf32> to vector<1x16x128xf32>
    %51 = vector.broadcast %49 : vector<8x1x128xf32> to vector<8x16x128xf32>
    %52 = vector.broadcast %50 : vector<1x16x128xf32> to vector<8x16x128xf32>
    %53 = arith.mulf %51, %52 : vector<8x16x128xf32>
    %54 = arith.addf %48, %53 : vector<8x16x128xf32>
    %55 = vector.extract_strided_slice %9 {offsets = [0, 7, 0], sizes = [8, 1, 128], strides = [1, 1, 1]} : vector<8x8x128xf32> to vector<8x1x128xf32>
    %56 = vector.extract_strided_slice %1 {offsets = [7, 0, 0], sizes = [1, 16, 128], strides = [1, 1, 1]} : vector<8x16x128xf32> to vector<1x16x128xf32>
    %57 = vector.broadcast %55 : vector<8x1x128xf32> to vector<8x16x128xf32>
    %58 = vector.broadcast %56 : vector<1x16x128xf32> to vector<8x16x128xf32>
    %59 = arith.mulf %57, %58 : vector<8x16x128xf32>
    %60 = arith.addf %54, %59 : vector<8x16x128xf32>
    %61 = vector.extract_strided_slice %1 {offsets = [0, 0, 0], sizes = [1, 16, 128], strides = [1, 1, 1]} : vector<8x16x128xf32> to vector<1x16x128xf32>
    %62 = vector.broadcast %61 : vector<1x16x128xf32> to vector<8x16x128xf32>
    %63 = arith.mulf %60, %62 : vector<8x16x128xf32>
    %cst = arith.constant dense<0.000000e+00> : vector<8x128xf32>
    %64 = vector.multi_reduction <add>, %63, %cst [1] : vector<8x16x128xf32> to vector<8x128xf32>
    %65 = vector.shape_cast %64 : vector<8x128xf32> to vector<8x1x128xf32>
    %66 = vector.extract_strided_slice %1 {offsets = [1, 0, 0], sizes = [1, 16, 128], strides = [1, 1, 1]} : vector<8x16x128xf32> to vector<1x16x128xf32>
    %67 = vector.broadcast %66 : vector<1x16x128xf32> to vector<8x16x128xf32>
    %68 = arith.mulf %60, %67 : vector<8x16x128xf32>
    %cst_9 = arith.constant dense<0.000000e+00> : vector<8x128xf32>
    %69 = vector.multi_reduction <add>, %68, %cst_9 [1] : vector<8x16x128xf32> to vector<8x128xf32>
    %70 = vector.shape_cast %69 : vector<8x128xf32> to vector<8x1x128xf32>
    %71 = vector.extract_strided_slice %1 {offsets = [2, 0, 0], sizes = [1, 16, 128], strides = [1, 1, 1]} : vector<8x16x128xf32> to vector<1x16x128xf32>
    %72 = vector.broadcast %71 : vector<1x16x128xf32> to vector<8x16x128xf32>
    %73 = arith.mulf %60, %72 : vector<8x16x128xf32>
    %cst_10 = arith.constant dense<0.000000e+00> : vector<8x128xf32>
    %74 = vector.multi_reduction <add>, %73, %cst_10 [1] : vector<8x16x128xf32> to vector<8x128xf32>
    %75 = vector.shape_cast %74 : vector<8x128xf32> to vector<8x1x128xf32>
    %76 = vector.extract_strided_slice %1 {offsets = [3, 0, 0], sizes = [1, 16, 128], strides = [1, 1, 1]} : vector<8x16x128xf32> to vector<1x16x128xf32>
    %77 = vector.broadcast %76 : vector<1x16x128xf32> to vector<8x16x128xf32>
    %78 = arith.mulf %60, %77 : vector<8x16x128xf32>
    %cst_11 = arith.constant dense<0.000000e+00> : vector<8x128xf32>
    %79 = vector.multi_reduction <add>, %78, %cst_11 [1] : vector<8x16x128xf32> to vector<8x128xf32>
    %80 = vector.shape_cast %79 : vector<8x128xf32> to vector<8x1x128xf32>
    %81 = vector.extract_strided_slice %1 {offsets = [4, 0, 0], sizes = [1, 16, 128], strides = [1, 1, 1]} : vector<8x16x128xf32> to vector<1x16x128xf32>
    %82 = vector.broadcast %81 : vector<1x16x128xf32> to vector<8x16x128xf32>
    %83 = arith.mulf %60, %82 : vector<8x16x128xf32>
    %cst_12 = arith.constant dense<0.000000e+00> : vector<8x128xf32>
    %84 = vector.multi_reduction <add>, %83, %cst_12 [1] : vector<8x16x128xf32> to vector<8x128xf32>
    %85 = vector.shape_cast %84 : vector<8x128xf32> to vector<8x1x128xf32>
    %86 = vector.extract_strided_slice %1 {offsets = [5, 0, 0], sizes = [1, 16, 128], strides = [1, 1, 1]} : vector<8x16x128xf32> to vector<1x16x128xf32>
    %87 = vector.broadcast %86 : vector<1x16x128xf32> to vector<8x16x128xf32>
    %88 = arith.mulf %60, %87 : vector<8x16x128xf32>
    %cst_13 = arith.constant dense<0.000000e+00> : vector<8x128xf32>
    %89 = vector.multi_reduction <add>, %88, %cst_13 [1] : vector<8x16x128xf32> to vector<8x128xf32>
    %90 = vector.shape_cast %89 : vector<8x128xf32> to vector<8x1x128xf32>
    %91 = vector.extract_strided_slice %1 {offsets = [6, 0, 0], sizes = [1, 16, 128], strides = [1, 1, 1]} : vector<8x16x128xf32> to vector<1x16x128xf32>
    %92 = vector.broadcast %91 : vector<1x16x128xf32> to vector<8x16x128xf32>
    %93 = arith.mulf %60, %92 : vector<8x16x128xf32>
    %cst_14 = arith.constant dense<0.000000e+00> : vector<8x128xf32>
    %94 = vector.multi_reduction <add>, %93, %cst_14 [1] : vector<8x16x128xf32> to vector<8x128xf32>
    %95 = vector.shape_cast %94 : vector<8x128xf32> to vector<8x1x128xf32>
    %96 = vector.extract_strided_slice %1 {offsets = [7, 0, 0], sizes = [1, 16, 128], strides = [1, 1, 1]} : vector<8x16x128xf32> to vector<1x16x128xf32>
    %97 = vector.broadcast %96 : vector<1x16x128xf32> to vector<8x16x128xf32>
    %98 = arith.mulf %60, %97 : vector<8x16x128xf32>
    %cst_15 = arith.constant dense<0.000000e+00> : vector<8x128xf32>
    %99 = vector.multi_reduction <add>, %98, %cst_15 [1] : vector<8x16x128xf32> to vector<8x128xf32>
    %100 = vector.shape_cast %99 : vector<8x128xf32> to vector<8x1x128xf32>
    %101 = tpu.concatenate %65, %70, %75, %80, %85, %90, %95, %100 in 1 : vector<8x1x128xf32>, vector<8x1x128xf32>, vector<8x1x128xf32>, vector<8x1x128xf32>, vector<8x1x128xf32>, vector<8x1x128xf32>, vector<8x1x128xf32>, vector<8x1x128xf32> -> vector<8x8x128xf32>
    %cst_16 = arith.constant 1.000000e+00 : f32
    %102 = vector.broadcast %cst_16 : f32 to vector<8x1x128xf32>
    %103 = arith.mulf %13, %102 : vector<8x1x128xf32>
    %104 = vector.broadcast %103 : vector<8x1x128xf32> to vector<8x8x128xf32>
    %105 = arith.mulf %101, %104 : vector<8x8x128xf32>
    %cst_17 = arith.constant 0.000000e+00 : f32
    %106 = vector.broadcast %cst_17 : f32 to vector<8x8x1xf32>
    %107 = arith.cmpf ogt, %3, %106 : vector<8x8x1xf32>
    %cst_18 = arith.constant 1.000000e-03 : f32
    %108 = vector.broadcast %cst_18 : f32 to vector<8x8x128xf32>
    %109 = arith.mulf %108, %105 : vector<8x8x128xf32>
    %110 = arith.subf %9, %109 : vector<8x8x128xf32>
    %cst_19 = arith.constant -1.000000e+00 : f32
    %111 = vector.shape_cast %107 : vector<8x8x1xi1> to vector<8x8x1xi1>
    %112 = vector.broadcast %111 : vector<8x8x1xi1> to vector<8x8x128xi1>
    %113 = vector.broadcast %cst_19 : f32 to vector<8x8x128xf32>
    %114 = arith.select %112, %113, %110 : vector<8x8x128xi1>, vector<8x8x128xf32>
    %115 = vector.extract_strided_slice %114 {offsets = [0, 0, 0], sizes = [8, 1, 128], strides = [1, 1, 1]} : vector<8x8x128xf32> to vector<8x1x128xf32>
    %116 = vector.extract_strided_slice %1 {offsets = [0, 0, 0], sizes = [1, 16, 128], strides = [1, 1, 1]} : vector<8x16x128xf32> to vector<1x16x128xf32>
    %117 = vector.broadcast %115 : vector<8x1x128xf32> to vector<8x16x128xf32>
    %118 = vector.broadcast %116 : vector<1x16x128xf32> to vector<8x16x128xf32>
    %119 = arith.mulf %117, %118 : vector<8x16x128xf32>
    %120 = vector.extract_strided_slice %114 {offsets = [0, 1, 0], sizes = [8, 1, 128], strides = [1, 1, 1]} : vector<8x8x128xf32> to vector<8x1x128xf32>
    %121 = vector.extract_strided_slice %1 {offsets = [1, 0, 0], sizes = [1, 16, 128], strides = [1, 1, 1]} : vector<8x16x128xf32> to vector<1x16x128xf32>
    %122 = vector.broadcast %120 : vector<8x1x128xf32> to vector<8x16x128xf32>
    %123 = vector.broadcast %121 : vector<1x16x128xf32> to vector<8x16x128xf32>
    %124 = arith.mulf %122, %123 : vector<8x16x128xf32>
    %125 = arith.addf %119, %124 : vector<8x16x128xf32>
    %126 = vector.extract_strided_slice %114 {offsets = [0, 2, 0], sizes = [8, 1, 128], strides = [1, 1, 1]} : vector<8x8x128xf32> to vector<8x1x128xf32>
    %127 = vector.extract_strided_slice %1 {offsets = [2, 0, 0], sizes = [1, 16, 128], strides = [1, 1, 1]} : vector<8x16x128xf32> to vector<1x16x128xf32>
    %128 = vector.broadcast %126 : vector<8x1x128xf32> to vector<8x16x128xf32>
    %129 = vector.broadcast %127 : vector<1x16x128xf32> to vector<8x16x128xf32>
    %130 = arith.mulf %128, %129 : vector<8x16x128xf32>
    %131 = arith.addf %125, %130 : vector<8x16x128xf32>
    %132 = vector.extract_strided_slice %114 {offsets = [0, 3, 0], sizes = [8, 1, 128], strides = [1, 1, 1]} : vector<8x8x128xf32> to vector<8x1x128xf32>
    %133 = vector.extract_strided_slice %1 {offsets = [3, 0, 0], sizes = [1, 16, 128], strides = [1, 1, 1]} : vector<8x16x128xf32> to vector<1x16x128xf32>
    %134 = vector.broadcast %132 : vector<8x1x128xf32> to vector<8x16x128xf32>
    %135 = vector.broadcast %133 : vector<1x16x128xf32> to vector<8x16x128xf32>
    %136 = arith.mulf %134, %135 : vector<8x16x128xf32>
    %137 = arith.addf %131, %136 : vector<8x16x128xf32>
    %138 = vector.extract_strided_slice %114 {offsets = [0, 4, 0], sizes = [8, 1, 128], strides = [1, 1, 1]} : vector<8x8x128xf32> to vector<8x1x128xf32>
    %139 = vector.extract_strided_slice %1 {offsets = [4, 0, 0], sizes = [1, 16, 128], strides = [1, 1, 1]} : vector<8x16x128xf32> to vector<1x16x128xf32>
    %140 = vector.broadcast %138 : vector<8x1x128xf32> to vector<8x16x128xf32>
    %141 = vector.broadcast %139 : vector<1x16x128xf32> to vector<8x16x128xf32>
    %142 = arith.mulf %140, %141 : vector<8x16x128xf32>
    %143 = arith.addf %137, %142 : vector<8x16x128xf32>
    %144 = vector.extract_strided_slice %114 {offsets = [0, 5, 0], sizes = [8, 1, 128], strides = [1, 1, 1]} : vector<8x8x128xf32> to vector<8x1x128xf32>
    %145 = vector.extract_strided_slice %1 {offsets = [5, 0, 0], sizes = [1, 16, 128], strides = [1, 1, 1]} : vector<8x16x128xf32> to vector<1x16x128xf32>
    %146 = vector.broadcast %144 : vector<8x1x128xf32> to vector<8x16x128xf32>
    %147 = vector.broadcast %145 : vector<1x16x128xf32> to vector<8x16x128xf32>
    %148 = arith.mulf %146, %147 : vector<8x16x128xf32>
    %149 = arith.addf %143, %148 : vector<8x16x128xf32>
    %150 = vector.extract_strided_slice %114 {offsets = [0, 6, 0], sizes = [8, 1, 128], strides = [1, 1, 1]} : vector<8x8x128xf32> to vector<8x1x128xf32>
    %151 = vector.extract_strided_slice %1 {offsets = [6, 0, 0], sizes = [1, 16, 128], strides = [1, 1, 1]} : vector<8x16x128xf32> to vector<1x16x128xf32>
    %152 = vector.broadcast %150 : vector<8x1x128xf32> to vector<8x16x128xf32>
    %153 = vector.broadcast %151 : vector<1x16x128xf32> to vector<8x16x128xf32>
    %154 = arith.mulf %152, %153 : vector<8x16x128xf32>
    %155 = arith.addf %149, %154 : vector<8x16x128xf32>
    %156 = vector.extract_strided_slice %114 {offsets = [0, 7, 0], sizes = [8, 1, 128], strides = [1, 1, 1]} : vector<8x8x128xf32> to vector<8x1x128xf32>
    %157 = vector.extract_strided_slice %1 {offsets = [7, 0, 0], sizes = [1, 16, 128], strides = [1, 1, 1]} : vector<8x16x128xf32> to vector<1x16x128xf32>
    %158 = vector.broadcast %156 : vector<8x1x128xf32> to vector<8x16x128xf32>
    %159 = vector.broadcast %157 : vector<1x16x128xf32> to vector<8x16x128xf32>
    %160 = arith.mulf %158, %159 : vector<8x16x128xf32>
    %161 = arith.addf %155, %160 : vector<8x16x128xf32>
    %162 = arith.mulf %161, %161 : vector<8x16x128xf32>
    %cst_20 = arith.constant dense<0.000000e+00> : vector<8x128xf32>
    %163 = vector.multi_reduction <add>, %162, %cst_20 [1] : vector<8x16x128xf32> to vector<8x128xf32>
    %164 = vector.shape_cast %163 : vector<8x128xf32> to vector<8x1x128xf32>
    %cst_21 = arith.constant 5.000000e-01 : f32
    %165 = vector.broadcast %cst_21 : f32 to vector<8x1x128xf32>
    %166 = arith.mulf %165, %164 : vector<8x1x128xf32>
    %cst_22 = arith.constant 1.000000e-03 : f32
    %167 = vector.broadcast %cst_22 : f32 to vector<8x1x128xf32>
    %168 = arith.mulf %167, %166 : vector<8x1x128xf32>
    %169 = arith.subf %13, %168 : vector<8x1x128xf32>
    %170 = vector.shape_cast %169 : vector<8x1x128xf32> to vector<1x8x128xf32>
    %171 = vector.broadcast %170 : vector<1x8x128xf32> to vector<8x8x128xf32>
    %172 = vector.broadcast %169 : vector<8x1x128xf32> to vector<8x8x128xf32>
    %173 = arith.cmpf ogt, %171, %172 : vector<8x8x128xf32>
    %174 = vector.broadcast %170 : vector<1x8x128xf32> to vector<8x8x128xf32>
    %175 = vector.broadcast %169 : vector<8x1x128xf32> to vector<8x8x128xf32>
    %176 = arith.cmpf oeq, %174, %175 : vector<8x8x128xf32>
    %cst_23 = arith.constant 0.000000e+00 : f32
    %177 = vector.broadcast %cst_23 : f32 to vector<8x8x1xf32>
    %178 = arith.cmpf ogt, %5, %177 : vector<8x8x1xf32>
    %179 = vector.broadcast %178 : vector<8x8x1xi1> to vector<8x8x128xi1>
    %180 = arith.andi %176, %179 : vector<8x8x128xi1>
    %181 = arith.ori %173, %180 : vector<8x8x128xi1>
    %182 = arith.extui %181 : vector<8x8x128xi1> to vector<8x8x128xi32>
    %183 = arith.sitofp %182 : vector<8x8x128xi32> to vector<8x8x128xf32>
    %184 = vector.broadcast %3 : vector<8x8x1xf32> to vector<8x8x128xf32>
    %185 = arith.addf %183, %184 : vector<8x8x128xf32>
    %cst_24 = arith.constant dense<0.000000e+00> : vector<8x128xf32>
    %186 = vector.multi_reduction <add>, %183, %cst_24 [1] : vector<8x8x128xf32> to vector<8x128xf32>
    %187 = vector.shape_cast %186 : vector<8x128xf32> to vector<8x1x128xf32>
    %cst_25 = arith.constant 1.000000e+00 : f32
    %188 = vector.broadcast %cst_25 : f32 to vector<8x1x128xf32>
    %189 = arith.addf %187, %188 : vector<8x1x128xf32>
    %190 = vector.broadcast %170 : vector<1x8x128xf32> to vector<8x8x128xf32>
    %191 = arith.mulf %185, %190 : vector<8x8x128xf32>
    %cst_26 = arith.constant dense<0.000000e+00> : vector<8x128xf32>
    %192 = vector.multi_reduction <add>, %191, %cst_26 [1] : vector<8x8x128xf32> to vector<8x128xf32>
    %193 = vector.shape_cast %192 : vector<8x128xf32> to vector<8x1x128xf32>
    %cst_27 = arith.constant dense<0xFF800000> : vector<1x128xf32>
    %194 = vector.multi_reduction <maximumf>, %169, %cst_27 [0] : vector<8x1x128xf32> to vector<1x128xf32>
    %195 = vector.shape_cast %194 : vector<1x128xf32> to vector<1x1x128xf32>
    %196 = vector.broadcast %195 : vector<1x1x128xf32> to vector<8x1x128xf32>
    %197 = arith.mulf %189, %196 : vector<8x1x128xf32>
    %198 = arith.subf %193, %197 : vector<8x1x128xf32>
    %cst_28 = arith.constant 1.000000e+00 : f32
    %199 = vector.broadcast %cst_28 : f32 to vector<8x1x128xf32>
    %200 = arith.subf %198, %199 : vector<8x1x128xf32>
    %201 = arith.divf %200, %189 : vector<8x1x128xf32>
    %202 = vector.broadcast %195 : vector<1x1x128xf32> to vector<8x1x128xf32>
    %203 = arith.subf %169, %202 : vector<8x1x128xf32>
    %204 = arith.cmpf ogt, %203, %201 : vector<8x1x128xf32>
    %205 = arith.extui %204 : vector<8x1x128xi1> to vector<8x1x128xi32>
    %206 = arith.sitofp %205 : vector<8x1x128xi32> to vector<8x1x128xf32>
    %cst_29 = arith.constant dense<0.000000e+00> : vector<1x128xf32>
    %207 = vector.multi_reduction <add>, %206, %cst_29 [0] : vector<8x1x128xf32> to vector<1x128xf32>
    %208 = vector.shape_cast %207 : vector<1x128xf32> to vector<1x1x128xf32>
    %209 = vector.broadcast %208 : vector<1x1x128xf32> to vector<8x1x128xf32>
    %210 = arith.cmpf oeq, %189, %209 : vector<8x1x128xf32>
    %211 = arith.extui %210 : vector<8x1x128xi1> to vector<8x1x128xi32>
    %212 = arith.sitofp %211 : vector<8x1x128xi32> to vector<8x1x128xf32>
    %213 = arith.mulf %212, %201 : vector<8x1x128xf32>
    %cst_30 = arith.constant dense<0.000000e+00> : vector<1x128xf32>
    %214 = vector.multi_reduction <add>, %213, %cst_30 [0] : vector<8x1x128xf32> to vector<1x128xf32>
    %215 = vector.shape_cast %214 : vector<1x128xf32> to vector<1x1x128xf32>
    %216 = vector.broadcast %195 : vector<1x1x128xf32> to vector<8x1x128xf32>
    %217 = arith.subf %169, %216 : vector<8x1x128xf32>
    %218 = vector.broadcast %215 : vector<1x1x128xf32> to vector<8x1x128xf32>
    %219 = arith.subf %217, %218 : vector<8x1x128xf32>
    %cst_31 = arith.constant 0.000000e+00 : f32
    %220 = vector.broadcast %cst_31 : f32 to vector<8x1x128xf32>
    %221 = arith.maximumf %219, %220 : vector<8x1x128xf32>
    %222 = vector.broadcast %221 : vector<8x1x128xf32> to vector<8x8x128xf32>
    %223 = arith.mulf %222, %114 : vector<8x8x128xf32>
    %224 = vector.shape_cast %223 : vector<8x8x128xf32> to vector<64x128xf32>
    %c0_32 = arith.constant 0 : index
    %c0_33 = arith.constant 0 : index
    %225 = vector.load %arg6[%c0_32, %c0_33] : memref<56x64xf32, #tpu.memory_space<vmem>>, vector<56x64xf32>
    %cst_34 = arith.constant dense<0.000000e+00> : vector<56x128xf32>
    %226 = tpu.matmul %225, %224, %cst_34 {dimension_numbers = #tpu.dot_dimension_numbers<[1], [0], [0], [1], [0, 0, 1, 1], [], []>} : vector<56x64xf32>, vector<64x128xf32>, vector<56x128xf32> -> vector<56x128xf32>
    %c0_35 = arith.constant 0 : index
    %c0_36 = arith.constant 0 : index
    %227 = vector.load %arg4[%c0_35, %c0_36] : memref<896x128xf32, #tpu.memory_space<vmem>>, vector<896x128xf32>
    %cst_37 = arith.constant dense<0.000000e+00> : vector<896x128xf32>
    %228 = tpu.matmul %227, %0, %cst_37 {dimension_numbers = #tpu.dot_dimension_numbers<[1], [0], [0], [1], [0, 0, 1, 1], [], []>} : vector<896x128xf32>, vector<128x128xf32>, vector<896x128xf32> -> vector<896x128xf32>
    %c0_38 = arith.constant 0 : index
    %c0_39 = arith.constant 0 : index
    %229 = vector.load %arg5[%c0_38, %c0_39] : memref<28x448xf32, #tpu.memory_space<vmem>>, vector<28x448xf32>
    %230 = vector.extract_strided_slice %228 {offsets = [0, 0], sizes = [448, 128], strides = [1, 1]} : vector<896x128xf32> to vector<448x128xf32>
    %231 = vector.extract_strided_slice %228 {offsets = [448, 0], sizes = [448, 128], strides = [1, 1]} : vector<896x128xf32> to vector<448x128xf32>
    %232 = arith.mulf %230, %231 : vector<448x128xf32>
    %cst_40 = arith.constant dense<0.000000e+00> : vector<28x128xf32>
    %233 = tpu.matmul %229, %232, %cst_40 {dimension_numbers = #tpu.dot_dimension_numbers<[1], [0], [0], [1], [0, 0, 1, 1], [], []>} : vector<28x448xf32>, vector<448x128xf32>, vector<28x128xf32> -> vector<28x128xf32>
    %cst_41 = arith.constant 0.000000e+00 : f32
    %234 = vector.broadcast %cst_41 : f32 to vector<44x128xf32>
    %235 = tpu.concatenate %226, %233, %234 in 0 : vector<56x128xf32>, vector<28x128xf32>, vector<44x128xf32> -> vector<128x128xf32>
    %c0_42 = arith.constant 0 : index
    %c0_43 = arith.constant 0 : index
    %236 = vector.load %arg9[%c0_42, %c0_43] : memref<128x128xf32, #tpu.memory_space<vmem>>, vector<128x128xf32>
    tpu.vector_store %arg9[%c0_42, %c0_43], %235 {strides = array<i32>} : memref<128x128xf32, #tpu.memory_space<vmem>>, vector<128x128xf32>,
    return
  }
  func.func @transform_0(%arg0: i32) -> (i32, i32) {
    %c0_i32 = arith.constant 0 : i32
    %c0_i32_0 = arith.constant 0 : i32
    return %c0_i32, %arg0 : i32, i32
  }
  func.func @transform_1(%arg0: i32) -> (i32, i32) {
    %c0_i32 = arith.constant 0 : i32
    %c0_i32_0 = arith.constant 0 : i32
    %c0_i32_1 = arith.constant 0 : i32
    return %c0_i32, %c0_i32_0 : i32, i32
  }
  func.func @transform_2(%arg0: i32) -> (i32, i32) {
    %c0_i32 = arith.constant 0 : i32
    %c0_i32_0 = arith.constant 0 : i32
    %c0_i32_1 = arith.constant 0 : i32
    return %c0_i32, %c0_i32_0 : i32, i32
  }
  func.func @transform_3(%arg0: i32) -> (i32, i32) {
    %c0_i32 = arith.constant 0 : i32
    %c0_i32_0 = arith.constant 0 : i32
    %c0_i32_1 = arith.constant 0 : i32
    return %c0_i32, %c0_i32_0 : i32, i32
  }
  func.func @transform_4(%arg0: i32) -> (i32, i32) {
    %c0_i32 = arith.constant 0 : i32
    %c0_i32_0 = arith.constant 0 : i32
    %c0_i32_1 = arith.constant 0 : i32
    return %c0_i32, %c0_i32_0 : i32, i32
  }
  func.func @transform_5(%arg0: i32) -> (i32, i32) {
    %c0_i32 = arith.constant 0 : i32
    %c0_i32_0 = arith.constant 0 : i32
    %c0_i32_1 = arith.constant 0 : i32
    return %c0_i32, %c0_i32_0 : i32, i32
  }
  func.func @transform_6(%arg0: i32) -> (i32, i32) {
    %c0_i32 = arith.constant 0 : i32
    %c0_i32_0 = arith.constant 0 : i32
    %c0_i32_1 = arith.constant 0 : i32
    return %c0_i32, %c0_i32_0 : i32, i32
  }
  func.func @transform_7(%arg0: i32) -> (i32, i32) {
    %c0_i32 = arith.constant 0 : i32
    %c0_i32_0 = arith.constant 0 : i32
    %c0_i32_1 = arith.constant 0 : i32
    return %c0_i32, %c0_i32_0 : i32, i32
  }
  func.func @transform_8(%arg0: i32) -> (i32, i32) {
    %c0_i32 = arith.constant 0 : i32
    %c0_i32_0 = arith.constant 0 : i32
    return %c0_i32, %arg0 : i32, i32
  }
}

module attributes {stable_mosaic.version = 11 : i64} {
  func.func @head_kernel(%arg0: memref<64x128xf32, #tpu.memory_space<vmem>>, %arg1: memref<64x1xf32, #tpu.memory_space<vmem>>, %arg2: memref<1x128xf32, #tpu.memory_space<vmem>>, %arg3: memref<1x128xf32, #tpu.memory_space<vmem>>, %arg4: memref<128x128xf32, #tpu.memory_space<vmem>>, %arg5: memref<1x128xf32, #tpu.memory_space<vmem>>, %arg6: memref<1x128xf32, #tpu.memory_space<vmem>>, %arg7: memref<1x128xf32, #tpu.memory_space<vmem>>, %arg8: memref<128x128xf32, #tpu.memory_space<vmem>>, %arg9: memref<1x128xf32, #tpu.memory_space<vmem>>, %arg10: memref<128x1xf32, #tpu.memory_space<vmem>>, %arg11: memref<1x1xf32, #tpu.memory_space<vmem>>, %arg12: memref<64x1xf32, #tpu.memory_space<vmem>>) attributes {dimension_semantics = [], scalar_prefetch = 0 : i64, scratch_operands = 0 : i64, tpu.core_type = #tpu.core_type<tc>} {
    %c0 = arith.constant 0 : index
    %c0_0 = arith.constant 0 : index
    %0 = vector.load %arg0[%c0, %c0_0] : memref<64x128xf32, #tpu.memory_space<vmem>>, vector<64x128xf32>
    %c0_1 = arith.constant 0 : index
    %c0_2 = arith.constant 0 : index
    %1 = vector.load %arg2[%c0_1, %c0_2] : memref<1x128xf32, #tpu.memory_space<vmem>>, vector<1x128xf32>
    %c0_3 = arith.constant 0 : index
    %c0_4 = arith.constant 0 : index
    %2 = vector.load %arg3[%c0_3, %c0_4] : memref<1x128xf32, #tpu.memory_space<vmem>>, vector<1x128xf32>
    %cst = arith.constant dense<0.000000e+00> : vector<128xf32>
    %3 = vector.multi_reduction <add>, %0, %cst [0] : vector<64x128xf32> to vector<128xf32>
    %4 = vector.shape_cast %3 : vector<128xf32> to vector<1x128xf32>
    %cst_5 = arith.constant 6.400000e+01 : f32
    %5 = vector.broadcast %cst_5 : f32 to vector<1x128xf32>
    %6 = arith.divf %4, %5 : vector<1x128xf32>
    %7 = vector.broadcast %6 : vector<1x128xf32> to vector<64x128xf32>
    %8 = arith.subf %0, %7 : vector<64x128xf32>
    %9 = arith.mulf %8, %8 : vector<64x128xf32>
    %cst_6 = arith.constant dense<0.000000e+00> : vector<128xf32>
    %10 = vector.multi_reduction <add>, %9, %cst_6 [0] : vector<64x128xf32> to vector<128xf32>
    %11 = vector.shape_cast %10 : vector<128xf32> to vector<1x128xf32>
    %cst_7 = arith.constant 6.400000e+01 : f32
    %12 = vector.broadcast %cst_7 : f32 to vector<1x128xf32>
    %13 = arith.divf %11, %12 : vector<1x128xf32>
    %14 = vector.broadcast %6 : vector<1x128xf32> to vector<64x128xf32>
    %15 = arith.subf %0, %14 : vector<64x128xf32>
    %cst_8 = arith.constant 9.99999974E-6 : f32
    %16 = vector.broadcast %cst_8 : f32 to vector<1x128xf32>
    %17 = arith.addf %13, %16 : vector<1x128xf32>
    %18 = math.rsqrt %17 : vector<1x128xf32>
    %19 = vector.broadcast %18 : vector<1x128xf32> to vector<64x128xf32>
    %20 = arith.mulf %15, %19 : vector<64x128xf32>
    %21 = vector.broadcast %1 : vector<1x128xf32> to vector<64x128xf32>
    %22 = arith.mulf %20, %21 : vector<64x128xf32>
    %23 = vector.broadcast %2 : vector<1x128xf32> to vector<64x128xf32>
    %24 = arith.addf %22, %23 : vector<64x128xf32>
    %c0_9 = arith.constant 0 : index
    %c0_10 = arith.constant 0 : index
    %25 = vector.load %arg4[%c0_9, %c0_10] : memref<128x128xf32, #tpu.memory_space<vmem>>, vector<128x128xf32>
    %cst_11 = arith.constant dense<0.000000e+00> : vector<64x128xf32>
    %26 = tpu.matmul %24, %25, %cst_11 {dimension_numbers = #tpu.dot_dimension_numbers<[1], [0], [0], [1], [0, 0, 1, 1], [], []>} : vector<64x128xf32>, vector<128x128xf32>, vector<64x128xf32> -> vector<64x128xf32>
    %c0_12 = arith.constant 0 : index
    %c0_13 = arith.constant 0 : index
    %27 = vector.load %arg5[%c0_12, %c0_13] : memref<1x128xf32, #tpu.memory_space<vmem>>, vector<1x128xf32>
    %28 = vector.broadcast %27 : vector<1x128xf32> to vector<64x128xf32>
    %29 = arith.addf %26, %28 : vector<64x128xf32>
    %cst_14 = arith.constant 0.000000e+00 : f32
    %30 = vector.broadcast %cst_14 : f32 to vector<64x128xf32>
    %31 = arith.maximumf %29, %30 : vector<64x128xf32>
    %c0_15 = arith.constant 0 : index
    %c0_16 = arith.constant 0 : index
    %32 = vector.load %arg6[%c0_15, %c0_16] : memref<1x128xf32, #tpu.memory_space<vmem>>, vector<1x128xf32>
    %c0_17 = arith.constant 0 : index
    %c0_18 = arith.constant 0 : index
    %33 = vector.load %arg7[%c0_17, %c0_18] : memref<1x128xf32, #tpu.memory_space<vmem>>, vector<1x128xf32>
    %cst_19 = arith.constant dense<0.000000e+00> : vector<128xf32>
    %34 = vector.multi_reduction <add>, %31, %cst_19 [0] : vector<64x128xf32> to vector<128xf32>
    %35 = vector.shape_cast %34 : vector<128xf32> to vector<1x128xf32>
    %cst_20 = arith.constant 6.400000e+01 : f32
    %36 = vector.broadcast %cst_20 : f32 to vector<1x128xf32>
    %37 = arith.divf %35, %36 : vector<1x128xf32>
    %38 = vector.broadcast %37 : vector<1x128xf32> to vector<64x128xf32>
    %39 = arith.subf %31, %38 : vector<64x128xf32>
    %40 = arith.mulf %39, %39 : vector<64x128xf32>
    %cst_21 = arith.constant dense<0.000000e+00> : vector<128xf32>
    %41 = vector.multi_reduction <add>, %40, %cst_21 [0] : vector<64x128xf32> to vector<128xf32>
    %42 = vector.shape_cast %41 : vector<128xf32> to vector<1x128xf32>
    %cst_22 = arith.constant 6.400000e+01 : f32
    %43 = vector.broadcast %cst_22 : f32 to vector<1x128xf32>
    %44 = arith.divf %42, %43 : vector<1x128xf32>
    %45 = vector.broadcast %37 : vector<1x128xf32> to vector<64x128xf32>
    %46 = arith.subf %31, %45 : vector<64x128xf32>
    %cst_23 = arith.constant 9.99999974E-6 : f32
    %47 = vector.broadcast %cst_23 : f32 to vector<1x128xf32>
    %48 = arith.addf %44, %47 : vector<1x128xf32>
    %49 = math.rsqrt %48 : vector<1x128xf32>
    %50 = vector.broadcast %49 : vector<1x128xf32> to vector<64x128xf32>
    %51 = arith.mulf %46, %50 : vector<64x128xf32>
    %52 = vector.broadcast %32 : vector<1x128xf32> to vector<64x128xf32>
    %53 = arith.mulf %51, %52 : vector<64x128xf32>
    %54 = vector.broadcast %33 : vector<1x128xf32> to vector<64x128xf32>
    %55 = arith.addf %53, %54 : vector<64x128xf32>
    %c0_24 = arith.constant 0 : index
    %c0_25 = arith.constant 0 : index
    %56 = vector.load %arg8[%c0_24, %c0_25] : memref<128x128xf32, #tpu.memory_space<vmem>>, vector<128x128xf32>
    %cst_26 = arith.constant dense<0.000000e+00> : vector<64x128xf32>
    %57 = tpu.matmul %55, %56, %cst_26 {dimension_numbers = #tpu.dot_dimension_numbers<[1], [0], [0], [1], [0, 0, 1, 1], [], []>} : vector<64x128xf32>, vector<128x128xf32>, vector<64x128xf32> -> vector<64x128xf32>
    %c0_27 = arith.constant 0 : index
    %c0_28 = arith.constant 0 : index
    %58 = vector.load %arg9[%c0_27, %c0_28] : memref<1x128xf32, #tpu.memory_space<vmem>>, vector<1x128xf32>
    %59 = vector.broadcast %58 : vector<1x128xf32> to vector<64x128xf32>
    %60 = arith.addf %57, %59 : vector<64x128xf32>
    %cst_29 = arith.constant 0.000000e+00 : f32
    %61 = vector.broadcast %cst_29 : f32 to vector<64x128xf32>
    %62 = arith.maximumf %60, %61 : vector<64x128xf32>
    %c0_30 = arith.constant 0 : index
    %c0_31 = arith.constant 0 : index
    %63 = vector.load %arg10[%c0_30, %c0_31] : memref<128x1xf32, #tpu.memory_space<vmem>>, vector<128x1xf32>
    %cst_32 = arith.constant dense<0.000000e+00> : vector<64x1xf32>
    %64 = tpu.matmul %62, %63, %cst_32 {dimension_numbers = #tpu.dot_dimension_numbers<[1], [0], [0], [1], [0, 0, 1, 1], [], []>} : vector<64x128xf32>, vector<128x1xf32>, vector<64x1xf32> -> vector<64x1xf32>
    %c0_33 = arith.constant 0 : index
    %c0_34 = arith.constant 0 : index
    %65 = vector.load %arg11[%c0_33, %c0_34] : memref<1x1xf32, #tpu.memory_space<vmem>>, vector<1x1xf32>
    %66 = vector.broadcast %65 : vector<1x1xf32> to vector<64x1xf32>
    %67 = arith.addf %64, %66 : vector<64x1xf32>
    %c0_35 = arith.constant 0 : index
    %c0_36 = arith.constant 0 : index
    %68 = vector.load %arg1[%c0_35, %c0_36] : memref<64x1xf32, #tpu.memory_space<vmem>>, vector<64x1xf32>
    %69 = arith.addf %67, %68 : vector<64x1xf32>
    %c0_37 = arith.constant 0 : index
    %c0_38 = arith.constant 0 : index
    %70 = vector.load %arg12[%c0_37, %c0_38] : memref<64x1xf32, #tpu.memory_space<vmem>>, vector<64x1xf32>
    tpu.vector_store %arg12[%c0_37, %c0_38], %69 {strides = array<i32>} : memref<64x1xf32, #tpu.memory_space<vmem>>, vector<64x1xf32>,
    return
  }
}

</mosaic_0001>

<bundles_post_ra>
// kernel: _lambda_.2
= control target key start
LH: loop header
LB: loop body
LE: loop exit
PB: predicated region body
PF: predicated region fallthrough
CT: control target
= control target key end

     0   :  { %v9452_v0 = vmov 0   ;;  %s9443_s2 = inlined_call_operand.vmem [shape: f32[8,1], index: 2, kind: input, shape index: {}]   ;;  %s9444_s1 = inlined_call_operand.vmem [shape: f32[64,1], index: 1, kind: input, shape index: {}]   ;;  %s9445_s6 = inlined_call_operand.vmem [shape: f32[64,1], index: 6, kind: input, shape index: {}]   ;;  %s9446_s7 = inlined_call_operand.vmem [shape: f32[64,1], index: 7, kind: input, shape index: {}]   ;;  %s9447_s0 = inlined_call_operand.vmem [shape: f32[128,128], index: 0, kind: input, shape index: {}]   ;;  %s9448_s3 = inlined_call_operand.vmem [shape: f32[896,128], index: 3, kind: input, shape index: {}]   ;;  %s9449_s8 = inlined_call_operand.vmem [shape: f32[128,128], index: 8, kind: output, shape index: {}]   ;;  %s9450_s5 = inlined_call_operand.vmem [shape: f32[56,64], index: 5, kind: input, shape index: {}]   ;;  %s9451_s4 = inlined_call_operand.vmem [shape: f32[28,448], index: 4, kind: input, shape index: {}]  }
   0x1   :  { %4439 = vset.pattern.permute.xlu0 %v9452_v0  ;;  %v4565_v1 = vld [vmem:[%s9443_s2] sm:$0xff]  ;;  %4441 = vset.pattern.permute.xlu2 %v9452_v0  ;;  %v4580_v6 = vld [vmem:[%s9444_s1 + $0x8] sm:$0xff]  ;;  %v4586_v7 = vld [vmem:[%s9444_s1 + $0x18] sm:$0xff] }
   0x2   :  { %v4571_v2 = vld [vmem:[%s9444_s1] sm:$0xff]  ;;  %v1285_v3 = vperm.slane %v4565_v1, 0  ;;  %4440 = vset.pattern.permute.xlu1 %v9452_v0  ;;  %v114_v4 = vrot.slane %v4565_v1, 4  ;;  %v112_v5 = vrot.slane %v4565_v1, 2  ;;  %v4591_v8 = vld [vmem:[%s9444_s1 + $0x10] sm:$0xff]  ;;  %v111_v12 = vrot.slane %v4565_v1, 1 }
   0x3   :  { %4309 = vpush %v4571_v2  ;;  %v4597_v9 = vld [vmem:[%s9444_s1 + $0x20] sm:$0xff]  ;;  %v4608_v13 = vld [vmem:[%s9444_s1 + $0x28] sm:$0xff]  ;;  %v4614_v14 = vld [vmem:[%s9444_s1 + $0x30] sm:$0xff]  ;;  %v113_v15 = vrot.slane %v4565_v1, 3  ;;  %v198_v17 = vrot.slane %v4571_v2, 1  ;;  %v199_v18 = vrot.slane %v4580_v6, 1 }
   0x4   :  { %4311 = vpush %v4580_v6  ;;  %1294 = vperm.xlu0 %4439, %v1285_v3   ;;  %v1289_v10 = vperm.slane %v114_v4, 0  ;;  %v1287_v11 = vperm.slane %v112_v5, 0  ;;  %v4621_v16 = vld [vmem:[%s9444_s1 + $0x38] sm:$0xff]  ;;  %v1286_v19 = vperm.slane %v111_v12, 0  ;;  %v200_v20 = vrot.slane %v4591_v8, 1  ;;  %v45_v37 = vld [vmem:[%s9445_s6] sm:$0xff] }
   0x5   :  { %4313 = vpush %v4591_v8  ;;  %v201_v21 = vrot.slane %v4586_v7, 1  ;;  %v1288_v22 = vperm.slane %v113_v15, 0  ;;  %v202_v23 = vrot.slane %v4597_v9, 1  ;;  %v203_v24 = vrot.slane %v4608_v13, 1  ;;  %v46_v38 = vld [vmem:[%s9445_s6 + $0x8] sm:$0xff]  ;;  %v47_v51 = vld [vmem:[%s9445_s6 + $0x10] sm:$0xff] }
   0x6   :  { %4315 = vpush %v4586_v7  ;;  %1310 = vperm.xlu2 %4441, %v1289_v10   ;;  %1302 = vperm.xlu1 %4440, %v1287_v11   ;;  %v204_v25 = vrot.slane %v4614_v14, 1  ;;  %v205_v26 = vrot.slane %v4621_v16, 1  ;;  %v115_v27 = vrot.slane %v4565_v1, 5  ;;  %v262_v28 = vrot.slane %v4571_v2, 2  ;;  %v48_v63 = vld [vmem:[%s9445_s6 + $0x18] sm:$0xff] }
   0x7   :  { %4317 = vpush %v4597_v9  ;;  %v263_v29 = vrot.slane %v4580_v6, 2  ;;  %v264_v30 = vrot.slane %v4591_v8, 2  ;;  %v265_v31 = vrot.slane %v4586_v7, 2  ;;  %v266_v33 = vrot.slane %v4597_v9, 2 }
   0x8   :  { %4319 = vpush %v4608_v13  ;;  %v1290_v32 = vperm.slane %v115_v27, 0  ;;  %v267_v34 = vrot.slane %v4608_v13, 2  ;;  %v116_v35 = vrot.slane %v4565_v1, 6  ;;  %v268_v36 = vrot.slane %v4614_v14, 2 }
   0x9   :  { %4321 = vpush %v4614_v14  ;;  %v269_v39 = vrot.slane %v4621_v16, 2  ;;  %v326_v40 = vrot.slane %v4571_v2, 3  ;;  %v327_v41 = vrot.slane %v4580_v6, 3  ;;  %vm1333_vm0 = vcmp.gt.f32.partialorder %v45_v37, 0.0  ;;  %v51_v37 = vld [vmem:[%s9445_s6 + $0x30] sm:$0xff] }
   0xa   :  { %4323 = vpush %v4621_v16  ;;  %v1291_v42 = vperm.slane %v116_v35, 0  ;;  %vm1334_vm1 = vcmp.gt.f32.partialorder %v46_v38, 0.0  ;;  %v328_v43 = vrot.slane %v4591_v8, 3  ;;  %v329_v44 = vrot.slane %v4586_v7, 3  ;;  %v52_v38 = vld [vmem:[%s9445_s6 + $0x38] sm:$0xff] }
   0xb   :  { %4325 = vpush %v198_v17  ;;  %v330_v45 = vrot.slane %v4597_v9, 3  ;;  %v1357_v46 = vsel %vm1333_vm0, 1, %v9452_v0  ;;  %v1358_v47 = vsel %vm1334_vm1, 1, %v9452_v0  ;;  %v331_v48 = vrot.slane %v4608_v13, 3 }
   0xc   :  { %4327 = vpush %v199_v18  ;;  %1298 = vperm.xlu0 %4439, %v1286_v19   ;;  %v332_v49 = vrot.slane %v4614_v14, 3  ;;  %v333_v50 = vrot.slane %v4621_v16, 3  ;;  %v390_v52 = vrot.slane %v4571_v2, 4  ;;  %v117_v53 = vrot.slane %v4565_v1, 7 }
   0xd   :  { %4329 = vpush %v200_v20  ;;  %v391_v54 = vrot.slane %v4580_v6, 4  ;;  %v392_v55 = vrot.slane %v4591_v8, 4  ;;  %vm1335_vm2 = vcmp.gt.f32.partialorder %v47_v51, 0.0  ;;  %v393_v56 = vrot.slane %v4586_v7, 4 }
   0xe   :  { %4331 = vpush %v201_v21  ;;  %1306 = vperm.xlu1 %4440, %v1288_v22   ;;  %71 = vperm.xlu2 %4441, %v4571_v2   ;;  %v394_v57 = vrot.slane %v4597_v9, 4  ;;  %v1292_v58 = vperm.slane %v117_v53, 0  ;;  %v395_v59 = vrot.slane %v4608_v13, 4  ;;  %v1359_v60 = vsel %vm1335_vm2, 1, %v9452_v0  ;;  %v49_v21 = vld [vmem:[%s9445_s6 + $0x20] sm:$0xff] }
   0xf   :  { %4333 = vpush %v202_v23  ;;  %v396_v61 = vrot.slane %v4614_v14, 4  ;;  %v397_v62 = vrot.slane %v4621_v16, 4  ;;  %v454_v3 = vrot.slane %v4571_v2, 5  ;;  %v455_v10 = vrot.slane %v4580_v6, 5 }
  0x10   :  { %4335 = vpush %v203_v24  ;;  %v456_v11 = vrot.slane %v4591_v8, 5  ;;  %vm1336_vm3 = vcmp.gt.f32.partialorder %v48_v63, 0.0  ;;  %v457_v17 = vrot.slane %v4586_v7, 5  ;;  %v458_v18 = vrot.slane %v4597_v9, 5  ;;  %v50_v24 = vld [vmem:[%s9445_s6 + $0x28] sm:$0xff] }
  0x11   :  { %4337 = vpush %v204_v25  ;;  %v459_v19 = vrot.slane %v4608_v13, 5  ;;  %v1360_v20 = vsel %vm1336_vm3, 1, %v9452_v0  ;;  %v460_v22 = vrot.slane %v4614_v14, 5  ;;  %v461_v23 = vrot.slane %v4621_v16, 5 }
  0x12   :  { %4339 = vpush %v205_v26  ;;  %v518_v25 = vrot.slane %v4571_v2, 6  ;;  %vm1337_vm4 = vcmp.gt.f32.partialorder %v49_v21, 0.0  ;;  %v519_v26 = vrot.slane %v4580_v6, 6  ;;  %vm1338_vm5 = vcmp.gt.f32.partialorder %v50_v24, 0.0 }
  0x13   :  { %4341 = vpush %v262_v28  ;;  %v520_v28 = vrot.slane %v4591_v8, 6  ;;  %vm1339_vm6 = vcmp.gt.f32.partialorder %v51_v37, 0.0  ;;  %vm1340_vm7 = vcmp.gt.f32.partialorder %v52_v38, 0.0  ;;  %vm9463_vm0 = vcmask 1040384  }
  0x14   :  { %4343 = vpush %v263_v29  ;;  %76 = vperm.xlu0 %4439, %v4580_v6   ;;  %v521_v29 = vrot.slane %v4586_v7, 6  ;;  %vm1231_vm1 = vcmask 1041408   ;;  %vm1240_vm2 = vcmask 1042432   ;;  %vm9462_vm3 = vcmask 1043456  }
  0x15   :  { %4345 = vpush %v264_v30  ;;  %v1361_v30 = vsel %vm1337_vm4, 1, %v9452_v0  ;;  %vm1258_vm4 = vcmask 1044480  }
  0x16   :  { %4347 = vpush %v265_v31  ;;  %1314 = vperm.xlu1 %4440, %v1290_v32   ;;  %81 = vperm.xlu2 %4441, %v4591_v8   ;;  %v522_v31 = vrot.slane %v4597_v9, 6  ;;  %v523_v32 = vrot.slane %v4608_v13, 6 }
  0x17   :  { %4349 = vpush %v266_v33  ;;  %v1362_v33 = vsel %vm1338_vm5, 1, %v9452_v0  ;;  %vm1267_vm5 = vcmask 1045504  }
  0x18   :  { %4351 = vpush %v267_v34  ;;  %v524_v34 = vrot.slane %v4614_v14, 6 }
  0x19   :  { %4353 = vpush %v268_v36  ;;  %v525_v36 = vrot.slane %v4621_v16, 6 }
  0x1a   :  { %4355 = vpush %v269_v39  ;;  %v582_v39 = vrot.slane %v4571_v2, 7  ;;  %v585_v2 = vrot.slane %v4586_v7, 7 }
  0x1b   :  { %4357 = vpush %v326_v40  ;;  %v583_v40 = vrot.slane %v4580_v6, 7  ;;  %v587_v6 = vrot.slane %v4608_v13, 7 }
  0x1c   :  { %4359 = vpush %v327_v41  ;;  %1318 = vperm.xlu0 %4439, %v1291_v42   ;;  %v584_v41 = vrot.slane %v4591_v8, 7  ;;  %v586_v42 = vrot.slane %v4597_v9, 7  ;;  %v1364_v8 = vsel %vm1340_vm7, 1, %v9452_v0 }
  0x1d   :  { %4361 = vpush %v328_v43  ;;  %v1363_v43 = vsel %vm1339_vm6, 1, %v9452_v0  ;;  %vm1276_vm6 = vcmask 1046528  }
  0x1e   :  { %4363 = vpush %v329_v44  ;;  %1366 = vperm.xlu1 %4440, %v1357_v46   ;;  %1369 = vperm.xlu2 %4441, %v1358_v47   ;;  %v53_v44 = vld [vmem:[%s9446_s7] sm:$0xff]  ;;  %v4784_v47 = vld [vmem:[%s9446_s7 + $0x10] sm:$0xff] }
  0x1f   :  { %4365 = vpush %v330_v45  ;;  %vm1933_vm8 = vcmp.gt.f32.partialorder %v53_v44, 0.0  ;;  %vm1935_vm10 = vcmp.gt.f32.partialorder %v4784_v47, 0.0 }
  0x20   :  { %4367 = vpush %v331_v48  ;;  %v1941_v48 = vsel %vm1933_vm8, 1, %v9452_v0 }
  0x21   :  { %4369 = vpush %v332_v49 }
  0x22   :  { %4371 = vpush %v333_v50 }
  0x23   :  { %4373 = vpush %v390_v52 }
  0x24   :  { %4375 = vpush %v391_v54  ;;  %86 = vperm.xlu0 %4439, %v4586_v7   ;;  %v588_v7 = vrot.slane %v4614_v14, 7 }
  0x25   :  { %4377 = vpush %v392_v55  ;;  %v4799_v55 = vld [vmem:[%s9447_s0 + $0x10] sm:$0xff] }
  0x26   :  { %4379 = vpush %v393_v56  ;;  %1322 = vperm.xlu1 %4440, %v1292_v58   ;;  %1372 = vperm.xlu2 %4441, %v1359_v60  }
  0x27   :  { %4381 = vpush %v394_v57 }
  0x28   :  { %4383 = vpush %v395_v59 }
  0x29   :  { %4385 = vpush %v396_v61 }
  0x2a   :  { %4387 = vpush %v397_v62 }
  0x2b   :  { %4389 = vpush %v454_v3  ;;  %v4818_v3 = vld [vmem:[%s9447_s0 + $0x18] sm:$0xff] }
  0x2c   :  { %4391 = vpush %v455_v10  ;;  %91 = vperm.xlu0 %4439, %v4597_v9   ;;  %v54_v9 = vld [vmem:[%s9446_s7 + $0x8] sm:$0xff] }
  0x2d   :  { %4393 = vpush %v456_v11  ;;  %vm1934_vm9 = vcmp.gt.f32.partialorder %v54_v9, 0.0 }
  0x2e   :  { %4395 = vpush %v457_v17  ;;  %1375 = vperm.xlu1 %4440, %v1360_v20   ;;  %96 = vperm.xlu2 %4441, %v4608_v13   ;;  %v589_v13 = vrot.slane %v4621_v16, 7  ;;  %v4792_v51 = vsel %vm1934_vm9, 1, %v9452_v0 }
  0x2f   :  { %4397 = vpush %v458_v18 }
  0x30   :  { %4399 = vpush %v459_v19 }
  0x31   :  { %4401 = vpush %v460_v22 }
  0x32   :  { %4403 = vpush %v461_v23 }
  0x33   :  { %4405 = vpush %v518_v25 }
  0x34   :  { %4407 = vpush %v519_v26  ;;  %s4715_s2 = spop %4309  ;;  %1378 = vperm.xlu0 %4439, %v1361_v30  }
  0x35   :  { %4409 = vpush %v520_v28  ;;  %s4718_s11 = spop %4311  ;;  %v159_v45 = vstv %s4715_s2 }
  0x36   :  { %4411 = vpush %v521_v29  ;;  %s4727_s16 = spop %4313  ;;  %101 = vperm.xlu1 %4440, %v4614_v14   ;;  %1381 = vperm.xlu2 %4441, %v1362_v33   ;;  %v4768_v14 = vld [vmem:[%s9447_s0] sm:$0xff]  ;;  %v162_v46 = vstv %s4718_s11 }
  0x37   :  { %4413 = vpush %v522_v31  ;;  %s4731_s17 = spop %4315  ;;  %v165_v49 = vstv %s4727_s16  ;;  %v182_v52 = vmul.f32 %v159_v45, %v4768_v14  ;;  %v184_v57 = vmul.f32 %v162_v46, %v4768_v14 }
  0x38   :  { %4415 = vpush %v523_v32  ;;  %s4734_s18 = spop %4317  ;;  %v168_v50 = vstv %s4731_s17  ;;  %v186_v61 = vmul.f32 %v165_v49, %v4768_v14 }
  0x39   :  { %4417 = vpush %v524_v34  ;;  %s4737_s19 = spop %4319  ;;  %v171_v59 = vstv %s4734_s18  ;;  %v188_v63 = vmul.f32 %v168_v50, %v4768_v14 }
  0x3a   :  { %4419 = vpush %v525_v36  ;;  %s4740_s20 = spop %4321  ;;  %v174_v60 = vstv %s4737_s19  ;;  %v190_v20 = vmul.f32 %v171_v59, %v4768_v14 }
  0x3b   :  { %4421 = vpush %v582_v39  ;;  %s4743_s21 = spop %4323  ;;  %v177_v17 = vstv %s4740_s20  ;;  %v192_v22 = vmul.f32 %v174_v60, %v4768_v14 }
  0x3c   :  { %4423 = vpush %v583_v40  ;;  %s4751_s23 = spop %4325  ;;  %106 = vperm.xlu0 %4439, %v4621_v16   ;;  %v4773_v16 = vld [vmem:[%s9447_s0 + $0x8] sm:$0xff]  ;;  %v180_v23 = vstv %s4743_s21 }
  0x3d   :  { %4425 = vpush %v584_v41  ;;  %s4758_s26 = spop %4327  ;;  %v183_v54 = vmul.f32 %v159_v45, %v4773_v16  ;;  %v207_v56 = vstv %s4751_s23  ;;  %v185_v58 = vmul.f32 %v162_v46, %v4773_v16  ;;  %v187_v62 = vmul.f32 %v165_v49, %v4773_v16 }
  0x3e   :  { %4427 = vpush %v585_v2  ;;  %s4761_s27 = spop %4329  ;;  %1384 = vperm.xlu1 %4440, %v1363_v43   ;;  %1387 = vperm.xlu2 %4441, %v1364_v8   ;;  %v210_v10 = vstv %s4758_s26  ;;  %v189_v11 = vmul.f32 %v168_v50, %v4773_v16  ;;  %v230_v18 = vmul.f32 %v207_v56, %v4799_v55 }
  0x3f   :  { %4429 = vpush %v586_v42  ;;  %s4763_s28 = spop %4331  ;;  %v213_v19 = vstv %s4761_s27  ;;  %v191_v21 = vmul.f32 %v171_v59, %v4773_v16  ;;  %v193_v24 = vmul.f32 %v174_v60, %v4773_v16  ;;  %v231_v25 = vmul.f32 %v207_v56, %v4818_v3 }
  0x40   :  { %4431 = vpush %v587_v6  ;;  %s4776_s12 = spop %4333  ;;  %v232_v26 = vmul.f32 %v210_v10, %v4799_v55  ;;  %v216_v28 = vstv %s4763_s28  ;;  %v233_v29 = vmul.f32 %v210_v10, %v4818_v3  ;;  %v234_v30 = vmul.f32 %v213_v19, %v4799_v55 }
  0x41   :  { %4433 = vpush %v588_v7  ;;  %s4779_s13 = spop %4335  ;;  %v219_v31 = vstv %s4776_s12  ;;  %v195_v32 = vmul.f32 %v177_v17, %v4773_v16  ;;  %v196_v33 = vmul.f32 %v180_v23, %v4768_v14  ;;  %v197_v34 = vmul.f32 %v180_v23, %v4773_v16 }
  0x42   :  { %4435 = vpush %v589_v13  ;;  %s4789_s1 = spop %4337  ;;  %v246_v36 = vadd.f32 %v230_v18, %v182_v52  ;;  %v235_v37 = vmul.f32 %v213_v19, %v4818_v3  ;;  %v236_v38 = vmul.f32 %v216_v28, %v4799_v55  ;;  %v222_v39 = vstv %s4779_s13 }
  0x43   :  { %s4802_s22 = spop %4339  ;;  %v225_v40 = vstv %s4789_s1  ;;  %v4860_v41 = vadd.f32 %v231_v25, %v183_v54  ;;  %v4862_v2 = vadd.f32 %v232_v26, %v184_v57  ;;  %v237_v42 = vmul.f32 %v216_v28, %v4818_v3  ;;  %v4953_v25 = vld [vmem:[%s9447_s0 + $0x70] sm:$0xff] }
  0x44   :  { %s4808_s16 = spop %4341  ;;  %119 = vperm.xlu0 %4439, %v4565_v1   ;;  %v238_v6 = vmul.f32 %v219_v31, %v4799_v55  ;;  %v4870_v43 = vadd.f32 %v233_v29, %v185_v58  ;;  %v4872_v8 = vadd.f32 %v234_v30, %v186_v61  ;;  %v239_v44 = vmul.f32 %v219_v31, %v4818_v3 }
  0x45   :  { %s4821_s18 = spop %4343  ;;  %v228_v7 = vstv %s4802_s22  ;;  %v240_v9 = vmul.f32 %v222_v39, %v4799_v55  ;;  %v241_v13 = vmul.f32 %v222_v39, %v4818_v3  ;;  %v242_v45 = vmul.f32 %v225_v40, %v4799_v55 }
  0x46   :  { %s4827_s19 = spop %4345  ;;  %124 = vperm.xlu1 %4440, %v111_v12   ;;  %1950 = vperm.xlu2 %4441, %v1941_v48   ;;  %v194_v12 = vmul.f32 %v177_v17, %v4768_v14  ;;  %v271_v46 = vstv %s4808_s16  ;;  %v251_v48 = vadd.f32 %v235_v37, %v187_v62  ;;  %v4892_v49 = vadd.f32 %v236_v38, %v188_v63  ;;  %v4986_v37 = vld [vmem:[%s9447_s0 + $0x68] sm:$0xff] }
  0x47   :  { %s4835_s24 = spop %4347  ;;  %v243_v50 = vmul.f32 %v225_v40, %v4818_v3  ;;  %v1943_v52 = vsel %vm1935_vm10, 1, %v9452_v0  ;;  %v4900_v54 = vadd.f32 %v237_v42, %v189_v11  ;;  %v4902_v56 = vadd.f32 %v238_v6, %v190_v20  ;;  %v4932_v11 = vld [vmem:[%s9447_s0 + $0x78] sm:$0xff]  ;;  %v5006_v42 = vld [vmem:[%s9447_s0 + $0x30] sm:$0xff] }
  0x48   :  { %s4841_s20 = spop %4349  ;;  %v274_v57 = vstv %s4821_s18  ;;  %v4913_v47 = vadd.f32 %v239_v44, %v191_v21  ;;  %v245_v58 = vmul.f32 %v228_v7, %v4818_v3  ;;  %v277_v60 = vstv %s4827_s19  ;;  %4261 = vmatpush.msra.mxu1 %v4932_v11  ;;  %4262 = vmatpush.msra.mxu2 %v4932_v11  ;;  %v5011_v6 = vld [vmem:[%s9447_s0 + $0x38] sm:$0xff] }
  0x49   :  { %s4847_s21 = spop %4351  ;;  %v4920_v61 = vadd.f32 %v240_v9, %v192_v22  ;;  %v4922_v62 = vadd.f32 %v241_v13, %v193_v24  ;;  %v4924_v63 = vadd.f32 %v242_v45, %v194_v12  ;;  %v280_v10 = vstv %s4835_s24 }
  0x4a   :  { %s4852_s25 = spop %4353  ;;  %v4934_v17 = vadd.f32 %v243_v50, %v195_v32  ;;  %v283_v20 = vstv %s4841_s20  ;;  %v4955_v26 = vadd.f32 %v245_v58, %v197_v34  ;;  %4264 = vmatpush.msra.mxu1 %v4953_v25  ;;  %v286_v31 = vstv %s4847_s21  ;;  %4265 = vmatpush.msra.mxu2 %v4953_v25 }
  0x4b   :  { %s4858_s26 = spop %4355  ;;  %v289_v32 = vstv %s4852_s25 }
  0x4c   :  { %s4866_s27 = spop %4357  ;;  %129 = vperm.xlu0 %4439, %v112_v5   ;;  %v4884_v5 = vld [vmem:[%s9447_s0 + $0x20] sm:$0xff]  ;;  %4267 = vmatpush.msra.mxu1 %v4986_v37 }
  0x4d   :  { %s4876_s28 = spop %4359  ;;  %v294_v59 = vmul.f32 %v271_v46, %v4884_v5  ;;  %v296_v19 = vmul.f32 %v274_v57, %v4884_v5  ;;  %v298_v23 = vmul.f32 %v277_v60, %v4884_v5  ;;  %v300_v12 = vmul.f32 %v280_v10, %v4884_v5  ;;  %4268 = vmatpush.msra.mxu2 %v4986_v37 }
  0x4e   :  { %s4887_s9 = spop %4361  ;;  %1953 = vperm.xlu1 %4440, %v4792_v51   ;;  %134 = vperm.xlu2 %4441, %v113_v15   ;;  %v244_v51 = vmul.f32 %v228_v7, %v4799_v55  ;;  %v4908_v15 = vld [vmem:[%s9447_s0 + $0x28] sm:$0xff]  ;;  %v302_v30 = vmul.f32 %v283_v20, %v4884_v5  ;;  %v338_v13 = vstv %s4876_s28 }
  0x4f   :  { %s4898_s10 = spop %4363  ;;  %v295_v18 = vmul.f32 %v271_v46, %v4908_v15  ;;  %v297_v22 = vmul.f32 %v274_v57, %v4908_v15  ;;  %v299_v24 = vmul.f32 %v277_v60, %v4908_v15  ;;  %v4957_v28 = vadd.f32 %v294_v59, %v246_v36  ;;  %v5065_v60 = vld [vmem:[%s9447_s0 + $0x50] sm:$0xff] }
  0x50   :  { %s4911_s14 = spop %4365  ;;  %v4943_v21 = vadd.f32 %v244_v51, %v196_v33  ;;  %v301_v29 = vmul.f32 %v280_v10, %v4908_v15  ;;  %v4974_v34 = vadd.f32 %v296_v19, %v4862_v2  ;;  %v303_v36 = vmul.f32 %v283_v20, %v4908_v15 }
  0x51   :  { %s4918_s15 = spop %4367  ;;  %v4971_v33 = vadd.f32 %v295_v18, %v4860_v41  ;;  %v4989_v38 = vadd.f32 %v297_v22, %v4870_v43  ;;  %v4992_v39 = vadd.f32 %v298_v23, %v4872_v8  ;;  %v4994_v40 = vadd.f32 %v299_v24, %v251_v48  ;;  %v5019_v8 = vld [vmem:[%s9447_s0 + $0x60] sm:$0xff]  ;;  %v5085_v22 = vld [vmem:[%s9447_s0 + $0x48] sm:$0xff] }
  0x52   :  { %s4927_s1 = spop %4369  ;;  %v305_v41 = vmul.f32 %v286_v31, %v4908_v15  ;;  %v306_v2 = vmul.f32 %v289_v32, %v4884_v5  ;;  %v335_v43 = vstv %s4866_s27  ;;  %v316_v44 = vadd.f32 %v300_v12, %v4892_v49  ;;  %4270 = vmatpush.msra.mxu1 %v5019_v8  ;;  %v5042_v49 = vld [vmem:[%s9447_s0 + $0x58] sm:$0xff]  ;;  %4271 = vmatpush.msra.mxu2 %v5019_v8 }
  0x53   :  { %s4939_s22 = spop %4371  ;;  %v317_v7 = vadd.f32 %v301_v29, %v4900_v54  ;;  %v5025_v9 = vadd.f32 %v302_v30, %v4902_v56  ;;  %v5032_v45 = vadd.f32 %v303_v36, %v4913_v47  ;;  %v307_v46 = vmul.f32 %v289_v32, %v4908_v15 }
  0x54   :  { %s4948_s16 = spop %4373  ;;  %1956 = vperm.xlu0 %4439, %v1943_v52   ;;  %v341_v50 = vstv %s4887_s9  ;;  %v358_v54 = vmul.f32 %v335_v43, %v5006_v42  ;;  %v359_v56 = vmul.f32 %v335_v43, %v5011_v6  ;;  %v344_v51 = vstv %s4898_s10  ;;  %4273 = vmatpush.msra.mxu1 %v5042_v49 }
  0x55   :  { %s4960_s18 = spop %4375  ;;  %v5056_v47 = vadd.f32 %v305_v41, %v4922_v62  ;;  %v5059_v58 = vadd.f32 %v306_v2, %v4924_v63  ;;  %v360_v59 = vmul.f32 %v338_v13, %v5006_v42  ;;  %4274 = vmatpush.msra.mxu2 %v5042_v49  ;;  %v362_v10 = vmul.f32 %v341_v50, %v5006_v42 }
  0x56   :  { %s4967_s19 = spop %4377  ;;  %139 = vperm.xlu1 %4440, %v114_v4   ;;  %144 = vperm.xlu2 %4441, %v115_v27   ;;  %v292_v4 = vstv %s4858_s26  ;;  %v304_v27 = vmul.f32 %v286_v31, %v4884_v5  ;;  %v363_v62 = vmul.f32 %v341_v50, %v5011_v6  ;;  %v347_v18 = vstv %s4911_s14 }
  0x57   :  { %s4981_s24 = spop %4379  ;;  %v308_v48 = vmul.f32 %v292_v4, %v4884_v5  ;;  %v309_v52 = vmul.f32 %v292_v4, %v4908_v15  ;;  %4276 = vmatpush.msra.mxu1 %v5065_v60  ;;  %v5078_v63 = vadd.f32 %v307_v46, %v4934_v17  ;;  %v364_v19 = vmul.f32 %v344_v51, %v5006_v42 }
  0x58   :  { %s4997_s25 = spop %4381  ;;  %v5053_v57 = vadd.f32 %v304_v27, %v4920_v61  ;;  %v361_v61 = vmul.f32 %v338_v13, %v5011_v6  ;;  %v365_v20 = vmul.f32 %v344_v51, %v5011_v6  ;;  %v374_v24 = vadd.f32 %v358_v54, %v4957_v28  ;;  %4277 = vmatpush.msra.mxu2 %v5065_v60 }
  0x59   :  { %s5014_s26 = spop %4383  ;;  %v324_v17 = vadd.f32 %v308_v48, %v4943_v21  ;;  %v325_v23 = vadd.f32 %v309_v52, %v4955_v26  ;;  %v375_v12 = vadd.f32 %v359_v56, %v4971_v33  ;;  %4279 = vmatpush.msra.mxu1 %v5085_v22  ;;  %v366_v29 = vmul.f32 %v347_v18, %v5006_v42  ;;  %v5107_v21 = vld [vmem:[%s9447_s0 + $0x40] sm:$0xff] }
  0x5a   :  { %s5028_s17 = spop %4385  ;;  %v350_v1 = vstv %s4918_s15  ;;  %v376_v26 = vadd.f32 %v360_v59, %v4974_v34  ;;  %v377_v28 = vadd.f32 %v361_v61, %v4989_v38  ;;  %v378_v30 = vadd.f32 %v362_v10, %v4992_v39  ;;  %4280 = vmatpush.msra.mxu2 %v5085_v22 }
  0x5b   :  { %s5037_s27 = spop %4387  ;;  %v379_v31 = vadd.f32 %v363_v62, %v4994_v40  ;;  %4282 = vmatpush.msra.mxu1 %v5107_v21  ;;  %v380_v32 = vadd.f32 %v364_v19, %v316_v44  ;;  %v381_v33 = vadd.f32 %v365_v20, %v317_v7  ;;  %v356_v36 = vstv %s4939_s22 }
  0x5c   :  { %s5049_s28 = spop %4389  ;;  %v399_v4 = vstv %s4948_s16  ;;  %v368_v34 = vmul.f32 %v350_v1, %v5006_v42  ;;  %v369_v38 = vmul.f32 %v350_v1, %v5011_v6  ;;  %v402_v27 = vstv %s4960_s18  ;;  %4283 = vmatpush.msra.mxu2 %v5107_v21 }
  0x5d   :  { %s5067_s10 = spop %4391  ;;  %4285 = vmatpush.msra.mxu1 %v5011_v6  ;;  %v382_v40 = vadd.f32 %v366_v29, %v5025_v9  ;;  %v405_v43 = vstv %s4967_s19  ;;  %v372_v44 = vmul.f32 %v356_v36, %v5006_v42  ;;  %v373_v7 = vmul.f32 %v356_v36, %v5011_v6 }
  0x5e   :  { %s5074_s29 = spop %4393  ;;  %149 = vperm.xlu1 %4440, %v116_v35   ;;  %154 = vperm.xlu2 %4441, %v117_v53   ;;  %v367_v35 = vmul.f32 %v347_v18, %v5011_v6  ;;  %v353_v53 = vstv %s4927_s1  ;;  %v422_v13 = vmul.f32 %v399_v4, %v5107_v21  ;;  %v408_v46 = vstv %s4981_s24 }
  0x5f   :  { %s5087_s13 = spop %4395  ;;  %v370_v39 = vmul.f32 %v353_v53, %v5006_v42  ;;  %v371_v2 = vmul.f32 %v353_v53, %v5011_v6  ;;  %4288 = vmatpush.msra.mxu1 %v5006_v42  ;;  %v423_v9 = vmul.f32 %v399_v4, %v5085_v22  ;;  %v425_v48 = vmul.f32 %v402_v27, %v5085_v22 }
  0x60   :  { %s5097_s14 = spop %4397  ;;  %v383_v41 = vadd.f32 %v367_v35, %v5032_v45  ;;  %v424_v45 = vmul.f32 %v402_v27, %v5107_v21  ;;  %v411_v50 = vstv %s4997_s25  ;;  %4286 = vmatpush.msra.mxu2 %v5011_v6  ;;  %v384_v52 = vadd.f32 %v368_v34, %v5053_v57 }
  0x61   :  { %s5109_s23 = spop %4399  ;;  %v385_v54 = vadd.f32 %v369_v38, %v5056_v47  ;;  %v386_v56 = vadd.f32 %v370_v39, %v5059_v58  ;;  %v426_v51 = vmul.f32 %v405_v43, %v5107_v21  ;;  %4291 = vmatpush.msra.mxu1 %v4908_v15  ;;  %v427_v59 = vmul.f32 %v405_v43, %v5085_v22 }
  0x62   :  { %s5116_s15 = spop %4401  ;;  %v428_v61 = vmul.f32 %v408_v46, %v5107_v21  ;;  %v429_v10 = vmul.f32 %v408_v46, %v5085_v22  ;;  %v414_v62 = vstv %s5014_s26  ;;  %4289 = vmatpush.msra.mxu2 %v5006_v42  ;;  %v387_v57 = vadd.f32 %v371_v2, %v5078_v63 }
  0x63   :  { %s5126_s1 = spop %4403  ;;  %v388_v47 = vadd.f32 %v372_v44, %v324_v17  ;;  %v389_v58 = vadd.f32 %v373_v7, %v325_v23  ;;  %v430_v18 = vmul.f32 %v411_v50, %v5107_v21  ;;  %4294 = vmatpush.msra.mxu1 %v4884_v5  ;;  %v438_v19 = vadd.f32 %v422_v13, %v374_v24 }
  0x64   :  { %s5138_s22 = spop %4405  ;;  %v439_v20 = vadd.f32 %v423_v9, %v375_v12  ;;  %v440_v29 = vadd.f32 %v424_v45, %v376_v26  ;;  %v441_v35 = vadd.f32 %v425_v48, %v377_v28  ;;  %4292 = vmatpush.msra.mxu2 %v4908_v15  ;;  %v431_v1 = vmul.f32 %v411_v50, %v5085_v22 }
  0x65   :  { %s5145_s16 = spop %4407  ;;  %v432_v63 = vmul.f32 %v414_v62, %v5107_v21  ;;  %v417_v17 = vstv %s5028_s17  ;;  %v420_v23 = vstv %s5037_s27  ;;  %4297 = vmatpush.msra.mxu1 %v4818_v3  ;;  %v442_v53 = vadd.f32 %v426_v51, %v378_v30 }
  0x66   :  { %s5157_s18 = spop %4409  ;;  %v443_v24 = vadd.f32 %v427_v59, %v379_v31  ;;  %v444_v12 = vadd.f32 %v428_v61, %v380_v32  ;;  %v445_v26 = vadd.f32 %v429_v10, %v381_v33  ;;  %4295 = vmatpush.msra.mxu2 %v4884_v5  ;;  %v446_v28 = vadd.f32 %v430_v18, %v382_v40 }
  0x67   :  { %s5163_s19 = spop %4411  ;;  %v433_v36 = vmul.f32 %v414_v62, %v5085_v22  ;;  %v463_v4 = vstv %s5049_s28  ;;  %v466_v34 = vstv %s5067_s10  ;;  %4300 = vmatpush.msra.mxu1 %v4799_v55  ;;  %v434_v38 = vmul.f32 %v417_v17, %v5107_v21 }
  0x68   :  { %s5171_s24 = spop %4413  ;;  %v435_v30 = vmul.f32 %v417_v17, %v5085_v22  ;;  %v436_v31 = vmul.f32 %v420_v23, %v5107_v21  ;;  %v469_v32 = vstv %s5074_s29  ;;  %4298 = vmatpush.msra.mxu2 %v4818_v3  ;;  %v447_v33 = vadd.f32 %v431_v1, %v383_v41 }
  0x69   :  { %s5182_s25 = spop %4415  ;;  %v448_v39 = vadd.f32 %v432_v63, %v384_v52  ;;  %v437_v27 = vmul.f32 %v420_v23, %v5085_v22  ;;  %v472_v40 = vstv %s5087_s13  ;;  %4303 = vmatpush.msra.mxu1 %v4773_v16  ;;  %v486_v2 = vmul.f32 %v463_v4, %v5065_v60 }
  0x6a   :  { %v487_v43 = vmul.f32 %v463_v4, %v5042_v49  ;;  %v488_v44 = vmul.f32 %v466_v34, %v5065_v60  ;;  %v475_v7 = vstv %s5097_s14  ;;  %s5192_s26 = spop %4417  ;;  %4301 = vmatpush.msra.mxu2 %v4799_v55  ;;  %v449_v13 = vadd.f32 %v433_v36, %v385_v54 }
  0x6b   :  { %v489_v41 = vmul.f32 %v466_v34, %v5042_v49  ;;  %v490_v46 = vmul.f32 %v469_v32, %v5065_v60  ;;  %v491_v9 = vmul.f32 %v469_v32, %v5042_v49  ;;  %4306 = vmatpush.msra.mxu1 %v4768_v14  ;;  %v450_v45 = vadd.f32 %v434_v38, %v386_v56  ;;  %s5200_s17 = spop %4419 }
  0x6c   :  { %v451_v48 = vadd.f32 %v435_v30, %v387_v57  ;;  %v452_v50 = vadd.f32 %v436_v31, %v388_v47  ;;  %v492_v52 = vmul.f32 %v472_v40, %v5065_v60  ;;  %4304 = vmatpush.msra.mxu2 %v4773_v16  ;;  %v493_v54 = vmul.f32 %v472_v40, %v5042_v49  ;;  %s5207_s27 = spop %4421 }
  0x6d   :  { %v494_v51 = vmul.f32 %v475_v7, %v5065_v60  ;;  %v495_v59 = vmul.f32 %v475_v7, %v5042_v49  ;;  %v478_v61 = vstv %s5109_s23  ;;  %v453_v10 = vadd.f32 %v437_v27, %v389_v58  ;;  %s5211_s20 = spop %4423 }
  0x6e   :  { %v502_v62 = vadd.f32 %v486_v2, %v438_v19  ;;  %v503_v56 = vadd.f32 %v487_v43, %v439_v20  ;;  %v504_v57 = vadd.f32 %v488_v44, %v440_v29  ;;  %4307 = vmatpush.msra.mxu2 %v4768_v14  ;;  %v505_v47 = vadd.f32 %v489_v41, %v441_v35  ;;  %v56_v29 = vld [vmem:[%s9446_s7 + $0x18] sm:$0xff]  ;;  %s5224_s21 = spop %4425 }
  0x6f   :  { %v506_v18 = vadd.f32 %v490_v46, %v442_v53  ;;  %v507_v1 = vadd.f32 %v491_v9, %v443_v24  ;;  %v539_v63 = vstv %s5171_s24  ;;  %v5213_v17 = vadd.f32 %v492_v52, %v444_v12  ;;  %s5230_s10 = spop %4427 }
  0x70   :  { %v496_v58 = vmul.f32 %v478_v61, %v5065_v60  ;;  %v497_v19 = vmul.f32 %v478_v61, %v5042_v49  ;;  %v481_v20 = vstv %s5116_s15  ;;  %v5221_v23 = vadd.f32 %v493_v54, %v445_v26  ;;  %s4430_s29 = spop %4429 }
  0x71   :  { %v510_v35 = vadd.f32 %v494_v51, %v446_v28  ;;  %v511_v53 = vadd.f32 %v495_v59, %v447_v33  ;;  %v484_v24 = vstv %s5126_s1  ;;  %v527_v36 = vstv %s5138_s22  ;;  %s5710_s11 = spop %4431 }
  0x72   :  { %v530_v12 = vstv %s5145_s16  ;;  %v558_v4 = vmul.f32 %v539_v63, %v5019_v8  ;;  %v559_v34 = vmul.f32 %v539_v63, %v4986_v37  ;;  %v498_v38 = vmul.f32 %v481_v20, %v5065_v60  ;;  %s5740_s23 = spop %4433 }
  0x73   :  { %v499_v30 = vmul.f32 %v481_v20, %v5042_v49  ;;  %v533_v31 = vstv %s5157_s18  ;;  %vm1936_vm11 = vcmp.gt.f32.partialorder %v56_v29, 0.0  ;;  %v512_v26 = vadd.f32 %v496_v58, %v448_v39 }
  0x74   :  { %v5235_v28 = vadd.f32 %v497_v19, %v449_v13  ;;  %v500_v32 = vmul.f32 %v484_v24, %v5065_v60  ;;  %v1944_v33 = vsel %vm1936_vm11, 1, %v9452_v0  ;;  %v501_v27 = vmul.f32 %v484_v24, %v5042_v49 }
  0x75   :  { %v550_v40 = vmul.f32 %v527_v36, %v5019_v8  ;;  %v551_v2 = vmul.f32 %v527_v36, %v4986_v37  ;;  %v552_v43 = vmul.f32 %v530_v12, %v5019_v8  ;;  %1959 = vperm.xlu0 %4439, %v1944_v33   ;;  %v553_v44 = vmul.f32 %v530_v12, %v4986_v37 }
  0x76   :  { %v554_v39 = vmul.f32 %v533_v31, %v5019_v8  ;;  %v574_v7 = vadd.f32 %v558_v4, %v510_v35  ;;  %v575_v13 = vadd.f32 %v559_v34, %v511_v53  ;;  %v514_v41 = vadd.f32 %v498_v38, %v450_v45 }
  0x77   :  { %v5245_v46 = vadd.f32 %v499_v30, %v451_v48  ;;  %v555_v9 = vmul.f32 %v533_v31, %v4986_v37  ;;  %v603_v52 = vstv %s4430_s29  ;;  %v516_v54 = vadd.f32 %v500_v32, %v452_v50 }
  0x78   :  { %v536_v51 = vstv %s5163_s19  ;;  %v622_v59 = vmul.f32 %v603_v52, %v4953_v25  ;;  %v623_v61 = vmul.f32 %v603_v52, %v4932_v11  ;;  %v517_v63 = vadd.f32 %v501_v27, %v453_v10 }
  0x79   :  { %v5251_v58 = vadd.f32 %v550_v40, %v502_v62  ;;  %v5253_v19 = vadd.f32 %v551_v2, %v503_v56  ;;  %v5255_v20 = vadd.f32 %v552_v43, %v504_v57  ;;  %v5257_v45 = vadd.f32 %v553_v44, %v505_v47 }
  0x7a   :  { %v5259_v48 = vadd.f32 %v554_v39, %v506_v18  ;;  %v5261_v29 = vadd.f32 %v622_v59, %v574_v7  ;;  %v5263_v35 = vadd.f32 %v623_v61, %v575_v13  ;;  %v5265_v50 = vadd.f32 %v555_v9, %v507_v1 }
  0x7b   :  { %v556_v53 = vmul.f32 %v536_v51, %v5019_v8  ;;  %v557_v10 = vmul.f32 %v536_v51, %v4986_v37  ;;  %v542_v62 = vstv %s5182_s25  ;;  %v545_v32 = vstv %s5192_s26 }
  0x7c   :  { %v654_v56 = vmul.f32 %v5261_v29, %v4768_v14  ;;  %v655_v57 = vmul.f32 %v5263_v35, %v4773_v16  ;;  %v726_v47 = vmul.f32 %v5261_v29, %v4799_v55  ;;  %v727_v18 = vmul.f32 %v5263_v35, %v4818_v3 }
  0x7d   :  { %v798_v1 = vmul.f32 %v5261_v29, %v4884_v5  ;;  %v799_v24 = vmul.f32 %v5263_v35, %v4908_v15  ;;  %v870_v36 = vmul.f32 %v5261_v29, %v5006_v42  ;;  %v871_v12 = vmul.f32 %v5263_v35, %v5011_v6 }
  0x7e   :  { %v690_v4 = vadd.f32 %v655_v57, %v654_v56  ;;  %v762_v34 = vadd.f32 %v727_v18, %v726_v47  ;;  %v942_v38 = vmul.f32 %v5261_v29, %v5107_v21  ;;  %v943_v30 = vmul.f32 %v5263_v35, %v5085_v22 }
  0x7f   :  { %v560_v31 = vmul.f32 %v542_v62, %v5019_v8  ;;  %v548_v33 = vstv %s5200_s17  ;;  %v834_v27 = vadd.f32 %v799_v24, %v798_v1  ;;  %v906_v2 = vadd.f32 %v871_v12, %v870_v36 }
  0x80   :  { %v691_v40 = vrot.slane %v690_v4, 4  ;;  %v1014_v43 = vmul.f32 %v5261_v29, %v5065_v60  ;;  %v1015_v44 = vmul.f32 %v5263_v35, %v5042_v49  ;;  %v5298_v39 = vadd.f32 %v556_v53, %v5213_v17 }
  0x81   :  { %v5301_v7 = vadd.f32 %v557_v10, %v5221_v23  ;;  %v561_v13 = vmul.f32 %v542_v62, %v4986_v37  ;;  %v763_v9 = vrot.slane %v762_v34, 4  ;;  %v562_v52 = vmul.f32 %v545_v32, %v5019_v8 }
  0x82   :  { %v563_v51 = vmul.f32 %v545_v32, %v4986_v37  ;;  %v591_v59 = vstv %s5207_s27  ;;  %v978_v61 = vadd.f32 %v943_v30, %v942_v38  ;;  %v5307_v56 = vadd.f32 %v560_v31, %v512_v26 }
  0x83   :  { %v564_v57 = vmul.f32 %v548_v33, %v5019_v8  ;;  %v565_v47 = vmul.f32 %v548_v33, %v4986_v37  ;;  %v835_v17 = vrot.slane %v834_v27, 4  ;;  %v594_v53 = vstv %s5211_s20 }
  0x84   :  { %v692_v18 = vadd.f32 %v691_v40, %v690_v4  ;;  %v907_v23 = vrot.slane %v906_v2, 4  ;;  %v1050_v10 = vadd.f32 %v1015_v44, %v1014_v43  ;;  %v5313_v62 = vadd.f32 %v561_v13, %v5235_v28  ;;  %v57_v28 = vld [vmem:[%s9446_s7 + $0x20] sm:$0xff] }
  0x85   :  { %v614_v1 = vmul.f32 %v591_v59, %v4953_v25  ;;  %v615_v24 = vmul.f32 %v591_v59, %v4932_v11  ;;  %v764_v36 = vadd.f32 %v763_v9, %v762_v34  ;;  %v5317_v12 = vadd.f32 %v562_v52, %v514_v41  ;;  %v59_v59 = vld [vmem:[%s9446_s7 + $0x30] sm:$0xff] }
  0x86   :  { %v979_v26 = vrot.slane %v978_v61, 4  ;;  %v1086_v38 = vmul.f32 %v5261_v29, %v5019_v8  ;;  %v1087_v4 = vmul.f32 %v5263_v35, %v4986_v37  ;;  %v5327_v30 = vadd.f32 %v563_v51, %v5245_v46 }
  0x87   :  { %v5329_v31 = vadd.f32 %v564_v57, %v516_v54  ;;  %v616_v41 = vmul.f32 %v594_v53, %v4953_v25  ;;  %v836_v34 = vadd.f32 %v835_v17, %v834_v27  ;;  %v5332_v32 = vadd.f32 %v565_v47, %v517_v63  ;;  %v58_v63 = vld [vmem:[%s9446_s7 + $0x28] sm:$0xff] }
  0x88   :  { %v693_v33 = vrot.slane %v692_v18, 2  ;;  %v908_v40 = vadd.f32 %v907_v23, %v906_v2  ;;  %v1051_v43 = vrot.slane %v1050_v10, 4  ;;  %v5335_v44 = vadd.f32 %v614_v1, %v5251_v58 }
  0x89   :  { %9507 = vst [vmem:[#allocation2_spill] sm:$0xff] %v5329_v31  ;;  %v5338_v13 = vadd.f32 %v615_v24, %v5253_v19  ;;  %v765_v9 = vrot.slane %v764_v36, 2  ;;  %vm1937_vm12 = vcmp.gt.f32.partialorder %v57_v28, 0.0  ;;  %v617_v46 = vmul.f32 %v594_v53, %v4932_v11 }
  0x8a   :  { %9508 = vst [vmem:[#allocation3_spill] sm:$0xff] %v5332_v32  ;;  %v597_v54 = vstv %s5224_s21  ;;  %v980_v52 = vadd.f32 %v979_v26, %v978_v61  ;;  %v1122_v51 = vadd.f32 %v1087_v4, %v1086_v38  ;;  %v5346_v27 = vadd.f32 %v616_v41, %v5255_v20  ;;  %v60_v20 = vld [vmem:[%s9446_s7 + $0x38] sm:$0xff] }
  0x8b   :  { %v837_v58 = vrot.slane %v836_v34, 2  ;;  %v1158_v19 = vmul.f32 %v5261_v29, %v4953_v25  ;;  %v1159_v2 = vmul.f32 %v5263_v35, %v4932_v11  ;;  %v694_v61 = vadd.f32 %v693_v33, %v692_v18 }
  0x8c   :  { %v909_v57 = vrot.slane %v908_v40, 2  ;;  %v1052_v47 = vadd.f32 %v1051_v43, %v1050_v10  ;;  %v1945_v17 = vsel %vm1937_vm12, 1, %v9452_v0  ;;  %v618_v53 = vmul.f32 %v597_v54, %v4953_v25 }
  0x8d   :  { %v600_v23 = vstv %s5230_s10  ;;  %v766_v29 = vadd.f32 %v765_v9, %v764_v36  ;;  %1962 = vperm.xlu0 %4439, %v1945_v17   ;;  %vm1938_vm13 = vcmp.gt.f32.partialorder %v58_v63, 0.0  ;;  %v981_v35 = vrot.slane %v980_v52, 2 }
  0x8e   :  { %v1123_v1 = vrot.slane %v1122_v51, 4  ;;  %v1946_v24 = vsel %vm1938_vm13, 1, %v9452_v0  ;;  %vm1939_vm14 = vcmp.gt.f32.partialorder %v59_v59, 0.0  ;;  %v838_v18 = vadd.f32 %v837_v58, %v836_v34 }
  0x8f   :  { %v1194_v26 = vadd.f32 %v1159_v2, %v1158_v19  ;;  %1965 = vperm.xlu1 %4440, %v1946_v24   ;;  %v1947_v10 = vsel %vm1939_vm14, 1, %v9452_v0  ;;  %vm1940_vm15 = vcmp.gt.f32.partialorder %v60_v20, 0.0  ;;  %v5364_v38 = vmul.f32 %v597_v54, %v4932_v11 }
  0x90   :  { %v695_v4 = vrot.slane %v694_v61, 1  ;;  %v910_v28 = vadd.f32 %v909_v57, %v908_v40  ;;  %v1053_v41 = vrot.slane %v1052_v47, 2  ;;  %1968 = vperm.xlu2 %4441, %v1947_v10   ;;  %v5367_v36 = vadd.f32 %v617_v46, %v5257_v45 }
  0x91   :  { %v5370_v33 = vmul.f32 %v600_v23, %v4953_v25  ;;  %v767_v34 = vrot.slane %v766_v29, 1  ;;  %v982_v43 = vadd.f32 %v981_v35, %v980_v52  ;;  %v1124_v9 = vadd.f32 %v1123_v1, %v1122_v51 }
  0x92   :  { %v1948_v63 = vsel %vm1940_vm15, 1, %v9452_v0  ;;  %v646_v54 = vmul.f32 %v5335_v44, %v4768_v14  ;;  %v839_v58 = vrot.slane %v838_v18, 1  ;;  %v1195_v19 = vrot.slane %v1194_v26, 4 }
  0x93   :  { %v647_v40 = vmul.f32 %v5338_v13, %v4773_v16  ;;  %v718_v45 = vmul.f32 %v5335_v44, %v4799_v55  ;;  %v696_v46 = vadd.f32 %v695_v4, %v694_v61  ;;  %v911_v2 = vrot.slane %v910_v28, 1  ;;  %v4459_v4 = vld [vmem:[%s9445_s6 + $0x8] sm:$0xff] }
  0x94   :  { %v1054_v59 = vadd.f32 %v1053_v41, %v1052_v47  ;;  %v719_v52 = vmul.f32 %v5338_v13, %v4818_v3  ;;  %v768_v51 = vadd.f32 %v767_v34, %v766_v29  ;;  %v790_v14 = vmul.f32 %v5335_v44, %v4884_v5  ;;  %v4458_v3 = vld [vmem:[%s9445_s6] sm:$0xff] }
  0x95   :  { %1971 = vperm.xlu0 %4439, %v1948_v63   ;;  %v662_v57 = vadd.f32 %v647_v40, %v646_v54  ;;  %v791_v17 = vmul.f32 %v5338_v13, %v4908_v15  ;;  %v1125_v20 = vrot.slane %v1124_v9, 2  ;;  %v862_v55 = vmul.f32 %v5335_v44, %v5006_v42 }
  0x96   :  { %v734_v16 = vadd.f32 %v719_v52, %v718_v45  ;;  %v863_v61 = vmul.f32 %v5338_v13, %v5011_v6  ;;  %v934_v35 = vmul.f32 %v5335_v44, %v5107_v21  ;;  %v935_v1 = vmul.f32 %v5338_v13, %v5085_v22 }
  0x97   :  { %2367 = vperm.xlu1 %4440, %v4458_v3   ;;  %v663_v47 = vrot.slane %v662_v57, 4  ;;  %v806_v29 = vadd.f32 %v791_v17, %v790_v14  ;;  %v840_v24 = vadd.f32 %v839_v58, %v838_v18  ;;  %v983_v10 = vrot.slane %v982_v43, 1 }
  0x98   :  { %2371 = vperm.xlu2 %4441, %v4459_v4   ;;  %v735_v41 = vrot.slane %v734_v16, 4  ;;  %v878_v34 = vadd.f32 %v863_v61, %v862_v55  ;;  %v1196_v63 = vadd.f32 %v1195_v19, %v1194_v26  ;;  %v1227_v54 = vsel %vm9463_vm0, %v696_v46, %v768_v51 }
  0x99   :  { %v1006_v40 = vmul.f32 %v5335_v44, %v5065_v60  ;;  %v1007_v45 = vmul.f32 %v5338_v13, %v5042_v49  ;;  %v5405_v52 = vadd.f32 %v618_v53, %v5259_v48  ;;  %v621_v18 = vmul.f32 %v600_v23, %v4932_v11  ;;  %v4460_v48 = vld [vmem:[%s9445_s6 + $0x10] sm:$0xff] }
  0x9a   :  { %v664_v58 = vadd.f32 %v663_v47, %v662_v57  ;;  %v807_v14 = vrot.slane %v806_v29, 4  ;;  %v912_v17 = vadd.f32 %v911_v2, %v910_v28  ;;  %v950_v55 = vadd.f32 %v935_v1, %v934_v35  ;;  %v4461_v47 = vld [vmem:[%s9445_s6 + $0x18] sm:$0xff] }
  0x9b   :  { %v1126_v26 = vadd.f32 %v1125_v20, %v1124_v9  ;;  %v1236_v19 = vsel %vm1231_vm1, %v1227_v54, %v840_v24  ;;  %v736_v46 = vadd.f32 %v735_v41, %v734_v16  ;;  %v879_v51 = vrot.slane %v878_v34, 4 }
  0x9c   :  { %v984_v61 = vadd.f32 %v983_v10, %v982_v43  ;;  %v1055_v3 = vrot.slane %v1054_v59, 1  ;;  %v1197_v4 = vrot.slane %v1196_v63, 2  ;;  %v1022_v53 = vadd.f32 %v1007_v45, %v1006_v40 }
  0x9d   :  { %2375 = vperm.xlu0 %4439, %v4460_v48   ;;  %v665_v23 = vrot.slane %v664_v58, 2  ;;  %v808_v57 = vadd.f32 %v807_v14, %v806_v29  ;;  %v1078_v28 = vmul.f32 %v5335_v44, %v5019_v8  ;;  %v1079_v9 = vmul.f32 %v5338_v13, %v4986_v37 }
  0x9e   :  { %v5418_v2 = vadd.f32 %v5364_v38, %v5265_v50  ;;  %v5422_v43 = vadd.f32 %v5370_v33, %v5298_v39  ;;  %v1245_v20 = vsel %vm1240_vm2, %v1236_v19, %v912_v17  ;;  %v951_v16 = vrot.slane %v950_v55, 4  ;;  %v4462_v50 = vld [vmem:[%s9445_s6 + $0x20] sm:$0xff] }
  0x9f   :  { %2379 = vperm.xlu1 %4440, %v4461_v47   ;;  %v5429_v29 = vadd.f32 %v621_v18, %v5301_v7  ;;  %v1127_v35 = vrot.slane %v1126_v26, 1  ;;  %v737_v1 = vrot.slane %v736_v46, 2  ;;  %v880_v24 = vadd.f32 %v879_v51, %v878_v34  ;;  %v5444_v18 = vld [vmem:[%s9447_s0] sm:$0xff] }
  0xa0   :  { %2383 = vperm.xlu2 %4441, %v4462_v50   ;;  %v1056_v39 = vadd.f32 %v1055_v3, %v1054_v59  ;;  %v5434_v38 = vadd.f32 %v1197_v4, %v1196_v63  ;;  %v1023_v33 = vrot.slane %v1022_v53, 4  ;;  %v1254_v10 = vsel %vm9462_vm3, %v1245_v20, %v984_v61  ;;  %v5473_v61 = vld [vmem:[%s9447_s0 + $0x10] sm:$0xff] }
  0xa1   :  { %v666_v41 = vadd.f32 %v665_v23, %v664_v58  ;;  %v809_v54 = vrot.slane %v808_v57, 2  ;;  %v1094_v40 = vadd.f32 %v1079_v9, %v1078_v28  ;;  %v952_v7 = vadd.f32 %v951_v16, %v950_v55  ;;  %v5482_v23 = vld [vmem:[%s9447_s0 + $0x18] sm:$0xff]  ;;  %v4468_v28 = vld [vmem:[%s9445_s6 + $0x30] sm:$0xff] }
  0xa2   :  { %v1150_v45 = vmul.f32 %v5335_v44, %v4953_v25  ;;  %v1151_v34 = vmul.f32 %v5338_v13, %v4932_v11  ;;  %v650_v59 = vmul.f32 %v5444_v18, %v5405_v52  ;;  %v5448_v63 = vadd.f32 %v1127_v35, %v1126_v26  ;;  %v5461_v13 = vld [vmem:[%s9447_s0 + $0x8] sm:$0xff]  ;;  %v4469_v35 = vld [vmem:[%s9445_s6 + $0x38] sm:$0xff] }
  0xa3   :  { %v5450_v58 = vadd.f32 %v737_v1, %v736_v46  ;;  %v881_v14 = vrot.slane %v880_v24, 2  ;;  %v5454_v44 = vsel %vm1258_vm4, %v1254_v10, %v1056_v39  ;;  %v5456_v11 = vadd.f32 %v1023_v33, %v1022_v53  ;;  %v4465_v26 = vld [vmem:[%s9445_s6 + $0x28] sm:$0xff]  ;;  %s5782_s6 = spop %4435 }
  0xa4   :  { %v651_v55 = vmul.f32 %v5461_v13, %v5418_v2  ;;  %v667_v19 = vrot.slane %v666_v41, 1  ;;  %v5468_v46 = vadd.f32 %v809_v54, %v808_v57  ;;  %v1095_v51 = vrot.slane %v1094_v40, 4 }
  0xa5   :  { %2387 = vperm.xlu0 %4439, %v4465_v26   ;;  %v722_v3 = vmul.f32 %v5473_v61, %v5405_v52  ;;  %v953_v4 = vrot.slane %v952_v7, 2  ;;  %v5477_v48 = vadd.f32 %v1151_v34, %v1150_v45  ;;  %v723_v57 = vmul.f32 %v5482_v23, %v5418_v2 }
  0xa6   :  { %v676_v53 = vadd.f32 %v651_v55, %v650_v59  ;;  %v739_v9 = vrot.slane %v5450_v58, 1  ;;  %v5490_v20 = vadd.f32 %v881_v14, %v880_v24  ;;  %v794_v16 = vmul.f32 %v5405_v52, %v4884_v5 }
  0xa7   :  { %2391 = vperm.xlu1 %4440, %v4468_v28   ;;  %v795_v47 = vmul.f32 %v5418_v2, %v4908_v15  ;;  %v748_v39 = vadd.f32 %v723_v57, %v722_v3  ;;  %v866_v33 = vmul.f32 %v5405_v52, %v5006_v42  ;;  %v5502_v24 = vadd.f32 %v1095_v51, %v1094_v40 }
  0xa8   :  { %2395 = vperm.xlu2 %4441, %v4469_v35   ;;  %v677_v50 = vrot.slane %v676_v53, 4  ;;  %v867_v5 = vmul.f32 %v5418_v2, %v5011_v6  ;;  %v938_v15 = vmul.f32 %v5405_v52, %v5107_v21  ;;  %v5508_v54 = vadd.f32 %v667_v19, %v666_v41 }
  0xa9   :  { %v820_v10 = vadd.f32 %v795_v47, %v794_v16  ;;  %v749_v34 = vrot.slane %v748_v39, 4  ;;  %v939_v59 = vmul.f32 %v5418_v2, %v5085_v22  ;;  %v1010_v40 = vmul.f32 %v5405_v52, %v5065_v60 }
  0xaa   :  { %v678_v45 = vadd.f32 %v677_v50, %v676_v53  ;;  %v892_v55 = vadd.f32 %v867_v5, %v866_v33  ;;  %v1011_v26 = vmul.f32 %v5418_v2, %v5042_v49  ;;  %v811_v51 = vrot.slane %v5468_v46, 1 }
  0xab   :  { %v821_v14 = vrot.slane %v820_v10, 4  ;;  %v750_v57 = vadd.f32 %v749_v34, %v748_v39  ;;  %v964_v28 = vadd.f32 %v939_v59, %v938_v15  ;;  %v5517_v41 = vadd.f32 %v953_v4, %v952_v7 }
  0xac   :  { %v679_v3 = vrot.slane %v678_v45, 2  ;;  %v893_v53 = vrot.slane %v892_v55, 4  ;;  %v1036_v16 = vadd.f32 %v1011_v26, %v1010_v40  ;;  %v1082_v33 = vmul.f32 %v5405_v52, %v5019_v8 }
  0xad   :  { %v822_v19 = vadd.f32 %v821_v14, %v820_v10  ;;  %v751_v35 = vrot.slane %v750_v57, 2  ;;  %v965_v50 = vrot.slane %v964_v28, 4  ;;  %v1167_v5 = vrot.slane %v5477_v48, 4 }
  0xae   :  { %v680_v47 = vadd.f32 %v679_v3, %v678_v45  ;;  %v894_v49 = vadd.f32 %v893_v53, %v892_v55  ;;  %v1037_v17 = vrot.slane %v1036_v16, 4  ;;  %v1083_v7 = vmul.f32 %v5418_v2, %v4986_v37  ;;  %v5532_v37 = vld [vmem:[%s9447_s0 + $0x78] sm:$0xff] }
  0xaf   :  { %v823_v0 = vrot.slane %v822_v19, 2  ;;  %v752_v32 = vadd.f32 %v751_v35, %v750_v57  ;;  %v966_v39 = vadd.f32 %v965_v50, %v964_v28  ;;  %v5525_v4 = vadd.f32 %v739_v9, %v5450_v58  ;;  %v5536_v58 = vpop.permute.xlu2 %1310 }
  0xb0   :  { %v681_v1 = vrot.slane %v680_v47, 1  ;;  %v895_v15 = vrot.slane %v894_v49, 2  ;;  %v1038_v45 = vadd.f32 %v1037_v17, %v1036_v16  ;;  %v1108_v14 = vadd.f32 %v1083_v7, %v1082_v33 }
  0xb1   :  { %v824_v10 = vadd.f32 %v823_v0, %v822_v19  ;;  %v753_v59 = vrot.slane %v752_v32, 1  ;;  %v967_v8 = vrot.slane %v966_v39, 2  ;;  %v1154_v3 = vmul.f32 %v5405_v52, %v4953_v25 }
  0xb2   :  { %v682_v34 = vadd.f32 %v681_v1, %v680_v47  ;;  %v896_v26 = vadd.f32 %v895_v15, %v894_v49  ;;  %v1039_v55 = vrot.slane %v1038_v45, 2  ;;  %v1109_v53 = vrot.slane %v1108_v14, 4 }
  0xb3   :  { %v825_v40 = vrot.slane %v824_v10, 1  ;;  %v754_v57 = vadd.f32 %v753_v59, %v752_v32  ;;  %v968_v28 = vadd.f32 %v967_v8, %v966_v39  ;;  %v1155_v0 = vmul.f32 %v5532_v37, %v5418_v2 }
  0xb4   :  { %v883_v17 = vrot.slane %v5490_v20, 1  ;;  %v897_v1 = vrot.slane %v896_v26, 1  ;;  %v1040_v19 = vadd.f32 %v1039_v55, %v1038_v45  ;;  %v1110_v25 = vadd.f32 %v1109_v53, %v1108_v14  ;;  %v5577_v53 = vld [vmem:[%s9447_s0 + $0x28] sm:$0xff] }
  0xb5   :  { %v826_v9 = vadd.f32 %v825_v40, %v824_v10  ;;  %v969_v16 = vrot.slane %v968_v28, 1  ;;  %v1180_v32 = vadd.f32 %v1155_v0, %v1154_v3  ;;  %v1225_v52 = vsel %vm9463_vm0, %v682_v34, %v754_v57 }
  0xb6   :  { %v9509_v47 = vrot.slane %v5456_v11, 2  ;;  %v898_v50 = vadd.f32 %v897_v1, %v896_v26  ;;  %v1041_v33 = vrot.slane %v1040_v19, 1  ;;  %v1111_v7 = vrot.slane %v1110_v25, 2 }
  0xb7   :  { %v1234_v2 = vsel %vm1231_vm1, %v1225_v52, %v826_v9  ;;  %v970_v39 = vadd.f32 %v969_v16, %v968_v28  ;;  %v1181_v10 = vrot.slane %v1180_v32, 4  ;;  %v5548_v15 = vadd.f32 %v811_v51, %v5468_v46 }
  0xb8   :  { %v5543_v35 = vadd.f32 %v9509_v47, %v5456_v11  ;;  %v955_v45 = vrot.slane %v5517_v41, 1  ;;  %v1243_v34 = vsel %vm1240_vm2, %v1234_v2, %v898_v50  ;;  %v648_v11 = vmul.f32 %v5444_v18, %v5346_v27 }
  0xb9   :  { %v5555_v59 = vadd.f32 %v883_v17, %v5490_v20  ;;  %v5558_v8 = vadd.f32 %v1167_v5, %v5477_v48  ;;  %v1112_v14 = vadd.f32 %v1111_v7, %v1110_v25  ;;  %v1182_v40 = vadd.f32 %v1181_v10, %v1180_v32  ;;  %v5570_v48 = vld [vmem:[%s9447_s0 + $0x20] sm:$0xff]  ;;  %v5588_v32 = vpop.permute.xlu2 %71 }
  0xba   :  { %v1042_v26 = vadd.f32 %v1041_v33, %v1040_v19  ;;  %v1252_v55 = vsel %vm9462_vm3, %v1243_v34, %v970_v39  ;;  %v649_v46 = vmul.f32 %v5461_v13, %v5367_v36  ;;  %v720_v51 = vmul.f32 %v5473_v61, %v5346_v27 }
  0xbb   :  { %v1113_v3 = vrot.slane %v1112_v14, 1  ;;  %v1183_v57 = vrot.slane %v1182_v40, 2  ;;  %v721_v20 = vmul.f32 %v5482_v23, %v5367_v36  ;;  %v792_v5 = vmul.f32 %v5570_v48, %v5346_v27 }
  0xbc   :  { %v669_v28 = vadd.f32 %v649_v46, %v648_v11  ;;  %v793_v0 = vmul.f32 %v5577_v53, %v5367_v36  ;;  %v864_v17 = vmul.f32 %v5346_v27, %v5006_v42  ;;  %v865_v9 = vmul.f32 %v5367_v36, %v5011_v6  ;;  %v5598_v46 = vld [vmem:[%s9447_s0 + $0x58] sm:$0xff] }
  0xbd   :  { %v1184_v19 = vadd.f32 %v1183_v57, %v1182_v40  ;;  %v741_v16 = vadd.f32 %v721_v20, %v720_v51  ;;  %v936_v25 = vmul.f32 %v5346_v27, %v5107_v21  ;;  %v937_v33 = vmul.f32 %v5367_v36, %v5085_v22  ;;  %9510 = vst [vmem:[#allocation4_spill] sm:$0xff] %v5598_v46 }
  0xbe   :  { %v670_v52 = vrot.slane %v669_v28, 4  ;;  %v813_v47 = vadd.f32 %v793_v0, %v792_v5  ;;  %v885_v50 = vadd.f32 %v865_v9, %v864_v17  ;;  %v1114_v2 = vadd.f32 %v1113_v3, %v1112_v14  ;;  %v5605_v14 = vld [vmem:[%s9447_s0 + $0x60] sm:$0xff] }
  0xbf   :  { %v1261_v42 = vsel %vm1258_vm4, %v1252_v55, %v1042_v26  ;;  %v742_v39 = vrot.slane %v741_v16, 4  ;;  %v1008_v6 = vmul.f32 %v5346_v27, %v5065_v60  ;;  %v957_v11 = vadd.f32 %v937_v33, %v936_v25  ;;  %9511 = vst [vmem:[#allocation5_spill] sm:$0xff] %v5605_v14 }
  0xc0   :  { %v671_v7 = vadd.f32 %v670_v52, %v669_v28  ;;  %v814_v10 = vrot.slane %v813_v47, 4  ;;  %v886_v34 = vrot.slane %v885_v50, 4  ;;  %v1185_v21 = vrot.slane %v1184_v19, 1  ;;  %v5615_v28 = vld [vmem:[%s9447_s0 + $0x68] sm:$0xff] }
  0xc1   :  { %v743_v40 = vadd.f32 %v742_v39, %v741_v16  ;;  %v1009_v22 = vmul.f32 %v5598_v46, %v5367_v36  ;;  %v1080_v60 = vmul.f32 %v5605_v14, %v5346_v27  ;;  %v958_v3 = vrot.slane %v957_v11, 4  ;;  %9512 = vst [vmem:[#allocation6_spill] sm:$0xff] %v5615_v28  ;;  %v5620_v49 = vpop.permute.xlu2 %81 }
  0xc2   :  { %v672_v26 = vrot.slane %v671_v7, 2  ;;  %v815_v55 = vadd.f32 %v814_v10, %v813_v47  ;;  %v887_v51 = vadd.f32 %v886_v34, %v885_v50  ;;  %v1223_v57 = vsel %vm9463_vm0, %v5508_v54, %v5525_v4 }
  0xc3   :  { %v744_v20 = vrot.slane %v743_v40, 2  ;;  %v1029_v5 = vadd.f32 %v1009_v22, %v1008_v6  ;;  %v1081_v0 = vmul.f32 %v5615_v28, %v5367_v36  ;;  %v1270_v17 = vsel %vm1267_vm5, %v1261_v42, %v1114_v2 }
  0xc4   :  { %v673_v9 = vadd.f32 %v672_v26, %v671_v7  ;;  %v816_v16 = vrot.slane %v815_v55, 2  ;;  %v888_v25 = vrot.slane %v887_v51, 2  ;;  %v959_v47 = vadd.f32 %v958_v3, %v957_v11 }
  0xc5   :  { %v745_v52 = vadd.f32 %v744_v20, %v743_v40  ;;  %v1030_v50 = vrot.slane %v1029_v5, 4  ;;  %v1101_v33 = vadd.f32 %v1081_v0, %v1080_v60  ;;  %v1186_v54 = vadd.f32 %v1185_v21, %v1184_v19 }
  0xc6   :  { %v674_v4 = vrot.slane %v673_v9, 1  ;;  %v817_v39 = vadd.f32 %v816_v16, %v815_v55  ;;  %v889_v6 = vadd.f32 %v888_v25, %v887_v51  ;;  %v960_v34 = vrot.slane %v959_v47, 2  ;;  %v1303_v51 = vpop.permute.xlu1 %1302 }
  0xc7   :  { %v746_v10 = vrot.slane %v745_v52, 1  ;;  %v1031_v22 = vadd.f32 %v1030_v50, %v1029_v5  ;;  %v1102_v1 = vrot.slane %v1101_v33, 4  ;;  %v5625_v2 = vadd.f32 %v955_v45, %v5517_v41  ;;  %v5639_v41 = vld [vmem:[%s9447_s0 + $0x70] sm:$0xff] }
  0xc8   :  { %v9513_v42 = vrot.slane %v5502_v24, 2  ;;  %v1232_v19 = vsel %vm1231_vm1, %v1223_v57, %v5548_v15  ;;  %v675_v11 = vadd.f32 %v674_v4, %v673_v9  ;;  %v818_v40 = vrot.slane %v817_v39, 1 }
  0xc9   :  { %v747_v21 = vadd.f32 %v746_v10, %v745_v52  ;;  %v1032_v60 = vrot.slane %v1031_v22, 2  ;;  %v1103_v26 = vadd.f32 %v1102_v1, %v1101_v33  ;;  %v1169_v55 = vrot.slane %v5558_v8, 2 }
  0xca   :  { %v5630_v7 = vadd.f32 %v9513_v42, %v5502_v24  ;;  %v1279_v3 = vsel %vm1276_vm6, %v1270_v17, %v1186_v54  ;;  %v1152_v24 = vmul.f32 %v5639_v41, %v5346_v27  ;;  %v1153_v15 = vmul.f32 %v5532_v37, %v5367_v36 }
  0xcb   :  { %v9514_v45 = vrot.slane %v5543_v35, 1  ;;  %v890_v57 = vrot.slane %v889_v6, 1  ;;  %v961_v20 = vadd.f32 %v960_v34, %v959_v47  ;;  %v1104_v5 = vrot.slane %v1103_v26, 2 }
  0xcc   :  { %v1241_v0 = vsel %vm1240_vm2, %v1232_v19, %v5555_v59  ;;  %v1173_v17 = vadd.f32 %v1153_v15, %v1152_v24  ;;  %v652_v9 = vmul.f32 %v5444_v18, %v5422_v43  ;;  %v653_v27 = vmul.f32 %v5461_v13, %v5429_v29 }
  0xcd   :  { %v5648_v1 = vadd.f32 %v9514_v45, %v5543_v35  ;;  %v1327_v16 = vmul.f32 %v1303_v51, %v1279_v3  ;;  %v819_v36 = vadd.f32 %v818_v40, %v817_v39  ;;  %v1033_v25 = vadd.f32 %v1032_v60, %v1031_v22  ;;  %v5676_v40 = vld [vmem:[%s9447_s0 + $0x38] sm:$0xff] }
  0xce   :  { %v1224_v52 = vsel %vm9463_vm0, %v675_v11, %v747_v21  ;;  %v1174_v35 = vrot.slane %v1173_v17, 4  ;;  %v683_v50 = vadd.f32 %v653_v27, %v652_v9  ;;  %v724_v47 = vmul.f32 %v5473_v61, %v5422_v43  ;;  %v5669_v21 = vld [vmem:[%s9447_s0 + $0x30] sm:$0xff]  ;;  %v5692_v9 = vld [vmem:[%s9447_s0 + $0x48] sm:$0xff] }
  0xcf   :  { %v725_v59 = vmul.f32 %v5482_v23, %v5429_v29  ;;  %v891_v33 = vadd.f32 %v890_v57, %v889_v6  ;;  %v962_v54 = vrot.slane %v961_v20, 1  ;;  %v1105_v4 = vadd.f32 %v1104_v5, %v1103_v26  ;;  %v5680_v26 = vpop.permute.xlu2 %1369  ;;  %v5685_v5 = vld [vmem:[%s9447_s0 + $0x40] sm:$0xff] }
  0xd0   :  { %v796_v10 = vmul.f32 %v5570_v48, %v5422_v43  ;;  %v1175_v34 = vadd.f32 %v1174_v35, %v1173_v17  ;;  %v684_v42 = vrot.slane %v683_v50, 4  ;;  %v797_v22 = vmul.f32 %v5577_v53, %v5429_v29 }
  0xd1   :  { %v755_v39 = vadd.f32 %v725_v59, %v724_v47  ;;  %v1034_v19 = vrot.slane %v1033_v25, 1  ;;  %v1233_v11 = vsel %vm1231_vm1, %v1224_v52, %v819_v36  ;;  %v868_v6 = vmul.f32 %v5669_v21, %v5422_v43  ;;  %v5700_v59 = vld [vmem:[%s9447_s0 + $0x50] sm:$0xff] }
  0xd2   :  { %v869_v60 = vmul.f32 %v5676_v40, %v5429_v29  ;;  %v1176_v51 = vrot.slane %v1175_v34, 2  ;;  %v685_v3 = vadd.f32 %v684_v42, %v683_v50  ;;  %v827_v15 = vadd.f32 %v797_v22, %v796_v10 }
  0xd3   :  { %v756_v24 = vrot.slane %v755_v39, 4  ;;  %v963_v45 = vadd.f32 %v962_v54, %v961_v20  ;;  %v940_v17 = vmul.f32 %v5685_v5, %v5422_v43  ;;  %v941_v27 = vmul.f32 %v5692_v9, %v5429_v29 }
  0xd4   :  { %v899_v57 = vadd.f32 %v869_v60, %v868_v6  ;;  %v1106_v36 = vrot.slane %v1105_v4, 1  ;;  %v1242_v20 = vsel %vm1240_vm2, %v1233_v11, %v891_v33  ;;  %v828_v35 = vrot.slane %v827_v15, 4  ;;  %v5706_v33 = vpop.permute.xlu0 %1294 }
  0xd5   :  { %v757_v52 = vadd.f32 %v756_v24, %v755_v39  ;;  %v1177_v50 = vadd.f32 %v1176_v51, %v1175_v34  ;;  %v971_v47 = vadd.f32 %v941_v27, %v940_v17  ;;  %v1012_v54 = vmul.f32 %v5700_v59, %v5422_v43 }
  0xd6   :  { %v1013_v10 = vmul.f32 %v5598_v46, %v5429_v29  ;;  %v1035_v42 = vadd.f32 %v1034_v19, %v1033_v25  ;;  %v686_v22 = vrot.slane %v685_v3, 2  ;;  %v900_v60 = vrot.slane %v899_v57, 4 }
  0xd7   :  { %v758_v6 = vrot.slane %v757_v52, 2  ;;  %v1099_v34 = vrot.slane %v5630_v7, 1  ;;  %v1251_v39 = vsel %vm9462_vm3, %v1242_v20, %v963_v45  ;;  %v829_v11 = vadd.f32 %v828_v35, %v827_v15 }
  0xd8   :  { %v1043_v51 = vadd.f32 %v1013_v10, %v1012_v54  ;;  %v1170_v24 = vadd.f32 %v1169_v55, %v5558_v8  ;;  %v1250_v25 = vsel %vm9462_vm3, %v1241_v0, %v5625_v2  ;;  %v1343_v19 = vmul.f32 0.001, %v1327_v16 }
  0xd9   :  { %v1084_v17 = vmul.f32 %v5605_v14, %v5422_v43  ;;  %v1107_v27 = vadd.f32 %v1106_v36, %v1105_v4  ;;  %v1178_v31 = vrot.slane %v1177_v50, 1  ;;  %v972_v46 = vrot.slane %v971_v47, 4  ;;  %v1373_v14 = vpop.permute.xlu2 %1372 }
  0xda   :  { %v1085_v15 = vmul.f32 %v5615_v28, %v5429_v29  ;;  %v1260_v45 = vsel %vm1258_vm4, %v1251_v39, %v1035_v42  ;;  %v687_v20 = vadd.f32 %v686_v22, %v685_v3  ;;  %v759_v35 = vadd.f32 %v758_v6, %v757_v52 }
  0xdb   :  { %v901_v54 = vadd.f32 %v900_v60, %v899_v57  ;;  %v606_v10 = vstv %s5710_s11  ;;  %v1100_v8 = vadd.f32 %v1099_v34, %v5630_v7  ;;  %v830_v55 = vrot.slane %v829_v11, 2 }
  0xdc   :  { %v1044_v2 = vrot.slane %v1043_v51, 4  ;;  %v1171_v0 = vrot.slane %v1170_v24, 1  ;;  %v1259_v16 = vsel %vm1258_vm4, %v1250_v25, %v5648_v1  ;;  %v1115_v4 = vadd.f32 %v1085_v15, %v1084_v17 }
  0xdd   :  { %v1156_v36 = vmul.f32 %v5639_v41, %v5422_v43  ;;  %v1351_v28 = vsub.f32 %v5620_v49, %v1343_v19  ;;  %v1179_v42 = vadd.f32 %v1178_v31, %v1177_v50  ;;  %v1269_v3 = vsel %vm1267_vm5, %v1260_v45, %v1107_v27 }
  0xde   :  { %v973_v57 = vadd.f32 %v972_v46, %v971_v47  ;;  %v688_v52 = vrot.slane %v687_v20, 1  ;;  %v760_v22 = vrot.slane %v759_v35, 1  ;;  %v902_v7 = vrot.slane %v901_v54, 2  ;;  %v1299_v47 = vpop.permute.xlu0 %1298 }
  0xdf   :  { %v1157_v6 = vmul.f32 %v5532_v37, %v5429_v29  ;;  %v831_v60 = vadd.f32 %v830_v55, %v829_v11  ;;  %v1045_v34 = vadd.f32 %v1044_v2, %v1043_v51  ;;  %v1116_v1 = vrot.slane %v1115_v4, 4 }
  0xe0   :  { %vm1391_vm7 = vcmp.eq.s32.totalorder %v1373_v14, 1  ;;  %v1272_v43 = vsel %vm1267_vm5, %v5454_v44, %v5448_v63  ;;  %v1268_v49 = vsel %vm1267_vm5, %v1259_v16, %v1100_v8  ;;  %v1172_v46 = vadd.f32 %v1171_v0, %v1170_v24 }
  0xe1   :  { %v1187_v31 = vadd.f32 %v1157_v6, %v1156_v36  ;;  %v5736_v50 = vsel %vm1391_vm7, -1.0, %v1351_v28  ;;  %v1278_v39 = vsel %vm1276_vm6, %v1269_v3, %v1179_v42  ;;  %v974_v25 = vrot.slane %v973_v57, 2 }
  0xe2   :  { %9515 = vst [vmem:[#allocation7_spill] sm:$0xff] %v5736_v50  ;;  %v1407_v29 = vperm.slane %v5736_v50, 0  ;;  %v689_v14 = vadd.f32 %v688_v52, %v687_v20  ;;  %v761_v11 = vadd.f32 %v760_v22, %v759_v35  ;;  %v903_v51 = vadd.f32 %v902_v7, %v901_v54 }
  0xe3   :  { %v1431_v63 = vperm.slane %v5736_v50, 1  ;;  %v832_v44 = vrot.slane %v831_v60, 1  ;;  %v1046_v19 = vrot.slane %v1045_v34, 2  ;;  %v1117_v17 = vadd.f32 %v1116_v1, %v1115_v4 }
  0xe4   :  { %v1188_v28 = vrot.slane %v1187_v31, 4  ;;  %v1417_v24 = vmul.f32 %v5444_v18, %v1407_v29  ;;  %v1418_v27 = vmul.f32 %v5461_v13, %v1407_v29  ;;  %v624_v8 = vmul.f32 %v5639_v41, %v606_v10 }
  0xe5   :  { %v1441_v15 = vmul.f32 %v5473_v61, %v1431_v63  ;;  %v1442_v45 = vmul.f32 %v5482_v23, %v1431_v63  ;;  %v625_v20 = vmul.f32 %v5532_v37, %v606_v10  ;;  %v609_v35 = vstv %s5740_s23 }
  0xe6   :  { %v975_v54 = vadd.f32 %v974_v25, %v973_v57  ;;  %v9516_v55 = vrot.slane %v5434_v38, 1  ;;  %v1277_v0 = vsel %vm1276_vm6, %v1268_v49, %v1172_v46  ;;  %v904_v16 = vrot.slane %v903_v51, 1 }
  0xe7   :  { %v1471_v4 = vperm.slane %v5736_v50, 2  ;;  %v1326_v36 = vmul.f32 %v1299_v47, %v1278_v39  ;;  %v833_v42 = vadd.f32 %v832_v44, %v831_v60  ;;  %v1118_v3 = vrot.slane %v1117_v17, 2 }
  0xe8   :  { %v1200_v2 = vadd.f32 %v9516_v55, %v5434_v38  ;;  %v1189_v52 = vadd.f32 %v1188_v28, %v1187_v31  ;;  %v1047_v22 = vadd.f32 %v1046_v19, %v1045_v34  ;;  %v1226_v7 = vsel %vm9463_vm0, %v689_v14, %v761_v11 }
  0xe9   :  { %v1457_v6 = vadd.f32 %v1441_v15, %v1417_v24  ;;  %v1458_v10 = vadd.f32 %v1442_v45, %v1418_v27  ;;  %v5757_v57 = vadd.f32 %v624_v8, %v5307_v56  ;;  %v626_v1 = vmul.f32 %v5639_v41, %v609_v35  ;;  %v77_v56 = vpop.permute.xlu0 %76 }
  0xea   :  { %v627_v38 = vmul.f32 %v5532_v37, %v609_v35  ;;  %v976_v49 = vrot.slane %v975_v54, 1  ;;  %v905_v46 = vadd.f32 %v904_v16, %v903_v51  ;;  %v1481_v25 = vmul.f32 %v5570_v48, %v1471_v4 }
  0xeb   :  { %v1482_v60 = vmul.f32 %v5577_v53, %v1471_v4  ;;  %v1511_v31 = vperm.slane %v5736_v50, 3  ;;  %v1325_v34 = vmul.f32 %v5706_v33, %v1277_v0  ;;  %v1119_v47 = vadd.f32 %v1118_v3, %v1117_v17 }
  0xec   :  { %v1190_v39 = vrot.slane %v1189_v52, 2  ;;  %v1235_v29 = vsel %vm1231_vm1, %v1226_v7, %v833_v42  ;;  %v1342_v14 = vmul.f32 0.001, %v1326_v36  ;;  %v1048_v11 = vrot.slane %v1047_v22, 1 }
  0xed   :  { %v1497_v63 = vadd.f32 %v1481_v25, %v1457_v6  ;;  %v1498_v44 = vadd.f32 %v1482_v60, %v1458_v10  ;;  %v1281_v19 = vsel %vm1276_vm6, %v1272_v43, %v1200_v2  ;;  %v5768_v51 = vadd.f32 %v625_v20, %v5313_v62 }
  0xee   :  { %v977_v28 = vadd.f32 %v976_v49, %v975_v54  ;;  %v1551_v24 = vperm.slane %v5736_v50, 4  ;;  %v1244_v27 = vsel %vm1240_vm2, %v1235_v29, %v905_v46  ;;  %v1521_v33 = vmul.f32 %v5669_v21, %v1511_v31  ;;  %v9521_v29 = vld [vmem:[#allocation5_spill] sm:$0xff] }
  0xef   :  { %v1522_v17 = vmul.f32 %v5676_v40, %v1511_v31  ;;  %v1350_v15 = vsub.f32 %v77_v56, %v1342_v14  ;;  %v5775_v45 = vadd.f32 %v626_v1, %v5317_v12  ;;  %v5778_v8 = vadd.f32 %v627_v38, %v5327_v30  ;;  %v9520_v31 = vld [vmem:[#allocation4_spill] sm:$0xff]  ;;  %v9522_v14 = vld [vmem:[#allocation6_spill] sm:$0xff] }
  0xf0   :  { %v1120_v43 = vrot.slane %v1119_v47, 1  ;;  %v1191_v35 = vadd.f32 %v1190_v39, %v1189_v52  ;;  %v5780_v62 = vmul.f32 0.001, %v1325_v34  ;;  %v1049_v20 = vadd.f32 %v1048_v11, %v1047_v22 }
  0xf1   :  { %v1537_v54 = vadd.f32 %v1521_v33, %v1497_v63  ;;  %v1538_v55 = vadd.f32 %v1522_v17, %v1498_v44  ;;  %vm1390_vm8 = vcmp.eq.s32.totalorder %v5680_v26, 1  ;;  %v1253_v2 = vsel %vm9462_vm3, %v1244_v27, %v977_v28 }
  0xf2   :  { %v1561_v12 = vmul.f32 %v5685_v5, %v1551_v24  ;;  %v1591_v0 = vperm.slane %v5736_v50, 5  ;;  %v1562_v30 = vmul.f32 %v5692_v9, %v1551_v24  ;;  %v5789_v16 = vsel %vm1390_vm8, -1.0, %v1350_v15 }
  0xf3   :  { %9517 = vst [vmem:[#allocation8_spill] sm:$0xff] %v5789_v16  ;;  %v656_v4 = vmul.f32 %v5444_v18, %v5757_v57  ;;  %v657_v36 = vmul.f32 %v5461_v13, %v5768_v51  ;;  %v9460_v42 = vstv %s5782_s6  ;;  %v1121_v3 = vadd.f32 %v1120_v43, %v1119_v47 }
  0xf4   :  { %v1192_v26 = vrot.slane %v1191_v35, 1  ;;  %v1631_v52 = vperm.slane %v5736_v50, 6  ;;  %v1262_v22 = vsel %vm1258_vm4, %v1253_v2, %v1049_v20  ;;  %v1577_v7 = vadd.f32 %v1561_v12, %v1537_v54 }
  0xf5   :  { %v1578_v6 = vadd.f32 %v1562_v30, %v1538_v55  ;;  %v9461_v10 = vperm.slane %v5736_v50, 7  ;;  %v5800_v1 = vmul.f32 %v5536_v58, %v1281_v19  ;;  %v1406_v49 = vperm.slane %v5789_v16, 0 }
  0xf6   :  { %v1430_v46 = vperm.slane %v5789_v16, 1  ;;  %v5809_v25 = vmul.f32 %v5639_v41, %v9460_v42  ;;  %v1601_v60 = vmul.f32 %v5700_v59, %v1591_v0  ;;  %v1602_v34 = vmul.f32 %v9520_v31, %v1591_v0 }
  0xf7   :  { %9518 = vst [vmem:[#allocation9_spill] sm:$0xff] %v5800_v1  ;;  %v697_v47 = vadd.f32 %v657_v36, %v656_v4  ;;  %v5813_v39 = vadd.f32 %v1192_v26, %v1191_v35  ;;  %v5816_v58 = vsel %vm1267_vm5, %v1262_v22, %v1121_v3  ;;  %v5819_v56 = vmul.f32 %v9521_v29, %v1631_v52 }
  0xf8   :  { %9519 = vst [vmem:[#allocation10_spill] sm:$0xff] %v5809_v25  ;;  %v5822_v11 = vmul.f32 %v9522_v14, %v1631_v52  ;;  %v5824_v63 = vadd.f32 %v1601_v60, %v1577_v7  ;;  %v5826_v44 = vadd.f32 %v1602_v34, %v1578_v6  ;;  %v5831_v19 = vmul.f32 %v5639_v41, %v9461_v10 }
  0xf9   :  { %v1470_v28 = vperm.slane %v5789_v16, 2  ;;  %v1415_v24 = vmul.f32 %v5444_v18, %v1406_v49  ;;  %v1439_v27 = vmul.f32 %v5473_v61, %v1430_v46  ;;  %v698_v33 = vrot.slane %v697_v47, 4 }
  0xfa   :  { %v728_v17 = vmul.f32 %v5473_v61, %v5757_v57  ;;  %v1510_v15 = vperm.slane %v5789_v16, 3  ;;  %v1550_v43 = vperm.slane %v5789_v16, 4  ;;  %v729_v35 = vmul.f32 %v5482_v23, %v5768_v51 }
  0xfb   :  { %v800_v20 = vmul.f32 %v5570_v48, %v5757_v57  ;;  %v1416_v54 = vmul.f32 %v5461_v13, %v1406_v49  ;;  %v699_v55 = vadd.f32 %v698_v33, %v697_v47  ;;  %v801_v2 = vmul.f32 %v5577_v53, %v5768_v51 }
  0xfc   :  { %v872_v12 = vmul.f32 %v5669_v21, %v5757_v57  ;;  %v1440_v0 = vmul.f32 %v5482_v23, %v1430_v46  ;;  %v1479_v30 = vmul.f32 %v5570_v48, %v1470_v28  ;;  %v769_v4 = vadd.f32 %v729_v35, %v728_v17 }
  0xfd   :  { %v873_v36 = vmul.f32 %v5676_v40, %v5768_v51  ;;  %v1455_v3 = vadd.f32 %v1439_v27, %v1415_v24  ;;  %v700_v26 = vrot.slane %v699_v55, 2  ;;  %v841_v52 = vadd.f32 %v801_v2, %v800_v20 }
  0xfe   :  { %v944_v22 = vmul.f32 %v5685_v5, %v5757_v57  ;;  %v1480_v7 = vmul.f32 %v5577_v53, %v1470_v28  ;;  %v1519_v6 = vmul.f32 %v5669_v21, %v1510_v15  ;;  %v770_v49 = vrot.slane %v769_v4, 4 }
  0xff   :  { %v913_v60 = vadd.f32 %v873_v36, %v872_v12  ;;  %v1520_v46 = vmul.f32 %v5676_v40, %v1510_v15  ;;  %v701_v34 = vadd.f32 %v700_v26, %v699_v55  ;;  %v842_v47 = vrot.slane %v841_v52, 4 }
 0x100   :  { %v945_v33 = vmul.f32 %v5692_v9, %v5768_v51  ;;  %v1456_v17 = vadd.f32 %v1440_v0, %v1416_v54  ;;  %v1559_v24 = vmul.f32 %v5685_v5, %v1550_v43  ;;  %v771_v27 = vadd.f32 %v770_v49, %v769_v4 }
 0x101   :  { %v914_v35 = vrot.slane %v913_v60, 4  ;;  %v1495_v20 = vadd.f32 %v1479_v30, %v1455_v3  ;;  %v1560_v2 = vmul.f32 %v5692_v9, %v1550_v43  ;;  %v843_v28 = vadd.f32 %v842_v47, %v841_v52 }
 0x102   :  { %v985_v38 = vadd.f32 %v945_v33, %v944_v22  ;;  %v1590_v42 = vperm.slane %v5789_v16, 5  ;;  %v702_v12 = vrot.slane %v701_v34, 1  ;;  %v772_v36 = vrot.slane %v771_v27, 2 }
 0x103   :  { %v915_v15 = vadd.f32 %v914_v35, %v913_v60  ;;  %v844_v26 = vrot.slane %v843_v28, 2  ;;  %v1016_v54 = vmul.f32 %v5700_v59, %v5757_v57  ;;  %v1496_v0 = vadd.f32 %v1480_v7, %v1456_v17 }
 0x104   :  { %v986_v10 = vrot.slane %v985_v38, 4  ;;  %v773_v30 = vadd.f32 %v772_v36, %v771_v27  ;;  %v1017_v22 = vmul.f32 %v9520_v31, %v5768_v51  ;;  %v1088_v49 = vmul.f32 %v9521_v29, %v5757_v57 }
 0x105   :  { %v916_v3 = vrot.slane %v915_v15, 2  ;;  %v845_v43 = vadd.f32 %v844_v26, %v843_v28  ;;  %v1535_v60 = vadd.f32 %v1519_v6, %v1495_v20  ;;  %v703_v47 = vadd.f32 %v702_v12, %v701_v34  ;;  %v5875_v6 = vpop.permute.xlu1 %1306 }
 0x106   :  { %v987_v52 = vadd.f32 %v986_v10, %v985_v38  ;;  %v774_v33 = vrot.slane %v773_v30, 1  ;;  %v1057_v25 = vadd.f32 %v1017_v22, %v1016_v54  ;;  %v1089_v7 = vmul.f32 %v9522_v14, %v5768_v51 }
 0x107   :  { %v917_v35 = vadd.f32 %v916_v3, %v915_v15  ;;  %v846_v55 = vrot.slane %v845_v43, 1  ;;  %v1536_v17 = vadd.f32 %v1520_v46, %v1496_v0  ;;  %v1160_v10 = vmul.f32 %v5639_v41, %v5757_v57 }
 0x108   :  { %v988_v1 = vrot.slane %v987_v52, 2  ;;  %v775_v27 = vadd.f32 %v774_v33, %v773_v30  ;;  %v1058_v26 = vrot.slane %v1057_v25, 4  ;;  %v1129_v4 = vadd.f32 %v1089_v7, %v1088_v49 }
 0x109   :  { %v918_v28 = vrot.slane %v917_v35, 1  ;;  %v847_v38 = vadd.f32 %v846_v55, %v845_v43  ;;  %v1599_v34 = vmul.f32 %v5700_v59, %v1590_v42  ;;  %v1600_v20 = vmul.f32 %v9520_v31, %v1590_v42 }
 0x10a   :  { %v989_v36 = vadd.f32 %v988_v1, %v987_v52  ;;  %v1161_v12 = vmul.f32 %v5532_v37, %v5768_v51  ;;  %v1228_v46 = vsel %vm9463_vm0, %v703_v47, %v775_v27  ;;  %v1059_v0 = vadd.f32 %v1058_v26, %v1057_v25 }
 0x10b   :  { %v919_v15 = vadd.f32 %v918_v28, %v917_v35  ;;  %v1130_v30 = vrot.slane %v1129_v4, 4  ;;  %v1575_v57 = vadd.f32 %v1559_v24, %v1535_v60  ;;  %v1237_v1 = vsel %vm1231_vm1, %v1228_v46, %v847_v38 }
 0x10c   :  { %v990_v54 = vrot.slane %v989_v36, 1  ;;  %v1201_v55 = vadd.f32 %v1161_v12, %v1160_v10  ;;  %v658_v3 = vmul.f32 %v5444_v18, %v5775_v45  ;;  %v1576_v43 = vadd.f32 %v1560_v2, %v1536_v17 }
 0x10d   :  { %v1060_v52 = vrot.slane %v1059_v0, 2  ;;  %v1131_v22 = vadd.f32 %v1130_v30, %v1129_v4  ;;  %v659_v42 = vmul.f32 %v5461_v13, %v5778_v8  ;;  %v730_v47 = vmul.f32 %v5473_v61, %v5775_v45 }
 0x10e   :  { %v991_v51 = vadd.f32 %v990_v54, %v989_v36  ;;  %v1202_v49 = vrot.slane %v1201_v55, 4  ;;  %v731_v25 = vmul.f32 %v5482_v23, %v5778_v8  ;;  %v1246_v33 = vsel %vm1240_vm2, %v1237_v1, %v919_v15  ;;  %v1315_v54 = vpop.permute.xlu1 %1314 }
 0x10f   :  { %v1061_v24 = vadd.f32 %v1060_v52, %v1059_v0  ;;  %v1132_v60 = vrot.slane %v1131_v22, 2  ;;  %v704_v35 = vadd.f32 %v659_v42, %v658_v3  ;;  %v1615_v18 = vadd.f32 %v1599_v34, %v1575_v57 }
 0x110   :  { %v1203_v2 = vadd.f32 %v1202_v49, %v1201_v55  ;;  %v776_v7 = vadd.f32 %v731_v25, %v730_v47  ;;  %v802_v4 = vmul.f32 %v5570_v48, %v5775_v45  ;;  %v803_v61 = vmul.f32 %v5577_v53, %v5778_v8 }
 0x111   :  { %v1062_v13 = vrot.slane %v1061_v24, 1  ;;  %v1133_v17 = vadd.f32 %v1132_v60, %v1131_v22  ;;  %v705_v27 = vrot.slane %v704_v35, 4  ;;  %v1255_v23 = vsel %vm9462_vm3, %v1246_v33, %v991_v51 }
 0x112   :  { %v1204_v28 = vrot.slane %v1203_v2, 2  ;;  %v777_v10 = vrot.slane %v776_v7, 4  ;;  %v874_v38 = vmul.f32 %v5669_v21, %v5775_v45  ;;  %v848_v12 = vadd.f32 %v803_v61, %v802_v4 }
 0x113   :  { %v1063_v36 = vadd.f32 %v1062_v13, %v1061_v24  ;;  %v1134_v26 = vrot.slane %v1133_v17, 1  ;;  %v706_v34 = vadd.f32 %v705_v27, %v704_v35  ;;  %v9523_v46 = vperm.slane %v5789_v16, 6 }
 0x114   :  { %v1205_v0 = vadd.f32 %v1204_v28, %v1203_v2  ;;  %v778_v30 = vadd.f32 %v777_v10, %v776_v7  ;;  %v875_v57 = vmul.f32 %v5676_v40, %v5778_v8  ;;  %v1616_v55 = vadd.f32 %v1600_v20, %v1576_v43 }
 0x115   :  { %v1639_v15 = vmul.f32 %v9521_v29, %v9523_v46  ;;  %v1135_v1 = vadd.f32 %v1134_v26, %v1133_v17  ;;  %v1264_v3 = vsel %vm1258_vm4, %v1255_v23, %v1063_v36  ;;  %v849_v52 = vrot.slane %v848_v12, 4 }
 0x116   :  { %v9524_v22 = vmov %v9523_v46  ;;  %v1206_v51 = vrot.slane %v1205_v0, 1  ;;  %v920_v49 = vadd.f32 %v875_v57, %v874_v38  ;;  %v946_v47 = vmul.f32 %v5685_v5, %v5775_v45 }
 0x117   :  { %v1640_v42 = vmul.f32 %v9522_v14, %v9524_v22  ;;  %v1655_v25 = vadd.f32 %v1639_v15, %v1615_v18  ;;  %v707_v24 = vrot.slane %v706_v34, 2  ;;  %v779_v60 = vrot.slane %v778_v30, 2  ;;  %v1367_v22 = vpop.permute.xlu1 %1366 }
 0x118   :  { %v947_v33 = vmul.f32 %v5692_v9, %v5778_v8  ;;  %v1207_v20 = vadd.f32 %v1206_v51, %v1205_v0  ;;  %v1273_v43 = vsel %vm1267_vm5, %v1264_v3, %v1135_v1  ;;  %v850_v35 = vadd.f32 %v849_v52, %v848_v12 }
 0x119   :  { %v1018_v2 = vmul.f32 %v5700_v59, %v5775_v45  ;;  %v1656_v7 = vadd.f32 %v1640_v42, %v1616_v55  ;;  %v921_v4 = vrot.slane %v920_v49, 4  ;;  %v1019_v17 = vmul.f32 %v9520_v31, %v5778_v8  ;;  %v5935_v55 = vpop.permute.xlu2 %96 }
 0x11a   :  { %v992_v13 = vadd.f32 %v947_v33, %v946_v47  ;;  %v1657_v18 = vadd.f32 %v5819_v56, %v5824_v63  ;;  %v1658_v27 = vadd.f32 %v5822_v11, %v5826_v44  ;;  %v9525_v61 = vperm.slane %v5789_v16, 7 }
 0x11b   :  { %v1090_v23 = vmul.f32 %v9521_v29, %v5775_v45  ;;  %v1282_v36 = vsel %vm1276_vm6, %v1273_v43, %v1207_v20  ;;  %v708_v26 = vadd.f32 %v707_v24, %v706_v34  ;;  %v780_v12 = vadd.f32 %v779_v60, %v778_v30 }
 0x11c   :  { %v1679_v28 = vmul.f32 %v5639_v41, %v9525_v61  ;;  %v9526_v10 = vmov %v9525_v61  ;;  %v851_v56 = vrot.slane %v850_v35, 2  ;;  %v993_v63 = vrot.slane %v992_v13, 4 }
 0x11d   :  { %v1680_v38 = vmul.f32 %v5532_v37, %v9526_v10  ;;  %v1064_v46 = vadd.f32 %v1019_v17, %v1018_v2  ;;  %v1091_v11 = vmul.f32 %v9522_v14, %v5778_v8  ;;  %v9527_v44 = vperm.slane %v5736_v50, 7 }
 0x11e   :  { %v1695_v0 = vadd.f32 %v1679_v28, %v1655_v25  ;;  %v922_v1 = vadd.f32 %v921_v4, %v920_v49  ;;  %v1330_v3 = vmul.f32 %v1315_v54, %v1282_v36  ;;  %v1162_v34 = vmul.f32 %v5639_v41, %v5775_v45 }
 0x11f   :  { %v1682_v15 = vmul.f32 %v5532_v37, %v9527_v44  ;;  %v1696_v57 = vadd.f32 %v1680_v38, %v1656_v7  ;;  %v1136_v52 = vadd.f32 %v1091_v11, %v1090_v23  ;;  %v1163_v30 = vmul.f32 %v5532_v37, %v5778_v8 }
 0x120   :  { %v9528_v42 = vstv %s5782_s6  ;;  %v1697_v47 = vadd.f32 %v5831_v19, %v1657_v18  ;;  %v709_v24 = vrot.slane %v708_v26, 1  ;;  %v781_v60 = vrot.slane %v780_v12, 1 }
 0x121   :  { %v5944_v51 = vmul.f32 %v5532_v37, %v9528_v42  ;;  %v1698_v25 = vadd.f32 %v1682_v15, %v1658_v27  ;;  %v852_v33 = vadd.f32 %v851_v56, %v850_v35  ;;  %v994_v49 = vadd.f32 %v993_v63, %v992_v13  ;;  %v1382_v15 = vpop.permute.xlu2 %1381  ;;  %v5990_v42 = vpop.permute.xlu0 %1318 }
 0x122   :  { %v1065_v54 = vrot.slane %v1064_v46, 4  ;;  %v1280_v45 = vsel %vm1276_vm6, %v5816_v58, %v5813_v39  ;;  %v1711_v20 = vmul.f32 %v1695_v0, %v1695_v0  ;;  %v923_v43 = vrot.slane %v922_v1, 2 }
 0x123   :  { %vm1389_vm9 = vcmp.eq.s32.totalorder %v1367_v22, 1  ;;  %v1712_v8 = vmul.f32 %v1696_v57, %v1696_v57  ;;  %v1346_v2 = vmul.f32 0.001, %v1330_v3  ;;  %v1137_v7 = vrot.slane %v1136_v52, 4 }
 0x124   :  { %v1208_v37 = vadd.f32 %v1163_v30, %v1162_v34  ;;  %v5950_v4 = vmul.f32 %v1697_v47, %v1697_v47  ;;  %v5952_v19 = vmul.f32 %v1698_v25, %v1698_v25  ;;  %v710_v17 = vadd.f32 %v709_v24, %v708_v26 }
 0x125   :  { %v9529_v35 = vsub.f32 %v5588_v32, %v5780_v62  ;;  %v782_v18 = vadd.f32 %v781_v60, %v780_v12  ;;  %v853_v27 = vrot.slane %v852_v33, 1  ;;  %v995_v39 = vrot.slane %v994_v49, 2  ;;  %v5966_v32 = vld [vmem:[%s9447_s0] sm:$0xff]  ;;  %v5972_v12 = vld [vmem:[%s9447_s0 + $0x8] sm:$0xff] }
 0x126   :  { %v1066_v58 = vadd.f32 %v1065_v54, %v1064_v46  ;;  %v924_v61 = vadd.f32 %v923_v43, %v922_v1  ;;  %v1732_v38 = vadd.f32 %v1712_v8, %v1711_v20  ;;  %v1354_v36 = vsub.f32 %v5935_v55, %v1346_v2  ;;  %v5978_v46 = vld [vmem:[%s9447_s0 + $0x10] sm:$0xff]  ;;  %v5985_v1 = vld [vmem:[%s9447_s0 + $0x18] sm:$0xff] }
 0x127   :  { %v5957_v13 = vsel %vm1389_vm9, -1.0, %v9529_v35  ;;  %v1138_v26 = vadd.f32 %v1137_v7, %v1136_v52  ;;  %v1209_v56 = vrot.slane %v1208_v37, 4  ;;  %v854_v0 = vadd.f32 %v853_v27, %v852_v33 }
 0x128   :  { %9530 = vst [vmem:[#allocation4_spill] sm:$0xff] %v5957_v13  ;;  %v1405_v28 = vperm.slane %v5957_v13, 0  ;;  %v1429_v23 = vperm.slane %v5957_v13, 1  ;;  %v1469_v10 = vperm.slane %v5957_v13, 2  ;;  %v1509_v44 = vperm.slane %v5957_v13, 3 }
 0x129   :  { %v996_v57 = vadd.f32 %v995_v39, %v994_v49  ;;  %v1067_v55 = vrot.slane %v1066_v58, 2  ;;  %v925_v52 = vrot.slane %v924_v61, 1  ;;  %v1229_v34 = vsel %vm9463_vm0, %v710_v17, %v782_v18 }
 0x12a   :  { %v1413_v62 = vmul.f32 %v5966_v32, %v1405_v28  ;;  %v1414_v63 = vmul.f32 %v5972_v12, %v1405_v28  ;;  %v1437_v11 = vmul.f32 %v5978_v46, %v1429_v23  ;;  %v1438_v3 = vmul.f32 %v5985_v1, %v1429_v23 }
 0x12b   :  { %v1477_v22 = vmul.f32 %v5570_v48, %v1469_v10  ;;  %v1139_v47 = vrot.slane %v1138_v26, 2  ;;  %v1478_v24 = vmul.f32 %v5577_v53, %v1469_v10  ;;  %vm1394_vm10 = vcmp.eq.s32.totalorder %v1382_v15, 1  ;;  %v9532_v15 = vld [vmem:[#allocation2_spill] sm:$0xff] }
 0x12c   :  { %v1453_v30 = vadd.f32 %v1437_v11, %v1413_v62  ;;  %v1454_v25 = vadd.f32 %v1438_v3, %v1414_v63  ;;  %v1210_v60 = vadd.f32 %v1209_v56, %v1208_v37  ;;  %v1517_v49 = vmul.f32 %v5669_v21, %v1509_v44 }
 0x12d   :  { %v1549_v54 = vperm.slane %v5957_v13, 4  ;;  %v997_v20 = vrot.slane %v996_v57, 1  ;;  %v1068_v43 = vadd.f32 %v1067_v55, %v1066_v58  ;;  %v1518_v2 = vmul.f32 %v5676_v40, %v1509_v44 }
 0x12e   :  { %v1493_v33 = vadd.f32 %v1477_v22, %v1453_v30  ;;  %v1494_v8 = vadd.f32 %v1478_v24, %v1454_v25  ;;  %v926_v7 = vadd.f32 %v925_v52, %v924_v61  ;;  %v1589_v35 = vperm.slane %v5957_v13, 5  ;;  %v6026_v24 = vpop.permute.xlu0 %86 }
 0x12f   :  { %v1557_v17 = vmul.f32 %v5685_v5, %v1549_v54  ;;  %v1733_v18 = vrot.slane %v1732_v38, 4  ;;  %v1238_v53 = vsel %vm1231_vm1, %v1229_v34, %v854_v0  ;;  %v6000_v27 = vsel %vm1394_vm10, -1.0, %v1354_v36  ;;  %v9533_v0 = vld [vmem:[#allocation10_spill] sm:$0xff] }
 0x130   :  { %v1533_v48 = vadd.f32 %v1517_v49, %v1493_v33  ;;  %v1534_v37 = vadd.f32 %v1518_v2, %v1494_v8  ;;  %9531 = vst [vmem:[#allocation5_spill] sm:$0xff] %v6000_v27  ;;  %v1328_v39 = vmul.f32 %v5875_v6, %v1280_v45  ;;  %v1140_v28 = vadd.f32 %v1139_v47, %v1138_v26 }
 0x131   :  { %v1211_v58 = vrot.slane %v1210_v60, 2  ;;  %v998_v10 = vadd.f32 %v997_v20, %v996_v57  ;;  %v1069_v56 = vrot.slane %v1068_v43, 1  ;;  %v1558_v61 = vmul.f32 %v5692_v9, %v1549_v54 }
 0x132   :  { %v1573_v23 = vadd.f32 %v1557_v17, %v1533_v48  ;;  %v1629_v62 = vperm.slane %v5957_v13, 6  ;;  %v1247_v63 = vsel %vm1240_vm2, %v1238_v53, %v926_v7  ;;  %v1597_v11 = vmul.f32 %v5700_v59, %v1589_v35 }
 0x133   :  { %v1410_v44 = vperm.slane %v6000_v27, 0  ;;  %v1434_v36 = vperm.slane %v6000_v27, 1  ;;  %v6011_v6 = vadd.f32 %v9533_v0, %v9532_v15  ;;  %v6015_v45 = vadd.f32 %v5952_v19, %v5950_v4 }
 0x134   :  { %v6017_v26 = vadd.f32 %v1733_v18, %v1732_v38  ;;  %v1574_v57 = vadd.f32 %v1558_v61, %v1534_v37  ;;  %v6019_v55 = vmul.f32 0.001, %v1328_v39  ;;  %v1141_v3 = vrot.slane %v1140_v28, 1  ;;  %v6053_v18 = vld [vmem:[%s9447_s0 + $0x78] sm:$0xff]  ;;  %v6059_v39 = vld [vmem:[%s9447_s0 + $0x20] sm:$0xff] }
 0x135   :  { %v6021_v52 = vadd.f32 %v1211_v58, %v1210_v60  ;;  %v1613_v34 = vadd.f32 %v1597_v11, %v1573_v23  ;;  %v1070_v30 = vadd.f32 %v1069_v56, %v1068_v43  ;;  %v1256_v22 = vsel %vm9462_vm3, %v1247_v63, %v998_v10  ;;  %v9534_v60 = vld [vmem:[#allocation3_spill] sm:$0xff] }
 0x136   :  { %v1598_v47 = vmul.f32 %v9520_v31, %v1589_v35  ;;  %v1637_v25 = vmul.f32 %v9521_v29, %v1629_v62  ;;  %v1669_v4 = vperm.slane %v5957_v13, 7  ;;  %v1423_v19 = vmul.f32 %v5966_v32, %v1410_v44 }
 0x137   :  { %v1447_v38 = vmul.f32 %v5978_v46, %v1434_v36  ;;  %v1474_v33 = vperm.slane %v6000_v27, 2  ;;  %v6034_v49 = vadd.f32 %v5944_v51, %v9534_v60  ;;  %v1740_v54 = vrot.slane %v6015_v45, 4  ;;  %v3499_v60 = vld [vmem:[%s9448_s3 + $0xf8] sm:$0xff] }
 0x138   :  { %v1735_v31 = vrot.slane %v6017_v26, 2  ;;  %v1614_v20 = vadd.f32 %v1598_v47, %v1574_v57  ;;  %v6038_v29 = vadd.f32 %v1141_v3, %v1140_v28  ;;  %v1213_v43 = vrot.slane %v6021_v52, 1  ;;  %3689 = vmatmul.f32.vlgmr.msra.gmra.mxu1 %v3499_v60  ;;  %v3500_v60 = vld [vmem:[%s9448_s3 + $0x100] sm:$0xff] }
 0x139   :  { %v1653_v8 = vadd.f32 %v1637_v25, %v1613_v34  ;;  %v1352_v2 = vsub.f32 %v6026_v24, %v6019_v55  ;;  %v6044_v7 = vsel %vm1258_vm4, %v1256_v22, %v1070_v30  ;;  %v1638_v48 = vmul.f32 %v9522_v14, %v1629_v62 }
 0x13a   :  { %v1424_v51 = vmul.f32 %v5972_v12, %v1410_v44  ;;  %v1448_v17 = vmul.f32 %v5985_v1, %v1434_v36  ;;  %v1677_v35 = vmul.f32 %v5639_v41, %v1669_v4  ;;  %v1678_v53 = vmul.f32 %v6053_v18, %v1669_v4  ;;  %v6065_v41 = vld [vmem:[%s9447_s0 + $0x28] sm:$0xff] }
 0x13b   :  { %v1463_v37 = vadd.f32 %v1447_v38, %v1423_v19  ;;  %v1487_v14 = vmul.f32 %v6059_v39, %v1474_v33  ;;  %v1654_v28 = vadd.f32 %v1638_v48, %v1614_v20  ;;  %v1488_v58 = vmul.f32 %v6065_v41, %v1474_v33 }
 0x13c   :  { %v660_v23 = vmul.f32 %v5966_v32, %v6011_v6  ;;  %v661_v10 = vmul.f32 %v5972_v12, %v6034_v49  ;;  %v1693_v56 = vadd.f32 %v1677_v35, %v1653_v8  ;;  %v1514_v61 = vperm.slane %v6000_v27, 3 }
 0x13d   :  { %v1554_v62 = vperm.slane %v6000_v27, 4  ;;  %v732_v63 = vmul.f32 %v5978_v46, %v6011_v6  ;;  %v1464_v11 = vadd.f32 %v1448_v17, %v1424_v51  ;;  %v1594_v44 = vperm.slane %v6000_v27, 5 }
 0x13e   :  { %v711_v36 = vadd.f32 %v661_v10, %v660_v23  ;;  %v733_v15 = vmul.f32 %v5985_v1, %v6034_v49  ;;  %v1503_v0 = vadd.f32 %v1487_v14, %v1463_v37  ;;  %v804_v57 = vmul.f32 %v6059_v39, %v6011_v6 }
 0x13f   :  { %v805_v3 = vmul.f32 %v6065_v41, %v6034_v49  ;;  %v876_v34 = vmul.f32 %v5669_v21, %v6011_v6  ;;  %v1694_v30 = vadd.f32 %v1678_v53, %v1654_v28  ;;  %v1634_v22 = vperm.slane %v6000_v27, 6 }
 0x140   :  { %v712_v47 = vrot.slane %v711_v36, 4  ;;  %v783_v25 = vadd.f32 %v733_v15, %v732_v63  ;;  %v1527_v4 = vmul.f32 %v5669_v21, %v1514_v61  ;;  %v877_v38 = vmul.f32 %v5676_v40, %v6034_v49  ;;  %3692 = vmatmul.f32.gmra.mxu1 %v3500_v60 }
 0x141   :  { %v855_v19 = vadd.f32 %v805_v3, %v804_v57  ;;  %v948_v33 = vmul.f32 %v5685_v5, %v6011_v6  ;;  %v1504_v20 = vadd.f32 %v1488_v58, %v1464_v11  ;;  %v1528_v8 = vmul.f32 %v5676_v40, %v1514_v61  ;;  %v6099_v61 = vpop.permute.xlu1 %1322 }
 0x142   :  { %v713_v48 = vadd.f32 %v712_v47, %v711_v36  ;;  %v784_v51 = vrot.slane %v783_v25, 4  ;;  %v1543_v17 = vadd.f32 %v1527_v4, %v1503_v0  ;;  %v927_v21 = vadd.f32 %v877_v38, %v876_v34 }
 0x143   :  { %v856_v35 = vrot.slane %v855_v19, 4  ;;  %v949_v53 = vmul.f32 %v5692_v9, %v6034_v49  ;;  %v1709_v37 = vmul.f32 %v1693_v56, %v1693_v56  ;;  %v1567_v14 = vmul.f32 %v5685_v5, %v1554_v62 }
 0x144   :  { %v714_v28 = vrot.slane %v713_v48, 2  ;;  %v785_v23 = vadd.f32 %v784_v51, %v783_v25  ;;  %v1568_v10 = vmul.f32 %v5692_v9, %v1554_v62  ;;  %v928_v58 = vrot.slane %v927_v21, 4  ;;  %v6106_v9 = vld [vmem:[%s9447_s0 + $0x58] sm:$0xff] }
 0x145   :  { %v857_v63 = vadd.f32 %v856_v35, %v855_v19  ;;  %v999_v11 = vadd.f32 %v949_v53, %v948_v33  ;;  %v1544_v40 = vadd.f32 %v1528_v8, %v1504_v20  ;;  %v1020_v0 = vmul.f32 %v5700_v59, %v6011_v6 }
 0x146   :  { %v715_v36 = vadd.f32 %v714_v28, %v713_v48  ;;  %v786_v15 = vrot.slane %v785_v23, 2  ;;  %v1583_v57 = vadd.f32 %v1567_v14, %v1543_v17  ;;  %v929_v56 = vadd.f32 %v928_v58, %v927_v21  ;;  %v6118_v28 = vld [vmem:[%s9447_s0 + $0x60] sm:$0xff] }
 0x147   :  { %v858_v3 = vrot.slane %v857_v63, 2  ;;  %v1000_v34 = vrot.slane %v999_v11, 4  ;;  %v1710_v5 = vmul.f32 %v1694_v30, %v1694_v30  ;;  %v1021_v62 = vmul.f32 %v6106_v9, %v6034_v49 }
 0x148   :  { %v716_v47 = vrot.slane %v715_v36, 1  ;;  %v787_v25 = vadd.f32 %v786_v15, %v785_v23  ;;  %v1607_v4 = vmul.f32 %v5700_v59, %v1594_v44  ;;  %v930_v38 = vrot.slane %v929_v56, 2  ;;  %v6136_v15 = vld [vmem:[%s9447_s0 + $0x70] sm:$0xff] }
 0x149   :  { %v859_v19 = vadd.f32 %v858_v3, %v857_v63  ;;  %v1001_v33 = vadd.f32 %v1000_v34, %v999_v11  ;;  %v1584_v30 = vadd.f32 %v1568_v10, %v1544_v40  ;;  %v1608_v20 = vmul.f32 %v6106_v9, %v1594_v44  ;;  %v6129_v40 = vld [vmem:[%s9447_s0 + $0x68] sm:$0xff] }
 0x14a   :  { %v788_v8 = vrot.slane %v787_v25, 1  ;;  %v1071_v48 = vadd.f32 %v1021_v62, %v1020_v0  ;;  %v1623_v51 = vadd.f32 %v1607_v4, %v1583_v57  ;;  %v931_v35 = vadd.f32 %v930_v38, %v929_v56 }
 0x14b   :  { %v860_v17 = vrot.slane %v859_v19, 1  ;;  %v1002_v21 = vrot.slane %v1001_v33, 2  ;;  %v717_v53 = vadd.f32 %v716_v47, %v715_v36  ;;  %v1092_v23 = vmul.f32 %v6118_v28, %v6011_v6 }
 0x14c   :  { %v789_v14 = vadd.f32 %v788_v8, %v787_v25  ;;  %v1072_v59 = vrot.slane %v1071_v48, 4  ;;  %v1647_v44 = vmul.f32 %v6118_v28, %v1634_v22  ;;  %v1674_v10 = vperm.slane %v6000_v27, 7 }
 0x14d   :  { %v932_v63 = vrot.slane %v931_v35, 1  ;;  %v1003_v58 = vadd.f32 %v1002_v21, %v1001_v33  ;;  %v1093_v36 = vmul.f32 %v6129_v40, %v6034_v49  ;;  %v1164_v0 = vmul.f32 %v6136_v15, %v6011_v6  ;;  %v1376_v33 = vpop.permute.xlu1 %1375 }
 0x14e   :  { %v1073_v11 = vadd.f32 %v1072_v59, %v1071_v48  ;;  %v1165_v57 = vmul.f32 %v6053_v18, %v6034_v49  ;;  %v6142_v3 = vadd.f32 %v1710_v5, %v1709_v37  ;;  %v1624_v56 = vadd.f32 %v1608_v20, %v1584_v30 }
 0x14f   :  { %v1663_v34 = vadd.f32 %v1647_v44, %v1623_v51  ;;  %v861_v47 = vadd.f32 %v860_v17, %v859_v19  ;;  %v1143_v62 = vadd.f32 %v1093_v36, %v1092_v23  ;;  %v1230_v38 = vsel %vm9463_vm0, %v717_v53, %v789_v14  ;;  %v3501_v19 = vld [vmem:[%s9448_s3 + $0x108] sm:$0xff] }
 0x150   :  { %v1074_v25 = vrot.slane %v1073_v11, 2  ;;  %v1215_v4 = vadd.f32 %v1165_v57, %v1164_v0  ;;  %v1648_v60 = vmul.f32 %v6129_v40, %v1634_v22  ;;  %v1687_v6 = vmul.f32 %v6136_v15, %v1674_v10  ;;  %3695 = vmatmul.f32.gmra.mxu1 %v3501_v19  ;;  %v6164_v0 = vpop.permute.xlu0 %91 }
 0x151   :  { %v1688_v8 = vmul.f32 %v6053_v18, %v1674_v10  ;;  %v1004_v49 = vrot.slane %v1003_v58, 1  ;;  %v933_v37 = vadd.f32 %v932_v63, %v931_v35  ;;  %v1144_v30 = vrot.slane %v1143_v62, 4 }
 0x152   :  { %v1075_v5 = vadd.f32 %v1074_v25, %v1073_v11  ;;  %v1216_v20 = vrot.slane %v1215_v4, 4  ;;  %v1726_v48 = vrot.slane %v6142_v3, 4  ;;  %v1664_v51 = vadd.f32 %v1648_v60, %v1624_v56 }
 0x153   :  { %v1239_v17 = vsel %vm1231_vm1, %v1230_v38, %v861_v47  ;;  %vm1392_vm11 = vcmp.eq.s32.totalorder %v1376_v33, 1  ;;  %v1703_v22 = vadd.f32 %v1687_v6, %v1663_v34  ;;  %v1145_v21 = vadd.f32 %v1144_v30, %v1143_v62 }
 0x154   :  { %v1217_v53 = vadd.f32 %v1216_v20, %v1215_v4  ;;  %v6158_v35 = vsel %vm1392_vm11, -1.0, %v1352_v2  ;;  %v1005_v14 = vadd.f32 %v1004_v49, %v1003_v58  ;;  %v1076_v10 = vrot.slane %v1075_v5, 1 }
 0x155   :  { %9535 = vst [vmem:[#allocation6_spill] sm:$0xff] %v6158_v35  ;;  %v1408_v59 = vperm.slane %v6158_v35, 0  ;;  %v1432_v23 = vperm.slane %v6158_v35, 1  ;;  %v1472_v44 = vperm.slane %v6158_v35, 2  ;;  %v1146_v63 = vrot.slane %v1145_v21, 2 }
 0x156   :  { %v1218_v11 = vrot.slane %v1217_v53, 2  ;;  %v1248_v36 = vsel %vm1240_vm2, %v1239_v17, %v933_v37  ;;  %v1512_v2 = vperm.slane %v6158_v35, 3  ;;  %v1704_v58 = vadd.f32 %v1688_v8, %v1664_v51  ;;  %v6177_v8 = vld [vmem:[%s9447_s0 + $0x30] sm:$0xff] }
 0x157   :  { %v1419_v57 = vmul.f32 %v5966_v32, %v1408_v59  ;;  %v1420_v55 = vmul.f32 %v5972_v12, %v1408_v59  ;;  %v1443_v24 = vmul.f32 %v5978_v46, %v1432_v23  ;;  %v1147_v56 = vadd.f32 %v1146_v63, %v1145_v21  ;;  %v6191_v59 = vld [vmem:[%s9447_s0 + $0x40] sm:$0xff] }
 0x158   :  { %v1219_v34 = vadd.f32 %v1218_v11, %v1217_v53  ;;  %v1444_v47 = vmul.f32 %v5985_v1, %v1432_v23  ;;  %v1719_v25 = vmul.f32 %v1703_v22, %v1703_v22  ;;  %v1257_v62 = vsel %vm9462_vm3, %v1248_v36, %v1005_v14  ;;  %v6202_v36 = vld [vmem:[%s9447_s0 + $0x48] sm:$0xff] }
 0x159   :  { %v1459_v4 = vadd.f32 %v1443_v24, %v1419_v57  ;;  %v1483_v38 = vmul.f32 %v6059_v39, %v1472_v44  ;;  %v1077_v33 = vadd.f32 %v1076_v10, %v1075_v5  ;;  %v1148_v60 = vrot.slane %v1147_v56, 1  ;;  %v6185_v5 = vld [vmem:[%s9447_s0 + $0x38] sm:$0xff] }
 0x15a   :  { %v1460_v6 = vadd.f32 %v1444_v47, %v1420_v55  ;;  %v1484_v49 = vmul.f32 %v6065_v41, %v1472_v44  ;;  %v1523_v30 = vmul.f32 %v6177_v8, %v1512_v2  ;;  %v1552_v20 = vperm.slane %v6158_v35, 4 }
 0x15b   :  { %v1499_v37 = vadd.f32 %v1483_v38, %v1459_v4  ;;  %v1592_v19 = vperm.slane %v6158_v35, 5  ;;  %v1720_v51 = vmul.f32 %v1704_v58, %v1704_v58  ;;  %v1220_v17 = vrot.slane %v1219_v34, 1  ;;  %v1379_v4 = vpop.permute.xlu0 %1378 }
 0x15c   :  { %v1500_v22 = vadd.f32 %v1484_v49, %v1460_v6  ;;  %v1524_v21 = vmul.f32 %v6185_v5, %v1512_v2  ;;  %v1149_v53 = vadd.f32 %v1148_v60, %v1147_v56  ;;  %v1563_v23 = vmul.f32 %v6191_v59, %v1552_v20  ;;  %v6211_v2 = vld [vmem:[%s9447_s0 + $0x50] sm:$0xff]  ;;  %v9536_v49 = vld [vmem:[#allocation9_spill] sm:$0xff] }
 0x15d   :  { %v1539_v14 = vadd.f32 %v1523_v30, %v1499_v37  ;;  %v1632_v44 = vperm.slane %v6158_v35, 6  ;;  %v1214_v10 = vadd.f32 %v1213_v43, %v6021_v52  ;;  %v1266_v63 = vsel %vm1258_vm4, %v1257_v62, %v1077_v33 }
 0x15e   :  { %v1540_v11 = vadd.f32 %v1524_v21, %v1500_v22  ;;  %v1564_v57 = vmul.f32 %v6202_v36, %v1552_v20  ;;  %v1274_v55 = vsel %vm1267_vm5, %v6044_v7, %v6038_v29  ;;  %v1603_v52 = vmul.f32 %v6211_v2, %v1592_v19 }
 0x15f   :  { %v1579_v24 = vadd.f32 %v1563_v23, %v1539_v14  ;;  %v1672_v43 = vperm.slane %v6158_v35, 7  ;;  %v1727_v58 = vadd.f32 %v1726_v48, %v6142_v3  ;;  %v1221_v56 = vadd.f32 %v1220_v17, %v1219_v34 }
 0x160   :  { %v1580_v47 = vadd.f32 %v1564_v57, %v1540_v11  ;;  %v1604_v62 = vmul.f32 %v6106_v9, %v1592_v19  ;;  %v1760_v38 = vadd.f32 %v1720_v51, %v1719_v25  ;;  %v1275_v29 = vsel %vm1267_vm5, %v1266_v63, %v1149_v53  ;;  %v6239_v63 = vpop.permute.xlu1 %101 }
 0x161   :  { %v1619_v7 = vadd.f32 %v1603_v52, %v1579_v24  ;;  %v1643_v33 = vmul.f32 %v6118_v28, %v1632_v44  ;;  %v1644_v6 = vmul.f32 %v6129_v40, %v1632_v44  ;;  %v1345_v37 = vmul.f32 0.001, %v9536_v49 }
 0x162   :  { %v1620_v60 = vadd.f32 %v1604_v62, %v1580_v47  ;;  %v6224_v3 = vadd.f32 %v1740_v54, %v6015_v45  ;;  %v1683_v34 = vmul.f32 %v6136_v15, %v1672_v43  ;;  %v1283_v25 = vsel %vm1276_vm6, %v1274_v55, %v1214_v10 }
 0x163   :  { %v1659_v48 = vadd.f32 %v1643_v33, %v1619_v7  ;;  %v1284_v30 = vsel %vm1276_vm6, %v1275_v29, %v1221_v56  ;;  %v1684_v19 = vmul.f32 %v6053_v18, %v1672_v43  ;;  %v6233_v51 = vadd.f32 %v1735_v31, %v6017_v26  ;;  %v107_v52 = vpop.permute.xlu0 %106  ;;  %v1388_v56 = vpop.permute.xlu2 %1387 }
 0x164   :  { %v1660_v20 = vadd.f32 %v1644_v6, %v1620_v60  ;;  %v1728_v17 = vrot.slane %v1727_v58, 2  ;;  %v1761_v22 = vrot.slane %v1760_v38, 4  ;;  %v1331_v54 = vmul.f32 %v5990_v42, %v1283_v25  ;;  %v3502_v42 = vld [vmem:[%s9448_s3 + $0x110] sm:$0xff] }
 0x165   :  { %v1699_v21 = vadd.f32 %v1683_v34, %v1659_v48  ;;  %v1332_v53 = vmul.f32 %v6099_v61, %v1284_v30  ;;  %v1353_v14 = vsub.f32 %v6164_v0, %v1345_v37  ;;  %v1742_v44 = vrot.slane %v6224_v3, 2  ;;  %3698 = vmatmul.f32.gmra.mxu1 %v3502_v42 }
 0x166   :  { %v1700_v45 = vadd.f32 %v1684_v19, %v1660_v20  ;;  %vm1393_vm12 = vcmp.eq.s32.totalorder %v1379_v4, 1  ;;  %v1737_v26 = vrot.slane %v6233_v51, 1  ;;  %v6242_v31 = vadd.f32 %v1728_v17, %v1727_v58 }
 0x167   :  { %v1715_v23 = vmul.f32 %v1699_v21, %v1699_v21  ;;  %v6244_v11 = vadd.f32 %v1761_v22, %v1760_v38  ;;  %v6246_v57 = vsel %vm1393_vm12, -1.0, %v1353_v14  ;;  %v6254_v43 = vmul.f32 0.001, %v1331_v54 }
 0x168   :  { %v1716_v10 = vmul.f32 %v1700_v45, %v1700_v45  ;;  %9537 = vst [vmem:[#allocation2_spill] sm:$0xff] %v6246_v57  ;;  %v1409_v0 = vperm.slane %v6246_v57, 0  ;;  %v1433_v55 = vperm.slane %v6246_v57, 1  ;;  %v1473_v24 = vperm.slane %v6246_v57, 2 }
 0x169   :  { %v1348_v58 = vmul.f32 0.001, %v1332_v53  ;;  %v1513_v47 = vperm.slane %v6246_v57, 3  ;;  %v1553_v62 = vperm.slane %v6246_v57, 4  ;;  %v1730_v33 = vrot.slane %v6242_v31, 1 }
 0x16a   :  { %v1746_v61 = vadd.f32 %v1716_v10, %v1715_v23  ;;  %v1421_v38 = vmul.f32 %v5966_v32, %v1409_v0  ;;  %v1422_v29 = vmul.f32 %v5972_v12, %v1409_v0  ;;  %v1445_v7 = vmul.f32 %v5978_v46, %v1433_v55 }
 0x16b   :  { %v1446_v60 = vmul.f32 %v5985_v1, %v1433_v55  ;;  %v1593_v6 = vperm.slane %v6246_v57, 5  ;;  %v1356_v49 = vsub.f32 %v107_v52, %v1348_v58  ;;  %v1763_v37 = vrot.slane %v6244_v11, 2  ;;  %v1385_v55 = vpop.permute.xlu1 %1384 }
 0x16c   :  { %v1747_v4 = vrot.slane %v1746_v61, 4  ;;  %vm1396_vm13 = vcmp.eq.s32.totalorder %v1388_v56, 1  ;;  %v1461_v48 = vadd.f32 %v1445_v7, %v1421_v38  ;;  %v1485_v34 = vmul.f32 %v6059_v39, %v1473_v24 }
 0x16d   :  { %v1462_v25 = vadd.f32 %v1446_v60, %v1422_v29  ;;  %v1486_v30 = vmul.f32 %v6065_v41, %v1473_v24  ;;  %v1525_v20 = vmul.f32 %v6177_v8, %v1513_v47  ;;  %v1633_v19 = vperm.slane %v6246_v57, 6 }
 0x16e   :  { %v6269_v17 = vadd.f32 %v1747_v4, %v1746_v61  ;;  %v1501_v22 = vadd.f32 %v1485_v34, %v1461_v48  ;;  %v1526_v21 = vmul.f32 %v6185_v5, %v1513_v47  ;;  %v1565_v45 = vmul.f32 %v6191_v59, %v1553_v62  ;;  %v3503_v47 = vld [vmem:[%s9448_s3 + $0x118] sm:$0xff] }
 0x16f   :  { %v1502_v54 = vadd.f32 %v1486_v30, %v1462_v25  ;;  %v1566_v53 = vmul.f32 %v6202_v36, %v1553_v62  ;;  %v1605_v14 = vmul.f32 %v6211_v2, %v1593_v6  ;;  %v6275_v23 = vsel %vm1396_vm13, -1.0, %v1356_v49  ;;  %3701 = vmatmul.f32.gmra.mxu1 %v3503_v47 }
 0x170   :  { %9538 = vst [vmem:[#allocation10_spill] sm:$0xff] %v6275_v23  ;;  %v1541_v10 = vadd.f32 %v1525_v20, %v1501_v22  ;;  %v1606_v42 = vmul.f32 %v6106_v9, %v1593_v6  ;;  %v1412_v0 = vperm.slane %v6275_v23, 0  ;;  %v1436_v61 = vperm.slane %v6275_v23, 1 }
 0x171   :  { %v1542_v24 = vadd.f32 %v1526_v21, %v1502_v54  ;;  %v1645_v52 = vmul.f32 %v6118_v28, %v1633_v19  ;;  %v1646_v58 = vmul.f32 %v6129_v40, %v1633_v19  ;;  %v1476_v56 = vperm.slane %v6275_v23, 2 }
 0x172   :  { %v1581_v62 = vadd.f32 %v1565_v45, %v1541_v10  ;;  %v1673_v4 = vperm.slane %v6246_v57, 7  ;;  %v1427_v38 = vmul.f32 %v5966_v32, %v1412_v0  ;;  %v1428_v29 = vmul.f32 %v5972_v12, %v1412_v0  ;;  %v6298_v10 = vpop.permute.xlu2 %1950 }
 0x173   :  { %v1582_v7 = vadd.f32 %v1566_v53, %v1542_v24  ;;  %v1451_v60 = vmul.f32 %v5978_v46, %v1436_v61  ;;  %v1452_v6 = vmul.f32 %v5985_v1, %v1436_v61  ;;  %vm1395_vm14 = vcmp.eq.s32.totalorder %v1385_v55, 1 }
 0x174   :  { %v1621_v49 = vadd.f32 %v1605_v14, %v1581_v62  ;;  %v1491_v48 = vmul.f32 %v6059_v39, %v1476_v56  ;;  %v1492_v34 = vmul.f32 %v6065_v41, %v1476_v56  ;;  %v1516_v25 = vperm.slane %v6275_v23, 3 }
 0x175   :  { %v1622_v30 = vadd.f32 %v1606_v42, %v1582_v7  ;;  %v1467_v20 = vadd.f32 %v1451_v60, %v1427_v38  ;;  %v1468_v19 = vadd.f32 %v1452_v6, %v1428_v29  ;;  %v1556_v22 = vperm.slane %v6275_v23, 4 }
 0x176   :  { %v1661_v21 = vadd.f32 %v1645_v52, %v1621_v49  ;;  %v1685_v45 = vmul.f32 %v6136_v15, %v1673_v4  ;;  %v1686_v54 = vmul.f32 %v6053_v18, %v1673_v4  ;;  %v1531_v53 = vmul.f32 %v6177_v8, %v1516_v25 }
 0x177   :  { %v1662_v14 = vadd.f32 %v1646_v58, %v1622_v30  ;;  %v1507_v0 = vadd.f32 %v1491_v48, %v1467_v20  ;;  %v1508_v61 = vadd.f32 %v1492_v34, %v1468_v19  ;;  %v1532_v24 = vmul.f32 %v6185_v5, %v1516_v25 }
 0x178   :  { %v1701_v56 = vadd.f32 %v1685_v45, %v1661_v21  ;;  %v1571_v42 = vmul.f32 %v6191_v59, %v1556_v22  ;;  %v1572_v47 = vmul.f32 %v6202_v36, %v1556_v22  ;;  %v1596_v52 = vperm.slane %v6275_v23, 5 }
 0x179   :  { %v1702_v62 = vadd.f32 %v1686_v54, %v1662_v14  ;;  %v1547_v38 = vadd.f32 %v1531_v53, %v1507_v0  ;;  %v1548_v29 = vadd.f32 %v1532_v24, %v1508_v61  ;;  %v1636_v4 = vperm.slane %v6275_v23, 6 }
 0x17a   :  { %v6306_v7 = vadd.f32 %v1763_v37, %v6244_v11  ;;  %v1749_v58 = vrot.slane %v6269_v17, 2  ;;  %v1717_v60 = vmul.f32 %v1701_v56, %v1701_v56  ;;  %v1355_v6 = vsub.f32 %v6239_v63, %v6254_v43 }
 0x17b   :  { %v1587_v49 = vadd.f32 %v1571_v42, %v1547_v38  ;;  %v1588_v48 = vadd.f32 %v1572_v47, %v1548_v29  ;;  %v1611_v34 = vmul.f32 %v6211_v2, %v1596_v52  ;;  %v1612_v25 = vmul.f32 %v6106_v9, %v1596_v52 }
 0x17c   :  { %v1718_v30 = vmul.f32 %v1702_v62, %v1702_v62  ;;  %v1651_v20 = vmul.f32 %v6118_v28, %v1636_v4  ;;  %v1676_v19 = vperm.slane %v6275_v23, 7  ;;  %v6316_v11 = vsel %vm1395_vm14, -1.0, %v1355_v6 }
 0x17d   :  { %9539 = vst [vmem:[#allocation3_spill] sm:$0xff] %v6316_v11  ;;  %v1627_v37 = vadd.f32 %v1611_v34, %v1587_v49  ;;  %v1628_v22 = vadd.f32 %v1612_v25, %v1588_v48  ;;  %v1652_v21 = vmul.f32 %v6129_v40, %v1636_v4  ;;  %v1411_v63 = vperm.slane %v6316_v11, 0  ;;  %v3504_v4 = vld [vmem:[%s9448_s3 + $0x120] sm:$0xff] }
 0x17e   :  { %v1750_v43 = vadd.f32 %v1749_v58, %v6269_v17  ;;  %v1691_v45 = vmul.f32 %v6136_v15, %v1676_v19  ;;  %v1435_v54 = vperm.slane %v6316_v11, 1  ;;  %v1475_v53 = vperm.slane %v6316_v11, 2  ;;  %v6329_v17 = vpop.permute.xlu2 %134  ;;  %3704 = vmatmul.f32.gmra.mxu1 %v3504_v4 }
 0x17f   :  { %v1667_v14 = vadd.f32 %v1651_v20, %v1627_v37  ;;  %v1668_v0 = vadd.f32 %v1652_v21, %v1628_v22  ;;  %v1692_v55 = vmul.f32 %v6053_v18, %v1676_v19  ;;  %v1425_v61 = vmul.f32 %v5966_v32, %v1411_v63 }
 0x180   :  { %v1753_v24 = vadd.f32 %v1718_v30, %v1717_v60  ;;  %v1426_v56 = vmul.f32 %v5972_v12, %v1411_v63  ;;  %v1449_v42 = vmul.f32 %v5978_v46, %v1435_v54  ;;  %v1450_v47 = vmul.f32 %v5985_v1, %v1435_v54 }
 0x181   :  { %v1707_v52 = vadd.f32 %v1691_v45, %v1667_v14  ;;  %v1708_v62 = vadd.f32 %v1692_v55, %v1668_v0  ;;  %v1489_v38 = vmul.f32 %v6059_v39, %v1475_v53  ;;  %v1490_v29 = vmul.f32 %v6065_v41, %v1475_v53 }
 0x182   :  { %v1465_v32 = vadd.f32 %v1449_v42, %v1425_v61  ;;  %v1466_v58 = vadd.f32 %v1450_v47, %v1426_v56  ;;  %v1515_v12 = vperm.slane %v6316_v11, 3  ;;  %v1555_v46 = vperm.slane %v6316_v11, 4  ;;  %v120_v42 = vpop.permute.xlu0 %119 }
 0x183   :  { %v1751_v1 = vrot.slane %v1750_v43, 1  ;;  %v1723_v60 = vmul.f32 %v1707_v52, %v1707_v52  ;;  %v1724_v6 = vmul.f32 %v1708_v62, %v1708_v62  ;;  %v1595_v49 = vperm.slane %v6316_v11, 5 }
 0x184   :  { %v1505_v48 = vadd.f32 %v1489_v38, %v1465_v32  ;;  %v1506_v39 = vadd.f32 %v1490_v29, %v1466_v58  ;;  %v1529_v41 = vmul.f32 %v6177_v8, %v1515_v12  ;;  %v1530_v34 = vmul.f32 %v6185_v5, %v1515_v12 }
 0x185   :  { %v1731_v25 = vadd.f32 %v1730_v33, %v6242_v31  ;;  %v1765_v30 = vrot.slane %v6306_v7, 1  ;;  %v1754_v20 = vrot.slane %v1753_v24, 4  ;;  %v1774_v19 = vadd.f32 %v1724_v6, %v1723_v60 }
 0x186   :  { %v1545_v37 = vadd.f32 %v1529_v41, %v1505_v48  ;;  %v1546_v22 = vadd.f32 %v1530_v34, %v1506_v39  ;;  %v1569_v21 = vmul.f32 %v6191_v59, %v1555_v46  ;;  %v1570_v63 = vmul.f32 %v6202_v36, %v1555_v46  ;;  %v145_v38 = vpop.permute.xlu2 %144 }
 0x187   :  { %v1752_v45 = vadd.f32 %v1751_v1, %v1750_v43  ;;  %v1775_v54 = vrot.slane %v1774_v19, 4  ;;  %v1609_v8 = vmul.f32 %v6211_v2, %v1595_v49  ;;  %v1635_v5 = vperm.slane %v6316_v11, 6 }
 0x188   :  { %v1585_v53 = vadd.f32 %v1569_v21, %v1545_v37  ;;  %v1586_v14 = vadd.f32 %v1570_v63, %v1546_v22  ;;  %v1610_v31 = vmul.f32 %v6106_v9, %v1595_v49  ;;  %v1675_v33 = vperm.slane %v6316_v11, 7 }
 0x189   :  { %v1743_v0 = vadd.f32 %v1742_v44, %v6224_v3  ;;  %v1766_v59 = vadd.f32 %v1765_v30, %v6306_v7  ;;  %v1755_v55 = vadd.f32 %v1754_v20, %v1753_v24  ;;  %v1776_v36 = vadd.f32 %v1775_v54, %v1774_v19  ;;  %v125_v3 = vpop.permute.xlu1 %124  ;;  %v3505_v54 = vld [vmem:[%s9448_s3 + $0x128] sm:$0xff] }
 0x18a   :  { %v1625_v43 = vadd.f32 %v1609_v8, %v1585_v53  ;;  %v1626_v61 = vadd.f32 %v1610_v31, %v1586_v14  ;;  %v1649_v2 = vmul.f32 %v6118_v28, %v1635_v5  ;;  %v1650_v56 = vmul.f32 %v6129_v40, %v1635_v5  ;;  %3707 = vmatmul.f32.gmra.mxu1 %v3505_v54 }
 0x18b   :  { %v1738_v9 = vadd.f32 %v1737_v26, %v6233_v51  ;;  %v1781_v47 = vmul.f32 0.5, %v1731_v25  ;;  %v1784_v52 = vmul.f32 0.5, %v1752_v45  ;;  %v1777_v62 = vrot.slane %v1776_v36, 2  ;;  %v130_v45 = vpop.permute.xlu0 %129 }
 0x18c   :  { %v1665_v44 = vadd.f32 %v1649_v2, %v1625_v43  ;;  %v1666_v7 = vadd.f32 %v1650_v56, %v1626_v61  ;;  %v1689_v24 = vmul.f32 %v6136_v15, %v1675_v33  ;;  %v1690_v29 = vmul.f32 %v6053_v18, %v1675_v33 }
 0x18d   :  { %v1744_v4 = vrot.slane %v1743_v0, 1  ;;  %v1786_v28 = vmul.f32 0.5, %v1766_v59  ;;  %v1778_v32 = vadd.f32 %v1777_v62, %v1776_v36  ;;  %v1756_v40 = vrot.slane %v1755_v55, 2 }
 0x18e   :  { %v1705_v58 = vadd.f32 %v1689_v24, %v1665_v44  ;;  %v1706_v12 = vadd.f32 %v1690_v29, %v1666_v7  ;;  %v1782_v46 = vmul.f32 0.5, %v1738_v9  ;;  %v1789_v1 = vmul.f32 0.001, %v1781_v47  ;;  %v155_v53 = vpop.permute.xlu2 %154 }
 0x18f   :  { %v1779_v51 = vrot.slane %v1778_v32, 1  ;;  %v122_v26 = vperm.slane %v120_v42, 0  ;;  %v1792_v60 = vmul.f32 0.001, %v1784_v52  ;;  %vm1973_vm15 = vcmp.eq.s32.totalorder %v6298_v10, 1 }
 0x190   :  { %v1721_v6 = vmul.f32 %v1705_v58, %v1705_v58  ;;  %v1722_v49 = vmul.f32 %v1706_v12, %v1706_v12  ;;  %v1745_v48 = vadd.f32 %v1744_v4, %v1743_v0  ;;  %v1794_v39 = vmul.f32 0.001, %v1786_v28 }
 0x191   :  { %v1780_v15 = vadd.f32 %v1779_v51, %v1778_v32  ;;  %v1757_v41 = vadd.f32 %v1756_v40, %v1755_v55  ;;  %v137_v18 = vperm.slane %v6329_v17, 0  ;;  %v127_v25 = vperm.slane %v125_v3, 0  ;;  %v1954_v14 = vpop.permute.xlu1 %1953 }
 0x192   :  { %v1767_v34 = vadd.f32 %v1722_v49, %v1721_v6  ;;  %v9540_v30 = vmov 0   ;;  %v147_v37 = vperm.slane %v145_v38, 0  ;;  %v6369_v22 = vsub.f32 %v122_v26, %v1789_v1 }
 0x193   :  { %v6367_v20 = vsel %vm1973_vm15, 1, %v9540_v30  ;;  %v1788_v19 = vmul.f32 0.5, %v1780_v15  ;;  %v1790_v21 = vmul.f32 0.001, %v1782_v46  ;;  %v6371_v63 = vsub.f32 %v137_v18, %v1792_v60 }
 0x194   :  { %v1783_v17 = vmul.f32 0.5, %v1745_v48  ;;  %v1768_v8 = vrot.slane %v1767_v34, 4  ;;  %v6376_v5 = vsub.f32 %v147_v37, %v1794_v39  ;;  %v1991_v31 = vrot.slane %v6367_v20, 3 }
 0x195   :  { %v1758_v33 = vrot.slane %v1757_v41, 1  ;;  %v1796_v0 = vmul.f32 0.001, %v1788_v19  ;;  %v6379_v59 = vsub.f32 %v127_v25, %v1790_v21  ;;  %v1993_v55 = vrot.slane %v6367_v20, 5  ;;  %v3532_v25 = vld [vmem:[%s9448_s3 + $0x200] sm:$0xff] }
 0x196   :  { %vm1869_vm1 = vcmp.eq.f32.partialorder %v6369_v22, %v6369_v22  ;;  %v132_v36 = vperm.slane %v130_v45, 0  ;;  %v1989_v43 = vrot.slane %v6367_v20, 1  ;;  %vm1872_vm2 = vcmp.eq.f32.partialorder %v6371_v63, %v6369_v22  ;;  %v6475_v15 = vpop.permute.xlu2 %1968  ;;  %v1957_v45 = vpop.permute.xlu0 %1956  ;;  %3788 = vmatmul.f32.vlgmr.msra.gmra.mxu2 %v3532_v25 }
 0x197   :  { %v157_v61 = vperm.slane %v155_v53, 0  ;;  %vm1974_vm4 = vcmp.eq.s32.totalorder %v1954_v14, 1  ;;  %v1791_v2 = vmul.f32 0.001, %v1783_v17  ;;  %v1769_v56 = vadd.f32 %v1768_v8, %v1767_v34  ;;  %vm6393_vm8 = vmand %vm1869_vm1, %vm1973_vm15 }
 0x198   :  { %vm1874_vm5 = vcmp.eq.f32.partialorder %v6376_v5, %v6369_v22  ;;  %vm2048_vm6 = vcmp.ne.s32.totalorder %v1991_v31, 0  ;;  %v1759_v42 = vadd.f32 %v1758_v33, %v1757_v41  ;;  %vm1870_vm7 = vcmp.eq.f32.partialorder %v6379_v59, %v6369_v22 }
 0x199   :  { %v6397_v47 = vsub.f32 %v157_v61, %v1796_v0  ;;  %vm2050_vm9 = vcmp.ne.s32.totalorder %v1993_v55, 0  ;;  %vm1808_vm10 = vcmp.gt.f32.partialorder %v6371_v63, %v6369_v22  ;;  %vm2112_vm11 = vmand %vm1872_vm2, %vm2048_vm6  ;;  %v6401_v52 = vsub.f32 %v132_v36, %v1791_v2 }
 0x19a   :  { %v6405_v62 = vsel %vm1974_vm4, 1, %v9540_v30  ;;  %v1995_v38 = vrot.slane %v6367_v20, 7  ;;  %vm2046_vm12 = vcmp.ne.s32.totalorder %v1989_v43, 0  ;;  %vm1810_vm13 = vcmp.gt.f32.partialorder %v6376_v5, %v6369_v22  ;;  %vm2114_vm14 = vmand %vm1874_vm5, %vm2050_vm9 }
 0x19b   :  { %v1990_v10 = vrot.slane %v6367_v20, 2  ;;  %v1770_v3 = vrot.slane %v1769_v56, 2  ;;  %vm1806_vm15 = vcmp.gt.f32.partialorder %v6379_v59, %v6369_v22  ;;  %vm2110_vm1 = vmand %vm1870_vm7, %vm2046_vm12  ;;  %v1785_v44 = vmul.f32 0.5, %v1759_v42 }
 0x19c   :  { %vm1876_vm2 = vcmp.eq.f32.partialorder %v6397_v47, %v6369_v22  ;;  %vm6418_vm6 = vmor %vm1808_vm10, %vm2112_vm11  ;;  %v1996_v24 = vrot.slane %v6405_v62, 1  ;;  %vm1871_vm9 = vcmp.eq.f32.partialorder %v6401_v52, %v6369_v22  ;;  %v1997_v4 = vrot.slane %v6405_v62, 2 }
 0x19d   :  { %vm6423_vm5 = vmor %vm1810_vm13, %vm2114_vm14  ;;  %vm9466_vm7 = vcmask 1041409   ;;  %vm2052_vm12 = vcmp.ne.s32.totalorder %v1995_v38, 0  ;;  %v1992_v28 = vrot.slane %v6367_v20, 4  ;;  %vm2047_vm10 = vcmp.ne.s32.totalorder %v1990_v10, 0 }
 0x19e   :  { %vm2174_vm3 = vmor %vm1806_vm15, %vm2110_vm1  ;;  %v1771_v32 = vadd.f32 %v1770_v3, %v1769_v56  ;;  %vm1812_vm11 = vcmp.gt.f32.partialorder %v6397_v47, %v6369_v22  ;;  %v6434_v58 = vmul.f32 0.001, %v1785_v44  ;;  %vm1877_vm14 = vcmp.eq.f32.partialorder %v6369_v22, %v6379_v59 }
 0x19f   :  { %vm2116_vm0 = vmand %vm1876_vm2, %vm2052_vm12  ;;  %vm6442_vm15 = vcmp.ne.s32.totalorder %v1996_v24, 0  ;;  %v9467_v1 = vmov 0.0   ;;  %v1998_v26 = vrot.slane %v6405_v62, 3  ;;  %v2000_v60 = vrot.slane %v6405_v62, 5  ;;  %v140_v24 = vpop.permute.xlu1 %139 }
 0x1a0   :  { %vm6436_vm13 = vmand %vm1871_vm9, %vm2047_vm10  ;;  %v6447_v51 = vsel %vm2174_vm3, 1.0, %v9467_v1  ;;  %vm6451_vm1 = vcmp.ne.s32.totalorder %v1997_v4, 0  ;;  %v6463_v48 = vsel %vm6393_vm8, 1.0, %v9467_v1  ;;  %vm1813_vm12 = vcmp.gt.f32.partialorder %v6369_v22, %v6379_v59 }
 0x1a1   :  { %vm6456_vm2 = vmand %vm1877_vm14, %vm1974_vm4  ;;  %vm1878_vm4 = vcmp.eq.f32.partialorder %v6379_v59, %v6379_v59  ;;  %v1772_v41 = vrot.slane %v1771_v32, 1  ;;  %v6480_v18 = vsel %vm6418_vm6, 1.0, %v9467_v1  ;;  %vm1880_vm8 = vcmp.eq.f32.partialorder %v6371_v63, %v6379_v59 }
 0x1a2   :  { %vm6465_vm3 = vmor %vm1812_vm11, %vm2116_vm0  ;;  %vm1879_vm0 = vcmp.eq.f32.partialorder %v6401_v52, %v6379_v59  ;;  %v6498_v19 = vsel %vm6423_vm5, 1.0, %v9467_v1  ;;  %v2645_v37 = vrot.slane %v6447_v51, 7  ;;  %vm1815_vm6 = vcmp.gt.f32.partialorder %v6401_v52, %v6379_v59 }
 0x1a3   :  { %vm6488_vm10 = vmand %vm1878_vm4, %vm6442_vm15  ;;  %v2002_v54 = vrot.slane %v6405_v62, 7  ;;  %vm2056_vm5 = vcmp.ne.s32.totalorder %v1998_v26, 0  ;;  %vm6512_vm15 = vcmp.ne.s32.totalorder %v2000_v60, 0  ;;  %v2651_v53 = vrot.slane %v6480_v18, 5 }
 0x1a4   :  { %vm6507_vm14 = vmand %vm1879_vm0, %vm6451_vm1  ;;  %vm9464_vm1 = vcmp.eq.s32.totalorder %v6475_v15, 1  ;;  %vm1882_vm9 = vcmp.eq.f32.partialorder %v6376_v5, %v6379_v59  ;;  %vm1884_vm11 = vcmp.eq.f32.partialorder %v6397_v47, %v6379_v59  ;;  %v1773_v31 = vadd.f32 %v1772_v41, %v1771_v32 }
 0x1a5   :  { %vm6521_vm4 = vmor %vm1813_vm12, %vm6456_vm2  ;;  %v6543_v33 = vsel %vm6465_vm3, 1.0, %v9467_v1  ;;  %v6557_v55 = vsel %vm6488_vm10, 1.0, %v9467_v1  ;;  %v6562_v43 = vsel %vm9466_vm7, %v2645_v37, %v6463_v48  ;;  %vm1820_vm3 = vcmp.gt.f32.partialorder %v6397_v47, %v6379_v59 }
 0x1a6   :  { %vm6536_vm2 = vmand %vm1880_vm8, %vm2056_vm5  ;;  %vm1975_vm8 = vcmp.eq.s32.totalorder %v1957_v45, 1  ;;  %vm9465_vm5 = vcmask 1042434   ;;  %v6575_v2 = vsel %vm9464_vm1, 1, %v9540_v30  ;;  %v1999_v56 = vrot.slane %v6405_v62, 4 }
 0x1a7   :  { %vm6550_vm12 = vmor %vm1815_vm6, %vm6507_vm14  ;;  %vm2060_vm10 = vcmp.ne.s32.totalorder %v2002_v54, 0  ;;  %vm9571_vm14 = vcmp.gt.f32.partialorder %v6371_v63, %v6379_v59  ;;  %v6586_v9 = vsel %vm1975_vm8, 1, %v9540_v30  ;;  %v6599_v3 = vsel %vm6521_vm4, 1.0, %v9467_v1 }
 0x1a8   :  { %vm6568_vm6 = vmand %vm1882_vm9, %vm6512_vm15  ;;  %v6604_v44 = vsel %vm6550_vm12, 1.0, %v9467_v1  ;;  %v2666_v7 = vrot.slane %v6557_v55, 7  ;;  %v1787_v29 = vmul.f32 0.5, %v1773_v31  ;;  %vm9577_vm4 = vcmp.gt.f32.partialorder %v6376_v5, %v6379_v59 }
 0x1a9   :  { %vm2184_vm0 = vmor %vm9571_vm14, %vm6536_vm2  ;;  %v2003_v49 = vrot.slane %v6586_v9, 1  ;;  %v2668_v41 = vrot.slane %v6604_v44, 6  ;;  %v2004_v25 = vrot.slane %v6586_v9, 2  ;;  %v142_v37 = vperm.slane %v140_v24, 0  ;;  %v6671_v24 = vpop.permute.xlu2 %2371 }
 0x1aa   :  { %vm6592_vm9 = vmand %vm1884_vm11, %vm2060_vm10  ;;  %vm9574_vm11 = vcmp.gt.f32.partialorder %v6401_v52, %v6369_v22  ;;  %v6625_v12 = vsel %vm2184_vm0, 1.0, %v9467_v1  ;;  %v2667_v21 = vsel %vm9466_vm7, %v2666_v7, %v6599_v3  ;;  %vm1885_vm0 = vcmp.eq.f32.partialorder %v6369_v22, %v6401_v52 }
 0x1ab   :  { %vm6612_vm15 = vmor %vm9574_vm11, %vm6436_vm13  ;;  %vm6630_vm13 = vcmp.ne.s32.totalorder %v1999_v56, 0  ;;  %v2005_v17 = vrot.slane %v6586_v9, 3  ;;  %v2670_v14 = vrot.slane %v6625_v12, 5  ;;  %v6663_v61 = vsub.f32 %v142_v37, %v6434_v58 }
 0x1ac   :  { %vm2186_vm2 = vmor %vm9577_vm4, %vm6568_vm6  ;;  %v6647_v54 = vsel %vm6612_vm15, 1.0, %v9467_v1  ;;  %v6665_v56 = vmul.f32 0.001, %v1787_v29  ;;  %v2007_v7 = vrot.slane %v6586_v9, 5  ;;  %vm2062_vm6 = vcmp.ne.s32.totalorder %v2003_v49, 0 }
 0x1ad   :  { %vm2188_vm12 = vmor %vm1820_vm3, %vm6592_vm9  ;;  %v6653_v8 = vsel %vm2186_vm2, 1.0, %v9467_v1  ;;  %v2669_v4 = vsel %vm9465_vm5, %v2668_v41, %v2667_v21  ;;  %v2648_v45 = vrot.slane %v6647_v54, 6  ;;  %vm6677_vm10 = vcmp.ne.s32.totalorder %v2004_v25, 0 }
 0x1ae   :  { %vm6658_vm3 = vmand %vm1885_vm0, %vm1975_vm8  ;;  %v6668_v10 = vsel %vm2188_vm12, 1.0, %v9467_v1  ;;  %vm1821_vm8 = vcmp.gt.f32.partialorder %v6369_v22, %v6401_v52  ;;  %vm1886_vm14 = vcmp.eq.f32.partialorder %v6379_v59, %v6401_v52  ;;  %vm1888_vm9 = vcmp.eq.f32.partialorder %v6371_v63, %v6401_v52 }
 0x1af   :  { %vm6686_vm11 = vcmp.ne.s32.totalorder %v2005_v17, 0  ;;  %vm6692_vm15 = vmor %vm1821_vm8, %vm6658_vm3  ;;  %vm9588_vm4 = vcmask 1043459   ;;  %vm1887_vm2 = vcmp.eq.f32.partialorder %v6401_v52, %v6401_v52  ;;  %vm1881_vm0 = vcmp.eq.f32.partialorder %v6663_v61, %v6379_v59 }
 0x1b0   :  { %v6697_v25 = vsel %vm9588_vm4, %v2670_v14, %v2669_v4  ;;  %vm6701_vm12 = vmand %vm1886_vm14, %vm2062_vm6  ;;  %v2404_v21 = vrot.slane %v6671_v24, 1  ;;  %v2006_v0 = vrot.slane %v6586_v9, 4  ;;  %v2009_v38 = vrot.slane %v6586_v9, 7  ;;  %v3506_v14 = vld [vmem:[%s9448_s3 + $0x130] sm:$0xff] }
 0x1b1   :  { %vm6711_vm3 = vcmp.ne.s32.totalorder %v2007_v7, 0  ;;  %vm6717_vm6 = vmand %vm1887_vm2, %vm6677_vm10  ;;  %vm6723_vm8 = vcmp.ne.s32.totalorder %v1992_v28, 0  ;;  %v2650_v17 = vsel %vm9465_vm5, %v2648_v45, %v6562_v43  ;;  %vm1822_vm14 = vcmp.gt.f32.partialorder %v6379_v59, %v6401_v52  ;;  %3710 = vmatmul.f32.gmra.mxu1 %v3506_v14  ;;  %v1960_v28 = vpop.permute.xlu0 %1959  ;;  %v7204_v27 = vpop.permute.xlu2 %2383 }
 0x1b2   :  { %vm1824_vm4 = vcmp.gt.f32.partialorder %v6371_v63, %v6401_v52  ;;  %vm6740_vm2 = vmand %vm1888_vm9, %vm6686_vm11  ;;  %vm1890_vm5 = vcmp.eq.f32.partialorder %v6376_v5, %v6401_v52  ;;  %vm1817_vm7 = vcmp.gt.f32.partialorder %v6663_v61, %v6379_v59  ;;  %v2405_v43 = vrot.slane %v6671_v24, 2 }
 0x1b3   :  { %vm2121_vm10 = vmand %vm1881_vm0, %vm6630_vm13  ;;  %vm9599_vm9 = vcmask 1043459   ;;  %vm1892_vm11 = vcmp.eq.f32.partialorder %v6397_v47, %v6401_v52  ;;  %v2526_v58 = vadd.f32 %v6557_v55, %v2404_v21  ;;  %vm6771_vm13 = vcmp.ne.s32.totalorder %v2006_v0, 0 }
 0x1b4   :  { %v6759_v7 = vsel %vm9599_vm9, %v2651_v53, %v2650_v17  ;;  %vm6766_vm1 = vmand %vm1890_vm5, %vm6711_vm3  ;;  %vm2068_vm0 = vcmp.ne.s32.totalorder %v2009_v38, 0  ;;  %v6787_v17 = vsel %vm6692_vm15, 1.0, %v9467_v1  ;;  %v2406_v55 = vrot.slane %v6671_v24, 3 }
 0x1b5   :  { %vm6780_vm9 = vmor %vm1822_vm14, %vm6701_vm12  ;;  %v6793_v38 = vsel %vm6717_vm6, 1.0, %v9467_v1  ;;  %v2407_v21 = vrot.slane %v6671_v24, 4  ;;  %v2408_v0 = vrot.slane %v6671_v24, 5  ;;  %v2525_v41 = vadd.f32 %v6599_v3, %v6671_v24 }
 0x1b6   :  { %vm6795_vm5 = vmor %vm1817_vm7, %vm2121_vm10  ;;  %vm1809_vm7 = vcmp.gt.f32.partialorder %v6663_v61, %v6369_v22  ;;  %vm1825_vm12 = vcmp.gt.f32.partialorder %v6663_v61, %v6401_v52  ;;  %v2527_v3 = vadd.f32 %v6604_v44, %v2405_v43  ;;  %v6831_v34 = vsel %vm6780_vm9, 1.0, %v9467_v1 }
 0x1b7   :  { %vm6809_vm15 = vmand %vm1892_vm11, %vm2068_vm0  ;;  %vm1873_vm6 = vcmp.eq.f32.partialorder %v6663_v61, %v6369_v22  ;;  %v2410_v44 = vrot.slane %v6671_v24, 7  ;;  %v2837_v43 = vmul.f32 %v2526_v58, %v6379_v59  ;;  %vm9612_vm14 = vcmp.gt.f32.partialorder %v6376_v5, %v6401_v52 }
 0x1b8   :  { %vm6824_vm3 = vmor %vm1824_vm4, %vm6740_vm2  ;;  %v2682_v53 = vrot.slane %v6793_v38, 6  ;;  %vm1889_vm10 = vcmp.eq.f32.partialorder %v6663_v61, %v6401_v52  ;;  %v6852_v29 = vsel %vm6795_vm5, 1.0, %v9467_v1  ;;  %v2528_v58 = vadd.f32 %v6625_v12, %v2406_v55 }
 0x1b9   :  { %vm6842_vm4 = vmor %vm9612_vm14, %vm6766_vm1  ;;  %vm9615_vm1 = vcmp.gt.f32.partialorder %v6397_v47, %v6401_v52  ;;  %v2530_v6 = vadd.f32 %v6653_v8, %v2408_v0  ;;  %v2532_v60 = vadd.f32 %v6668_v10, %v2410_v44  ;;  %v2836_v26 = vmul.f32 %v2525_v41, %v6369_v22 }
 0x1ba   :  { %vm6860_vm2 = vmor %vm9615_vm1, %vm6809_vm15  ;;  %vm1829_vm11 = vcmp.gt.f32.partialorder %v6369_v22, %v6371_v63  ;;  %v6872_v12 = vsel %vm6824_vm3, 1.0, %v9467_v1  ;;  %v2680_v55 = vrot.slane %v6831_v34, 7  ;;  %v2838_v37 = vmul.f32 %v2527_v3, %v6401_v52 }
 0x1bb   :  { %vm6881_vm0 = vmand %vm1873_vm6, %vm6723_vm8  ;;  %vm1976_vm9 = vcmp.eq.s32.totalorder %v1960_v28, 1  ;;  %v2529_v41 = vadd.f32 %v6852_v29, %v2407_v21  ;;  %v2970_v4 = vrot.slane %v2837_v43, 7  ;;  %vm1893_vm15 = vcmp.eq.f32.partialorder %v6369_v22, %v6371_v63 }
 0x1bc   :  { %vm6891_vm5 = vmand %vm1889_vm10, %vm6771_vm13  ;;  %v6898_v36 = vsel %vm1976_vm9, 1, %v9540_v30  ;;  %vm1830_vm8 = vcmp.gt.f32.partialorder %v6379_v59, %v6371_v63  ;;  %v6913_v28 = vsel %vm6842_vm4, 1.0, %v9467_v1  ;;  %v2684_v46 = vrot.slane %v6872_v12, 5 }
 0x1bd   :  { %v2010_v21 = vrot.slane %v6898_v36, 1  ;;  %v2011_v49 = vrot.slane %v6898_v36, 2  ;;  %v2012_v3 = vrot.slane %v6898_v36, 3  ;;  %v2013_v44 = vrot.slane %v6898_v36, 4  ;;  %vm6906_vm13 = vmand %vm1893_vm15, %vm1976_vm9 }
 0x1be   :  { %v2839_v32 = vmul.f32 %v2528_v58, %v6371_v63  ;;  %vm6922_vm6 = vmor %vm1809_vm7, %vm6881_vm0  ;;  %v2014_v42 = vrot.slane %v6898_v36, 5  ;;  %v6928_v40 = vmul.f32 %v2530_v6, %v6376_v5  ;;  %v6931_v14 = vmul.f32 %v2532_v60, %v6397_v47 }
 0x1bf   :  { %vm6938_vm14 = vmor %vm1825_vm12, %vm6891_vm5  ;;  %vm2070_vm7 = vcmp.ne.s32.totalorder %v2010_v21, 0  ;;  %vm6942_vm4 = vcmp.ne.s32.totalorder %v2011_v49, 0  ;;  %vm9630_vm10 = vcmask 1041409   ;;  %v2972_v1 = vrot.slane %v2838_v37, 6  ;;  %v150_v21 = vpop.permute.xlu1 %149 }
 0x1c0   :  { %v2681_v6 = vsel %vm9630_vm10, %v2680_v55, %v6787_v17  ;;  %vm1894_vm1 = vcmp.eq.f32.partialorder %v6379_v59, %v6371_v63  ;;  %vm6950_vm0 = vcmp.ne.s32.totalorder %v2012_v3, 0  ;;  %vm6959_vm12 = vmor %vm1829_vm11, %vm6906_vm13  ;;  %v2840_v55 = vmul.f32 %v2529_v41, %v6663_v61 }
 0x1c1   :  { %vm9635_vm9 = vmmov %vm9630_vm10  ;;  %vm1895_vm5 = vcmp.eq.f32.partialorder %v6401_v52, %v6371_v63  ;;  %vm6967_vm15 = vcmp.ne.s32.totalorder %v2013_v44, 0  ;;  %v9640_v43 = vmov 0.0   ;;  %v2974_v41 = vrot.slane %v2839_v32, 5 }
 0x1c2   :  { %v2971_v37 = vsel %vm9635_vm9, %v2970_v4, %v2836_v26  ;;  %vm6971_vm10 = vmand %vm1894_vm1, %vm2070_vm7  ;;  %v6978_v13 = vsel %vm6860_vm2, 1.0, %v9640_v43  ;;  %vm1896_vm13 = vcmp.eq.f32.partialorder %v6371_v63, %v6371_v63  ;;  %vm6982_vm9 = vcmp.ne.s32.totalorder %v2014_v42, 0 }
 0x1c3   :  { %vm6988_vm7 = vmand %vm1895_vm5, %vm6942_vm4  ;;  %v9645_v44 = vrot.slane %v6367_v20, 6  ;;  %vm9648_vm2 = vcmask 1042434   ;;  %vm1897_vm11 = vcmp.eq.f32.partialorder %v6663_v61, %v6371_v63  ;;  %v2016_v42 = vrot.slane %v6898_v36, 7 }
 0x1c4   :  { %v2683_v32 = vsel %vm9648_vm2, %v2682_v53, %v2681_v6  ;;  %vm7004_vm3 = vmand %vm1896_vm13, %vm6950_vm0  ;;  %v152_v16 = vperm.slane %v150_v21, 0  ;;  %v9651_v20 = vrot.slane %v6405_v62, 6  ;;  %v2672_v6 = vrot.slane %v6852_v29, 4 }
 0x1c5   :  { %vm6994_vm1 = vcmp.ne.s32.totalorder %v9645_v44, 0  ;;  %vm9654_vm5 = vmmov %vm9648_vm2  ;;  %v7019_v50 = vsel %vm6922_vm6, 1.0, %v9640_v43  ;;  %vm1898_vm0 = vcmp.eq.f32.partialorder %v6376_v5, %v6371_v63  ;;  %v9657_v60 = vrot.slane %v6586_v9, 6 }
 0x1c6   :  { %vm7010_vm4 = vcmp.ne.s32.totalorder %v9651_v20, 0  ;;  %v2973_v53 = vsel %vm9654_vm5, %v2972_v1, %v2971_v37  ;;  %vm7025_vm13 = vmand %vm1897_vm11, %vm6967_vm15  ;;  %v2976_v29 = vrot.slane %v2840_v55, 4  ;;  %v7038_v45 = vsel %vm6938_vm14, 1.0, %v9640_v43 }
 0x1c7   :  { %vm7031_vm2 = vcmp.ne.s32.totalorder %v9657_v60, 0  ;;  %vm7044_vm15 = vmand %vm1898_vm0, %vm6982_vm9  ;;  %v7049_v9 = vsub.f32 %v152_v16, %v6665_v56  ;;  %vm9662_vm11 = vcmask 1043459   ;;  %v2688_v55 = vrot.slane %v6913_v28, 3 }
 0x1c8   :  { %v2685_v37 = vsel %vm9662_vm11, %v2684_v46, %v2683_v32  ;;  %vm9663_vm5 = vmmov %vm9662_vm11  ;;  %vm1831_vm14 = vcmp.gt.f32.partialorder %v6401_v52, %v6371_v63  ;;  %v2654_v49 = vrot.slane %v7019_v50, 4  ;;  %vm2076_vm6 = vcmp.ne.s32.totalorder %v2016_v42, 0  ;;  %v3533_v32 = vld [vmem:[%s9448_s3 + $0x208] sm:$0xff] }
 0x1c9   :  { %v2975_v58 = vsel %vm9663_vm5, %v2974_v41, %v2973_v53  ;;  %vm2198_vm9 = vmor %vm1830_vm8, %vm6971_vm10  ;;  %v9665_v46 = vrot.slane %v6575_v2, 1  ;;  %v2686_v3 = vrot.slane %v7038_v45, 4  ;;  %vm9668_vm10 = vcmp.eq.f32.partialorder %v6397_v47, %v6371_v63  ;;  %3791 = vmatmul.f32.gmra.mxu2 %v3533_v32 }
 0x1ca   :  { %vm2199_vm11 = vmor %vm1831_vm14, %vm6988_vm7  ;;  %v7067_v16 = vsel %vm2198_vm9, 1.0, %v9640_v43  ;;  %v9672_v42 = vrot.slane %v6575_v2, 2  ;;  %vm9675_vm14 = vcmask 1044484   ;;  %vm1834_vm9 = vcmp.gt.f32.partialorder %v6376_v5, %v6371_v63 }
 0x1cb   :  { %9664 = vst [vmem:[#allocation9_spill] sm:$0xff] %v7067_v16  ;;  %vm7071_vm5 = vcmp.ne.s32.totalorder %v9665_v46, 0  ;;  %vm7081_vm0 = vmand %vm9668_vm10, %vm2076_vm6  ;;  %v7086_v26 = vsel %vm2199_vm11, 1.0, %v9640_v43  ;;  %v2694_v4 = vrot.slane %v7067_v16, 7  ;;  %v2977_v53 = vsel %vm9675_vm14, %v2976_v29, %v2975_v58 }
 0x1cc   :  { %9671 = vst [vmem:[#allocation11_spill] sm:$0xff] %v7086_v26  ;;  %vm7094_vm7 = vcmp.ne.s32.totalorder %v9672_v42, 0  ;;  %vm9676_vm6 = vmmov %vm9675_vm14  ;;  %vm9677_vm11 = vcmp.gt.f32.partialorder %v6663_v61, %v6371_v63  ;;  %v9680_v29 = vrot.slane %v6575_v2, 3  ;;  %v7130_v58 = vsel %vm6959_vm12, 1.0, %v9640_v43 }
 0x1cd   :  { %v2673_v60 = vsel %vm9676_vm6, %v2672_v6, %v6697_v25  ;;  %vm7108_vm10 = vmor %vm9677_vm11, %vm7025_vm13  ;;  %v2015_v6 = vrot.slane %v6898_v36, 6  ;;  %9685 = vst [vmem:[#allocation12_spill] sm:$0xff] %v7130_v58  ;;  %v2696_v32 = vrot.slane %v7086_v26, 6  ;;  %v9686_v42 = vrot.slane %v6575_v2, 4 }
 0x1ce   :  { %vm7116_vm14 = vcmp.ne.s32.totalorder %v9680_v29, 0  ;;  %vm7123_vm6 = vmor %vm1834_vm9, %vm7044_vm15  ;;  %v9687_v36 = vmov 0  ;;  %v2978_v21 = vrot.slane %v6928_v40, 3  ;;  %vm9689_vm15 = vcmask 1044484  }
 0x1cf   :  { %vm7137_vm11 = vcmp.ne.s32.totalorder %v9686_v42, 0  ;;  %v2656_v29 = vsel %vm9689_vm15, %v2654_v49, %v6759_v7  ;;  %vm9690_vm12 = vcmp.gt.f32.partialorder %v6397_v47, %v6371_v63  ;;  %vm9693_vm13 = vcmask 1041409  }
 0x1d0   :  { %v9688_v36 = vsel %vm7137_vm11, 4294967295, %v9687_v36  ;;  %vm7149_vm9 = vmor %vm9690_vm12, %vm7081_vm0  ;;  %v2695_v42 = vsel %vm9693_vm13, %v2694_v4, %v7130_v58  ;;  %v9694_v40 = vrot.slane %v6575_v2, 5  ;;  %v9697_v7 = vrot.slane %v6575_v2, 6 }
 0x1d1   :  { %v9698_v49 = vmov 0  ;;  %vm9700_vm0 = vcmask 1044484   ;;  %v7174_v4 = vsel %vm7004_vm3, 1.0, %v9640_v43  ;;  %vm9702_vm12 = vcmp.eq.f32.partialorder %v7049_v9, %v6369_v22 }
 0x1d2   :  { %vm7159_vm11 = vcmp.ne.s32.totalorder %v9694_v40, 0  ;;  %vm7165_vm15 = vcmp.ne.s32.totalorder %v9697_v7, 0  ;;  %v2687_v57 = vsel %vm9700_vm0, %v2686_v3, %v2685_v37  ;;  %9701 = vst [vmem:[#allocation13_spill] sm:$0xff] %v7174_v4  ;;  %vm7183_vm8 = vmand %vm9702_vm12, %vm6994_vm1  ;;  %v9703_v40 = vmov 0 }
 0x1d3   :  { %v9699_v49 = vsel %vm7165_vm15, 4294967295, %v9698_v49  ;;  %v9704_v40 = vsel %vm7183_vm8, 4294967295, %v9703_v40  ;;  %v9705_v7 = vrot.slane %v6575_v2, 7  ;;  %v9706_v37 = vmov 0 }
 0x1d4   :  { %vm9708_vm3 = vcmask 1045509   ;;  %v9709_v39 = vrot.slane %v6653_v8, 3  ;;  %vm9711_vm12 = vcmp.eq.f32.partialorder %v7049_v9, %v6379_v59  ;;  %vm1918_vm1 = vcmp.eq.f32.partialorder %v6379_v59, %v7049_v9 }
 0x1d5   :  { %vm7189_vm0 = vcmp.ne.s32.totalorder %v9705_v7, 0  ;;  %v7194_v0 = vsel %vm9708_vm3, %v2978_v21, %v2977_v53  ;;  %vm9710_vm13 = vmmov %vm9708_vm3  ;;  %vm2075_vm3 = vcmp.ne.s32.totalorder %v2015_v6, 0  ;;  %v9715_v53 = vrot.slane %v6498_v19, 3  ;;  %v7232_v6 = vpop.permute.xlu0 %1962 }
 0x1d6   :  { %v9707_v37 = vsel %vm7189_vm0, 4294967295, %v9706_v37  ;;  %v7200_v41 = vsel %vm9710_vm13, %v9709_v39, %v2673_v60  ;;  %vm7211_vm8 = vmand %vm9711_vm12, %vm7010_vm4  ;;  %vm9714_vm0 = vcmask 1042434   ;;  %vm9716_vm15 = vcmp.eq.f32.partialorder %v7049_v9, %v6401_v52 }
 0x1d7   :  { %v2697_v8 = vsel %vm9714_vm0, %v2696_v32, %v2695_v42  ;;  %v7219_v60 = vsel %vm9710_vm13, %v9715_v53, %v2656_v29  ;;  %vm7228_vm4 = vmand %vm9716_vm15, %vm7031_vm2  ;;  %v7237_v32 = vsel %vm7108_vm10, 1.0, %v9640_v43  ;;  %v2698_v21 = vrot.slane %v7174_v4, 5 }
 0x1d8   :  { %9719 = vst [vmem:[#allocation14_spill] sm:$0xff] %v7237_v32  ;;  %vm9720_vm0 = vmmov %vm9710_vm13  ;;  %vm9721_vm2 = vcmp.eq.f32.partialorder %v7049_v9, %v6371_v63  ;;  %v9722_v1 = vmov 0  ;;  %vm9724_vm10 = vcmp.eq.s32.totalorder %v6475_v15, 1  ;;  %vm1921_vm13 = vcmp.eq.f32.partialorder %v6663_v61, %v7049_v9 }
 0x1d9   :  { %v7241_v29 = vsel %vm9720_vm0, %v2688_v55, %v2687_v57  ;;  %vm7248_vm15 = vmand %vm9721_vm2, %vm2075_vm3  ;;  %vm9725_vm0 = vcmp.eq.f32.partialorder %v6369_v22, %v7049_v9  ;;  %vm9728_vm3 = vcmask 1043459   ;;  %v7284_v39 = vsel %vm7123_vm6, 1.0, %v9640_v43 }
 0x1da   :  { %v9723_v1 = vsel %vm7248_vm15, 4294967295, %v9722_v1  ;;  %vm7262_vm12 = vmand %vm9725_vm0, %vm9724_vm10  ;;  %v2699_v7 = vsel %vm9728_vm3, %v2698_v21, %v2697_v8  ;;  %vm9475_vm10 = vcmp.eq.s32.totalorder %v7232_v6, 1  ;;  %9731 = vst [vmem:[#allocation15_spill] sm:$0xff] %v7284_v39  ;;  %v2700_v8 = vrot.slane %v7237_v32, 4 }
 0x1db   :  { %vm7276_vm15 = vmand %vm1918_vm1, %vm7071_vm5  ;;  %vm9732_vm5 = vcmp.eq.f32.partialorder %v6401_v52, %v7049_v9  ;;  %v7303_v62 = vsel %vm7149_vm9, 1.0, %v9640_v43  ;;  %vm9739_vm9 = vcmask 1044484   ;;  %vm9740_vm6 = vnez %v9688_v36 }
 0x1dc   :  { %vm7296_vm1 = vmand %vm9732_vm5, %vm7094_vm7  ;;  %9735 = vst [vmem:[#allocation16_spill] sm:$0xff] %v7303_v62  ;;  %vm9736_vm7 = vcmp.eq.f32.partialorder %v6371_v63, %v7049_v9  ;;  %v2701_v31 = vsel %vm9739_vm9, %v2700_v8, %v2699_v7  ;;  %v7337_v53 = vsel %vm9475_vm10, 1, %v9540_v30  ;;  %v2702_v21 = vrot.slane %v7284_v39, 3  ;;  %v3534_v7 = vld [vmem:[%s9448_s3 + $0x210] sm:$0xff] }
 0x1dd   :  { %vm7316_vm5 = vmand %vm9736_vm7, %vm7116_vm14  ;;  %v9744_v36 = vmov 0  ;;  %vm9746_vm10 = vnez %v9699_v49  ;;  %vm9747_vm14 = vcmp.eq.f32.partialorder %v7049_v9, %v7049_v9  ;;  %vm9750_vm2 = vnez %v9707_v37  ;;  %3794 = vmatmul.f32.gmra.mxu2 %v3534_v7 }
 0x1de   :  { %vm7330_vm0 = vmand %vm1921_vm13, %vm9740_vm6  ;;  %vm9743_vm13 = vcmp.eq.f32.partialorder %v6376_v5, %v7049_v9  ;;  %vm9754_vm7 = vcmask 1045509   ;;  %vm9756_vm9 = vcmp.gt.f32.partialorder %v7049_v9, %v6369_v22  ;;  %v2017_v57 = vrot.slane %v7337_v53, 1 }
 0x1df   :  { %vm7351_vm6 = vmand %vm9743_vm13, %vm7159_vm11  ;;  %v2703_v49 = vsel %vm9754_vm7, %v2702_v21, %v2701_v31  ;;  %v2018_v42 = vrot.slane %v7337_v53, 2  ;;  %vm9758_vm7 = vcmp.gt.f32.partialorder %v7049_v9, %v6401_v52  ;;  %v2020_v37 = vrot.slane %v7337_v53, 4  ;;  %v7411_v21 = vpop.permute.xlu1 %1965 }
 0x1e0   :  { %v9745_v36 = vsel %vm7351_vm6, 4294967295, %v9744_v36  ;;  %vm7360_vm3 = vmand %vm9747_vm14, %vm9746_vm10  ;;  %vm9751_vm10 = vcmp.eq.f32.partialorder %v6397_v47, %v7049_v9  ;;  %vm9755_vm6 = vnez %v9704_v40  ;;  %v2019_v40 = vrot.slane %v7337_v53, 3 }
 0x1e1   :  { %vm7376_vm14 = vmand %vm9751_vm10, %vm9750_vm2  ;;  %vm9757_vm2 = vcmp.gt.f32.partialorder %v7049_v9, %v6379_v59  ;;  %v2021_v3 = vrot.slane %v7337_v53, 5  ;;  %v2022_v8 = vrot.slane %v7337_v53, 6  ;;  %v2023_v11 = vrot.slane %v7337_v53, 7 }
 0x1e2   :  { %vm2179_vm11 = vmor %vm9756_vm9, %vm9755_vm6  ;;  %vm9759_vm6 = vnez %v9723_v1  ;;  %v3507_v1 = vld [vmem:[%s9448_s3 + $0x138] sm:$0xff]  ;;  %v9770_v23 = vrot.slane %v6671_v24, 6  ;;  %vm7475_vm13 = vcmp.ne.s32.totalorder %v2019_v40, 0  ;;  %v9804_v35 = vrot.slane %v6543_v33, 1 }
 0x1e3   :  { %vm2187_vm10 = vmor %vm9757_vm2, %vm7211_vm8  ;;  %v7395_v31 = vsel %vm2179_vm11, 1.0, %v9640_v43  ;;  %vm9760_vm11 = vcmp.gt.f32.partialorder %v7049_v9, %v6371_v63  ;;  %3713 = vmatmul.f32.gmra.mxu1 %v3507_v1  ;;  %v9817_v7 = vrot.slane %v6978_v13, 1 }
 0x1e4   :  { %vm2195_vm9 = vmor %vm9758_vm7, %vm7228_vm4  ;;  %v4168_v2 = vsel %vm2187_vm10, 1.0, %v9640_v43  ;;  %v2660_v46 = vrot.slane %v7395_v31, 2  ;;  %vm9761_vm10 = vcmp.gt.f32.partialorder %v6369_v22, %v7049_v9  ;;  %vm9771_vm4 = vcmp.gt.f32.partialorder %v6401_v52, %v7049_v9 }
 0x1e5   :  { %vm2203_vm2 = vmor %vm9760_vm11, %vm9759_vm6  ;;  %v7419_v44 = vsel %vm2195_vm9, 1.0, %v9640_v43  ;;  %v2676_v4 = vrot.slane %v4168_v2, 2  ;;  %vm7443_vm6 = vcmp.ne.s32.totalorder %v2017_v57, 0  ;;  %vm7447_vm11 = vcmp.ne.s32.totalorder %v2018_v42, 0 }
 0x1e6   :  { %vm7434_vm7 = vmor %vm9761_vm10, %vm7262_vm12  ;;  %v7439_v32 = vsel %vm2203_vm2, 1.0, %v9640_v43  ;;  %vm9769_vm12 = vcmp.gt.f32.partialorder %v6379_v59, %v7049_v9  ;;  %v2531_v26 = vadd.f32 %v4168_v2, %v9770_v23  ;;  %v2690_v16 = vrot.slane %v7419_v44, 2 }
 0x1e7   :  { %9764 = vst [vmem:[#allocation17_spill] sm:$0xff] %v7439_v32  ;;  %vm2222_vm2 = vmor %vm9769_vm12, %vm7276_vm15  ;;  %v2704_v57 = vrot.slane %v7439_v32, 2  ;;  %vm7479_vm10 = vcmp.ne.s32.totalorder %v2020_v37, 0  ;;  %vm7483_vm9 = vcmp.ne.s32.totalorder %v2021_v3, 0  ;;  %v7499_v37 = vsel %vm7360_vm3, 1.0, %v9640_v43 }
 0x1e8   :  { %vm2223_vm8 = vmor %vm9771_vm4, %vm7296_vm1  ;;  %v7469_v42 = vsel %vm2222_vm2, 1.0, %v9640_v43  ;;  %vm9779_vm1 = vcmp.gt.f32.partialorder %v6371_v63, %v7049_v9  ;;  %9782 = vst [vmem:[#allocation19_spill] sm:$0xff] %v7499_v37  ;;  %vm9784_vm2 = vcmask 1046534   ;;  %vm9785_vm3 = vcmp.gt.f32.partialorder %v6663_v61, %v7049_v9 }
 0x1e9   :  { %9772 = vst [vmem:[#allocation18_spill] sm:$0xff] %v7469_v42  ;;  %vm7492_vm4 = vmor %vm9779_vm1, %vm7316_vm5  ;;  %v7502_v40 = vsel %vm2223_vm8, 1.0, %v9640_v43  ;;  %v2736_v3 = vrot.slane %v7469_v42, 7  ;;  %v2662_v20 = vsel %vm9784_vm2, %v2660_v46, %v7219_v60  ;;  %v7526_v60 = vsel %vm7434_vm7, 1.0, %v9640_v43 }
 0x1ea   :  { %9783 = vst [vmem:[#allocation20_spill] sm:$0xff] %v7502_v40  ;;  %vm7519_vm8 = vmor %vm9785_vm3, %vm7330_vm0  ;;  %v2738_v46 = vrot.slane %v7502_v40, 6  ;;  %vm9791_vm0 = vnez %v9745_v36  ;;  %vm9792_vm3 = vcmp.gt.f32.partialorder %v6376_v5, %v7049_v9  ;;  %vm9795_vm15 = vcmask 1041409  }
 0x1eb   :  { %9788 = vst [vmem:[#allocation21_spill] sm:$0xff] %v7526_v60  ;;  %vm9789_vm1 = vmmov %vm9784_vm2  ;;  %vm9790_vm2 = vcmp.eq.s32.totalorder %v7411_v21, 1 }
 0x1ec   :  { %v2677_v1 = vsel %vm9789_vm1, %v2676_v4, %v7200_v41  ;;  %v7534_v25 = vsel %vm9790_vm2, 1, %v9540_v30  ;;  %vm2226_vm5 = vmor %vm9792_vm3, %vm9791_vm0  ;;  %v2737_v41 = vsel %vm9795_vm15, %v2736_v3, %v7526_v60  ;;  %v2842_v4 = vmul.f32 %v2531_v26, %v7049_v9 }
 0x1ed   :  { %vm9793_vm7 = vmmov %vm9789_vm1  ;;  %vm7563_vm15 = vcmp.ne.s32.totalorder %v2022_v8, 0  ;;  %vm7567_vm0 = vcmp.ne.s32.totalorder %v2023_v11, 0  ;;  %v7580_v56 = vsel %vm2226_vm5, 1.0, %v9640_v43  ;;  %vm9808_vm3 = vcmp.eq.s32.totalorder %v7232_v6, 1 }
 0x1ee   :  { %v2691_v39 = vsel %vm9793_vm7, %v2690_v16, %v7241_v29  ;;  %vm9794_vm12 = vmmov %vm9789_vm1  ;;  %vm9796_vm1 = vcmp.gt.f32.partialorder %v6397_v47, %v7049_v9  ;;  %v7559_v16 = vsel %vm7492_vm4, 1.0, %v9640_v43  ;;  %9807 = vst [vmem:[#allocation24_spill] sm:$0xff] %v7580_v56  ;;  %vm9809_vm7 = vcmp.eq.f32.partialorder %v6369_v22, %v6663_v61 }
 0x1ef   :  { %v2705_v40 = vsel %vm9794_vm12, %v2704_v57, %v2703_v49  ;;  %vm7552_vm2 = vmor %vm9796_vm1, %vm7376_vm14  ;;  %9799 = vst [vmem:[#allocation22_spill] sm:$0xff] %v7559_v16  ;;  %vm1837_vm12 = vcmp.gt.f32.partialorder %v6369_v22, %v6663_v61  ;;  %vm9805_vm14 = vcmask 1047559   ;;  %v7577_v57 = vsel %vm7519_vm8, 1.0, %v9640_v43 }
 0x1f0   :  { %v2665_v49 = vsel %vm9805_vm14, %v9804_v35, %v2662_v20  ;;  %9806 = vst [vmem:[#allocation23_spill] sm:$0xff] %v7577_v57  ;;  %vm7590_vm1 = vmand %vm9809_vm7, %vm9808_vm3  ;;  %v9812_v3 = vrot.slane %v6668_v10, 1  ;;  %v9819_v10 = vrot.slane %v7303_v62, 1  ;;  %v7619_v53 = vsel %vm7552_vm2, 1.0, %v9640_v43 }
 0x1f1   :  { %vm9813_vm8 = vmmov %vm9805_vm14  ;;  %vm9814_vm14 = vcmp.eq.f32.partialorder %v6379_v59, %v6663_v61  ;;  %9822 = vst [vmem:[#allocation25_spill] sm:$0xff] %v7619_v53  ;;  %v2740_v8 = vrot.slane %v7559_v16, 5  ;;  %v2744_v36 = vrot.slane %v7580_v56, 3  ;;  %v2026_v23 = vrot.slane %v7534_v25, 3 }
 0x1f2   :  { %v2679_v20 = vsel %vm9813_vm8, %v9812_v3, %v2677_v1  ;;  %vm7604_vm4 = vmand %vm9814_vm14, %vm7443_vm6  ;;  %v2024_v3 = vrot.slane %v7534_v25, 1  ;;  %vm9830_vm6 = vcmask 1043459   ;;  %v2028_v16 = vrot.slane %v7534_v25, 5 }
 0x1f3   :  { %vm9818_vm3 = vmmov %vm9813_vm8  ;;  %vm9821_vm8 = vcmask 1042434   ;;  %v9837_v60 = vrot.slane %v7204_v27, 4  ;;  %v2029_v32 = vrot.slane %v7534_v25, 6  ;;  %v2030_v29 = vrot.slane %v7534_v25, 7 }
 0x1f4   :  { %v2693_v2 = vsel %vm9818_vm3, %v9817_v7, %v2691_v39  ;;  %vm9820_vm7 = vmmov %vm9818_vm3  ;;  %v2739_v35 = vsel %vm9821_vm8, %v2738_v46, %v2737_v41  ;;  %vm9823_vm3 = vcmp.eq.f32.partialorder %v6401_v52, %v6663_v61  ;;  %v2980_v46 = vrot.slane %v2842_v4, 2 }
 0x1f5   :  { %v2707_v1 = vsel %vm9820_vm7, %v9819_v10, %v2705_v40  ;;  %vm7631_vm7 = vmand %vm9823_vm3, %vm7447_vm11  ;;  %v2772_v39 = vrot.slane %v2665_v49, 4  ;;  %v2742_v41 = vrot.slane %v7577_v57, 4  ;;  %vm9826_vm8 = vcmp.eq.f32.partialorder %v6371_v63, %v6663_v61 }
 0x1f6   :  { %vm7644_vm14 = vmand %vm9826_vm8, %vm7475_vm13  ;;  %v2778_v7 = vrot.slane %v2679_v20, 4  ;;  %v2025_v4 = vrot.slane %v7534_v25, 2  ;;  %vm9829_vm11 = vcmp.eq.f32.partialorder %v6663_v61, %v6663_v61  ;;  %v2741_v10 = vsel %vm9830_vm6, %v2740_v8, %v2739_v35 }
 0x1f7   :  { %vm2145_vm3 = vmand %vm9829_vm11, %vm7479_vm10  ;;  %v2784_v56 = vrot.slane %v2693_v2, 4  ;;  %v2027_v57 = vrot.slane %v7534_v25, 4  ;;  %vm9831_vm8 = vcmp.eq.f32.partialorder %v6376_v5, %v6663_v61  ;;  %v2790_v35 = vrot.slane %v2707_v1, 4 }
 0x1f8   :  { %vm7665_vm2 = vmand %vm9831_vm8, %vm7483_vm9  ;;  %v7670_v8 = vsel %vm2145_vm3, 1.0, %v9640_v43  ;;  %vm9834_vm10 = vcmp.eq.f32.partialorder %v7049_v9, %v6663_v61  ;;  %vm9838_vm9 = vcmask 1046534   ;;  %vm9846_vm11 = vcmask 1044484  }
 0x1f9   :  { %vm7678_vm6 = vmand %vm9834_vm10, %vm7563_vm15  ;;  %v2553_v42 = vadd.f32 %v7670_v8, %v9837_v60  ;;  %v2981_v62 = vsel %vm9838_vm9, %v2980_v46, %v7194_v0  ;;  %vm9839_vm15 = vcmp.eq.f32.partialorder %v6397_v47, %v6663_v61  ;;  %vm7702_vm10 = vcmp.ne.s32.totalorder %v2024_v3, 0 }
 0x1fa   :  { %vm7696_vm3 = vmand %vm9839_vm15, %vm7567_vm0  ;;  %vm7706_vm9 = vcmp.ne.s32.totalorder %v2025_v4, 0  ;;  %v2743_v25 = vsel %vm9846_vm11, %v2742_v41, %v2741_v10  ;;  %v7711_v26 = vadd.f32 %v2772_v39, %v2665_v49  ;;  %v2714_v46 = vrot.slane %v7670_v8, 4 }
 0x1fb   :  { %vm2205_vm0 = vmor %vm1837_vm12, %vm7590_vm1  ;;  %vm7721_vm8 = vcmp.ne.s32.totalorder %v2026_v23, 0  ;;  %vm7725_vm13 = vcmp.ne.s32.totalorder %v2027_v57, 0  ;;  %v7729_v49 = vadd.f32 %v2778_v7, %v2679_v20  ;;  %vm9851_vm12 = vcmp.gt.f32.partialorder %v6379_v59, %v6663_v61 }
 0x1fc   :  { %vm2206_vm1 = vmor %vm9851_vm12, %vm7604_vm4  ;;  %v4186_v11 = vsel %vm2205_vm0, 1.0, %v9640_v43  ;;  %vm7739_vm15 = vcmp.ne.s32.totalorder %v2028_v16, 0  ;;  %v7743_v57 = vadd.f32 %v2784_v56, %v2693_v2  ;;  %v7745_v41 = vadd.f32 %v2790_v35, %v2707_v1 }
 0x1fd   :  { %v9854_v20 = vrot.slane %v6931_v14, 1  ;;  %vm9855_vm5 = vcmask 1047559   ;;  %vm9856_vm4 = vcmp.gt.f32.partialorder %v6401_v52, %v6663_v61  ;;  %v4187_v16 = vsel %vm2206_vm1, 1.0, %v9640_v43 }
 0x1fe   :  { %vm2207_vm0 = vmor %vm9856_vm4, %vm7631_vm7  ;;  %v2549_v7 = vadd.f32 %v4186_v11, %v7204_v27  ;;  %v7760_v56 = vmul.f32 %v2553_v42, %v6663_v61  ;;  %vm7764_vm11 = vcmp.ne.s32.totalorder %v2029_v32, 0  ;;  %vm9860_vm7 = vcmp.gt.f32.partialorder %v6371_v63, %v6663_v61 }
 0x1ff   :  { %v7750_v6 = vsel %vm9855_vm5, %v9854_v20, %v2981_v62  ;;  %vm9859_vm5 = vcmask 1045509   ;;  %vm2208_vm1 = vmor %vm9860_vm7, %vm7644_vm14  ;;  %v4188_v2 = vsel %vm2207_vm0, 1.0, %v9640_v43  ;;  %v9861_v42 = vrot.slane %v7204_v27, 1 }
 0x200   :  { %v7769_v62 = vsel %vm9859_vm5, %v2744_v36, %v2743_v25  ;;  %v2708_v40 = vrot.slane %v4187_v16, 7  ;;  %vm7781_vm12 = vcmp.ne.s32.totalorder %v2030_v29, 0  ;;  %v2774_v36 = vrot.slane %v7711_v26, 2 }
 0x201   :  { %v2550_v1 = vadd.f32 %v4187_v16, %v9861_v42  ;;  %vm9864_vm14 = vcmp.gt.f32.partialorder %v6376_v5, %v6663_v61  ;;  %v4189_v55 = vsel %vm2208_vm1, 1.0, %v9640_v43  ;;  %v9865_v10 = vrot.slane %v7204_v27, 2 }
 0x202   :  { %vm2210_vm5 = vmor %vm9864_vm14, %vm7665_vm2  ;;  %v2710_v8 = vrot.slane %v4188_v2, 6  ;;  %v2860_v35 = vmul.f32 %v2549_v7, %v6369_v22  ;;  %vm9866_vm7 = vcmp.gt.f32.partialorder %v7049_v9, %v6663_v61  ;;  %v9867_v29 = vrot.slane %v7204_v27, 3 }
 0x203   :  { %v2551_v23 = vadd.f32 %v4188_v2, %v9865_v10  ;;  %vm2211_vm4 = vmor %vm9866_vm7, %vm7678_vm6  ;;  %v4191_v24 = vsel %vm2210_vm5, 1.0, %v9640_v43  ;;  %vm9868_vm2 = vcmask 1041409   ;;  %v2712_v16 = vrot.slane %v4189_v55, 5 }
 0x204   :  { %v2552_v25 = vadd.f32 %v4189_v55, %v9867_v29  ;;  %v2709_v20 = vsel %vm9868_vm2, %v2708_v40, %v4186_v11  ;;  %vm1916_vm1 = vcmp.eq.f32.partialorder %v6397_v47, %v6376_v5  ;;  %vm9869_vm14 = vcmp.gt.f32.partialorder %v6397_v47, %v6663_v61 }
 0x205   :  { %vm2212_vm0 = vmor %vm9869_vm14, %vm7696_vm3  ;;  %v4192_v15 = vsel %vm2211_vm4, 1.0, %v9640_v43  ;;  %v9870_v7 = vrot.slane %v7204_v27, 5  ;;  %vm9871_vm6 = vcmask 1042434   ;;  %v2716_v10 = vrot.slane %v4191_v24, 3 }
 0x206   :  { %v2711_v42 = vsel %vm9871_vm6, %v2710_v8, %v2709_v20  ;;  %vm1845_vm5 = vcmp.gt.f32.partialorder %v6369_v22, %v6376_v5  ;;  %v4193_v11 = vsel %vm2212_vm0, 1.0, %v9640_v43  ;;  %v9872_v40 = vrot.slane %v7204_v27, 6 }
 0x207   :  { %v2554_v2 = vadd.f32 %v4191_v24, %v9870_v7  ;;  %vm9873_vm7 = vcmask 1043459   ;;  %v2718_v29 = vrot.slane %v4192_v15, 2  ;;  %vm9874_vm4 = vcmp.eq.s32.totalorder %v7411_v21, 1 }
 0x208   :  { %v2555_v58 = vadd.f32 %v4192_v15, %v9872_v40  ;;  %v2713_v55 = vsel %vm9873_vm7, %v2712_v16, %v2711_v42  ;;  %vm9875_vm2 = vcmp.eq.f32.partialorder %v6369_v22, %v6376_v5  ;;  %v9878_v24 = vrot.slane %v7204_v27, 7  ;;  %v3535_v27 = vld [vmem:[%s9448_s3 + $0x218] sm:$0xff] }
 0x209   :  { %vm7830_vm14 = vmand %vm9875_vm2, %vm9874_vm4  ;;  %vm9879_vm0 = vcmask 1044484   ;;  %v2720_v40 = vrot.slane %v4193_v11, 1  ;;  %v2861_v16 = vmul.f32 %v2550_v1, %v6379_v59  ;;  %vm9880_vm7 = vcmp.eq.f32.partialorder %v6379_v59, %v6376_v5  ;;  %3797 = vmatmul.f32.gmra.mxu2 %v3535_v27 }
 0x20a   :  { %v2556_v20 = vadd.f32 %v4193_v11, %v9878_v24  ;;  %v2715_v7 = vsel %vm9879_vm0, %v2714_v46, %v2713_v55  ;;  %vm7845_vm4 = vmand %vm9880_vm7, %vm7702_vm10  ;;  %vm9883_vm2 = vcmask 1045509   ;;  %v2862_v1 = vmul.f32 %v2551_v23, %v6401_v52 }
 0x20b   :  { %v2717_v46 = vsel %vm9883_vm2, %v2716_v10, %v2715_v7  ;;  %v2863_v15 = vmul.f32 %v2552_v25, %v6371_v63  ;;  %v2865_v42 = vmul.f32 %v2554_v2, %v6376_v5  ;;  %vm9884_vm10 = vcmp.eq.f32.partialorder %v6401_v52, %v6376_v5 }
 0x20c   :  { %vm7863_vm7 = vmand %vm9884_vm10, %vm7706_vm9  ;;  %vm9887_vm2 = vcmask 1046534   ;;  %v2866_v23 = vmul.f32 %v2555_v58, %v7049_v9  ;;  %v2867_v25 = vmul.f32 %v2556_v20, %v6397_v47  ;;  %v3012_v2 = vrot.slane %v2861_v16, 7 }
 0x20d   :  { %v2719_v10 = vsel %vm9887_vm2, %v2718_v29, %v2717_v46  ;;  %vm9888_vm6 = vcmp.eq.f32.partialorder %v6371_v63, %v6376_v5  ;;  %vm9891_vm10 = vcmask 1047559   ;;  %v3014_v55 = vrot.slane %v2862_v1, 6 }
 0x20e   :  { %vm7877_vm9 = vmand %vm9888_vm6, %vm7721_vm8  ;;  %v2721_v11 = vsel %vm9891_vm10, %v2720_v40, %v2719_v10  ;;  %v3018_v58 = vrot.slane %v7760_v56, 4  ;;  %vm9892_vm0 = vcmp.eq.f32.partialorder %v6663_v61, %v6376_v5  ;;  %v2780_v29 = vrot.slane %v7729_v49, 2 }
 0x20f   :  { %vm7890_vm3 = vmand %vm9892_vm0, %vm7725_vm13  ;;  %v2796_v24 = vrot.slane %v2721_v11, 4  ;;  %vm9895_vm8 = vcmask 1041409   ;;  %v3016_v7 = vrot.slane %v2863_v15, 5  ;;  %vm1852_vm6 = vcmp.gt.f32.partialorder %v6397_v47, %v6376_v5 }
 0x210   :  { %v3013_v20 = vsel %vm9895_vm8, %v3012_v2, %v2860_v35  ;;  %vm9896_vm10 = vcmp.eq.f32.partialorder %v6376_v5, %v6376_v5  ;;  %v2786_v4 = vrot.slane %v7743_v57, 2  ;;  %vm9897_vm13 = vcmask 1042434  }
 0x211   :  { %vm2154_vm2 = vmand %vm9896_vm10, %vm7739_vm15  ;;  %v3015_v56 = vsel %vm9897_vm13, %v3014_v55, %v3013_v20  ;;  %v3020_v40 = vrot.slane %v2865_v42, 3  ;;  %vm9898_vm0 = vcmp.eq.f32.partialorder %v7049_v9, %v6376_v5  ;;  %v2792_v16 = vrot.slane %v7745_v41, 2 }
 0x212   :  { %vm7910_vm8 = vmand %vm9898_vm0, %vm7764_vm11  ;;  %v7915_v39 = vsel %vm2154_vm2, 1.0, %v9640_v43  ;;  %v2797_v27 = vadd.f32 %v2796_v24, %v2721_v11  ;;  %vm9901_vm15 = vcmask 1043459   ;;  %v3022_v1 = vrot.slane %v2866_v23, 2  ;;  %v3536_v24 = vld [vmem:[%s9448_s3 + $0x220] sm:$0xff] }
 0x213   :  { %v3017_v46 = vsel %vm9901_vm15, %v3016_v7, %v3015_v56  ;;  %v3024_v15 = vrot.slane %v2867_v25, 1  ;;  %vm7924_vm10 = vmand %vm1916_vm1, %vm7781_vm12  ;;  %vm9904_vm11 = vcmask 1044484   ;;  %v2730_v32 = vrot.slane %v7915_v39, 3  ;;  %3800 = vmatmul.f32.gmra.mxu2 %v3536_v24 }
 0x214   :  { %v3019_v42 = vsel %vm9904_vm11, %v3018_v58, %v3017_v46  ;;  %vm7934_vm2 = vmor %vm1845_vm5, %vm7830_vm14  ;;  %v3082_v23 = vrot.slane %v7750_v6, 4  ;;  %v9907_v25 = vrot.slane %v7499_v37, 2  ;;  %vm9908_vm12 = vcmask 1046534  }
 0x215   :  { %v2798_v11 = vrot.slane %v2797_v27, 2  ;;  %vm9909_vm1 = vcmask 1045509   ;;  %vm9910_vm5 = vcmp.gt.f32.partialorder %v6379_v59, %v6376_v5  ;;  %v2775_v8 = vadd.f32 %v2774_v36, %v7711_v26  ;;  %vm9911_vm13 = vmmov %vm9908_vm12 }
 0x216   :  { %v2747_v2 = vsel %vm9908_vm12, %v9907_v25, %v7769_v62  ;;  %v3021_v55 = vsel %vm9909_vm1, %v3020_v40, %v3019_v42  ;;  %vm2214_vm14 = vmor %vm9910_vm5, %vm7845_vm4  ;;  %v2781_v58 = vadd.f32 %v2780_v29, %v7729_v49  ;;  %vm9912_vm0 = vcmp.gt.f32.partialorder %v6401_v52, %v6376_v5 }
 0x217   :  { %v3023_v62 = vsel %vm9911_vm13, %v3022_v1, %v3021_v55  ;;  %vm2215_vm15 = vmor %vm9912_vm0, %vm7863_vm7  ;;  %v7964_v21 = vsel %vm2214_vm14, 1.0, %v9640_v43  ;;  %v2787_v20 = vadd.f32 %v2786_v4, %v7743_v57  ;;  %v2793_v26 = vadd.f32 %v2792_v16, %v7745_v41 }
 0x218   :  { %v2799_v49 = vadd.f32 %v2798_v11, %v2797_v27  ;;  %vm9913_vm4 = vcmask 1047559   ;;  %vm9914_vm11 = vcmp.gt.f32.partialorder %v6371_v63, %v6376_v5  ;;  %v7975_v0 = vsel %vm2215_vm15, 1.0, %v9640_v43 }
 0x219   :  { %v3025_v36 = vsel %vm9913_vm4, %v3024_v15, %v3023_v62  ;;  %vm2216_vm12 = vmor %vm9914_vm11, %vm7877_vm9  ;;  %v2722_v29 = vrot.slane %v7964_v21, 7  ;;  %vm9915_vm7 = vcmp.gt.f32.partialorder %v6663_v61, %v6376_v5  ;;  %v7986_v57 = vsel %vm7934_vm2, 1.0, %v9640_v43 }
 0x21a   :  { %v3100_v7 = vrot.slane %v3025_v36, 4  ;;  %vm2217_vm1 = vmor %vm9915_vm7, %vm7890_vm3  ;;  %v7989_v41 = vsel %vm2216_vm12, 1.0, %v9640_v43  ;;  %v2724_v60 = vrot.slane %v7975_v0, 6  ;;  %v2800_v4 = vrot.slane %v2799_v49, 1 }
 0x21b   :  { %vm9916_vm9 = vcmp.gt.f32.partialorder %v7049_v9, %v6376_v5  ;;  %v7998_v3 = vsel %vm2217_vm1, 1.0, %v9640_v43  ;;  %vm9917_vm3 = vcmask 1041409   ;;  %v2726_v40 = vrot.slane %v7989_v41, 5  ;;  %vm2220_vm2 = vmor %vm1852_vm6, %vm7924_vm10 }
 0x21c   :  { %vm2219_vm5 = vmor %vm9916_vm9, %vm7910_vm8  ;;  %v2723_v56 = vsel %vm9917_vm3, %v2722_v29, %v7986_v57  ;;  %vm9919_vm14 = vcmask 1042434   ;;  %v2728_v27 = vrot.slane %v7998_v3, 4  ;;  %v3083_v46 = vadd.f32 %v3082_v23, %v7750_v6  ;;  %v3508_v6 = vld [vmem:[%s9448_s3 + $0x140] sm:$0xff]  ;;  %v3537_v23 = vld [vmem:[%s9448_s3 + $0x228] sm:$0xff] }
 0x21d   :  { %v8009_v35 = vsel %vm2219_vm5, 1.0, %v9640_v43  ;;  %v2725_v16 = vsel %vm9919_vm14, %v2724_v60, %v2723_v56  ;;  %v3101_v1 = vadd.f32 %v3100_v7, %v3025_v36  ;;  %v8015_v15 = vsel %vm2220_vm2, 1.0, %v9640_v43  ;;  %v8029_v36 = vpop.permute.xlu2 %2395  ;;  %vm9926_vm0 = vmmov %vm9913_vm4  ;;  %3716 = vmatmul.f32.gmra.mxu1 %v3508_v6  ;;  %3803 = vmatmul.f32.gmra.mxu2 %v3537_v23 }
 0x21e   :  { %9918 = vst [vmem:[#allocation26_spill] sm:$0xff] %v8009_v35  ;;  %vm9921_vm8 = vcmask 1043459   ;;  %v2776_v14 = vrot.slane %v2775_v8, 1  ;;  %v2801_v10 = vadd.f32 %v2800_v4, %v2799_v49  ;;  %vm9922_vm13 = vcmask 1044484   ;;  %vm9927_vm15 = vmmov %vm9926_vm0 }
 0x21f   :  { %9920 = vst [vmem:[#allocation27_spill] sm:$0xff] %v8015_v15  ;;  %v2727_v42 = vsel %vm9921_vm8, %v2726_v40, %v2725_v16  ;;  %v2732_v11 = vrot.slane %v8009_v35, 2  ;;  %v2782_v55 = vrot.slane %v2781_v58, 1  ;;  %vm9923_vm6 = vcmask 1045509  }
 0x220   :  { %v2729_v25 = vsel %vm9922_vm13, %v2728_v27, %v2727_v42  ;;  %v2734_v62 = vrot.slane %v8015_v15, 1  ;;  %v2788_v29 = vrot.slane %v2787_v20, 1  ;;  %v2794_v60 = vrot.slane %v2793_v26, 1 }
 0x221   :  { %v2731_v24 = vsel %vm9923_vm6, %v2730_v32, %v2729_v25  ;;  %vm9924_vm10 = vcmask 1046534   ;;  %v9925_v7 = vrot.slane %v7619_v53, 1  ;;  %v3084_v4 = vrot.slane %v3083_v46, 2 }
 0x222   :  { %v2733_v49 = vsel %vm9924_vm10, %v2732_v11, %v2731_v24  ;;  %v3102_v56 = vrot.slane %v3101_v1, 2  ;;  %v8035_v16 = vadd.f32 1.0, %v2801_v10  ;;  %v2777_v42 = vadd.f32 %v2776_v14, %v2775_v8 }
 0x223   :  { %v2749_v32 = vsel %vm9926_vm0, %v9925_v7, %v2747_v2  ;;  %v2735_v40 = vsel %vm9927_vm15, %v2734_v62, %v2733_v49  ;;  %v2783_v25 = vadd.f32 %v2782_v55, %v2781_v58  ;;  %v2789_v11 = vadd.f32 %v2788_v29, %v2787_v20  ;;  %v1972_v58 = vpop.permute.xlu0 %1971  ;;  %v3538_v29 = vld [vmem:[%s9448_s3 + $0x230] sm:$0xff] }
 0x224   :  { %9928 = vst [vmem:[#allocation28_spill] sm:$0xff] %v8035_v16  ;;  %v2802_v27 = vrot.slane %v2735_v40, 4  ;;  %v2795_v24 = vadd.f32 %v2794_v60, %v2793_v26  ;;  %v2808_v15 = vrot.slane %v2749_v32, 4  ;;  %v8040_v6 = vadd.f32 %v3084_v4, %v3083_v46 }
 0x225   :  { %v8042_v7 = vadd.f32 %v3102_v56, %v3101_v1  ;;  %4442 = vrcp.f32 %v8035_v16  ;;  %v8048_v26 = vadd.f32 1.0, %v2777_v42  ;;  %v8050_v14 = vadd.f32 1.0, %v2783_v25  ;;  %3806 = vmatmul.f32.gmra.mxu2 %v3538_v29 }
 0x226   :  { %v2803_v35 = vadd.f32 %v2802_v27, %v2735_v40  ;;  %v8052_v55 = vadd.f32 %v2808_v15, %v2749_v32  ;;  %v8054_v46 = vadd.f32 1.0, %v2789_v11  ;;  %v8056_v1 = vadd.f32 1.0, %v2795_v24 }
 0x227   :  { %vm1861_vm4 = vcmp.gt.f32.partialorder %v6369_v22, %v6397_v47  ;;  %vm1925_vm11 = vcmp.eq.f32.partialorder %v6369_v22, %v6397_v47  ;;  %vm1980_vm12 = vcmp.eq.s32.totalorder %v1972_v58, 1  ;;  %vm1926_vm7 = vcmp.eq.f32.partialorder %v6379_v59, %v6397_v47 }
 0x228   :  { %v2804_v20 = vrot.slane %v2803_v35, 2  ;;  %9929 = vst [vmem:[#allocation29_spill] sm:$0xff] %v8056_v1  ;;  %vm1927_vm1 = vcmp.eq.f32.partialorder %v6401_v52, %v6397_v47  ;;  %vm1928_vm9 = vcmp.eq.f32.partialorder %v6371_v63, %v6397_v47  ;;  %v1988_v15 = vsel %vm1980_vm12, 1, %v9540_v30  ;;  %vm2165_vm5 = vmand %vm1925_vm11, %vm1980_vm12  ;;  %v2368_v30 = vpop.permute.xlu1 %2367 }
 0x229   :  { %v2038_v49 = vrot.slane %v1988_v15, 1  ;;  %v2039_v32 = vrot.slane %v1988_v15, 2  ;;  %v2040_v4 = vrot.slane %v1988_v15, 3  ;;  %vm1862_vm3 = vcmp.gt.f32.partialorder %v6379_v59, %v6397_v47  ;;  %vm8078_vm2 = vmor %vm1861_vm4, %vm2165_vm5 }
 0x22a   :  { %v2805_v60 = vadd.f32 %v2804_v20, %v2803_v35  ;;  %v2041_v56 = vrot.slane %v1988_v15, 4  ;;  %v2042_v40 = vrot.slane %v1988_v15, 5  ;;  %v2043_v27 = vrot.slane %v1988_v15, 6 }
 0x22b   :  { %v2044_v42 = vrot.slane %v1988_v15, 7  ;;  %v8082_v11 = vpop.eup %4442  ;;  %vm2102_vm8 = vcmp.ne.s32.totalorder %v2038_v49, 0  ;;  %vm2103_vm13 = vcmp.ne.s32.totalorder %v2039_v32, 0  ;;  %vm8086_vm6 = vcmp.ne.s32.totalorder %v2040_v4, 0 }
 0x22c   :  { %v2806_v35 = vrot.slane %v2805_v60, 1  ;;  %9932 = vst [vmem:[#allocation30_spill] sm:$0xff] %v8082_v11  ;;  %vm1929_vm0 = vcmp.eq.f32.partialorder %v6663_v61, %v6397_v47  ;;  %vm1930_vm15 = vcmp.eq.f32.partialorder %v6376_v5, %v6397_v47  ;;  %vm1931_vm4 = vcmp.eq.f32.partialorder %v7049_v9, %v6397_v47  ;;  %vm8105_vm12 = vmand %vm1926_vm7, %vm2102_vm8 }
 0x22d   :  { %vm8098_vm11 = vcmp.ne.s32.totalorder %v2041_v56, 0  ;;  %vm8113_vm10 = vcmp.ne.s32.totalorder %v2042_v40, 0  ;;  %vm8120_vm14 = vmand %vm1927_vm1, %vm2103_vm13  ;;  %v4210_v49 = vsel %vm8078_vm2, 1.0, %v9640_v43  ;;  %v2397_v32 = vrot.slane %v2368_v30, 1 }
 0x22e   :  { %v2807_v24 = vadd.f32 %v2806_v35, %v2805_v60  ;;  %vm1866_vm7 = vcmp.gt.f32.partialorder %v6376_v5, %v6397_v47  ;;  %vm8129_vm8 = vcmp.ne.s32.totalorder %v2043_v27, 0  ;;  %vm8133_vm5 = vcmp.ne.s32.totalorder %v2044_v42, 0  ;;  %vm8142_vm1 = vmand %vm1928_vm9, %vm8086_vm6  ;;  %v3539_v27 = vld [vmem:[%s9448_s3 + $0x238] sm:$0xff] }
 0x22f   :  { %v2573_v25 = vadd.f32 %v4210_v49, %v8029_v36  ;;  %4444 = vrcp.f32 %v8048_v26  ;;  %vm8156_vm2 = vmand %vm1929_vm0, %vm8098_vm11  ;;  %v2399_v58 = vrot.slane %v2368_v30, 3  ;;  %v2400_v23 = vrot.slane %v2368_v30, 4  ;;  %3809 = vmatmul.f32.gmra.mxu2 %v3539_v27 }
 0x230   :  { %v8109_v60 = vadd.f32 1.0, %v2807_v24  ;;  %4446 = vrcp.f32 %v8050_v14  ;;  %v2398_v24 = vrot.slane %v2368_v30, 2  ;;  %vm8166_vm9 = vmand %vm1930_vm15, %vm8113_vm10  ;;  %v2401_v20 = vrot.slane %v2368_v30, 5 }
 0x231   :  { %4448 = vrcp.f32 %v8054_v46  ;;  %v2402_v8 = vrot.slane %v2368_v30, 6  ;;  %v2403_v10 = vrot.slane %v2368_v30, 7  ;;  %vm1867_vm13 = vcmp.gt.f32.partialorder %v7049_v9, %v6397_v47  ;;  %vm8181_vm10 = vmand %vm1931_vm4, %vm8129_vm8 }
 0x232   :  { %9939 = vst [vmem:[#allocation31_spill] sm:$0xff] %v8109_v60  ;;  %4450 = vrcp.f32 %v8109_v60  ;;  %vm1932_vm6 = vcmp.eq.f32.partialorder %v6397_v47, %v6397_v47  ;;  %v2518_v2 = vadd.f32 %v6447_v51, %v2397_v32  ;;  %v2446_v53 = vrot.slane %v8029_v36, 1  ;;  %vm2230_vm15 = vmor %vm1862_vm3, %vm8105_vm12 }
 0x233   :  { %vm8188_vm0 = vmand %vm1932_vm6, %vm8133_vm5  ;;  %v8194_v37 = vmul.f32 %v2573_v25, %v6369_v22  ;;  %4452 = vrcp.f32 %v8056_v1  ;;  %v2517_v51 = vadd.f32 %v6463_v48, %v2368_v30  ;;  %v2519_v32 = vadd.f32 %v6647_v54, %v2398_v24 }
 0x234   :  { %v2520_v56 = vadd.f32 %v6480_v18, %v2399_v58  ;;  %v2521_v11 = vadd.f32 %v7019_v50, %v2400_v23  ;;  %vm9958_vm4 = vcmp.gt.f32.partialorder %v6401_v52, %v6397_v47  ;;  %v4211_v29 = vsel %vm2230_vm15, 1.0, %v9640_v43  ;;  %v3509_v50 = vld [vmem:[%s9448_s3 + $0x148] sm:$0xff]  ;;  %vm2234_vm8 = vmor %vm1866_vm7, %vm8166_vm9 }
 0x235   :  { %v8207_v25 = vpop.eup %4444  ;;  %vm2231_vm11 = vmor %vm9958_vm4, %vm8120_vm14  ;;  %v2522_v4 = vadd.f32 %v6498_v19, %v2401_v20  ;;  %v8217_v48 = vadd.f32 %v7395_v31, %v2402_v8  ;;  %v8220_v54 = vadd.f32 %v6543_v33, %v2403_v10  ;;  %vm9959_vm3 = vcmp.gt.f32.partialorder %v6371_v63, %v6397_v47  ;;  %3719 = vmatmul.f32.gmra.mxu1 %v3509_v50 }
 0x236   :  { %v8225_v18 = vpop.eup %4446  ;;  %vm2232_vm14 = vmor %vm9959_vm3, %vm8142_vm1  ;;  %v4212_v19 = vsel %vm2231_vm11, 1.0, %v9640_v43  ;;  %v4217_v31 = vsel %vm8188_vm0, 1.0, %v9640_v43  ;;  %v2750_v33 = vrot.slane %v4211_v29, 7  ;;  %v8237_v10 = vmul.f32 %v2518_v2, %v6379_v59  ;;  %v3540_v2 = vld [vmem:[%s9448_s3 + $0x240] sm:$0xff] }
 0x237   :  { %v8239_v8 = vpop.eup %4448  ;;  %vm9961_vm12 = vcmp.gt.f32.partialorder %v6663_v61, %v6397_v47  ;;  %v4213_v23 = vsel %vm2232_vm14, 1.0, %v9640_v43  ;;  %v2574_v30 = vadd.f32 %v4211_v29, %v2446_v53  ;;  %v9962_v35 = vrot.slane %v8029_v36, 2  ;;  %3812 = vmatmul.f32.gmra.mxu2 %v3540_v2 }
 0x238   :  { %9960 = vst [vmem:[#allocation32_spill] sm:$0xff] %v8239_v8  ;;  %vm2233_vm5 = vmor %vm9961_vm12, %vm8156_vm2  ;;  %v2752_v24 = vrot.slane %v4212_v19, 6  ;;  %v8252_v58 = vpop.eup %4450  ;;  %v9964_v53 = vrot.slane %v8029_v36, 3  ;;  %vm9965_vm1 = vcmask 1041409   ;;  %v2754_v29 = vrot.slane %v4213_v23, 5 }
 0x239   :  { %v2575_v40 = vadd.f32 %v4212_v19, %v9962_v35  ;;  %9963 = vst [vmem:[#allocation33_spill] sm:$0xff] %v8252_v58  ;;  %v4214_v42 = vsel %vm2233_vm5, 1.0, %v9640_v43  ;;  %v2751_v27 = vsel %vm9965_vm1, %v2750_v33, %v4210_v49  ;;  %v8263_v50 = vpop.eup %4452  ;;  %vm2235_vm2 = vmor %vm1867_vm13, %vm8181_vm10  ;;  %v4215_v62 = vsel %vm2234_vm8, 1.0, %v9640_v43 }
 0x23a   :  { %v2576_v20 = vadd.f32 %v4213_v23, %v9964_v53  ;;  %9966 = vst [vmem:[#allocation34_spill] sm:$0xff] %v8263_v50  ;;  %v9967_v19 = vrot.slane %v8029_v36, 4  ;;  %vm9968_vm7 = vcmask 1042434   ;;  %v2756_v8 = vrot.slane %v4214_v42, 4  ;;  %vm9977_vm15 = vmmov %vm9965_vm1 }
 0x23b   :  { %v2753_v58 = vsel %vm9968_vm7, %v2752_v24, %v2751_v27  ;;  %v4216_v49 = vsel %vm2235_vm2, 1.0, %v9640_v43  ;;  %v9969_v33 = vrot.slane %v8029_v36, 5  ;;  %vm9970_vm9 = vcmask 1043459   ;;  %vm9978_vm4 = vmmov %vm9968_vm7 }
 0x23c   :  { %v2577_v35 = vadd.f32 %v4214_v42, %v9967_v19  ;;  %v2755_v15 = vsel %vm9970_vm9, %v2754_v29, %v2753_v58  ;;  %v2758_v53 = vrot.slane %v4215_v62, 3  ;;  %v9971_v50 = vrot.slane %v8029_v36, 7  ;;  %vm9979_vm11 = vmmov %vm9965_vm1 }
 0x23d   :  { %v2578_v23 = vadd.f32 %v4215_v62, %v9969_v33  ;;  %vm9972_vm13 = vcmask 1044484   ;;  %v2760_v1 = vrot.slane %v4216_v49, 2  ;;  %v2885_v19 = vmul.f32 %v2574_v30, %v6379_v59  ;;  %vm9980_vm3 = vmmov %vm9970_vm9 }
 0x23e   :  { %v2580_v60 = vadd.f32 %v4217_v31, %v9971_v50  ;;  %v2757_v16 = vsel %vm9972_vm13, %v2756_v8, %v2755_v15  ;;  %v9973_v24 = vrot.slane %v8029_v36, 6  ;;  %vm9974_vm6 = vcmask 1045509   ;;  %v2376_v15 = vpop.permute.xlu0 %2375  ;;  %vm9981_vm14 = vmmov %vm9978_vm4 }
 0x23f   :  { %v2759_v2 = vsel %vm9974_vm6, %v2758_v53, %v2757_v16  ;;  %v2762_v27 = vrot.slane %v4217_v31, 1  ;;  %v2886_v43 = vmul.f32 %v2575_v40, %v6401_v52  ;;  %vm9975_vm10 = vcmask 1046534   ;;  %vm9982_vm12 = vmmov %vm9980_vm3 }
 0x240   :  { %v2579_v42 = vadd.f32 %v4216_v49, %v9973_v24  ;;  %v2761_v33 = vsel %vm9975_vm10, %v2760_v1, %v2759_v2  ;;  %v2887_v58 = vmul.f32 %v2576_v20, %v6371_v63  ;;  %v3054_v29 = vrot.slane %v2885_v19, 7  ;;  %vm9983_vm5 = vmmov %vm9972_vm13 }
 0x241   :  { %v2830_v50 = vmul.f32 %v2519_v32, %v6401_v52  ;;  %vm9976_vm0 = vcmask 1047559   ;;  %v2888_v62 = vmul.f32 %v2577_v35, %v6663_v61  ;;  %v8292_v30 = vmul.f32 %v2578_v23, %v6376_v5  ;;  %v3541_v32 = vld [vmem:[%s9448_s3 + $0x248] sm:$0xff]  ;;  %vm9984_vm8 = vmmov %vm9974_vm6 }
 0x242   :  { %v2763_v8 = vsel %vm9976_vm0, %v2762_v27, %v2761_v33  ;;  %v3056_v36 = vrot.slane %v2886_v43, 6  ;;  %v3055_v16 = vsel %vm9977_vm15, %v3054_v29, %v8194_v37  ;;  %v2828_v31 = vmul.f32 %v2517_v51, %v6369_v22  ;;  %3815 = vmatmul.f32.gmra.mxu2 %v3541_v32  ;;  %v3542_v32 = vld [vmem:[%s9448_s3 + $0x250] sm:$0xff]  ;;  %vm9985_vm1 = vmmov %vm9983_vm5 }
 0x243   :  { %v2814_v49 = vrot.slane %v2763_v8, 4  ;;  %v2831_v1 = vmul.f32 %v2520_v56, %v6371_v63  ;;  %v8302_v40 = vmul.f32 %v2579_v42, %v7049_v9  ;;  %v8305_v20 = vmul.f32 %v2580_v60, %v6397_v47  ;;  %vm9986_vm2 = vmmov %vm9975_vm10 }
 0x244   :  { %v2832_v43 = vmul.f32 %v2521_v11, %v6663_v61  ;;  %v2833_v35 = vmul.f32 %v2522_v4, %v6376_v5  ;;  %v3057_v37 = vsel %vm9978_vm4, %v3056_v36, %v3055_v16  ;;  %v2956_v51 = vrot.slane %v8237_v10, 7  ;;  %vm9988_vm7 = vmmov %vm9976_vm0 }
 0x245   :  { %v2815_v23 = vadd.f32 %v2814_v49, %v2763_v8  ;;  %v2958_v56 = vrot.slane %v2830_v50, 6  ;;  %v3058_v53 = vrot.slane %v2887_v58, 5  ;;  %v3060_v19 = vrot.slane %v2888_v62, 4  ;;  %vm9989_vm9 = vmmov %vm9974_vm6 }
 0x246   :  { %v3062_v24 = vrot.slane %v8292_v30, 3  ;;  %v2834_v60 = vmul.f32 %v8217_v48, %v7049_v9  ;;  %v2835_v11 = vmul.f32 %v8220_v54, %v6397_v47  ;;  %v2957_v4 = vsel %vm9979_vm11, %v2956_v51, %v2828_v31  ;;  %vm9990_vm13 = vmmov %vm9979_vm11 }
 0x247   :  { %v2816_v42 = vrot.slane %v2815_v23, 2  ;;  %v2960_v2 = vrot.slane %v2831_v1, 5  ;;  %v3059_v27 = vsel %vm9980_vm3, %v3058_v53, %v3057_v37  ;;  %v2959_v10 = vsel %vm9981_vm14, %v2958_v56, %v2957_v4  ;;  %v3510_v4 = vld [vmem:[%s9448_s3 + $0x150] sm:$0xff]  ;;  %vm9991_vm6 = vmmov %vm9978_vm4 }
 0x248   :  { %v2962_v33 = vrot.slane %v2832_v43, 4  ;;  %v2411_v29 = vrot.slane %v2376_v15, 1  ;;  %v2964_v50 = vrot.slane %v2833_v35, 3  ;;  %v2412_v8 = vrot.slane %v2376_v15, 2  ;;  %3722 = vmatmul.f32.gmra.mxu1 %v3510_v4  ;;  %vm9992_vm10 = vmmov %vm9980_vm3 }
 0x249   :  { %v2961_v58 = vsel %vm9982_vm12, %v2960_v2, %v2959_v10  ;;  %v2413_v62 = vrot.slane %v2376_v15, 3  ;;  %v2966_v30 = vrot.slane %v2834_v60, 2  ;;  %v2414_v36 = vrot.slane %v2376_v15, 4  ;;  %vm9993_vm0 = vmmov %vm9985_vm1 }
 0x24a   :  { %v2963_v48 = vsel %vm9983_vm5, %v2962_v33, %v2961_v58  ;;  %v2415_v49 = vrot.slane %v2376_v15, 5  ;;  %v2817_v54 = vadd.f32 %v2816_v42, %v2815_v23  ;;  %v2416_v31 = vrot.slane %v2376_v15, 6  ;;  %3818 = vmatmul.f32.gmra.mxu2 %v3542_v32  ;;  %v2380_v58 = vpop.permute.xlu1 %2379  ;;  %vm9996_vm15 = vmmov %vm9984_vm8 }
 0x24b   :  { %v2965_v16 = vsel %vm9984_vm8, %v2964_v50, %v2963_v48  ;;  %v2417_v1 = vrot.slane %v2376_v15, 7  ;;  %v3061_v43 = vsel %vm9985_vm1, %v3060_v19, %v3059_v27  ;;  %v3064_v35 = vrot.slane %v8302_v40, 2  ;;  %vm10000_vm4 = vmmov %vm9986_vm2 }
 0x24c   :  { %v2968_v37 = vrot.slane %v2835_v11, 1  ;;  %v2534_v51 = vadd.f32 %v6831_v34, %v2411_v29  ;;  %v2967_v56 = vsel %vm9986_vm2, %v2966_v30, %v2965_v16  ;;  %v9987_v23 = vrot.slane %v8052_v55, 2  ;;  %vm10004_vm11 = vmmov %vm9988_vm7 }
 0x24d   :  { %v2535_v60 = vadd.f32 %v6793_v38, %v2412_v8  ;;  %v2536_v42 = vadd.f32 %v6872_v12, %v2413_v62  ;;  %v2533_v19 = vadd.f32 %v6787_v17, %v2376_v15  ;;  %v2537_v11 = vadd.f32 %v7038_v45, %v2414_v36  ;;  %vm10005_vm3 = vmmov %vm9990_vm13 }
 0x24e   :  { %v2811_v53 = vadd.f32 %v9987_v23, %v8052_v55  ;;  %v2538_v34 = vadd.f32 %v6913_v28, %v2415_v49  ;;  %v2539_v2 = vadd.f32 %v7419_v44, %v2416_v31  ;;  %v2818_v27 = vrot.slane %v2817_v54, 1  ;;  %vm10006_vm14 = vmmov %vm9991_vm6 }
 0x24f   :  { %v3066_v55 = vrot.slane %v8305_v20, 1  ;;  %v2540_v38 = vadd.f32 %v6978_v13, %v2417_v1  ;;  %v2845_v12 = vmul.f32 %v2534_v51, %v6379_v59  ;;  %v2969_v10 = vsel %vm9988_vm7, %v2968_v37, %v2967_v56  ;;  %vm10007_vm12 = vmmov %vm9992_vm10 }
 0x250   :  { %v2846_v33 = vmul.f32 %v2535_v60, %v6401_v52  ;;  %v2847_v17 = vmul.f32 %v2536_v42, %v6371_v63  ;;  %v2848_v45 = vmul.f32 %v2537_v11, %v6663_v61  ;;  %v8349_v28 = vsel %vm9989_vm9, %v3062_v24, %v3061_v43  ;;  %v3543_v24 = vld [vmem:[%s9448_s3 + $0x258] sm:$0xff]  ;;  %vm10008_vm5 = vmmov %vm9993_vm0 }
 0x251   :  { %v2812_v44 = vrot.slane %v2811_v53, 1  ;;  %v2849_v15 = vmul.f32 %v2538_v34, %v6376_v5  ;;  %v2850_v29 = vmul.f32 %v2539_v2, %v7049_v9  ;;  %v2844_v13 = vmul.f32 %v2533_v19, %v6369_v22  ;;  %v9994_v34 = vld [vmem:[#allocation12_spill] sm:$0xff]  ;;  %vm10009_vm1 = vmmov %vm9986_vm2 }
 0x252   :  { %v2851_v50 = vmul.f32 %v2540_v38, %v6397_v47  ;;  %v2984_v8 = vrot.slane %v2845_v12, 7  ;;  %v2986_v62 = vrot.slane %v2846_v33, 6  ;;  %v2819_v48 = vadd.f32 %v2818_v27, %v2817_v54  ;;  %v3511_v54 = vld [vmem:[%s9448_s3 + $0x158] sm:$0xff]  ;;  %3821 = vmatmul.f32.gmra.mxu2 %v3543_v24  ;;  %v9997_v33 = vld [vmem:[#allocation11_spill] sm:$0xff]  ;;  %vm10012_vm2 = vmmov %vm9988_vm7 }
 0x253   :  { %v3076_v30 = vrot.slane %v2969_v10, 4  ;;  %v2988_v36 = vrot.slane %v2847_v17, 5  ;;  %v2990_v49 = vrot.slane %v2848_v45, 4  ;;  %v2992_v31 = vrot.slane %v2849_v15, 3  ;;  %3725 = vmatmul.f32.gmra.mxu1 %v3511_v54  ;;  %v9995_v27 = vld [vmem:[#allocation9_spill] sm:$0xff]  ;;  %vm10013_vm7 = vmmov %vm10005_vm3 }
 0x254   :  { %v2985_v16 = vsel %vm9990_vm13, %v2984_v8, %v2844_v13  ;;  %v2994_v1 = vrot.slane %v2850_v29, 2  ;;  %v2418_v32 = vrot.slane %v2380_v58, 1  ;;  %v2419_v37 = vrot.slane %v2380_v58, 2  ;;  %v9998_v45 = vld [vmem:[#allocation13_spill] sm:$0xff]  ;;  %v9999_v29 = vld [vmem:[#allocation14_spill] sm:$0xff]  ;;  %v10001_v8 = vld [vmem:[#allocation15_spill] sm:$0xff] }
 0x255   :  { %v2987_v43 = vsel %vm9991_vm6, %v2986_v62, %v2985_v16  ;;  %v2420_v51 = vrot.slane %v2380_v58, 3  ;;  %v2421_v56 = vrot.slane %v2380_v58, 4  ;;  %v2996_v60 = vrot.slane %v2851_v50, 1  ;;  %vm10014_vm9 = vmmov %vm9991_vm6 }
 0x256   :  { %v2989_v23 = vsel %vm9992_vm10, %v2988_v36, %v2987_v43  ;;  %v2422_v42 = vrot.slane %v2380_v58, 5  ;;  %v2423_v4 = vrot.slane %v2380_v58, 6  ;;  %v2424_v11 = vrot.slane %v2380_v58, 7  ;;  %v10002_v36 = vld [vmem:[#allocation17_spill] sm:$0xff]  ;;  %vm10015_vm13 = vmmov %vm9992_vm10 }
 0x257   :  { %v2991_v19 = vsel %vm9993_vm0, %v2990_v49, %v2989_v23  ;;  %v2541_v2 = vadd.f32 %v9994_v34, %v2380_v58  ;;  %v2542_v38 = vadd.f32 %v9995_v27, %v2418_v32  ;;  %v2543_v17 = vadd.f32 %v9997_v33, %v2419_v37  ;;  %v10003_v49 = vld [vmem:[#allocation16_spill] sm:$0xff]  ;;  %vm10016_vm6 = vmmov %vm9993_vm0 }
 0x258   :  { %v2993_v12 = vsel %vm9996_vm15, %v2992_v31, %v2991_v19  ;;  %v2544_v15 = vadd.f32 %v9998_v45, %v2420_v51  ;;  %v2545_v13 = vadd.f32 %v9999_v29, %v2421_v56  ;;  %v2546_v62 = vadd.f32 %v10001_v8, %v2422_v42  ;;  %vm10020_vm10 = vmmov %vm9984_vm8 }
 0x259   :  { %v2995_v50 = vsel %vm10000_vm4, %v2994_v1, %v2993_v12  ;;  %v2547_v24 = vadd.f32 %v10002_v36, %v2423_v4  ;;  %v2548_v16 = vadd.f32 %v10003_v49, %v2424_v11  ;;  %v8375_v43 = vadd.f32 %v2812_v44, %v2811_v53  ;;  %v2388_v44 = vpop.permute.xlu0 %2387  ;;  %vm10024_vm0 = vmmov %vm10009_vm1 }
 0x25a   :  { %v2997_v58 = vsel %vm10004_vm11, %v2996_v60, %v2995_v50  ;;  %v2853_v31 = vmul.f32 %v2542_v38, %v6379_v59  ;;  %v2854_v32 = vmul.f32 %v2543_v17, %v6401_v52  ;;  %v2855_v51 = vmul.f32 %v2544_v15, %v6371_v63  ;;  %v3512_v60 = vld [vmem:[%s9448_s3 + $0x160] sm:$0xff]  ;;  %vm10026_vm15 = vmmov %vm10012_vm2 }
 0x25b   :  { %v3088_v37 = vrot.slane %v2997_v58, 4  ;;  %v2856_v56 = vmul.f32 %v2545_v13, %v6663_v61  ;;  %v2857_v1 = vmul.f32 %v2546_v62, %v6376_v5  ;;  %v2852_v54 = vmul.f32 %v2541_v2, %v6369_v22  ;;  %3728 = vmatmul.f32.gmra.mxu1 %v3512_v60  ;;  %v2392_v60 = vpop.permute.xlu1 %2391  ;;  %vm10028_vm4 = vmmov %vm10005_vm3 }
 0x25c   :  { %v2858_v23 = vmul.f32 %v2547_v24, %v7049_v9  ;;  %v2998_v42 = vrot.slane %v2853_v31, 7  ;;  %v3000_v53 = vrot.slane %v2854_v32, 6  ;;  %v8388_v4 = vadd.f32 1.0, %v2819_v48  ;;  %vm10029_vm11 = vmmov %vm10024_vm0 }
 0x25d   :  { %v8390_v19 = vadd.f32 %v3076_v30, %v2969_v10  ;;  %v8392_v11 = vadd.f32 %v3088_v37, %v2997_v58  ;;  %v2859_v34 = vmul.f32 %v2548_v16, %v6397_v47  ;;  %v3002_v2 = vrot.slane %v2855_v51, 5  ;;  %v3513_v51 = vld [vmem:[%s9448_s3 + $0x168] sm:$0xff] }
 0x25e   :  { %v2999_v27 = vsel %vm10005_vm3, %v2998_v42, %v2852_v54  ;;  %v3004_v38 = vrot.slane %v2856_v56, 4  ;;  %v3006_v12 = vrot.slane %v2857_v1, 3  ;;  %v3008_v17 = vrot.slane %v2858_v23, 2  ;;  %v10010_v56 = vld [vmem:[#allocation26_spill] sm:$0xff]  ;;  %v10011_v1 = vld [vmem:[#allocation27_spill] sm:$0xff]  ;;  %vm10030_vm3 = vmmov %vm10014_vm9 }
 0x25f   :  { %v3001_v33 = vsel %vm10006_vm14, %v3000_v53, %v2999_v27  ;;  %v2432_v45 = vrot.slane %v2388_v44, 1  ;;  %v2433_v15 = vrot.slane %v2388_v44, 2  ;;  %v2434_v29 = vrot.slane %v2388_v44, 3  ;;  %vm10031_vm14 = vmmov %vm10012_vm2 }
 0x260   :  { %v3003_v48 = vsel %vm10007_vm12, %v3002_v2, %v3001_v33  ;;  %v2435_v10 = vrot.slane %v2388_v44, 4  ;;  %v2436_v30 = vrot.slane %v2388_v44, 5  ;;  %v3010_v50 = vrot.slane %v2859_v34, 1 }
 0x261   :  { %v3005_v13 = vsel %vm10008_vm5, %v3004_v38, %v3003_v48  ;;  %v2437_v8 = vrot.slane %v2388_v44, 6  ;;  %v2438_v62 = vrot.slane %v2388_v44, 7  ;;  %v2557_v24 = vadd.f32 %v7986_v57, %v2388_v44 }
 0x262   :  { %v3007_v36 = vsel %vm9984_vm8, %v3006_v12, %v3005_v13  ;;  %v2558_v49 = vadd.f32 %v7964_v21, %v2432_v45  ;;  %v2559_v16 = vadd.f32 %v7975_v0, %v2433_v15  ;;  %v2560_v31 = vadd.f32 %v7989_v41, %v2434_v29 }
 0x263   :  { %v3009_v58 = vsel %vm10009_vm1, %v3008_v17, %v3007_v36  ;;  %v2561_v32 = vadd.f32 %v7998_v3, %v2435_v10  ;;  %v2562_v37 = vadd.f32 %v7915_v39, %v2436_v30  ;;  %4454 = vrcp.f32 %v8388_v4  ;;  %3731 = vmatmul.f32.gmra.mxu1 %v3513_v51  ;;  %v10018_v51 = vld [vmem:[#allocation20_spill] sm:$0xff]  ;;  %vm10032_vm1 = vmmov %vm10024_vm0 }
 0x264   :  { %v3078_v57 = vrot.slane %v8390_v19, 2  ;;  %v2563_v21 = vadd.f32 %v10010_v56, %v2437_v8  ;;  %v2564_v0 = vadd.f32 %v10011_v1, %v2438_v62  ;;  %v3011_v54 = vsel %vm10012_vm2, %v3010_v50, %v3009_v58  ;;  %v3514_v58 = vld [vmem:[%s9448_s3 + $0x170] sm:$0xff] }
 0x265   :  { %v2869_v41 = vmul.f32 %v2558_v49, %v6379_v59  ;;  %v2870_v3 = vmul.f32 %v2559_v16, %v6401_v52  ;;  %v2871_v39 = vmul.f32 %v2560_v31, %v6371_v63  ;;  %v3090_v23 = vrot.slane %v8392_v11, 2 }
 0x266   :  { %v2872_v42 = vmul.f32 %v2561_v32, %v6663_v61  ;;  %v2873_v53 = vmul.f32 %v2562_v37, %v6376_v5  ;;  %v2874_v44 = vmul.f32 %v2563_v21, %v7049_v9  ;;  %v2868_v34 = vmul.f32 %v2557_v24, %v6369_v22  ;;  %v10017_v32 = vld [vmem:[#allocation18_spill] sm:$0xff] }
 0x267   :  { %v2875_v27 = vmul.f32 %v2564_v0, %v6397_v47  ;;  %v3026_v2 = vrot.slane %v2869_v41, 7  ;;  %v3028_v38 = vrot.slane %v2870_v3, 6  ;;  %v3094_v12 = vrot.slane %v3011_v54, 4  ;;  %v10019_v21 = vld [vmem:[#allocation22_spill] sm:$0xff]  ;;  %v10021_v41 = vld [vmem:[#allocation21_spill] sm:$0xff] }
 0x268   :  { %v3030_v33 = vrot.slane %v2871_v39, 5  ;;  %v3032_v17 = vrot.slane %v2872_v42, 4  ;;  %v3034_v45 = vrot.slane %v2873_v53, 3  ;;  %v3036_v48 = vrot.slane %v2874_v44, 2  ;;  %v10022_v39 = vld [vmem:[#allocation23_spill] sm:$0xff]  ;;  %v10023_v53 = vld [vmem:[#allocation24_spill] sm:$0xff] }
 0x269   :  { %v3027_v15 = vsel %vm10013_vm7, %v3026_v2, %v2868_v34  ;;  %v2439_v29 = vrot.slane %v2392_v60, 1  ;;  %v2440_v10 = vrot.slane %v2392_v60, 2  ;;  %v8425_v30 = vpop.eup %4454  ;;  %v2441_v50 = vrot.slane %v2392_v60, 3  ;;  %v10025_v2 = vld [vmem:[#allocation19_spill] sm:$0xff] }
 0x26a   :  { %v3029_v13 = vsel %vm10014_vm9, %v3028_v38, %v3027_v15  ;;  %v2442_v8 = vrot.slane %v2392_v60, 4  ;;  %v2443_v62 = vrot.slane %v2392_v60, 5  ;;  %v3038_v24 = vrot.slane %v2875_v27, 1  ;;  %v10027_v15 = vld [vmem:[#allocation25_spill] sm:$0xff] }
 0x26b   :  { %v3031_v36 = vsel %vm10015_vm13, %v3030_v33, %v3029_v13  ;;  %v2444_v49 = vrot.slane %v2392_v60, 6  ;;  %v2445_v16 = vrot.slane %v2392_v60, 7  ;;  %v2566_v37 = vadd.f32 %v10017_v32, %v2439_v29  ;;  %3734 = vmatmul.f32.gmra.mxu1 %v3514_v58  ;;  %v3515_v58 = vld [vmem:[%s9448_s3 + $0x178] sm:$0xff] }
 0x26c   :  { %v3033_v31 = vsel %vm10016_vm6, %v3032_v17, %v3031_v36  ;;  %v2567_v56 = vadd.f32 %v10018_v51, %v2440_v10  ;;  %v2568_v1 = vadd.f32 %v10019_v21, %v2441_v50  ;;  %v2565_v3 = vadd.f32 %v10021_v41, %v2392_v60 }
 0x26d   :  { %v3035_v0 = vsel %vm10020_vm10, %v3034_v45, %v3033_v31  ;;  %v2569_v42 = vadd.f32 %v10022_v39, %v2442_v8  ;;  %v2570_v44 = vadd.f32 %v10023_v53, %v2443_v62  ;;  %v3095_v34 = vadd.f32 %v3094_v12, %v3011_v54 }
 0x26e   :  { %v3037_v27 = vsel %vm10024_vm0, %v3036_v48, %v3035_v0  ;;  %v2571_v38 = vadd.f32 %v10025_v2, %v2444_v49  ;;  %v2877_v33 = vmul.f32 %v2566_v37, %v6379_v59  ;;  %v2572_v29 = vadd.f32 %v10027_v15, %v2445_v16 }
 0x26f   :  { %v3039_v17 = vsel %vm10026_vm15, %v3038_v24, %v3037_v27  ;;  %v2878_v45 = vmul.f32 %v2567_v56, %v6401_v52  ;;  %v2879_v60 = vmul.f32 %v2568_v1, %v6371_v63  ;;  %v3079_v10 = vadd.f32 %v3078_v57, %v8390_v19 }
 0x270   :  { %v8449_v13 = vadd.f32 1.0, %v8375_v43  ;;  %v3106_v54 = vrot.slane %v3039_v17, 4  ;;  %v2880_v12 = vmul.f32 %v2569_v42, %v6663_v61  ;;  %v2876_v48 = vmul.f32 %v2565_v3, %v6369_v22 }
 0x271   :  { %v2881_v50 = vmul.f32 %v2570_v44, %v6376_v5  ;;  %v3040_v8 = vrot.slane %v2877_v33, 7  ;;  %v3042_v62 = vrot.slane %v2878_v45, 6  ;;  %v3091_v36 = vadd.f32 %v3090_v23, %v8392_v11  ;;  %v3516_v45 = vld [vmem:[%s9448_s3 + $0x180] sm:$0xff] }
 0x272   :  { %v3096_v24 = vrot.slane %v3095_v34, 2  ;;  %v3107_v49 = vadd.f32 %v3106_v54, %v3039_v17  ;;  %v2882_v16 = vmul.f32 %v2571_v38, %v7049_v9  ;;  %v2883_v19 = vmul.f32 %v2572_v29, %v6397_v47 }
 0x273   :  { %v3041_v43 = vsel %vm10028_vm4, %v3040_v8, %v2876_v48  ;;  %v3044_v57 = vrot.slane %v2879_v60, 5  ;;  %v3065_v31 = vsel %vm10029_vm11, %v3064_v35, %v8349_v28  ;;  %v3046_v23 = vrot.slane %v2880_v12, 4  ;;  %3737 = vmatmul.f32.gmra.mxu1 %v3515_v58 }
 0x274   :  { %v3108_v32 = vrot.slane %v3107_v49, 2  ;;  %v3043_v11 = vsel %vm10030_vm3, %v3042_v62, %v3041_v43  ;;  %v3067_v37 = vsel %vm10031_vm14, %v3066_v55, %v3065_v31  ;;  %v3080_v51 = vrot.slane %v3079_v10, 1 }
 0x275   :  { %v3045_v56 = vsel %vm10007_vm12, %v3044_v57, %v3043_v11  ;;  %v3048_v21 = vrot.slane %v2881_v50, 3  ;;  %v3118_v1 = vrot.slane %v3067_v37, 4  ;;  %v3050_v41 = vrot.slane %v2882_v16, 2 }
 0x276   :  { %v3047_v0 = vsel %vm10008_vm5, %v3046_v23, %v3045_v56  ;;  %v3097_v40 = vadd.f32 %v3096_v24, %v3095_v34  ;;  %v3109_v3 = vadd.f32 %v3108_v32, %v3107_v49  ;;  %v3052_v28 = vrot.slane %v2883_v19, 1 }
 0x277   :  { %v3049_v35 = vsel %vm9984_vm8, %v3048_v21, %v3047_v0  ;;  %v3119_v39 = vadd.f32 %v3118_v1, %v3067_v37  ;;  %v3124_v20 = vmax.f32 %v6369_v22, %v6663_v61  ;;  %v3092_v42 = vrot.slane %v3091_v36, 1  ;;  %v10034_v21 = vld [vmem:[#allocation29_spill] sm:$0xff]  ;;  %v10035_v0 = vld [vmem:[#allocation28_spill] sm:$0xff] }
 0x278   :  { %v3051_v55 = vsel %vm10032_vm1, %v3050_v41, %v3049_v35  ;;  %v3104_v53 = vrot.slane %v8042_v7, 1  ;;  %v3126_v44 = vmax.f32 %v6401_v52, %v7049_v9  ;;  %v3125_v34 = vmax.f32 %v6379_v59, %v6376_v5 }
 0x279   :  { %v3053_v27 = vsel %vm10012_vm2, %v3052_v28, %v3051_v55  ;;  %v3120_v2 = vrot.slane %v3119_v39, 2  ;;  %v3127_v38 = vmax.f32 %v6371_v63, %v6397_v47  ;;  %v3098_v17 = vrot.slane %v3097_v40, 1  ;;  %v10036_v55 = vld [vmem:[#allocation31_spill] sm:$0xff] }
 0x27a   :  { %v3112_v33 = vrot.slane %v3053_v27, 4  ;;  %v3110_v15 = vrot.slane %v3109_v3, 1  ;;  %v3156_v29 = vmul.f32 %v8207_v25, %v8048_v26  ;;  %4456 = vrcp.f32 %v8449_v13 }
 0x27b   :  { %v3121_v60 = vadd.f32 %v3120_v2, %v3119_v39  ;;  %v3128_v54 = vmax.f32 %v3124_v20, %v3125_v34  ;;  %v3129_v12 = vmax.f32 %v3126_v44, %v3127_v38  ;;  %v3081_v50 = vadd.f32 %v3080_v51, %v3079_v10  ;;  %3740 = vmatmul.f32.gmra.mxu1 %v3516_v45  ;;  %v3517_v20 = vld [vmem:[%s9448_s3 + $0x188] sm:$0xff] }
 0x27c   :  { %v3113_v48 = vadd.f32 %v3112_v33, %v3053_v27  ;;  %v10033_v8 = vrot.slane %v8040_v6, 1  ;;  %v3157_v24 = vsub.f32 1.0, %v3156_v29  ;;  %v3093_v49 = vadd.f32 %v3092_v42, %v3091_v36 }
 0x27d   :  { %v3105_v16 = vadd.f32 %v3104_v53, %v8042_v7  ;;  %v3122_v19 = vrot.slane %v3121_v60, 1  ;;  %v8493_v43 = vmax.f32 %v3128_v54, %v3129_v12  ;;  %v3099_v57 = vadd.f32 %v3098_v17, %v3097_v40 }
 0x27e   :  { %v3087_v62 = vadd.f32 %v10033_v8, %v8040_v6  ;;  %v3111_v58 = vadd.f32 %v3110_v15, %v3109_v3  ;;  %v3114_v31 = vrot.slane %v3113_v48, 2  ;;  %vm3160_vm7 = vweird.f32 %v8048_v26 }
 0x27f   :  { %v3132_v10 = vmul.f32 %v8493_v43, %v8050_v14  ;;  %v3164_v32 = vand.u32 2147483647, %v8048_v26  ;;  %v3166_v6 = vand.u32 2147483648, %v8048_v26  ;;  %v3171_v36 = vmul.f32 %v8225_v18, %v8050_v14 }
 0x280   :  { %v3115_v7 = vadd.f32 %v3114_v31, %v3113_v48  ;;  %v3131_v11 = vmul.f32 %v8493_v43, %v8048_v26  ;;  %v3133_v23 = vmul.f32 %v8493_v43, %v8054_v46  ;;  %v3158_v37 = vmul.f32 %v8207_v25, %v3157_v24  ;;  %v8507_v51 = vpop.eup %4456 }
 0x281   :  { %v3123_v56 = vadd.f32 %v3122_v19, %v3121_v60  ;;  %v3134_v1 = vmul.f32 %v8493_v43, %v10034_v21  ;;  %v3135_v41 = vmul.f32 %v8493_v43, %v10035_v0  ;;  %v3138_v40 = vmul.f32 %v8493_v43, %v8388_v4 }
 0x282   :  { %v3116_v3 = vrot.slane %v3115_v7, 1  ;;  %v3139_v35 = vsub.f32 %v3081_v50, %v3131_v11  ;;  %v3140_v28 = vsub.f32 %v3087_v62, %v3132_v10  ;;  %v3141_v39 = vsub.f32 %v3093_v49, %v3133_v23  ;;  %v10039_v50 = vld [vmem:[#allocation32_spill] sm:$0xff] }
 0x283   :  { %v3136_v42 = vmul.f32 %v8493_v43, %v10036_v55  ;;  %vm3161_vm9 = vweird.f32 %v8207_v25  ;;  %vm8521_vm13 = vcmp.eq.f32.partialorder %v3164_v32, 8.507059e+37  ;;  %vm3175_vm6 = vweird.f32 %v8050_v14  ;;  %3743 = vmatmul.f32.gmra.mxu1 %v3517_v20 }
 0x284   :  { %v3117_v44 = vadd.f32 %v3116_v3, %v3115_v7  ;;  %v3137_v27 = vmul.f32 %v8493_v43, %v8449_v13  ;;  %v3142_v2 = vsub.f32 %v3099_v57, %v3134_v1  ;;  %v3167_v34 = vor.u32 1.1754944e-38, %v3166_v6  ;;  %vm3162_vm10 = vmor %vm3160_vm7, %vm3161_vm9  ;;  %v10042_v6 = vld [vmem:[#allocation34_spill] sm:$0xff]  ;;  %v3518_v7 = vld [vmem:[%s9448_s3 + $0x190] sm:$0xff] }
 0x285   :  { %v3143_v38 = vsub.f32 %v3105_v16, %v3135_v41  ;;  %v3144_v33 = vsub.f32 %v3111_v58, %v3136_v42  ;;  %v3159_v17 = vadd.f32 %v8207_v25, %v3158_v37  ;;  %v3172_v15 = vsub.f32 1.0, %v3171_v36  ;;  %v10045_v42 = vld [vmem:[#allocation30_spill] sm:$0xff] }
 0x286   :  { %v3146_v29 = vsub.f32 %v3123_v56, %v3138_v40  ;;  %v4218_v45 = vadd.f32 -1.0, %v3139_v35  ;;  %v4219_v60 = vadd.f32 -1.0, %v3140_v28  ;;  %v4220_v54 = vadd.f32 -1.0, %v3141_v39 }
 0x287   :  { %v3163_v12 = vsel %vm3162_vm10, %v8207_v25, %v3159_v17  ;;  %v3173_v48 = vmul.f32 %v8225_v18, %v3172_v15  ;;  %vm3176_vm0 = vweird.f32 %v8225_v18  ;;  %v3186_v8 = vmul.f32 %v10039_v50, %v8054_v46  ;;  %v10048_v17 = vld [vmem:[#allocation33_spill] sm:$0xff] }
 0x288   :  { %v3145_v62 = vsub.f32 %v3117_v44, %v3137_v27  ;;  %v8538_v24 = vadd.f32 -1.0, %v3142_v2  ;;  %v3179_v49 = vand.u32 2147483647, %v8050_v14  ;;  %v3181_v16 = vand.u32 2147483648, %v8050_v14  ;;  %vm8553_vm15 = vmor %vm3175_vm6, %vm3176_vm0 }
 0x289   :  { %v8542_v19 = vadd.f32 -1.0, %v3143_v38  ;;  %v8544_v57 = vadd.f32 -1.0, %v3144_v33  ;;  %v3174_v25 = vadd.f32 %v8225_v18, %v3173_v48  ;;  %v3187_v58 = vsub.f32 1.0, %v3186_v8 }
 0x28a   :  { %v8547_v31 = vadd.f32 -1.0, %v3146_v29  ;;  %v3168_v10 = vsel %vm8521_vm13, %v3167_v34, %v3163_v12  ;;  %vm3190_vm4 = vweird.f32 %v8054_v46  ;;  %v3201_v36 = vmul.f32 %v10042_v6, %v10034_v21 }
 0x28b   :  { %v3178_v11 = vsel %vm8553_vm15, %v8225_v18, %v3174_v25  ;;  %v3188_v23 = vmul.f32 %v10039_v50, %v3187_v58  ;;  %vm3191_vm11 = vweird.f32 %v10039_v50  ;;  %v3194_v37 = vand.u32 2147483647, %v8054_v46  ;;  %3746 = vmatmul.f32.gmra.mxu1 %v3518_v7 }
 0x28c   :  { %v8569_v56 = vadd.f32 -1.0, %v3145_v62  ;;  %vm3180_vm3 = vcmp.eq.f32.partialorder %v3179_v49, 8.507059e+37  ;;  %v3182_v1 = vor.u32 1.1754944e-38, %v3181_v16  ;;  %v3202_v41 = vsub.f32 1.0, %v3201_v36  ;;  %vm8578_vm14 = vmor %vm3190_vm4, %vm3191_vm11 }
 0x28d   :  { %v8571_v40 = vmul.f32 %v4218_v45, %v3168_v10  ;;  %v3189_v3 = vadd.f32 %v10039_v50, %v3188_v23  ;;  %v3196_v35 = vand.u32 2147483648, %v8054_v46  ;;  %v3209_v28 = vand.u32 2147483647, %v10034_v21 }
 0x28e   :  { %v3183_v18 = vsel %vm3180_vm3, %v3182_v1, %v3178_v11  ;;  %v3203_v20 = vmul.f32 %v10042_v6, %v3202_v41  ;;  %vm3205_vm12 = vweird.f32 %v10034_v21  ;;  %v3216_v53 = vmul.f32 %v10045_v42, %v10035_v0 }
 0x28f   :  { %v3193_v44 = vsel %vm8578_vm14, %v10039_v50, %v3189_v3  ;;  %vm8589_vm5 = vcmp.eq.f32.partialorder %v3194_v37, 8.507059e+37  ;;  %vm3206_vm8 = vweird.f32 %v10042_v6  ;;  %v3211_v2 = vand.u32 2147483648, %v10034_v21 }
 0x290   :  { %v3204_v34 = vadd.f32 %v10042_v6, %v3203_v20  ;;  %v3217_v38 = vsub.f32 1.0, %v3216_v53  ;;  %v3224_v33 = vand.u32 2147483647, %v10035_v0  ;;  %v3231_v15 = vmul.f32 %v10048_v17, %v10036_v55  ;;  %vm8606_vm2 = vmor %vm3205_vm12, %vm3206_vm8 }
 0x291   :  { %v8599_v29 = vmul.f32 %v4219_v60, %v3183_v18  ;;  %v3197_v45 = vor.u32 1.1754944e-38, %v3196_v35  ;;  %vm8601_vm1 = vcmp.eq.f32.partialorder %v3209_v28, 8.507059e+37  ;;  %v3226_v48 = vand.u32 2147483648, %v10035_v0 }
 0x292   :  { %v3218_v8 = vmul.f32 %v10045_v42, %v3217_v38  ;;  %vm3220_vm7 = vweird.f32 %v10035_v0  ;;  %vm3221_vm9 = vweird.f32 %v10045_v42  ;;  %v3232_v62 = vsub.f32 1.0, %v3231_v15 }
 0x293   :  { %v3198_v60 = vsel %vm8589_vm5, %v3197_v45, %v3193_v44  ;;  %v3208_v49 = vsel %vm8606_vm2, %v10042_v6, %v3204_v34  ;;  %v3212_v16 = vor.u32 1.1754944e-38, %v3211_v2  ;;  %v3246_v25 = vmul.f32 %v8507_v51, %v8449_v13  ;;  %vm3222_vm6 = vmor %vm3220_vm7, %vm3221_vm9 }
 0x294   :  { %v8620_v58 = vmul.f32 %v4220_v54, %v3198_v60  ;;  %v3219_v10 = vadd.f32 %v10045_v42, %v3218_v8  ;;  %vm3225_vm13 = vcmp.eq.f32.partialorder %v3224_v33, 8.507059e+37  ;;  %v3233_v32 = vmul.f32 %v10048_v17, %v3232_v62 }
 0x295   :  { %v3227_v36 = vor.u32 1.1754944e-38, %v3226_v48  ;;  %v3239_v7 = vand.u32 2147483647, %v10036_v55  ;;  %v3241_v11 = vand.u32 2147483648, %v10036_v55  ;;  %v3247_v23 = vsub.f32 1.0, %v3246_v25 }
 0x296   :  { %v3213_v6 = vsel %vm8601_vm1, %v3212_v16, %v3208_v49  ;;  %v3223_v37 = vsel %vm3222_vm6, %v10045_v42, %v3219_v10  ;;  %v3234_v54 = vadd.f32 %v10048_v17, %v3233_v32  ;;  %vm3236_vm10 = vweird.f32 %v10048_v17 }
 0x297   :  { %v3228_v1 = vsel %vm3225_vm13, %v3227_v36, %v3223_v37  ;;  %v3248_v41 = vmul.f32 %v8507_v51, %v3247_v23  ;;  %v3256_v3 = vand.u32 2147483648, %v8449_v13  ;;  %v3261_v35 = vmul.f32 %v8425_v30, %v8388_v4 }
 0x298   :  { %v8636_v28 = vmul.f32 %v8538_v24, %v3213_v6  ;;  %vm3235_vm0 = vweird.f32 %v10036_v55  ;;  %vm3250_vm15 = vweird.f32 %v8449_v13  ;;  %vm3251_vm4 = vweird.f32 %v8507_v51  ;;  %v3545_v6 = vld [vmem:[%s9448_s3 + $0x268] sm:$0xff] }
 0x299   :  { %vm8641_vm11 = vmor %vm3235_vm0, %vm3236_vm10  ;;  %vm8645_vm3 = vcmp.eq.f32.partialorder %v3239_v7, 8.507059e+37  ;;  %v3242_v20 = vor.u32 1.1754944e-38, %v3241_v11  ;;  %v3249_v42 = vadd.f32 %v8507_v51, %v3248_v41  ;;  %v3262_v53 = vsub.f32 1.0, %v3261_v35 }
 0x29a   :  { %v8651_v24 = vmul.f32 %v8542_v19, %v3228_v1  ;;  %v3238_v44 = vsel %vm8641_vm11, %v10048_v17, %v3234_v54  ;;  %v3254_v27 = vand.u32 2147483647, %v8449_v13  ;;  %vm3265_vm14 = vweird.f32 %v8388_v4  ;;  %vm8658_vm12 = vmor %vm3250_vm15, %vm3251_vm4 }
 0x29b   :  { %v3257_v34 = vor.u32 1.1754944e-38, %v3256_v3  ;;  %v3263_v38 = vmul.f32 %v8425_v30, %v3262_v53  ;;  %vm3266_vm5 = vweird.f32 %v8425_v30  ;;  %v3269_v19 = vand.u32 2147483647, %v8388_v4 }
 0x29c   :  { %v3253_v33 = vsel %vm8658_vm12, %v8507_v51, %v3249_v42  ;;  %v3271_v17 = vand.u32 2147483648, %v8388_v4  ;;  %v8671_v15 = vsub.f32 %v6369_v22, %v8493_v43  ;;  %v8675_v45 = vsub.f32 %v6379_v59, %v8493_v43  ;;  %v3544_v22 = vld [vmem:[%s9448_s3 + $0x260] sm:$0xff]  ;;  %vm8696_vm1 = vmor %vm3265_vm14, %vm3266_vm5 }
 0x29d   :  { %v3243_v12 = vsel %vm8645_vm3, %v3242_v20, %v3238_v44  ;;  %v3264_v48 = vadd.f32 %v8425_v30, %v3263_v38  ;;  %v8682_v50 = vsub.f32 %v6401_v52, %v8493_v43  ;;  %v8686_v51 = vsub.f32 %v6371_v63, %v8493_v43  ;;  %3824 = vmatmul.f32.gmra.mxu2 %v3544_v22 }
 0x29e   :  { %v8692_v59 = vmul.f32 %v8544_v57, %v3243_v12  ;;  %vm3255_vm8 = vcmp.eq.f32.partialorder %v3254_v27, 8.507059e+37  ;;  %vm3283_vm2 = vcmp.gt.f32.partialorder %v8671_v15, %v8571_v40  ;;  %vm3284_vm7 = vcmp.gt.f32.partialorder %v8675_v45, %v8599_v29 }
 0x29f   :  { %v3258_v63 = vsel %vm3255_vm8, %v3257_v34, %v3253_v33  ;;  %v3268_v52 = vsel %vm8696_vm1, %v8425_v30, %v3264_v48  ;;  %vm3285_vm9 = vcmp.gt.f32.partialorder %v8682_v50, %v8620_v58  ;;  %vm3286_vm13 = vcmp.gt.f32.partialorder %v8686_v51, %v8636_v28 }
 0x2a0   :  { %v8712_v57 = vmul.f32 %v8569_v56, %v3258_v63  ;;  %vm3270_vm6 = vcmp.eq.f32.partialorder %v3269_v19, 8.507059e+37  ;;  %v3272_v62 = vor.u32 1.1754944e-38, %v3271_v17  ;;  %v10061_v60 = vmov 0.0  }
 0x2a1   :  { %v4226_v49 = vsel %vm3283_vm2, 1.0, %v10061_v60  ;;  %v8717_v16 = vsub.f32 %v6663_v61, %v8493_v43  ;;  %v8721_v30 = vsub.f32 %v6376_v5, %v8493_v43  ;;  %v4227_v25 = vsel %vm3284_vm7, 1.0, %v10061_v60  ;;  %4145 = vst [vmem:[%s9449_s8 + $0x58] sm:$0xff] %v10061_v60 }
 0x2a2   :  { %v4228_v10 = vsel %vm3285_vm9, 1.0, %v10061_v60  ;;  %v3273_v32 = vsel %vm3270_vm6, %v3272_v62, %v3268_v52  ;;  %v8727_v56 = vsub.f32 %v7049_v9, %v8493_v43  ;;  %v4229_v36 = vsel %vm3286_vm13, 1.0, %v10061_v60  ;;  %v3548_v62 = vld [vmem:[%s9448_s3 + $0x280] sm:$0xff]  ;;  %4146 = vst [vmem:[%s9449_s8 + $0x60] sm:$0xff] %v10061_v60 }
 0x2a3   :  { %vm10062_vm10 = vcmask 1040384   ;;  %vm3287_vm0 = vcmp.gt.f32.partialorder %v8717_v16, %v8651_v24  ;;  %vm3288_vm15 = vcmp.gt.f32.partialorder %v8721_v30, %v8692_v59  ;;  %v8738_v23 = vmul.f32 %v8547_v31, %v3273_v32  ;;  %v8805_v32 = vpop.f32.mrf.mxu1  ;;  %4147 = vst [vmem:[%s9449_s8 + $0x68] sm:$0xff] %v10061_v60 }
 0x2a4   :  { %v3307_v7 = vsel %vm10062_vm10, %v4226_v49, 0.0  ;;  %vm10063_vm4 = vmmov %vm10062_vm10  ;;  %vm3289_vm3 = vcmp.gt.f32.partialorder %v8727_v56, %v8712_v57  ;;  %v4230_v37 = vsel %vm3287_vm0, 1.0, %v10061_v60  ;;  %v4231_v54 = vsel %vm3288_vm15, 1.0, %v10061_v60  ;;  %v3520_v49 = vld [vmem:[%s9448_s3 + $0x1a0] sm:$0xff]  ;;  %4148 = vst [vmem:[%s9449_s8 + $0x70] sm:$0xff] %v10061_v60 }
 0x2a5   :  { %v3308_v5 = vsel %vm10063_vm4, %v4227_v25, 0.0  ;;  %vm10064_vm11 = vmmov %vm10063_vm4  ;;  %3827 = vmatmul.f32.gmra.mxu2 %v3545_v6  ;;  %v8750_v41 = vsub.f32 %v6397_v47, %v8493_v43  ;;  %v4232_v31 = vsel %vm3289_vm3, 1.0, %v10061_v60  ;;  %v3546_v47 = vld [vmem:[%s9448_s3 + $0x270] sm:$0xff]  ;;  %4149 = vst [vmem:[%s9449_s8 + $0x78] sm:$0xff] %v10061_v60 }
 0x2a6   :  { %v3310_v61 = vsel %vm10064_vm11, %v4228_v10, 0.0  ;;  %v3309_v11 = vadd.f32 %v3308_v5, %v3307_v7  ;;  %vm10065_vm14 = vmmov %vm10063_vm4  ;;  %v8807_v7 = vpop.f32.mrf.mxu2 }
 0x2a7   :  { %v3312_v9 = vsel %vm10065_vm14, %v4229_v36, 0.0  ;;  %vm3290_vm12 = vcmp.gt.f32.partialorder %v8750_v41, %v8738_v23  ;;  %vm10066_vm5 = vmmov %vm10063_vm4 }
 0x2a8   :  { %v3311_v1 = vadd.f32 %v3310_v61, %v3309_v11  ;;  %v3314_v35 = vsel %vm10066_vm5, %v4230_v37, 0.0  ;;  %vm10067_vm8 = vmmov %vm10063_vm4  ;;  %v4233_v42 = vsel %vm3290_vm12, 1.0, %v10061_v60 }
 0x2a9   :  { %v3316_v18 = vsel %vm10067_vm8, %v4231_v54, 0.0  ;;  %vm10068_vm1 = vmmov %vm10063_vm4 }
 0x2aa   :  { %v3313_v3 = vadd.f32 %v3312_v9, %v3311_v1  ;;  %v3318_v20 = vsel %vm10068_vm1, %v4232_v31, 0.0  ;;  %vm10069_vm2 = vmmov %vm10068_vm1  ;;  %v3549_v9 = vld [vmem:[%s9448_s3 + $0x288] sm:$0xff] }
 0x2ab   :  { %v3320_v44 = vsel %vm10069_vm2, %v4233_v42, 0.0  ;;  %vm10070_vm4 = vmmov %vm10068_vm1 }
 0x2ac   :  { %v3315_v39 = vadd.f32 %v3314_v35, %v3313_v3  ;;  %vm10071_vm11 = vmmov %vm10068_vm1 }
 0x2ad   :  { %3830 = vmatmul.f32.gmra.mxu2 %v3546_v47  ;;  %vm10072_vm14 = vmmov %vm10068_vm1  ;;  %v10078_v47 = vld [vmem:[#allocation10_spill] sm:$0xff] }
 0x2ae   :  { %v3317_v53 = vadd.f32 %v3316_v18, %v3315_v39  ;;  %vm10073_vm12 = vmmov %vm10068_vm1  ;;  %v8822_v39 = vpop.f32.mrf.mxu2 }
 0x2af   :  { %vm10074_vm5 = vmmov %vm10068_vm1 }
 0x2b0   :  { %v3319_v43 = vadd.f32 %v3318_v20, %v3317_v53  ;;  %vm10075_vm8 = vmmov %vm10068_vm1  ;;  %v8824_v20 = vpop.f32.mrf.mxu1 }
 0x2b1   :  { %vm10076_vm2 = vmmov %vm10068_vm1  ;;  %10077 = vst [vmem:[#allocation12_spill] sm:$0xff] %v8824_v20 }
 0x2b2   :  { %v3321_v27 = vadd.f32 %v3320_v44, %v3319_v43 }
 0x2b4   :  { %vm3322_vm7 = vcmp.eq.f32.partialorder %v8048_v26, %v3321_v27  ;;  %vm3323_vm9 = vcmp.eq.f32.partialorder %v8050_v14, %v3321_v27  ;;  %vm3324_vm13 = vcmp.eq.f32.partialorder %v8054_v46, %v3321_v27  ;;  %vm3325_vm6 = vcmp.eq.f32.partialorder %v10034_v21, %v3321_v27  ;;  %v3519_v26 = vld [vmem:[%s9448_s3 + $0x198] sm:$0xff] }
 0x2b5   :  { %vm3326_vm10 = vcmp.eq.f32.partialorder %v10035_v0, %v3321_v27  ;;  %v4234_v2 = vsel %vm3322_vm7, 1.0, %v10061_v60  ;;  %v4235_v34 = vsel %vm3323_vm9, 1.0, %v10061_v60  ;;  %v4236_v38 = vsel %vm3324_vm13, 1.0, %v10061_v60  ;;  %v3547_v14 = vld [vmem:[%s9448_s3 + $0x278] sm:$0xff]  ;;  %3749 = vmatmul.f32.gmra.mxu1 %v3519_v26 }
 0x2b6   :  { %v4237_v19 = vsel %vm3325_vm6, 1.0, %v10061_v60  ;;  %vm3327_vm0 = vcmp.eq.f32.partialorder %v10036_v55, %v3321_v27  ;;  %v3346_v46 = vmul.f32 %v4234_v2, %v8571_v40  ;;  %v3347_v21 = vmul.f32 %v4235_v34, %v8599_v29  ;;  %3833 = vmatmul.f32.gmra.mxu2 %v3547_v14  ;;  %v10079_v2 = vld [vmem:[#allocation3_spill] sm:$0xff] }
 0x2b7   :  { %v3348_v0 = vmul.f32 %v4236_v38, %v8620_v58  ;;  %v4238_v33 = vsel %vm3326_vm10, 1.0, %v10061_v60  ;;  %vm3328_vm15 = vcmp.eq.f32.partialorder %v8449_v13, %v3321_v27  ;;  %v3349_v17 = vmul.f32 %v4237_v19, %v8636_v28 }
 0x2b8   :  { %v3354_v12 = vsel %vm10070_vm4, %v3346_v46, 0.0  ;;  %v3355_v48 = vsel %vm10071_vm11, %v3347_v21, 0.0  ;;  %v4239_v55 = vsel %vm3327_vm0, 1.0, %v10061_v60  ;;  %vm3329_vm3 = vcmp.eq.f32.partialorder %v8388_v4, %v3321_v27  ;;  %v3550_v27 = vld [vmem:[%s9448_s3 + $0x290] sm:$0xff]  ;;  %v8838_v21 = vpop.f32.mrf.mxu2 }
 0x2b9   :  { %v3356_v22 = vadd.f32 %v3355_v48, %v3354_v12  ;;  %v3350_v40 = vmul.f32 %v4238_v33, %v8651_v24  ;;  %v3357_v29 = vsel %vm10072_vm14, %v3348_v0, 0.0  ;;  %v4240_v58 = vsel %vm3328_vm15, 1.0, %v10061_v60  ;;  %v10081_v0 = vld [vmem:[#allocation2_spill] sm:$0xff]  ;;  %v8841_v48 = vpop.f32.mrf.mxu1 }
 0x2ba   :  { %v3351_v13 = vmul.f32 %v4239_v55, %v8692_v59  ;;  %v3359_v28 = vsel %vm10073_vm12, %v3349_v17, 0.0  ;;  %v4241_v63 = vsel %vm3329_vm3, 1.0, %v10061_v60  ;;  %v3352_v4 = vmul.f32 %v4240_v58, %v8712_v57  ;;  %10082 = vst [vmem:[#allocation9_spill] sm:$0xff] %v8841_v48  ;;  %v10084_v58 = vld [vmem:[#allocation7_spill] sm:$0xff]  ;;  %v4499_v60 = vld [vmem:[%s9447_s0 + $0x70] sm:$0xff] }
 0x2bb   :  { %v3358_v8 = vadd.f32 %v3357_v29, %v3356_v22  ;;  %v3361_v24 = vsel %vm10074_vm5, %v3350_v40, 0.0  ;;  %v3353_v59 = vmul.f32 %v4241_v63, %v8738_v23  ;;  %v3521_v23 = vld [vmem:[%s9448_s3 + $0x1a8] sm:$0xff]  ;;  %v3551_v40 = vld [vmem:[%s9448_s3 + $0x298] sm:$0xff]  ;;  %vm3408_vm7 = vcmask 523264  }
 0x2bc   :  { %v3363_v10 = vsel %vm10075_vm8, %v3351_v13, 0.0  ;;  %v3365_v57 = vsel %vm10068_vm1, %v3352_v4, 0.0  ;;  %v3523_v29 = vld [vmem:[%s9448_s3 + $0x1b8] sm:$0xff]  ;;  %vm10137_vm9 = vcmask 1043456  }
 0x2bd   :  { %v3360_v52 = vadd.f32 %v3359_v28, %v3358_v8  ;;  %3752 = vmatmul.f32.gmra.mxu1 %v3520_v49  ;;  %v3367_v61 = vsel %vm10076_vm2, %v3353_v59, 0.0  ;;  %v10085_v28 = vld [vmem:[#allocation8_spill] sm:$0xff]  ;;  %v3524_v49 = vld [vmem:[%s9448_s3 + $0x1c0] sm:$0xff] }
 0x2be   :  { %3836 = vmatmul.f32.gmra.mxu2 %v3548_v62  ;;  %v10086_v62 = vld [vmem:[#allocation4_spill] sm:$0xff]  ;;  %v3552_v59 = vld [vmem:[%s9448_s3 + $0x2a0] sm:$0xff] }
 0x2bf   :  { %v3362_v25 = vadd.f32 %v3361_v24, %v3360_v52  ;;  %v3401_v24 = vld [vmem:[%s9450_s5] sm:$0xff] }
 0x2c0   :  { %v8860_v52 = vpop.f32.mrf.mxu2 }
 0x2c1   :  { %v3364_v36 = vadd.f32 %v3363_v10, %v3362_v25  ;;  %v4498_v25 = vld [vmem:[%s9447_s0 + $0x78] sm:$0xff]  ;;  %v8888_v10 = vpop.f32.mrf.mxu1 }
 0x2c3   :  { %v3366_v5 = vadd.f32 %v3365_v57, %v3364_v36  ;;  %v4500_v57 = vld [vmem:[%s9447_s0 + $0x68] sm:$0xff] }
 0x2c5   :  { %v3368_v11 = vadd.f32 %v3367_v61, %v3366_v5  ;;  %3755 = vmatmul.f32.gmra.mxu1 %v3521_v23  ;;  %v3402_v5 = vld [vmem:[%s9450_s5 + $0x8] sm:$0xff]  ;;  %v4501_v61 = vld [vmem:[%s9447_s0 + $0x60] sm:$0xff]  ;;  %v4502_v23 = vld [vmem:[%s9447_s0 + $0x58] sm:$0xff] }
 0x2c6   :  { %3839 = vmatmul.f32.gmra.mxu2 %v3549_v9  ;;  %v3405_v9 = vld [vmem:[%s9450_s5 + $0x20] sm:$0xff] }
 0x2c7   :  { %v3376_v6 = vsub.f32 %v8750_v41, %v3368_v11  ;;  %v3375_v37 = vsub.f32 %v8727_v56, %v3368_v11  ;;  %v3374_v54 = vsub.f32 %v8721_v30, %v3368_v11  ;;  %v3373_v1 = vsub.f32 %v8717_v16, %v3368_v11 }
 0x2c8   :  { %v3372_v18 = vsub.f32 %v8686_v51, %v3368_v11  ;;  %v3371_v56 = vsub.f32 %v8682_v50, %v3368_v11  ;;  %v3370_v44 = vsub.f32 %v8675_v45, %v3368_v11  ;;  %v3522_v51 = vld [vmem:[%s9448_s3 + $0x1b0] sm:$0xff]  ;;  %v3369_v19 = vsub.f32 %v8671_v15, %v3368_v11  ;;  %v10080_v45 = vld [vmem:[#allocation5_spill] sm:$0xff]  ;;  %v10083_v15 = vld [vmem:[#allocation6_spill] sm:$0xff]  ;;  %v8893_v36 = vpop.f32.mrf.mxu2 }
 0x2c9   :  { %v3384_v31 = vmax.f32 %v3376_v6, 0.0  ;;  %v3383_v3 = vmax.f32 %v3375_v37, 0.0  ;;  %v3382_v35 = vmax.f32 %v3374_v54, 0.0  ;;  %v3381_v41 = vmax.f32 %v3373_v1, 0.0  ;;  %v3525_v11 = vld [vmem:[%s9448_s3 + $0x1c8] sm:$0xff]  ;;  %v4503_v37 = vld [vmem:[%s9447_s0 + $0x50] sm:$0xff]  ;;  %v8921_v54 = vpop.f32.mrf.mxu1 }
 0x2ca   :  { %v3380_v16 = vmax.f32 %v3372_v18, 0.0  ;;  %v3379_v50 = vmax.f32 %v3371_v56, 0.0  ;;  %v3378_v46 = vmax.f32 %v3370_v44, 0.0  ;;  %v3377_v12 = vmax.f32 %v3369_v19, 0.0  ;;  %v3553_v6 = vld [vmem:[%s9448_s3 + $0x2a8] sm:$0xff]  ;;  %v3526_v18 = vld [vmem:[%s9448_s3 + $0x1d0] sm:$0xff] }
 0x2cb   :  { %v3392_v42 = vperm.slane %v3384_v31, 0  ;;  %v3391_v53 = vperm.slane %v3383_v3, 0  ;;  %v3390_v43 = vperm.slane %v3382_v35, 0  ;;  %v3389_v38 = vperm.slane %v3381_v41, 0  ;;  %v4504_v31 = vld [vmem:[%s9447_s0 + $0x48] sm:$0xff]  ;;  %v3403_v3 = vld [vmem:[%s9450_s5 + $0x10] sm:$0xff] }
 0x2cc   :  { %v3388_v14 = vperm.slane %v3380_v16, 0  ;;  %v3387_v17 = vperm.slane %v3379_v50, 0  ;;  %v3386_v22 = vperm.slane %v3378_v46, 0  ;;  %v3385_v13 = vperm.slane %v3377_v12, 0  ;;  %v4505_v35 = vld [vmem:[%s9447_s0 + $0x40] sm:$0xff]  ;;  %v3554_v41 = vld [vmem:[%s9448_s3 + $0x2b0] sm:$0xff] }
 0x2cd   :  { %v3400_v30 = vmul.f32 %v3392_v42, %v10078_v47  ;;  %v3399_v34 = vmul.f32 %v3391_v53, %v10079_v2  ;;  %3758 = vmatmul.f32.gmra.mxu1 %v3522_v51  ;;  %v3398_v26 = vmul.f32 %v3390_v43, %v10080_v45  ;;  %v3397_v33 = vmul.f32 %v3389_v38, %v10081_v0  ;;  %v3406_v42 = vld [vmem:[%s9450_s5 + $0x28] sm:$0xff]  ;;  %v4506_v53 = vld [vmem:[%s9447_s0 + $0x38] sm:$0xff]  ;;  %v4507_v56 = vld [vmem:[%s9447_s0 + $0x30] sm:$0xff] }
 0x2ce   :  { %3842 = vmatmul.f32.gmra.mxu2 %v3550_v27  ;;  %v3396_v55 = vmul.f32 %v3388_v14, %v10083_v15  ;;  %v3395_v8 = vmul.f32 %v3387_v17, %v10084_v58  ;;  %v3394_v63 = vmul.f32 %v3386_v22, %v10085_v28  ;;  %v3393_v4 = vmul.f32 %v3385_v13, %v10086_v62  ;;  %v3404_v16 = vld [vmem:[%s9450_s5 + $0x18] sm:$0xff]  ;;  %v4509_v44 = vld [vmem:[%s9447_s0 + $0x20] sm:$0xff]  ;;  %v3407_v51 = vld [vmem:[%s9450_s5 + $0x30] sm:$0xff] }
 0x2cf   :  { %3438 = vmatpush.msra.mxu0 %v3400_v30  ;;  %4253 = vmatpush.msra.mxu3 %v3400_v30  ;;  %v4508_v30 = vld [vmem:[%s9447_s0 + $0x28] sm:$0xff]  ;;  %v3527_v27 = vld [vmem:[%s9448_s3 + $0x1d8] sm:$0xff]  ;;  %v4511_v38 = vld [vmem:[%s9447_s0 + $0x10] sm:$0xff] }
 0x2d0   :  { %v8923_v1 = vpop.f32.mrf.mxu2  ;;  %v4510_v2 = vld [vmem:[%s9447_s0 + $0x18] sm:$0xff]  ;;  %v4512_v19 = vld [vmem:[%s9447_s0 + $0x8] sm:$0xff]  ;;  %v3468_v45 = vld [vmem:[%s9448_s3] sm:$0xff] }
 0x2d1   :  { %3439 = vmatpush.msra.mxu0 %v3399_v34  ;;  %4254 = vmatpush.msra.mxu3 %v3399_v34  ;;  %v8956_v43 = vpop.f32.mrf.mxu1  ;;  %v3555_v34 = vld [vmem:[%s9448_s3 + $0x2b8] sm:$0xff]  ;;  %v3528_v46 = vld [vmem:[%s9448_s3 + $0x1e0] sm:$0xff]  ;;  %v3557_v0 = vld [vmem:[%s9448_s3 + $0x2c8] sm:$0xff] }
 0x2d2   :  { %v3469_v12 = vld [vmem:[%s9448_s3 + $0x8] sm:$0xff]  ;;  %v3530_v58 = vld [vmem:[%s9448_s3 + $0x1f0] sm:$0xff]  ;;  %v3531_v62 = vld [vmem:[%s9448_s3 + $0x1f8] sm:$0xff] }
 0x2d3   :  { %3440 = vmatpush.msra.mxu0 %v3398_v26  ;;  %4255 = vmatpush.msra.mxu3 %v3398_v26  ;;  %v4513_v26 = vld [vmem:[%s9447_s0] sm:$0xff]  ;;  %v3529_v15 = vld [vmem:[%s9448_s3 + $0x1e8] sm:$0xff] }
 0x2d5   :  { %3441 = vmatpush.msra.mxu0 %v3397_v33  ;;  %4256 = vmatpush.msra.mxu3 %v3397_v33  ;;  %v3556_v33 = vld [vmem:[%s9448_s3 + $0x2c0] sm:$0xff] }
 0x2d6   :  { %3761 = vmatmul.f32.gmra.mxu1 %v3523_v29  ;;  %3845 = vmatmul.f32.gmra.mxu2 %v3551_v40  ;;  %v3470_v29 = vld [vmem:[%s9448_s3 + $0x10] sm:$0xff] }
 0x2d7   :  { %3442 = vmatpush.msra.mxu0 %v3396_v55  ;;  %4257 = vmatpush.msra.mxu3 %v3396_v55  ;;  %v3558_v55 = vld [vmem:[%s9448_s3 + $0x2d0] sm:$0xff] }
 0x2d8   :  { %v8951_v47 = vpop.f32.mrf.mxu2 }
 0x2d9   :  { %3443 = vmatpush.msra.mxu0 %v3395_v8  ;;  %4258 = vmatpush.msra.mxu3 %v3395_v8  ;;  %v8992_v14 = vpop.f32.mrf.mxu1  ;;  %v3559_v8 = vld [vmem:[%s9448_s3 + $0x2d8] sm:$0xff] }
 0x2db   :  { %3444 = vmatpush.msra.mxu0 %v3394_v63  ;;  %4259 = vmatpush.msra.mxu3 %v3394_v63  ;;  %v3471_v63 = vld [vmem:[%s9448_s3 + $0x18] sm:$0xff] }
 0x2dd   :  { %3445 = vmatpush.msra.mxu0 %v3393_v4  ;;  %4260 = vmatpush.msra.mxu3 %v3393_v4  ;;  %v3560_v4 = vld [vmem:[%s9448_s3 + $0x2e0] sm:$0xff] }
 0x2de   :  { %4242 = vmatmul.msk.f32.vlgmr.msra.gmra.mxu0 %vm3408_vm7, %v3401_v24  ;;  %3764 = vmatmul.f32.gmra.mxu1 %v3524_v49 }
 0x2df   :  { %4263 = vmatpush.msrb.mxu3 %v4498_v25  ;;  %3580 = vmatpush.msrb.mxu0 %v4498_v25  ;;  %v3472_v25 = vld [vmem:[%s9448_s3 + $0x20] sm:$0xff] }
 0x2e0   :  { %3848 = vmatmul.f32.gmra.mxu2 %v3552_v59  ;;  %4246 = vmatmul.msk.f32.vlgmr.msra.gmra.mxu3 %vm3408_vm7, %v3405_v9  ;;  %v8981_v50 = vpop.f32.mrf.mxu2  ;;  %v3561_v59 = vld [vmem:[%s9448_s3 + $0x2e8] sm:$0xff]  ;;  %v3474_v9 = vld [vmem:[%s9448_s3 + $0x30] sm:$0xff] }
 0x2e1   :  { %4266 = vmatpush.msrb.mxu3 %v4499_v60  ;;  %3581 = vmatpush.msrb.mxu0 %v4499_v60  ;;  %v9014_v22 = vpop.f32.mrf.mxu1 }
 0x2e3   :  { %4269 = vmatpush.msrb.mxu3 %v4500_v57  ;;  %3582 = vmatpush.msrb.mxu0 %v4500_v57  ;;  %v3473_v57 = vld [vmem:[%s9448_s3 + $0x28] sm:$0xff] }
 0x2e5   :  { %4272 = vmatpush.msrb.mxu3 %v4501_v61  ;;  %3583 = vmatpush.msrb.mxu0 %v4501_v61  ;;  %v3562_v61 = vld [vmem:[%s9448_s3 + $0x2f0] sm:$0xff] }
 0x2e6   :  { %4243 = vmatmul.msk.f32.gmra.mxu0 %vm3408_vm7, %v3402_v5  ;;  %3767 = vmatmul.f32.gmra.mxu1 %v3525_v11 }
 0x2e7   :  { %4275 = vmatpush.msrb.mxu3 %v4502_v23  ;;  %3584 = vmatpush.msrb.mxu0 %v4502_v23  ;;  %v3563_v23 = vld [vmem:[%s9448_s3 + $0x2f8] sm:$0xff] }
 0x2e8   :  { %3851 = vmatmul.f32.gmra.mxu2 %v3553_v6  ;;  %4247 = vmatmul.msk.f32.gmra.mxu3 %vm3408_vm7, %v3406_v42  ;;  %v9003_v17 = vpop.f32.mrf.mxu2  ;;  %v3476_v42 = vld [vmem:[%s9448_s3 + $0x40] sm:$0xff] }
 0x2e9   :  { %4278 = vmatpush.msrb.mxu3 %v4503_v37  ;;  %3585 = vmatpush.msrb.mxu0 %v4503_v37  ;;  %10087 = vst [vmem:[#allocation11_spill] sm:$0xff] %v9003_v17  ;;  %v9027_v13 = vpop.f32.mrf.mxu1 }
 0x2eb   :  { %4281 = vmatpush.msrb.mxu3 %v4504_v31  ;;  %3586 = vmatpush.msrb.mxu0 %v4504_v31  ;;  %v3475_v31 = vld [vmem:[%s9448_s3 + $0x38] sm:$0xff] }
 0x2ed   :  { %4284 = vmatpush.msrb.mxu3 %v4505_v35  ;;  %3587 = vmatpush.msrb.mxu0 %v4505_v35 }
 0x2ee   :  { %4244 = vmatmul.msk.f32.gmra.mxu0 %vm3408_vm7, %v3403_v3  ;;  %3770 = vmatmul.f32.gmra.mxu1 %v3526_v18  ;;  %v3564_v3 = vld [vmem:[%s9448_s3 + $0x300] sm:$0xff] }
 0x2ef   :  { %4287 = vmatpush.msrb.mxu3 %v4506_v53  ;;  %3588 = vmatpush.msrb.mxu0 %v4506_v53  ;;  %v3565_v53 = vld [vmem:[%s9448_s3 + $0x308] sm:$0xff] }
 0x2f0   :  { %3854 = vmatmul.f32.gmra.mxu2 %v3554_v41  ;;  %4248 = vmatmul.msk.f32.gmra.mxu3 %vm3408_vm7, %v3407_v51  ;;  %v9016_v40 = vpop.f32.mrf.mxu2 }
 0x2f1   :  { %4290 = vmatpush.msrb.mxu3 %v4507_v56  ;;  %3589 = vmatpush.msrb.mxu0 %v4507_v56  ;;  %10088 = vst [vmem:[#allocation13_spill] sm:$0xff] %v9016_v40  ;;  %v9042_v49 = vpop.f32.mrf.mxu1 }
 0x2f3   :  { %4293 = vmatpush.msrb.mxu3 %v4508_v30  ;;  %3590 = vmatpush.msrb.mxu0 %v4508_v30  ;;  %v3477_v30 = vld [vmem:[%s9448_s3 + $0x48] sm:$0xff] }
 0x2f5   :  { %4296 = vmatpush.msrb.mxu3 %v4509_v44  ;;  %3591 = vmatpush.msrb.mxu0 %v4509_v44  ;;  %v3478_v44 = vld [vmem:[%s9448_s3 + $0x50] sm:$0xff] }
 0x2f6   :  { %4245 = vmatmul.msk.f32.gmra.mxu0 %vm3408_vm7, %v3404_v16  ;;  %3773 = vmatmul.f32.gmra.mxu1 %v3527_v27  ;;  %v3566_v16 = vld [vmem:[%s9448_s3 + $0x310] sm:$0xff] }
 0x2f7   :  { %4299 = vmatpush.msrb.mxu3 %v4510_v2  ;;  %3592 = vmatpush.msrb.mxu0 %v4510_v2  ;;  %v3567_v2 = vld [vmem:[%s9448_s3 + $0x318] sm:$0xff] }
 0x2f8   :  { %3857 = vmatmul.f32.gmra.mxu2 %v3555_v34  ;;  %v9029_v28 = vpop.f32.mrf.mxu2  ;;  %v3479_v34 = vld [vmem:[%s9448_s3 + $0x58] sm:$0xff] }
 0x2f9   :  { %4302 = vmatpush.msrb.mxu3 %v4511_v38  ;;  %3593 = vmatpush.msrb.mxu0 %v4511_v38  ;;  %10089 = vst [vmem:[#allocation14_spill] sm:$0xff] %v9029_v28  ;;  %v9055_v5 = vpop.f32.mrf.mxu1 }
 0x2fb   :  { %4305 = vmatpush.msrb.mxu3 %v4512_v19  ;;  %3594 = vmatpush.msrb.mxu0 %v4512_v19  ;;  %v3568_v19 = vld [vmem:[%s9448_s3 + $0x320] sm:$0xff] }
 0x2fd   :  { %4308 = vmatpush.msrb.mxu3 %v4513_v26  ;;  %3595 = vmatpush.msrb.mxu0 %v4513_v26 }
 0x2fe   :  { %3596 = vmatmul.f32.vlgmr.msrb.gmra.mxu0 %v3468_v45  ;;  %3863 = vmatmul.f32.vlgmr.msrb.gmra.mxu3 %v3557_v0 }
 0x2ff   :  { %3776 = vmatmul.f32.gmra.mxu1 %v3528_v46  ;;  %v3480_v46 = vld [vmem:[%s9448_s3 + $0x60] sm:$0xff] }
 0x300   :  { %3860 = vmatmul.f32.gmra.mxu2 %v3556_v33  ;;  %v9040_v24 = vpop.f32.mrf.mxu2  ;;  %v3569_v33 = vld [vmem:[%s9448_s3 + $0x328] sm:$0xff] }
 0x301   :  { %10090 = vst [vmem:[#allocation15_spill] sm:$0xff] %v9040_v24  ;;  %v9068_v6 = vpop.f32.mrf.mxu1 }
 0x306   :  { %3599 = vmatmul.f32.gmra.mxu0 %v3469_v12  ;;  %3866 = vmatmul.f32.gmra.mxu3 %v3558_v55  ;;  %v3481_v55 = vld [vmem:[%s9448_s3 + $0x68] sm:$0xff] }
 0x307   :  { %3779 = vmatmul.f32.gmra.mxu1 %v3529_v15 }
 0x309   :  { %v9078_v35 = vpop.f32.mrf.mxu1 }
 0x30e   :  { %3602 = vmatmul.f32.gmra.mxu0 %v3470_v29  ;;  %3869 = vmatmul.f32.gmra.mxu3 %v3559_v8 }
 0x30f   :  { %3782 = vmatmul.f32.gmra.mxu1 %v3530_v58  ;;  %v3570_v58 = vld [vmem:[%s9448_s3 + $0x330] sm:$0xff] }
 0x311   :  { %v9090_v56 = vpop.f32.mrf.mxu1 }
 0x316   :  { %3605 = vmatmul.f32.gmra.mxu0 %v3471_v63  ;;  %3872 = vmatmul.f32.gmra.mxu3 %v3560_v4  ;;  %v3482_v4 = vld [vmem:[%s9448_s3 + $0x70] sm:$0xff] }
 0x317   :  { %3785 = vmatmul.f32.gmra.mxu1 %v3531_v62 }
 0x319   :  { %v9103_v51 = vpop.f32.mrf.mxu1 }
 0x31e   :  { %3608 = vmatmul.f32.gmra.mxu0 %v3472_v25  ;;  %3875 = vmatmul.f32.gmra.mxu3 %v3561_v59  ;;  %v3571_v59 = vld [vmem:[%s9448_s3 + $0x338] sm:$0xff] }
 0x320   :  { %v9050_v60 = vpop.f32.mrf.mxu2 }
 0x321   :  { %10091 = vst [vmem:[#allocation17_spill] sm:$0xff] %v9050_v60  ;;  %v9116_v45 = vpop.f32.mrf.mxu1 }
 0x326   :  { %3611 = vmatmul.f32.gmra.mxu0 %v3473_v57  ;;  %3878 = vmatmul.f32.gmra.mxu3 %v3562_v61 }
 0x328   :  { %v9060_v11 = vpop.f32.mrf.mxu2 }
 0x329   :  { %10092 = vst [vmem:[#allocation16_spill] sm:$0xff] %v9060_v11  ;;  %v9129_v12 = vpop.f32.mrf.mxu1 }
 0x32e   :  { %3614 = vmatmul.f32.gmra.mxu0 %v3474_v9  ;;  %3881 = vmatmul.f32.gmra.mxu3 %v3563_v23  ;;  %v3483_v9 = vld [vmem:[%s9448_s3 + $0x78] sm:$0xff] }
 0x330   :  { %v9070_v37 = vpop.f32.mrf.mxu2 }
 0x331   :  { %10093 = vst [vmem:[#allocation26_spill] sm:$0xff] %v9070_v37  ;;  %v9142_v63 = vpop.f32.mrf.mxu1  ;;  %v3497_v37 = vld [vmem:[%s9448_s3 + $0xe8] sm:$0xff] }
 0x332   :  { %10100 = vst [vmem:[#allocation24_spill] sm:$0xff] %v9142_v63 }
 0x336   :  { %3617 = vmatmul.f32.gmra.mxu0 %v3475_v31  ;;  %3884 = vmatmul.f32.gmra.mxu3 %v3564_v3 }
 0x339   :  { %v9080_v18 = vpop.f32.mrf.mxu2  ;;  %v9169_v31 = vpop.f32.mrf.mxu1 }
 0x33a   :  { %10094 = vst [vmem:[#allocation27_spill] sm:$0xff] %v9080_v18 }
 0x33b   :  { %10103 = vst [vmem:[#allocation29_spill] sm:$0xff] %v9169_v31 }
 0x33e   :  { %3620 = vmatmul.f32.gmra.mxu0 %v3476_v42  ;;  %3887 = vmatmul.f32.gmra.mxu3 %v3565_v53  ;;  %v3484_v53 = vld [vmem:[%s9448_s3 + $0x80] sm:$0xff] }
 0x341   :  { %v9088_v41 = vpop.f32.mrf.mxu2 }
 0x342   :  { %10095 = vst [vmem:[#allocation18_spill] sm:$0xff] %v9088_v41 }
 0x346   :  { %3623 = vmatmul.f32.gmra.mxu0 %v3477_v30  ;;  %3890 = vmatmul.f32.gmra.mxu3 %v3566_v16 }
 0x349   :  { %v9101_v27 = vpop.f32.mrf.mxu2 }
 0x34a   :  { %10096 = vst [vmem:[#allocation20_spill] sm:$0xff] %v9101_v27 }
 0x34e   :  { %3626 = vmatmul.f32.gmra.mxu0 %v3478_v44  ;;  %3893 = vmatmul.f32.gmra.mxu3 %v3567_v2  ;;  %v3572_v44 = vld [vmem:[%s9448_s3 + $0x340] sm:$0xff]  ;;  %v9183_v2 = vpop.f32.mrf.mxu1 }
 0x34f   :  { %10104 = vst [vmem:[#allocation28_spill] sm:$0xff] %v9183_v2 }
 0x351   :  { %v9111_v38 = vpop.f32.mrf.mxu2 }
 0x352   :  { %10097 = vst [vmem:[#allocation22_spill] sm:$0xff] %v9111_v38 }
 0x356   :  { %3629 = vmatmul.f32.gmra.mxu0 %v3479_v34  ;;  %3896 = vmatmul.f32.gmra.mxu3 %v3568_v19  ;;  %v3485_v19 = vld [vmem:[%s9448_s3 + $0x88] sm:$0xff] }
 0x359   :  { %v9121_v0 = vpop.f32.mrf.mxu2 }
 0x35a   :  { %10098 = vst [vmem:[#allocation21_spill] sm:$0xff] %v9121_v0 }
 0x35b   :  { %v3447_v26 = vpop.f32.mrf.mxu0 }
 0x35c   :  { %4134 = vst [vmem:[%s9449_s8] sm:$0xff] %v3447_v26 }
 0x35e   :  { %3632 = vmatmul.f32.gmra.mxu0 %v3480_v46  ;;  %3899 = vmatmul.f32.gmra.mxu3 %v3569_v33  ;;  %v9195_v46 = vpop.f32.mrf.mxu1 }
 0x35f   :  { %10106 = vst [vmem:[#allocation32_spill] sm:$0xff] %v9195_v46 }
 0x363   :  { %v3450_v15 = vpop.f32.mrf.mxu0  ;;  %v9137_v29 = vpop.f32.mrf.mxu2 }
 0x364   :  { %4135 = vst [vmem:[%s9449_s8 + $0x8] sm:$0xff] %v3450_v15  ;;  %v3459_v8 = vpop.f32.mrf.mxu3  ;;  %v3486_v15 = vld [vmem:[%s9448_s3 + $0x90] sm:$0xff] }
 0x365   :  { %10099 = vst [vmem:[#allocation23_spill] sm:$0xff] %v9137_v29 }
 0x366   :  { %3635 = vmatmul.f32.gmra.mxu0 %v3481_v55  ;;  %3902 = vmatmul.f32.gmra.mxu3 %v3570_v58  ;;  %4138 = vst [vmem:[%s9449_s8 + $0x20] sm:$0xff] %v3459_v8  ;;  %v3574_v55 = vld [vmem:[%s9448_s3 + $0x350] sm:$0xff]  ;;  %v9207_v8 = vpop.f32.mrf.mxu1 }
 0x367   :  { %10107 = vst [vmem:[#allocation34_spill] sm:$0xff] %v9207_v8  ;;  %v3493_v8 = vld [vmem:[%s9448_s3 + $0xc8] sm:$0xff] }
 0x36b   :  { %v3453_v62 = vpop.f32.mrf.mxu0  ;;  %v9153_v25 = vpop.f32.mrf.mxu2 }
 0x36c   :  { %4136 = vst [vmem:[%s9449_s8 + $0x10] sm:$0xff] %v3453_v62  ;;  %v3462_v57 = vpop.f32.mrf.mxu3 }
 0x36d   :  { %10101 = vst [vmem:[#allocation19_spill] sm:$0xff] %v9153_v25 }
 0x36e   :  { %3638 = vmatmul.f32.gmra.mxu0 %v3482_v4  ;;  %3905 = vmatmul.f32.gmra.mxu3 %v3571_v59  ;;  %4139 = vst [vmem:[%s9449_s8 + $0x28] sm:$0xff] %v3462_v57  ;;  %v3487_v4 = vld [vmem:[%s9448_s3 + $0x98] sm:$0xff] }
 0x36f   :  { %v3575_v59 = vld [vmem:[%s9448_s3 + $0x358] sm:$0xff] }
 0x373   :  { %v3456_v61 = vpop.f32.mrf.mxu0  ;;  %v9167_v23 = vpop.f32.mrf.mxu2 }
 0x374   :  { %4137 = vst [vmem:[%s9449_s8 + $0x18] sm:$0xff] %v3456_v61  ;;  %v3465_v3 = vpop.f32.mrf.mxu3 }
 0x375   :  { %10102 = vst [vmem:[#allocation25_spill] sm:$0xff] %v9167_v23 }
 0x376   :  { %3641 = vmatmul.f32.gmra.mxu0 %v3483_v9  ;;  %4140 = vst [vmem:[%s9449_s8 + $0x30] sm:$0xff] %v3465_v3  ;;  %3908 = vmatmul.f32.gmra.mxu3 %v3572_v44  ;;  %v3488_v9 = vld [vmem:[%s9448_s3 + $0xa0] sm:$0xff]  ;;  %v9224_v3 = vpop.f32.mrf.mxu1  ;;  %v3489_v44 = vld [vmem:[%s9448_s3 + $0xa8] sm:$0xff] }
 0x377   :  { %10108 = vst [vmem:[#allocation30_spill] sm:$0xff] %v9224_v3 }
 0x37b   :  { %v9171_v42 = vpop.f32.mrf.mxu0  ;;  %v3858_v30 = vpop.f32.mrf.mxu2 }
 0x37c   :  { %v3980_v16 = vmul.f32 %v3858_v30, %v8805_v32  ;;  %v3573_v32 = vld [vmem:[%s9448_s3 + $0x348] sm:$0xff] }
 0x37e   :  { %3644 = vmatmul.f32.gmra.mxu0 %v3484_v53  ;;  %4046 = vmatpush.msra.mxu3 %v3980_v16  ;;  %v3576_v53 = vld [vmem:[%s9448_s3 + $0x360] sm:$0xff] }
 0x37f   :  { %3911 = vmatmul.f32.gmra.mxu3 %v3573_v32  ;;  %v9239_v32 = vpop.f32.mrf.mxu1 }
 0x380   :  { %10109 = vst [vmem:[#allocation33_spill] sm:$0xff] %v9239_v32  ;;  %v3494_v32 = vld [vmem:[%s9448_s3 + $0xd0] sm:$0xff] }
 0x381   :  { %v9190_v26 = vpop.f32.mrf.mxu3 }
 0x382   :  { %10105 = vst [vmem:[#allocation31_spill] sm:$0xff] %v9190_v26 }
 0x383   :  { %v9185_v34 = vpop.f32.mrf.mxu0 }
 0x386   :  { %3647 = vmatmul.f32.gmra.mxu0 %v3485_v19  ;;  %v3577_v19 = vld [vmem:[%s9448_s3 + $0x368] sm:$0xff] }
 0x387   :  { %3914 = vmatmul.f32.gmra.mxu3 %v3574_v55  ;;  %v3490_v55 = vld [vmem:[%s9448_s3 + $0xb0] sm:$0xff] }
 0x389   :  { %v9205_v58 = vpop.f32.mrf.mxu3 }
 0x38b   :  { %v9197_v33 = vpop.f32.mrf.mxu0 }
 0x38e   :  { %3650 = vmatmul.f32.gmra.mxu0 %v3486_v15 }
 0x38f   :  { %3917 = vmatmul.f32.gmra.mxu3 %v3575_v59  ;;  %v3578_v59 = vld [vmem:[%s9448_s3 + $0x370] sm:$0xff] }
 0x391   :  { %v9217_v57 = vpop.f32.mrf.mxu3 }
 0x393   :  { %v9209_v62 = vpop.f32.mrf.mxu0 }
 0x396   :  { %3653 = vmatmul.f32.gmra.mxu0 %v3487_v4 }
 0x397   :  { %3920 = vmatmul.f32.gmra.mxu3 %v3576_v53 }
 0x399   :  { %v9229_v30 = vpop.f32.mrf.mxu3 }
 0x39b   :  { %v9219_v61 = vpop.f32.mrf.mxu0 }
 0x39e   :  { %3656 = vmatmul.f32.gmra.mxu0 %v3488_v9  ;;  %v9251_v9 = vpop.f32.mrf.mxu1 }
 0x39f   :  { %3923 = vmatmul.f32.gmra.mxu3 %v3577_v19  ;;  %10110 = vst [vmem:[#allocation10_spill] sm:$0xff] %v9251_v9  ;;  %v3579_v19 = vld [vmem:[%s9448_s3 + $0x378] sm:$0xff] }
 0x3a1   :  { %v9246_v4 = vpop.f32.mrf.mxu3 }
 0x3a3   :  { %v9231_v16 = vpop.f32.mrf.mxu0 }
 0x3a6   :  { %3659 = vmatmul.f32.gmra.mxu0 %v3489_v44  ;;  %v3491_v44 = vld [vmem:[%s9448_s3 + $0xb8] sm:$0xff]  ;;  %v9261_v31 = vpop.f32.mrf.mxu1 }
 0x3a7   :  { %3926 = vmatmul.f32.gmra.mxu3 %v3578_v59 }
 0x3a9   :  { %v9259_v63 = vpop.f32.mrf.mxu3 }
 0x3ab   :  { %v9241_v15 = vpop.f32.mrf.mxu0 }
 0x3ae   :  { %3662 = vmatmul.f32.gmra.mxu0 %v3490_v55  ;;  %v3492_v55 = vld [vmem:[%s9448_s3 + $0xc0] sm:$0xff]  ;;  %v3768_v3 = vpop.f32.mrf.mxu1 }
 0x3af   :  { %3929 = vmatmul.f32.gmra.mxu3 %v3579_v19 }
 0x3b1   :  { %v9266_v59 = vpop.f32.mrf.mxu3 }
 0x3b3   :  { %v3618_v53 = vpop.f32.mrf.mxu0 }
 0x3b6   :  { %3665 = vmatmul.f32.gmra.mxu0 %v3491_v44  ;;  %v3771_v9 = vpop.f32.mrf.mxu1 }
 0x3b9   :  { %v9271_v44 = vpop.f32.mrf.mxu3 }
 0x3bb   :  { %v3621_v2 = vpop.f32.mrf.mxu0 }
 0x3be   :  { %3668 = vmatmul.f32.gmra.mxu0 %v3492_v55  ;;  %v3495_v55 = vld [vmem:[%s9448_s3 + $0xd8] sm:$0xff]  ;;  %v3774_v28 = vpop.f32.mrf.mxu1 }
 0x3c1   :  { %v9279_v40 = vpop.f32.mrf.mxu3 }
 0x3c3   :  { %v3624_v46 = vpop.f32.mrf.mxu0 }
 0x3c6   :  { %3671 = vmatmul.f32.gmra.mxu0 %v3493_v8  ;;  %v3496_v8 = vld [vmem:[%s9448_s3 + $0xe0] sm:$0xff]  ;;  %v3777_v11 = vpop.f32.mrf.mxu1 }
 0x3c9   :  { %v9284_v60 = vpop.f32.mrf.mxu3 }
 0x3cb   :  { %v3627_v19 = vpop.f32.mrf.mxu0 }
 0x3cc   :  { %v3959_v48 = vmul.f32 %v8838_v21, %v3627_v19  ;;  %v3953_v21 = vmul.f32 %v3777_v11, %v9219_v61 }
 0x3ce   :  { %3674 = vmatmul.f32.gmra.mxu0 %v3494_v32  ;;  %v3780_v27 = vpop.f32.mrf.mxu1 }
 0x3d1   :  { %v3894_v18 = vpop.f32.mrf.mxu3 }
 0x3d3   :  { %v3630_v17 = vpop.f32.mrf.mxu0 }
 0x3d4   :  { %v3960_v26 = vmul.f32 %v8860_v52, %v3630_v17  ;;  %v3954_v17 = vmul.f32 %v3780_v27, %v9231_v16 }
 0x3d6   :  { %3677 = vmatmul.f32.gmra.mxu0 %v3495_v55  ;;  %v3498_v55 = vld [vmem:[%s9448_s3 + $0xf0] sm:$0xff]  ;;  %v3783_v25 = vpop.f32.mrf.mxu1 }
 0x3d9   :  { %v3897_v38 = vpop.f32.mrf.mxu3 }
 0x3db   :  { %v3633_v24 = vpop.f32.mrf.mxu0 }
 0x3de   :  { %3680 = vmatmul.f32.gmra.mxu0 %v3496_v8 }
 0x3e3   :  { %v3636_v32 = vpop.f32.mrf.mxu0 }
 0x3e4   :  { %v3962_v23 = vmul.f32 %v8923_v1, %v3636_v32  ;;  %v10117_v32 = vld [vmem:[#allocation21_spill] sm:$0xff] }
 0x3e6   :  { %3683 = vmatmul.f32.gmra.mxu0 %v3497_v37  ;;  %v3961_v37 = vmul.f32 %v8893_v36, %v3633_v24  ;;  %v3955_v24 = vmul.f32 %v3783_v25, %v9241_v15  ;;  %v3949_v25 = vmul.f32 %v9261_v31, %v9171_v42  ;;  %v3990_v31 = vmul.f32 %v9279_v40, %v9055_v5  ;;  %v10114_v15 = vld [vmem:[#allocation25_spill] sm:$0xff] }
 0x3e7   :  { %v3985_v40 = vmul.f32 %v9229_v30, %v8956_v43 }
 0x3eb   :  { %v3639_v41 = vpop.f32.mrf.mxu0 }
 0x3ec   :  { %v3963_v29 = vmul.f32 %v8951_v47, %v3639_v41  ;;  %v3786_v47 = vpop.f32.mrf.mxu1  ;;  %v3957_v41 = vmul.f32 %v8807_v7, %v3621_v2  ;;  %v3951_v7 = vmul.f32 %v3771_v9, %v9197_v33  ;;  %v3993_v2 = vmul.f32 %v3897_v38, %v9090_v56  ;;  %v10115_v9 = vld [vmem:[#allocation19_spill] sm:$0xff] }
 0x3ed   :  { %v3956_v36 = vmul.f32 %v3786_v47, %v3618_v53  ;;  %v3988_v56 = vmul.f32 %v9266_v59, %v9027_v13  ;;  %v3983_v13 = vmul.f32 %v9205_v58, %v8888_v10  ;;  %v3933_v59 = vld [vmem:[%s9451_s4] sm:$0xff]  ;;  %v10119_v47 = vld [vmem:[#allocation20_spill] sm:$0xff] }
 0x3ee   :  { %3686 = vmatmul.f32.gmra.mxu0 %v3498_v55  ;;  %v3900_v55 = vpop.f32.mrf.mxu3 }
 0x3f3   :  { %v3642_v0 = vpop.f32.mrf.mxu0 }
 0x3f4   :  { %v3964_v8 = vmul.f32 %v8981_v50, %v3642_v0  ;;  %v3958_v50 = vmul.f32 %v8822_v39, %v3624_v46  ;;  %v3950_v0 = vmul.f32 %v3768_v3, %v9185_v34  ;;  %v3992_v34 = vmul.f32 %v3894_v18, %v9078_v35  ;;  %v10112_v18 = vld [vmem:[#allocation31_spill] sm:$0xff] }
 0x3f5   :  { %v3987_v35 = vmul.f32 %v9259_v63, %v9014_v22  ;;  %v10111_v22 = vld [vmem:[#allocation9_spill] sm:$0xff] }
 0x3f6   :  { %4017 = vmatpush.msrb.mxu2 %v3964_v8  ;;  %v3903_v52 = vpop.f32.mrf.mxu3 }
 0x3f8   :  { %4018 = vmatpush.msrb.mxu2 %v3963_v29 }
 0x3fa   :  { %4019 = vmatpush.msrb.mxu2 %v3962_v23  ;;  %v3995_v23 = vmul.f32 %v3903_v52, %v9116_v45  ;;  %v3982_v45 = vmul.f32 %v10112_v18, %v10111_v22  ;;  %v10133_v18 = vld [vmem:[#allocation32_spill] sm:$0xff] }
 0x3fb   :  { %v9296_v20 = vpop.f32.mrf.mxu0 }
 0x3fc   :  { %4020 = vmatpush.msrb.mxu2 %v3961_v37 }
 0x3fe   :  { %4021 = vmatpush.msrb.mxu2 %v3960_v26  ;;  %v3906_v29 = vpop.f32.mrf.mxu3 }
 0x3ff   :  { %v3996_v27 = vmul.f32 %v3906_v29, %v9129_v12  ;;  %v3991_v12 = vmul.f32 %v9284_v60, %v9068_v6  ;;  %v3986_v60 = vmul.f32 %v9246_v4, %v8992_v14  ;;  %v3861_v6 = vpop.f32.mrf.mxu2  ;;  %v10113_v14 = vld [vmem:[#allocation12_spill] sm:$0xff]  ;;  %v3941_v29 = vld [vmem:[%s9451_s4 + $0x40] sm:$0xff] }
 0x400   :  { %4022 = vmatpush.msrb.mxu2 %v3959_v48  ;;  %v3952_v48 = vmul.f32 %v3774_v28, %v9209_v62  ;;  %v3994_v28 = vmul.f32 %v3900_v55, %v9103_v51  ;;  %v3989_v51 = vmul.f32 %v9271_v44, %v9042_v49  ;;  %v3984_v49 = vmul.f32 %v9217_v57, %v8921_v54  ;;  %v10116_v44 = vld [vmem:[#allocation23_spill] sm:$0xff]  ;;  %v10118_v55 = vld [vmem:[#allocation22_spill] sm:$0xff] }
 0x401   :  { %v3981_v63 = vmul.f32 %v3861_v6, %v10113_v14  ;;  %v3938_v14 = vld [vmem:[%s9451_s4 + $0x28] sm:$0xff] }
 0x402   :  { %4023 = vmatpush.msrb.mxu2 %v3958_v50 }
 0x403   :  { %v9302_v1 = vpop.f32.mrf.mxu0 }
 0x404   :  { %4024 = vmatpush.msrb.mxu2 %v3957_v41 }
 0x406   :  { %4025 = vmatpush.msrb.mxu2 %v3956_v36  ;;  %v9344_v46 = vpop.f32.mrf.mxu3  ;;  %v3937_v36 = vld [vmem:[%s9451_s4 + $0x20] sm:$0xff] }
 0x408   :  { %4026 = vmatpush.msrb.mxu2 %v3955_v24  ;;  %v10120_v24 = vld [vmem:[#allocation18_spill] sm:$0xff] }
 0x40a   :  { %4027 = vmatpush.msrb.mxu2 %v3954_v17  ;;  %v10121_v17 = vld [vmem:[#allocation27_spill] sm:$0xff] }
 0x40b   :  { %v9307_v39 = vpop.f32.mrf.mxu0 }
 0x40c   :  { %4028 = vmatpush.msrb.mxu2 %v3953_v21 }
 0x40e   :  { %4029 = vmatpush.msrb.mxu2 %v3952_v48  ;;  %v9346_v33 = vpop.f32.mrf.mxu3  ;;  %v10122_v48 = vld [vmem:[#allocation26_spill] sm:$0xff] }
 0x410   :  { %4030 = vmatpush.msrb.mxu2 %v3951_v7 }
 0x412   :  { %4031 = vmatpush.msrb.mxu2 %v3950_v0 }
 0x413   :  { %v9315_v11 = vpop.f32.mrf.mxu0 }
 0x414   :  { %4032 = vmatpush.msrb.mxu2 %v3949_v25  ;;  %v10123_v25 = vld [vmem:[#allocation16_spill] sm:$0xff] }
 0x415   :  { %4033 = vmatmul.f32.vlgmr.msrb.gmra.mxu2 %v3933_v59 }
 0x416   :  { %4075 = vmatpush.msra.mxu2 %v3996_v27  ;;  %v3915_v10 = vpop.f32.mrf.mxu3 }
 0x418   :  { %4076 = vmatpush.msra.mxu2 %v3995_v23  ;;  %v10124_v23 = vld [vmem:[#allocation17_spill] sm:$0xff] }
 0x41a   :  { %4077 = vmatpush.msra.mxu2 %v3994_v28 }
 0x41b   :  { %v9321_v26 = vpop.f32.mrf.mxu0 }
 0x41c   :  { %4078 = vmatpush.msra.mxu2 %v3993_v2  ;;  %v3969_v28 = vmul.f32 %v10124_v23, %v9321_v26  ;;  %v10125_v2 = vld [vmem:[#allocation15_spill] sm:$0xff] }
 0x41d   :  { %4036 = vmatmul.f32.gmra.mxu2 %v3937_v36  ;;  %v10128_v26 = vld [vmem:[#allocation11_spill] sm:$0xff] }
 0x41e   :  { %4079 = vmatpush.msra.mxu2 %v3992_v34  ;;  %v3918_v61 = vpop.f32.mrf.mxu3  ;;  %v3968_v34 = vmul.f32 %v10125_v2, %v9315_v11  ;;  %v10129_v11 = vld [vmem:[#allocation10_spill] sm:$0xff] }
 0x420   :  { %4080 = vmatpush.msra.mxu2 %v3991_v12  ;;  %v10126_v12 = vld [vmem:[#allocation14_spill] sm:$0xff] }
 0x422   :  { %4081 = vmatpush.msra.mxu2 %v3990_v31  ;;  %v3967_v31 = vmul.f32 %v10126_v12, %v9307_v39  ;;  %v3934_v39 = vld [vmem:[%s9451_s4 + $0x8] sm:$0xff] }
 0x423   :  { %v3660_v38 = vpop.f32.mrf.mxu0 }
 0x424   :  { %4082 = vmatpush.msra.mxu2 %v3989_v51  ;;  %v3970_v27 = vmul.f32 %v10123_v25, %v3660_v38  ;;  %v3945_v51 = vld [vmem:[%s9451_s4 + $0x60] sm:$0xf] }
 0x425   :  { %4039 = vmatmul.f32.gmra.mxu2 %v3941_v29 }
 0x426   :  { %4083 = vmatpush.msra.mxu2 %v3988_v56  ;;  %v3921_v30 = vpop.f32.mrf.mxu3  ;;  %v10127_v56 = vld [vmem:[#allocation13_spill] sm:$0xff] }
 0x427   :  { %v3966_v38 = vmul.f32 %v10127_v56, %v9302_v1  ;;  %v3935_v1 = vld [vmem:[%s9451_s4 + $0x10] sm:$0xff] }
 0x428   :  { %4084 = vmatpush.msra.mxu2 %v3987_v35 }
 0x42a   :  { %4085 = vmatpush.msra.mxu2 %v3986_v60  ;;  %v3965_v60 = vmul.f32 %v10128_v26, %v9296_v20  ;;  %v10132_v20 = vld [vmem:[#allocation34_spill] sm:$0xff] }
 0x42b   :  { %v3663_v5 = vpop.f32.mrf.mxu0  ;;  %v4001_v22 = vmul.f32 %v3921_v30, %v10132_v20  ;;  %v3940_v30 = vld [vmem:[%s9451_s4 + $0x38] sm:$0xff] }
 0x42c   :  { %4086 = vmatpush.msra.mxu2 %v3985_v40  ;;  %v3971_v7 = vmul.f32 %v10122_v48, %v3663_v5 }
 0x42d   :  { %4042 = vmatmul.f32.gmra.mxu2 %v3945_v51 }
 0x42e   :  { %4087 = vmatpush.msra.mxu2 %v3984_v49  ;;  %v3924_v37 = vpop.f32.mrf.mxu3  ;;  %v10130_v49 = vld [vmem:[#allocation33_spill] sm:$0xff] }
 0x430   :  { %4088 = vmatpush.msra.mxu2 %v3983_v13  ;;  %v10131_v13 = vld [vmem:[#allocation30_spill] sm:$0xff] }
 0x431   :  { %v4002_v6 = vmul.f32 %v3924_v37, %v10131_v13 }
 0x432   :  { %4089 = vmatpush.msra.mxu2 %v3982_v45  ;;  %v4000_v45 = vmul.f32 %v3918_v61, %v10133_v18  ;;  %v3943_v61 = vld [vmem:[%s9451_s4 + $0x50] sm:$0xff] }
 0x433   :  { %v3666_v42 = vpop.f32.mrf.mxu0 }
 0x434   :  { %4090 = vmatpush.msra.mxu2 %v3981_v63  ;;  %v3972_v21 = vmul.f32 %v10121_v17, %v3666_v42  ;;  %v10134_v63 = vld [vmem:[#allocation28_spill] sm:$0xff] }
 0x435   :  { %4091 = vmatmul.f32.vlgmr.msra.gmra.mxu2 %v3935_v1  ;;  %v3999_v42 = vmul.f32 %v3915_v10, %v10134_v63  ;;  %v3942_v10 = vld [vmem:[%s9451_s4 + $0x48] sm:$0xff] }
 0x436   :  { %v3927_v0 = vpop.f32.mrf.mxu3 }
 0x437   :  { %v4003_v5 = vmul.f32 %v3927_v0, %v10130_v49 }
 0x43b   :  { %v3669_v43 = vpop.f32.mrf.mxu0 }
 0x43c   :  { %v3973_v52 = vmul.f32 %v10120_v24, %v3669_v43  ;;  %v3939_v43 = vld [vmem:[%s9451_s4 + $0x30] sm:$0xff] }
 0x43d   :  { %4094 = vmatmul.f32.gmra.mxu2 %v3939_v43 }
 0x43e   :  { %v3930_v35 = vpop.f32.mrf.mxu3 }
 0x43f   :  { %v4004_v40 = vmul.f32 %v3930_v35, %v10129_v11 }
 0x443   :  { %v3672_v54 = vpop.f32.mrf.mxu0 }
 0x444   :  { %v3974_v41 = vmul.f32 %v10119_v47, %v3672_v54  ;;  %v10135_v54 = vld [vmem:[#allocation29_spill] sm:$0xff] }
 0x445   :  { %4097 = vmatmul.f32.gmra.mxu2 %v3943_v61 }
 0x44b   :  { %v3675_v62 = vpop.f32.mrf.mxu0 }
 0x44c   :  { %v3975_v50 = vmul.f32 %v10118_v55, %v3675_v62  ;;  %v3998_v62 = vmul.f32 %v9346_v33, %v10135_v54  ;;  %v3946_v33 = vld [vmem:[%s9451_s4 + $0x68] sm:$0xf] }
 0x453   :  { %v3678_v57 = vpop.f32.mrf.mxu0 }
 0x454   :  { %v3976_v8 = vmul.f32 %v10117_v32, %v3678_v57  ;;  %v10136_v57 = vld [vmem:[#allocation24_spill] sm:$0xff] }
 0x45b   :  { %v3681_v58 = vpop.f32.mrf.mxu0 }
 0x45c   :  { %v3977_v19 = vmul.f32 %v10116_v44, %v3681_v58  ;;  %v3997_v58 = vmul.f32 %v9344_v46, %v10136_v57  ;;  %v3947_v46 = vld [vmem:[%s9451_s4 + $0x70] sm:$0xf] }
 0x45d   :  { %4100 = vmatmul.f32.gmra.mxu2 %v3947_v46 }
 0x463   :  { %v3684_v3 = vpop.f32.mrf.mxu0 }
 0x464   :  { %v3978_v53 = vmul.f32 %v10115_v9, %v3684_v3  ;;  %v3936_v3 = vld [vmem:[%s9451_s4 + $0x18] sm:$0xff] }
 0x46b   :  { %v3687_v16 = vpop.f32.mrf.mxu0 }
 0x46c   :  { %v3979_v4 = vmul.f32 %v10114_v15, %v3687_v16  ;;  %v3944_v16 = vld [vmem:[%s9451_s4 + $0x58] sm:$0xff] }
 0x46d   :  { %v3948_v15 = vld [vmem:[%s9451_s4 + $0x78] sm:$0xf] }
 0x46e   :  { %4047 = vmatpush.msra.mxu3 %v3979_v4 }
 0x470   :  { %4048 = vmatpush.msra.mxu3 %v3978_v53 }
 0x472   :  { %4049 = vmatpush.msra.mxu3 %v3977_v19 }
 0x474   :  { %4050 = vmatpush.msra.mxu3 %v3976_v8 }
 0x476   :  { %4051 = vmatpush.msra.mxu3 %v3975_v50 }
 0x478   :  { %4052 = vmatpush.msra.mxu3 %v3974_v41 }
 0x47a   :  { %4053 = vmatpush.msra.mxu3 %v3973_v52 }
 0x47c   :  { %4054 = vmatpush.msra.mxu3 %v3972_v21 }
 0x47e   :  { %4055 = vmatpush.msra.mxu3 %v3971_v7 }
 0x480   :  { %4056 = vmatpush.msra.mxu3 %v3970_v27 }
 0x482   :  { %4057 = vmatpush.msra.mxu3 %v3969_v28 }
 0x484   :  { %4058 = vmatpush.msra.mxu3 %v3968_v34 }
 0x486   :  { %4059 = vmatpush.msra.mxu3 %v3967_v31 }
 0x488   :  { %4060 = vmatpush.msra.mxu3 %v3966_v38 }
 0x48a   :  { %4061 = vmatpush.msra.mxu3 %v3965_v60 }
 0x48b   :  { %4062 = vmatmul.f32.vlgmr.msra.gmra.mxu3 %v3934_v39 }
 0x48c   :  { %4112 = vmatpush.msrb.mxu3 %v4004_v40 }
 0x48e   :  { %4113 = vmatpush.msrb.mxu3 %v4003_v5 }
 0x490   :  { %4114 = vmatpush.msrb.mxu3 %v4002_v6 }
 0x492   :  { %4115 = vmatpush.msrb.mxu3 %v4001_v22 }
 0x493   :  { %4065 = vmatmul.f32.gmra.mxu3 %v3938_v14 }
 0x494   :  { %4116 = vmatpush.msrb.mxu3 %v4000_v45 }
 0x496   :  { %4117 = vmatpush.msrb.mxu3 %v3999_v42 }
 0x498   :  { %4118 = vmatpush.msrb.mxu3 %v3998_v62  ;;  %v4034_v4 = vpop.f32.mrf.mxu2 }
 0x49a   :  { %4119 = vmatpush.msrb.mxu3 %v3997_v58 }
 0x49b   :  { %4068 = vmatmul.f32.gmra.mxu3 %v3942_v10 }
 0x4a0   :  { %v4037_v9 = vpop.f32.mrf.mxu2 }
 0x4a3   :  { %4071 = vmatmul.f32.gmra.mxu3 %v3946_v33 }
 0x4a8   :  { %v4040_v59 = vpop.f32.mrf.mxu2 }
 0x4ab   :  { %4249 = vmatmul.msk.f32.vlgmr.msrb.gmra.mxu3 %vm3408_vm7, %v3936_v3 }
 0x4b0   :  { %v4043_v19 = vpop.f32.mrf.mxu2 }
 0x4b3   :  { %4250 = vmatmul.msk.f32.gmra.mxu3 %vm3408_vm7, %v3940_v30 }
 0x4b8   :  { %v4092_v8 = vpop.f32.mrf.mxu2 }
 0x4bb   :  { %4251 = vmatmul.msk.f32.gmra.mxu3 %vm3408_vm7, %v3944_v16 }
 0x4c0   :  { %v4095_v41 = vpop.f32.mrf.mxu2 }
 0x4c3   :  { %4252 = vmatmul.msk.f32.gmra.mxu3 %vm3408_vm7, %v3948_v15 }
 0x4c8   :  { %v4098_v48 = vpop.f32.mrf.mxu2 }
 0x4e0   :  { %v4101_v23 = vpop.f32.mrf.mxu2 }
 0x50e   :  { %v4063_v53 = vpop.f32.mrf.mxu3 }
 0x50f   :  { %v4064_v55 = vadd.f32 %v4063_v53, %v4034_v4 }
 0x511   :  { %v4093_v50 = vadd.f32 %v4092_v8, %v4064_v55 }
 0x516   :  { %v4066_v44 = vpop.f32.mrf.mxu3 }
 0x517   :  { %v4067_v24 = vadd.f32 %v4066_v44, %v4037_v9 }
 0x519   :  { %v4096_v52 = vadd.f32 %v4095_v41, %v4067_v24 }
 0x51e   :  { %v4069_v32 = vpop.f32.mrf.mxu3 }
 0x51f   :  { %v4070_v7 = vadd.f32 %v4069_v32, %v4040_v59 }
 0x521   :  { %v4099_v0 = vadd.f32 %v4098_v48, %v4070_v7 }
 0x526   :  { %v4072_v37 = vpop.f32.mrf.mxu3 }
 0x527   :  { %v4073_v27 = vadd.f32 %v4072_v37, %v4043_v19 }
 0x529   :  { %v4102_v28 = vadd.f32 %v4101_v23, %v4073_v27 }
 0x52e   :  { %v4121_v47 = vpop.f32.mrf.mxu3 }
 0x52f   :  { %v4122_v36 = vadd.f32 %v4121_v47, %v4093_v50 }
 0x531   :  { %4141 = vst [vmem:[%s9449_s8 + $0x38] sm:$0xff] %v4122_v36 }
 0x536   :  { %v4124_v17 = vpop.f32.mrf.mxu3 }
 0x537   :  { %v4125_v21 = vadd.f32 %v4124_v17, %v4096_v52 }
 0x539   :  { %4142 = vst [vmem:[%s9449_s8 + $0x40] sm:$0xff] %v4125_v21 }
 0x53e   :  { %v4127_v29 = vpop.f32.mrf.mxu3 }
 0x53f   :  { %v4128_v25 = vadd.f32 %v4127_v29, %v4099_v0 }
 0x541   :  { %4143 = vst [vmem:[%s9449_s8 + $0x48] sm:$0xff] %v4128_v25 }
 0x546   :  { %v4130_v2 = vpop.f32.mrf.mxu3 }
 0x547   :  { %v4131_v34 = vadd.f32 %v4130_v2, %v4102_v28 }
 0x549   :  { %v4133_v12 = vsel %vm10137_vm9, %v4131_v34, 0.0 }
 0x54a   :  { %4144 = vst [vmem:[%s9449_s8 + $0x50] sm:$0xff] %v4133_v12 }

// kernel: _lambda_.3
= control target key start
LH: loop header
LB: loop body
LE: loop exit
PB: predicated region body
PF: predicated region fallthrough
CT: control target
= control target key end

     0   :  { %v506_v4 = vmov 64.0   ;;  %vm447_vm7 = vcmask 7168   ;;  %s874_s4 = inlined_call_operand.vmem [shape: f32[128,128], index: 4, kind: input, shape index: {}]   ;;  %s875_s0 = inlined_call_operand.vmem [shape: f32[64,128], index: 0, kind: input, shape index: {}]   ;;  %s876_s2 = inlined_call_operand.vmem [shape: f32[1,128], index: 2, kind: input, shape index: {}]   ;;  %s877_s3 = inlined_call_operand.vmem [shape: f32[1,128], index: 3, kind: input, shape index: {}]   ;;  %s878_s5 = inlined_call_operand.vmem [shape: f32[1,128], index: 5, kind: input, shape index: {}]   ;;  %s879_s6 = inlined_call_operand.vmem [shape: f32[1,128], index: 6, kind: input, shape index: {}]   ;;  %s880_s7 = inlined_call_operand.vmem [shape: f32[1,128], index: 7, kind: input, shape index: {}]   ;;  %s881_s9 = inlined_call_operand.vmem [shape: f32[1,128], index: 9, kind: input, shape index: {}]   ;;  %s882_s8 = inlined_call_operand.vmem [shape: f32[128,128], index: 8, kind: input, shape index: {}]   ;;  %s883_s10 = inlined_call_operand.vmem [shape: f32[128,1], index: 10, kind: input, shape index: {}]   ;;  %s884_s11 = inlined_call_operand.<no memory space> [shape: f32[1,1], index: 11, kind: input, shape index: {}]   ;;  %s885_s1 = inlined_call_operand.vmem [shape: f32[64,1], index: 1, kind: input, shape index: {}]   ;;  %s886_s12 = inlined_call_operand.vmem [shape: f32[64,1], index: 12, kind: output, shape index: {}]  }
   0x1   :  { %v160_v0 = vld [vmem:[%s874_s4 + $0x78] sm:$0xff]  ;;  %v159_v1 = vld [vmem:[%s874_s4 + $0x70] sm:$0xff]  ;;  %v158_v2 = vld [vmem:[%s874_s4 + $0x68] sm:$0xff]  ;;  %500 = vrcp.f32 %v506_v4 }
   0x2   :  { %165 = vmatpush.msra.mxu0 %v160_v0  ;;  %460 = vmatpush.msra.mxu3 %v160_v0  ;;  %v157_v3 = vld [vmem:[%s874_s4 + $0x60] sm:$0xff]  ;;  %v592_v6 = vld [vmem:[%s875_s0 + $0x8] sm:$0xff]  ;;  %v156_v7 = vld [vmem:[%s874_s4 + $0x58] sm:$0xff] }
   0x3   :  { %v587_v5 = vld [vmem:[%s875_s0] sm:$0xff]  ;;  %v600_v8 = vld [vmem:[%s875_s0 + $0x10] sm:$0xff]  ;;  %v610_v11 = vld [vmem:[%s875_s0 + $0x18] sm:$0xff] }
   0x4   :  { %166 = vmatpush.msra.mxu0 %v159_v1  ;;  %461 = vmatpush.msra.mxu3 %v159_v1  ;;  %v53_v9 = vadd.f32 %v592_v6, %v587_v5  ;;  %v155_v10 = vld [vmem:[%s874_s4 + $0x50] sm:$0xff]  ;;  %v47_v13 = vld [vmem:[%s875_s0 + $0x20] sm:$0xff]  ;;  %v154_v15 = vld [vmem:[%s874_s4 + $0x48] sm:$0xff] }
   0x5   :  { %v48_v17 = vld [vmem:[%s875_s0 + $0x28] sm:$0xff]  ;;  %v153_v18 = vld [vmem:[%s874_s4 + $0x40] sm:$0xff]  ;;  %v49_v20 = vld [vmem:[%s875_s0 + $0x30] sm:$0xff] }
   0x6   :  { %167 = vmatpush.msra.mxu0 %v158_v2  ;;  %462 = vmatpush.msra.mxu3 %v158_v2  ;;  %v54_v12 = vadd.f32 %v53_v9, %v600_v8  ;;  %v152_v22 = vld [vmem:[%s874_s4 + $0x38] sm:$0xff]  ;;  %v151_v25 = vld [vmem:[%s874_s4 + $0x30] sm:$0xff]  ;;  %v150_v28 = vld [vmem:[%s874_s4 + $0x28] sm:$0xff] }
   0x7   :  { %v501_v14 = vpop.eup %500  ;;  %v50_v24 = vld [vmem:[%s875_s0 + $0x38] sm:$0xff]  ;;  %v149_v30 = vld [vmem:[%s874_s4 + $0x20] sm:$0xff]  ;;  %v147_v35 = vld [vmem:[%s874_s4 + $0x10] sm:$0xff] }
   0x8   :  { %168 = vmatpush.msra.mxu0 %v157_v3  ;;  %463 = vmatpush.msra.mxu3 %v157_v3  ;;  %v55_v16 = vadd.f32 %v54_v12, %v610_v11  ;;  %v67_v21 = vmul.f32 64.0, %v501_v14  ;;  %v148_v33 = vld [vmem:[%s874_s4 + $0x18] sm:$0xff]  ;;  %v146_v38 = vld [vmem:[%s874_s4 + $0x8] sm:$0xff]  ;;  %vm71_vm0 = vweird.f32 %v501_v14  ;;  %v145_v40 = vld [vmem:[%s874_s4] sm:$0xff] }
   0xa   :  { %169 = vmatpush.msra.mxu0 %v156_v7  ;;  %464 = vmatpush.msra.mxu3 %v156_v7  ;;  %v56_v19 = vadd.f32 %v55_v16, %v47_v13  ;;  %v68_v27 = vsub.f32 1.0, %v67_v21  ;;  %v494_v21 = vld [vmem:[%s877_s3] ss:$0 sm:$0xff] }
   0xc   :  { %170 = vmatpush.msra.mxu0 %v155_v10  ;;  %465 = vmatpush.msra.mxu3 %v155_v10  ;;  %v57_v23 = vadd.f32 %v56_v19, %v48_v17  ;;  %v69_v32 = vmul.f32 %v501_v14, %v68_v27 }
   0xe   :  { %171 = vmatpush.msra.mxu0 %v154_v15  ;;  %466 = vmatpush.msra.mxu3 %v154_v15  ;;  %v58_v26 = vadd.f32 %v57_v23, %v49_v20  ;;  %v70_v37 = vadd.f32 %v501_v14, %v69_v32 }
  0x10   :  { %172 = vmatpush.msra.mxu0 %v153_v18  ;;  %467 = vmatpush.msra.mxu3 %v153_v18  ;;  %v59_v29 = vadd.f32 %v58_v26, %v50_v24  ;;  %v656_v42 = vsel %vm71_vm0, %v501_v14, %v70_v37  ;;  %v493_v18 = vld [vmem:[%s876_s2] ss:$0 sm:$0xff] }
  0x12   :  { %173 = vmatpush.msra.mxu0 %v152_v22  ;;  %468 = vmatpush.msra.mxu3 %v152_v22  ;;  %v60_v31 = vrot.slane %v59_v29, 4 }
  0x14   :  { %174 = vmatpush.msra.mxu0 %v151_v25  ;;  %469 = vmatpush.msra.mxu3 %v151_v25  ;;  %v61_v34 = vadd.f32 %v60_v31, %v59_v29 }
  0x16   :  { %175 = vmatpush.msra.mxu0 %v150_v28  ;;  %470 = vmatpush.msra.mxu3 %v150_v28  ;;  %v62_v36 = vrot.slane %v61_v34, 2 }
  0x18   :  { %176 = vmatpush.msra.mxu0 %v149_v30  ;;  %471 = vmatpush.msra.mxu3 %v149_v30  ;;  %v63_v39 = vadd.f32 %v62_v36, %v61_v34 }
  0x1a   :  { %177 = vmatpush.msra.mxu0 %v148_v33  ;;  %472 = vmatpush.msra.mxu3 %v148_v33  ;;  %v64_v41 = vrot.slane %v63_v39, 1 }
  0x1c   :  { %178 = vmatpush.msra.mxu0 %v147_v35  ;;  %473 = vmatpush.msra.mxu3 %v147_v35  ;;  %v65_v43 = vadd.f32 %v64_v41, %v63_v39 }
  0x1e   :  { %179 = vmatpush.msra.mxu0 %v146_v38  ;;  %474 = vmatpush.msra.mxu3 %v146_v38  ;;  %v73_v44 = vmul.f32 %v656_v42, %v65_v43 }
  0x20   :  { %180 = vmatpush.msra.mxu0 %v145_v40  ;;  %475 = vmatpush.msra.mxu3 %v145_v40  ;;  %v74_v45 = vsub.f32 %v587_v5, %v73_v44  ;;  %v75_v46 = vsub.f32 %v592_v6, %v73_v44  ;;  %v76_v47 = vsub.f32 %v600_v8, %v73_v44 }
  0x21   :  { %v77_v48 = vsub.f32 %v610_v11, %v73_v44  ;;  %v78_v49 = vsub.f32 %v47_v13, %v73_v44  ;;  %v79_v53 = vsub.f32 %v48_v17, %v73_v44  ;;  %v80_v56 = vsub.f32 %v49_v20, %v73_v44 }
  0x22   :  { %v82_v50 = vmul.f32 %v74_v45, %v74_v45  ;;  %v83_v51 = vmul.f32 %v75_v46, %v75_v46  ;;  %v84_v52 = vmul.f32 %v76_v47, %v76_v47  ;;  %v81_v59 = vsub.f32 %v50_v24, %v73_v44 }
  0x23   :  { %v85_v54 = vmul.f32 %v77_v48, %v77_v48  ;;  %v86_v57 = vmul.f32 %v78_v49, %v78_v49  ;;  %v87_v60 = vmul.f32 %v79_v53, %v79_v53  ;;  %v88_v62 = vmul.f32 %v80_v56, %v80_v56 }
  0x24   :  { %v90_v55 = vadd.f32 %v83_v51, %v82_v50  ;;  %v89_v0 = vmul.f32 %v81_v59, %v81_v59  ;;  %v495_v50 = vld [vmem:[%s878_s5] ss:$0 sm:$0xff] }
  0x26   :  { %v91_v58 = vadd.f32 %v90_v55, %v84_v52 }
  0x28   :  { %v92_v61 = vadd.f32 %v91_v58, %v85_v54 }
  0x2a   :  { %v93_v63 = vadd.f32 %v92_v61, %v86_v57 }
  0x2c   :  { %v94_v1 = vadd.f32 %v93_v63, %v87_v60 }
  0x2e   :  { %v95_v2 = vadd.f32 %v94_v1, %v88_v62 }
  0x30   :  { %v96_v3 = vadd.f32 %v95_v2, %v89_v0 }
  0x32   :  { %v97_v4 = vrot.slane %v96_v3, 4 }
  0x34   :  { %v98_v5 = vadd.f32 %v97_v4, %v96_v3 }
  0x36   :  { %v99_v6 = vrot.slane %v98_v5, 2 }
  0x38   :  { %v100_v7 = vadd.f32 %v99_v6, %v98_v5 }
  0x3a   :  { %v101_v8 = vrot.slane %v100_v7, 1 }
  0x3c   :  { %v102_v9 = vadd.f32 %v101_v8, %v100_v7 }
  0x3e   :  { %v103_v10 = vmul.f32 %v102_v9, %v656_v42 }
  0x40   :  { %v104_v11 = vadd.f32 1e-05, %v103_v10 }
  0x42   :  { %502 = vrsqrt.f32 %v104_v11  ;;  %vm111_vm1 = vweird.f32 %v104_v11 }
  0x48   :  { %v503_v12 = vpop.eup %502 }
  0x49   :  { %v106_v13 = vmul.f32 %v503_v12, %v104_v11  ;;  %vm112_vm2 = vweird.f32 %v503_v12 }
  0x4a   :  { %vm113_vm3 = vmor %vm111_vm1, %vm112_vm2 }
  0x4b   :  { %v107_v14 = vmul.f32 %v503_v12, %v106_v13 }
  0x4d   :  { %v108_v15 = vmul.f32 0.5, %v107_v14 }
  0x4f   :  { %v109_v16 = vsub.f32 1.5, %v108_v15 }
  0x51   :  { %v110_v17 = vmul.f32 %v503_v12, %v109_v16 }
  0x53   :  { %v114_v19 = vsel %vm113_vm3, %v503_v12, %v110_v17 }
  0x54   :  { %v115_v20 = vmul.f32 %v114_v19, %v74_v45  ;;  %v116_v22 = vmul.f32 %v114_v19, %v75_v46  ;;  %v117_v23 = vmul.f32 %v114_v19, %v76_v47  ;;  %v118_v24 = vmul.f32 %v114_v19, %v77_v48 }
  0x55   :  { %v121_v25 = vmul.f32 %v114_v19, %v80_v56  ;;  %v119_v26 = vmul.f32 %v114_v19, %v78_v49  ;;  %v122_v39 = vmul.f32 %v114_v19, %v81_v59  ;;  %v120_v40 = vmul.f32 %v114_v19, %v79_v53  ;;  %v316_v19 = vld [vmem:[%s882_s8 + $0x78] sm:$0xff] }
  0x56   :  { %v126_v27 = vmul.f32 %v493_v18, %v115_v20  ;;  %v127_v28 = vmul.f32 %v493_v18, %v116_v22  ;;  %v128_v29 = vmul.f32 %v493_v18, %v117_v23  ;;  %v129_v30 = vmul.f32 %v493_v18, %v118_v24  ;;  %321 = vmatpush.msra.mxu1 %v316_v19  ;;  %v314_v23 = vld [vmem:[%s882_s8 + $0x68] sm:$0xff] }
  0x57   :  { %v132_v31 = vmul.f32 %v493_v18, %v121_v25  ;;  %v130_v32 = vmul.f32 %v493_v18, %v119_v26  ;;  %v133_v41 = vmul.f32 %v493_v18, %v122_v39  ;;  %v131_v43 = vmul.f32 %v493_v18, %v120_v40  ;;  %476 = vmatpush.msrb.mxu3 %v316_v19  ;;  %v310_v39 = vld [vmem:[%s882_s8 + $0x48] sm:$0xff] }
  0x58   :  { %v137_v33 = vadd.f32 %v494_v21, %v126_v27  ;;  %v138_v34 = vadd.f32 %v494_v21, %v127_v28  ;;  %v139_v35 = vadd.f32 %v494_v21, %v128_v29  ;;  %v140_v36 = vadd.f32 %v494_v21, %v129_v30  ;;  %v313_v27 = vld [vmem:[%s882_s8 + $0x60] sm:$0xff] }
  0x59   :  { %v143_v37 = vadd.f32 %v494_v21, %v132_v31  ;;  %v141_v38 = vadd.f32 %v494_v21, %v130_v32  ;;  %v144_v44 = vadd.f32 %v494_v21, %v133_v41  ;;  %v142_v45 = vadd.f32 %v494_v21, %v131_v43  ;;  %v315_v21 = vld [vmem:[%s882_s8 + $0x70] sm:$0xff]  ;;  %v312_v31 = vld [vmem:[%s882_s8 + $0x58] sm:$0xff] }
  0x5a   :  { %181 = vmatmul.f32.vlgmr.msra.gmra.mxu0 %v137_v33  ;;  %322 = vmatpush.msra.mxu1 %v315_v21 }
  0x5b   :  { %199 = vmatmul.f32.vlgmr.msra.gmra.mxu3 %v143_v37 }
  0x5c   :  { %477 = vmatpush.msrb.mxu3 %v315_v21  ;;  %323 = vmatpush.msra.mxu1 %v314_v23 }
  0x5e   :  { %478 = vmatpush.msrb.mxu3 %v314_v23  ;;  %324 = vmatpush.msra.mxu1 %v313_v27 }
  0x60   :  { %479 = vmatpush.msrb.mxu3 %v313_v27  ;;  %325 = vmatpush.msra.mxu1 %v312_v31 }
  0x62   :  { %184 = vmatmul.f32.gmra.mxu0 %v138_v34  ;;  %480 = vmatpush.msrb.mxu3 %v312_v31 }
  0x63   :  { %202 = vmatmul.f32.gmra.mxu3 %v144_v44  ;;  %v309_v44 = vld [vmem:[%s882_s8 + $0x40] sm:$0xff] }
  0x6a   :  { %187 = vmatmul.f32.gmra.mxu0 %v139_v35  ;;  %v311_v35 = vld [vmem:[%s882_s8 + $0x50] sm:$0xff] }
  0x6b   :  { %326 = vmatpush.msra.mxu1 %v311_v35  ;;  %481 = vmatpush.msrb.mxu3 %v311_v35  ;;  %v380_v35 = vld [vmem:[%s883_s10 + $0x50] sm:$0xff] }
  0x6d   :  { %327 = vmatpush.msra.mxu1 %v310_v39  ;;  %482 = vmatpush.msrb.mxu3 %v310_v39 }
  0x6f   :  { %328 = vmatpush.msra.mxu1 %v309_v44  ;;  %483 = vmatpush.msrb.mxu3 %v309_v44  ;;  %v376_v44 = vld [vmem:[%s883_s10 + $0x30] sm:$0xff] }
  0x72   :  { %190 = vmatmul.f32.gmra.mxu0 %v140_v36 }
  0x7a   :  { %193 = vmatmul.f32.gmra.mxu0 %v141_v38 }
  0x82   :  { %196 = vmatmul.f32.gmra.mxu0 %v142_v45 }
  0xd7   :  { %v182_v46 = vpop.f32.mrf.mxu0 }
  0xd8   :  { %v183_v53 = vadd.f32 %v495_v50, %v182_v46 }
  0xda   :  { %v206_v58 = vmax.f32 %v183_v53, 0.0 }
  0xde   :  { %v200_v51 = vpop.f32.mrf.mxu3 }
  0xdf   :  { %v185_v47 = vpop.f32.mrf.mxu0  ;;  %v201_v4 = vadd.f32 %v495_v50, %v200_v51  ;;  %v307_v51 = vld [vmem:[%s882_s8 + $0x30] sm:$0xff] }
  0xe0   :  { %v186_v52 = vadd.f32 %v495_v50, %v185_v47 }
  0xe1   :  { %v212_v9 = vmax.f32 %v201_v4, 0.0 }
  0xe2   :  { %v207_v56 = vmax.f32 %v186_v52, 0.0 }
  0xe4   :  { %v216_v61 = vadd.f32 %v207_v56, %v206_v58 }
  0xe6   :  { %v203_v63 = vpop.f32.mrf.mxu3 }
  0xe7   :  { %v188_v48 = vpop.f32.mrf.mxu0  ;;  %v204_v6 = vadd.f32 %v495_v50, %v203_v63  ;;  %v301_v63 = vld [vmem:[%s882_s8] sm:$0xff] }
  0xe8   :  { %v189_v54 = vadd.f32 %v495_v50, %v188_v48  ;;  %v308_v48 = vld [vmem:[%s882_s8 + $0x38] sm:$0xff] }
  0xe9   :  { %v213_v11 = vmax.f32 %v204_v6, 0.0  ;;  %329 = vmatpush.msra.mxu1 %v308_v48  ;;  %484 = vmatpush.msrb.mxu3 %v308_v48 }
  0xea   :  { %v208_v59 = vmax.f32 %v189_v54, 0.0  ;;  %v306_v54 = vld [vmem:[%s882_s8 + $0x28] sm:$0xff] }
  0xeb   :  { %330 = vmatpush.msra.mxu1 %v307_v51  ;;  %485 = vmatpush.msrb.mxu3 %v307_v51 }
  0xec   :  { %v217_v0 = vadd.f32 %v216_v61, %v208_v59  ;;  %v302_v61 = vld [vmem:[%s882_s8 + $0x8] sm:$0xff] }
  0xed   :  { %331 = vmatpush.msra.mxu1 %v306_v54  ;;  %486 = vmatpush.msrb.mxu3 %v306_v54  ;;  %v498_v54 = vld [vmem:[%s881_s9] ss:$0 sm:$0xff] }
  0xef   :  { %v191_v49 = vpop.f32.mrf.mxu0 }
  0xf0   :  { %v192_v57 = vadd.f32 %v495_v50, %v191_v49 }
  0xf2   :  { %v209_v62 = vmax.f32 %v192_v57, 0.0 }
  0xf4   :  { %v218_v3 = vadd.f32 %v217_v0, %v209_v62 }
  0xf7   :  { %v194_v55 = vpop.f32.mrf.mxu0 }
  0xf8   :  { %v195_v60 = vadd.f32 %v495_v50, %v194_v55 }
  0xfa   :  { %v210_v1 = vmax.f32 %v195_v60, 0.0  ;;  %v303_v60 = vld [vmem:[%s882_s8 + $0x10] sm:$0xff] }
  0xfc   :  { %v219_v7 = vadd.f32 %v218_v3, %v210_v1 }
  0xff   :  { %v197_v2 = vpop.f32.mrf.mxu0 }
 0x100   :  { %v198_v5 = vadd.f32 %v495_v50, %v197_v2 }
 0x102   :  { %v211_v8 = vmax.f32 %v198_v5, 0.0 }
 0x104   :  { %v220_v10 = vadd.f32 %v219_v7, %v211_v8 }
 0x106   :  { %v221_v12 = vadd.f32 %v220_v10, %v212_v9 }
 0x108   :  { %v222_v13 = vadd.f32 %v221_v12, %v213_v11 }
 0x10a   :  { %v223_v14 = vrot.slane %v222_v13, 4 }
 0x10c   :  { %v224_v15 = vadd.f32 %v223_v14, %v222_v13 }
 0x10e   :  { %v225_v16 = vrot.slane %v224_v15, 2 }
 0x110   :  { %v226_v17 = vadd.f32 %v225_v16, %v224_v15 }
 0x112   :  { %v227_v18 = vrot.slane %v226_v17, 1 }
 0x114   :  { %v228_v20 = vadd.f32 %v227_v18, %v226_v17 }
 0x116   :  { %v229_v22 = vmul.f32 %v228_v20, %v656_v42 }
 0x118   :  { %v683_v24 = vsub.f32 %v206_v58, %v229_v22  ;;  %v685_v25 = vsub.f32 %v207_v56, %v229_v22  ;;  %v687_v26 = vsub.f32 %v208_v59, %v229_v22  ;;  %v692_v28 = vsub.f32 %v209_v62, %v229_v22  ;;  %v305_v56 = vld [vmem:[%s882_s8 + $0x20] sm:$0xff]  ;;  %v304_v58 = vld [vmem:[%s882_s8 + $0x18] sm:$0xff] }
 0x119   :  { %v701_v32 = vsub.f32 %v210_v1, %v229_v22  ;;  %v708_v36 = vsub.f32 %v211_v8, %v229_v22  ;;  %v715_v40 = vsub.f32 %v212_v9, %v229_v22  ;;  %v237_v45 = vsub.f32 %v213_v11, %v229_v22  ;;  %332 = vmatpush.msra.mxu1 %v305_v56  ;;  %v496_v11 = vld [vmem:[%s879_s6] ss:$0 sm:$0xff] }
 0x11a   :  { %v238_v29 = vmul.f32 %v683_v24, %v683_v24  ;;  %v239_v30 = vmul.f32 %v685_v25, %v685_v25  ;;  %v240_v33 = vmul.f32 %v687_v26, %v687_v26  ;;  %v241_v37 = vmul.f32 %v692_v28, %v692_v28  ;;  %487 = vmatpush.msrb.mxu3 %v305_v56 }
 0x11b   :  { %v242_v41 = vmul.f32 %v701_v32, %v701_v32  ;;  %v243_v46 = vmul.f32 %v708_v36, %v708_v36  ;;  %v244_v49 = vmul.f32 %v715_v40, %v715_v40  ;;  %v245_v52 = vmul.f32 %v237_v45, %v237_v45  ;;  %333 = vmatpush.msra.mxu1 %v304_v58 }
 0x11c   :  { %v246_v34 = vadd.f32 %v239_v30, %v238_v29  ;;  %488 = vmatpush.msrb.mxu3 %v304_v58  ;;  %v385_v29 = vld [vmem:[%s883_s10 + $0x78] sm:$0xff] }
 0x11d   :  { %334 = vmatpush.msra.mxu1 %v303_v60  ;;  %390 = vmatpush.msra.mxu2 %v385_v29 }
 0x11e   :  { %v247_v38 = vadd.f32 %v246_v34, %v240_v33  ;;  %489 = vmatpush.msrb.mxu3 %v303_v60  ;;  %v381_v34 = vld [vmem:[%s883_s10 + $0x58] sm:$0xff] }
 0x11f   :  { %335 = vmatpush.msra.mxu1 %v302_v61 }
 0x120   :  { %v248_v43 = vadd.f32 %v247_v38, %v241_v37  ;;  %490 = vmatpush.msrb.mxu3 %v302_v61  ;;  %v379_v38 = vld [vmem:[%s883_s10 + $0x48] sm:$0xff] }
 0x121   :  { %336 = vmatpush.msra.mxu1 %v301_v63 }
 0x122   :  { %v249_v47 = vadd.f32 %v248_v43, %v242_v41  ;;  %491 = vmatpush.msrb.mxu3 %v301_v63  ;;  %v377_v43 = vld [vmem:[%s883_s10 + $0x38] sm:$0xff] }
 0x124   :  { %v250_v50 = vadd.f32 %v249_v47, %v243_v46  ;;  %v375_v46 = vld [vmem:[%s883_s10 + $0x28] sm:$0xff] }
 0x126   :  { %v251_v53 = vadd.f32 %v250_v50, %v244_v49  ;;  %v373_v49 = vld [vmem:[%s883_s10 + $0x18] sm:$0xff] }
 0x128   :  { %v252_v55 = vadd.f32 %v251_v53, %v245_v52  ;;  %v372_v52 = vld [vmem:[%s883_s10 + $0x10] sm:$0xff]  ;;  %v371_v53 = vld [vmem:[%s883_s10 + $0x8] sm:$0xff] }
 0x12a   :  { %v253_v57 = vrot.slane %v252_v55, 4 }
 0x12c   :  { %v254_v59 = vadd.f32 %v253_v57, %v252_v55 }
 0x12e   :  { %v255_v62 = vrot.slane %v254_v59, 2 }
 0x130   :  { %v256_v0 = vadd.f32 %v255_v62, %v254_v59 }
 0x132   :  { %v257_v1 = vrot.slane %v256_v0, 1 }
 0x134   :  { %v258_v2 = vadd.f32 %v257_v1, %v256_v0 }
 0x136   :  { %v259_v3 = vmul.f32 %v258_v2, %v656_v42  ;;  %v497_v42 = vld [vmem:[%s880_s7] ss:$0 sm:$0xff] }
 0x138   :  { %v260_v4 = vadd.f32 1e-05, %v259_v3  ;;  %v17_v3 = vstv %s884_s11 }
 0x139   :  { %18 = vst [vmem:[#allocation2] sm:$0x1] %v17_v3 }
 0x13a   :  { %504 = vrsqrt.f32 %v260_v4  ;;  %vm267_vm5 = vweird.f32 %v260_v4 }
 0x140   :  { %v505_v5 = vpop.eup %504 }
 0x141   :  { %v262_v6 = vmul.f32 %v505_v5, %v260_v4  ;;  %vm268_vm4 = vweird.f32 %v505_v5 }
 0x142   :  { %vm269_vm6 = vmor %vm267_vm5, %vm268_vm4 }
 0x143   :  { %v263_v7 = vmul.f32 %v505_v5, %v262_v6 }
 0x145   :  { %v264_v8 = vmul.f32 0.5, %v263_v7 }
 0x147   :  { %v265_v9 = vsub.f32 1.5, %v264_v8 }
 0x149   :  { %v266_v10 = vmul.f32 %v505_v5, %v265_v9 }
 0x14b   :  { %v270_v12 = vsel %vm269_vm6, %v505_v5, %v266_v10 }
 0x14c   :  { %v278_v13 = vmul.f32 %v270_v12, %v237_v45  ;;  %v271_v14 = vmul.f32 %v270_v12, %v683_v24  ;;  %v272_v19 = vmul.f32 %v270_v12, %v685_v25  ;;  %v273_v22 = vmul.f32 %v270_v12, %v687_v26  ;;  %v384_v25 = vld [vmem:[%s883_s10 + $0x70] sm:$0xff]  ;;  %v383_v26 = vld [vmem:[%s883_s10 + $0x68] sm:$0xff] }
 0x14d   :  { %v274_v24 = vmul.f32 %v270_v12, %v692_v28  ;;  %391 = vmatpush.msra.mxu2 %v384_v25  ;;  %v382_v28 = vld [vmem:[%s883_s10 + $0x60] sm:$0xff]  ;;  %v275_v33 = vmul.f32 %v270_v12, %v701_v32  ;;  %v276_v41 = vmul.f32 %v270_v12, %v708_v36  ;;  %v277_v48 = vmul.f32 %v270_v12, %v715_v40 }
 0x14e   :  { %v282_v15 = vmul.f32 %v496_v11, %v271_v14  ;;  %v289_v16 = vmul.f32 %v496_v11, %v278_v13  ;;  %v283_v20 = vmul.f32 %v496_v11, %v272_v19  ;;  %v284_v23 = vmul.f32 %v496_v11, %v273_v22  ;;  %v378_v32 = vld [vmem:[%s883_s10 + $0x40] sm:$0xff] }
 0x14f   :  { %v285_v30 = vmul.f32 %v496_v11, %v274_v24  ;;  %392 = vmatpush.msra.mxu2 %v383_v26  ;;  %v286_v37 = vmul.f32 %v496_v11, %v275_v33  ;;  %v287_v45 = vmul.f32 %v496_v11, %v276_v41  ;;  %v374_v36 = vld [vmem:[%s883_s10 + $0x20] sm:$0xff]  ;;  %v288_v50 = vmul.f32 %v496_v11, %v277_v48  ;;  %v433_v24 = vld [vmem:[%s885_s1 + $0x10] sm:$0xff]  ;;  %v434_v26 = vld [vmem:[%s885_s1 + $0x18] sm:$0xff] }
 0x150   :  { %v293_v17 = vadd.f32 %v497_v42, %v282_v15  ;;  %v300_v18 = vadd.f32 %v497_v42, %v289_v16  ;;  %v294_v21 = vadd.f32 %v497_v42, %v283_v20  ;;  %v295_v27 = vadd.f32 %v497_v42, %v284_v23  ;;  %v370_v40 = vld [vmem:[%s883_s10] sm:$0xff] }
 0x151   :  { %v296_v31 = vadd.f32 %v497_v42, %v285_v30  ;;  %393 = vmatpush.msra.mxu2 %v382_v28  ;;  %v297_v39 = vadd.f32 %v497_v42, %v286_v37  ;;  %v298_v47 = vadd.f32 %v497_v42, %v287_v45  ;;  %v299_v51 = vadd.f32 %v497_v42, %v288_v50  ;;  %v499_v15 = vld [vmem:[#allocation2] ss:$0 sm:$0xff] }
 0x152   :  { %337 = vmatmul.f32.vlgmr.msra.gmra.mxu1 %v293_v17  ;;  %358 = vmatmul.f32.vlgmr.msrb.gmra.mxu3 %v300_v18  ;;  %v431_v17 = vld [vmem:[%s885_s1] sm:$0xff] }
 0x153   :  { %394 = vmatpush.msra.mxu2 %v381_v34  ;;  %v435_v34 = vld [vmem:[%s885_s1 + $0x20] sm:$0xff] }
 0x155   :  { %395 = vmatpush.msra.mxu2 %v380_v35 }
 0x157   :  { %396 = vmatpush.msra.mxu2 %v379_v38 }
 0x159   :  { %397 = vmatpush.msra.mxu2 %v378_v32  ;;  %v436_v32 = vld [vmem:[%s885_s1 + $0x28] sm:$0xff] }
 0x15a   :  { %340 = vmatmul.f32.gmra.mxu1 %v294_v21  ;;  %v432_v21 = vld [vmem:[%s885_s1 + $0x8] sm:$0xff] }
 0x15b   :  { %398 = vmatpush.msra.mxu2 %v377_v43 }
 0x15d   :  { %399 = vmatpush.msra.mxu2 %v376_v44  ;;  %v437_v44 = vld [vmem:[%s885_s1 + $0x30] sm:$0xff] }
 0x15f   :  { %400 = vmatpush.msra.mxu2 %v375_v46 }
 0x161   :  { %401 = vmatpush.msra.mxu2 %v374_v36 }
 0x162   :  { %343 = vmatmul.f32.gmra.mxu1 %v295_v27 }
 0x163   :  { %402 = vmatpush.msra.mxu2 %v373_v49 }
 0x165   :  { %403 = vmatpush.msra.mxu2 %v372_v52 }
 0x167   :  { %404 = vmatpush.msra.mxu2 %v371_v53 }
 0x169   :  { %405 = vmatpush.msra.mxu2 %v370_v40 }
 0x16a   :  { %346 = vmatmul.f32.gmra.mxu1 %v296_v31 }
 0x172   :  { %349 = vmatmul.f32.gmra.mxu1 %v297_v39 }
 0x17a   :  { %352 = vmatmul.f32.gmra.mxu1 %v298_v47  ;;  %v438_v47 = vld [vmem:[%s885_s1 + $0x38] sm:$0xff] }
 0x182   :  { %355 = vmatmul.f32.gmra.mxu1 %v299_v51 }
 0x1cf   :  { %v338_v55 = vpop.f32.mrf.mxu1 }
 0x1d0   :  { %v339_v56 = vadd.f32 %v498_v54, %v338_v55 }
 0x1d2   :  { %v362_v57 = vmax.f32 %v339_v56, 0.0 }
 0x1d4   :  { %406 = vmatmul.f32.vlgmr.msra.gmra.mxu2 %v362_v57 }
 0x1d5   :  { %v359_v13 = vpop.f32.mrf.mxu3 }
 0x1d6   :  { %v360_v14 = vadd.f32 %v498_v54, %v359_v13 }
 0x1d7   :  { %v341_v58 = vpop.f32.mrf.mxu1 }
 0x1d8   :  { %v342_v59 = vadd.f32 %v498_v54, %v341_v58  ;;  %v369_v42 = vmax.f32 %v360_v14, 0.0 }
 0x1da   :  { %v363_v60 = vmax.f32 %v342_v59, 0.0 }
 0x1dc   :  { %409 = vmatmul.f32.gmra.mxu2 %v363_v60 }
 0x1df   :  { %v344_v61 = vpop.f32.mrf.mxu1 }
 0x1e0   :  { %v345_v62 = vadd.f32 %v498_v54, %v344_v61 }
 0x1e2   :  { %v364_v63 = vmax.f32 %v345_v62, 0.0 }
 0x1e4   :  { %412 = vmatmul.f32.gmra.mxu2 %v364_v63 }
 0x1e7   :  { %v347_v0 = vpop.f32.mrf.mxu1 }
 0x1e8   :  { %v348_v1 = vadd.f32 %v498_v54, %v347_v0 }
 0x1ea   :  { %v365_v2 = vmax.f32 %v348_v1, 0.0 }
 0x1ec   :  { %415 = vmatmul.f32.gmra.mxu2 %v365_v2 }
 0x1ef   :  { %v350_v4 = vpop.f32.mrf.mxu1 }
 0x1f0   :  { %v351_v5 = vadd.f32 %v498_v54, %v350_v4 }
 0x1f2   :  { %v366_v6 = vmax.f32 %v351_v5, 0.0 }
 0x1f4   :  { %418 = vmatmul.f32.gmra.mxu2 %v366_v6 }
 0x1f7   :  { %v353_v7 = vpop.f32.mrf.mxu1 }
 0x1f8   :  { %v354_v8 = vadd.f32 %v498_v54, %v353_v7 }
 0x1fa   :  { %v367_v9 = vmax.f32 %v354_v8, 0.0 }
 0x1fc   :  { %421 = vmatmul.f32.gmra.mxu2 %v367_v9 }
 0x1ff   :  { %v356_v10 = vpop.f32.mrf.mxu1 }
 0x200   :  { %v357_v11 = vadd.f32 %v498_v54, %v356_v10 }
 0x202   :  { %v368_v12 = vmax.f32 %v357_v11, 0.0 }
 0x204   :  { %424 = vmatmul.f32.gmra.mxu2 %v368_v12 }
 0x20c   :  { %427 = vmatmul.f32.gmra.mxu2 %v369_v42 }
 0x257   :  { %v407_v16 = vpop.f32.mrf.mxu2 }
 0x258   :  { %v408_v18 = vadd.f32 %v499_v15, %v407_v16 }
 0x25a   :  { %v439_v19 = vadd.f32 %v431_v17, %v408_v18 }
 0x25c   :  { %448 = vst.msk [vmem:[%s886_s12] sm:$0xff] %vm447_vm7, %v439_v19 }
 0x25f   :  { %v410_v20 = vpop.f32.mrf.mxu2 }
 0x260   :  { %v411_v22 = vadd.f32 %v499_v15, %v410_v20 }
 0x262   :  { %v440_v23 = vadd.f32 %v432_v21, %v411_v22 }
 0x264   :  { %449 = vst.msk [vmem:[%s886_s12 + $0x8] sm:$0xff] %vm447_vm7, %v440_v23 }
 0x267   :  { %v413_v27 = vpop.f32.mrf.mxu2 }
 0x268   :  { %v414_v29 = vadd.f32 %v499_v15, %v413_v27 }
 0x26a   :  { %v441_v25 = vadd.f32 %v433_v24, %v414_v29 }
 0x26c   :  { %450 = vst.msk [vmem:[%s886_s12 + $0x10] sm:$0xff] %vm447_vm7, %v441_v25 }
 0x26f   :  { %v416_v30 = vpop.f32.mrf.mxu2 }
 0x270   :  { %v417_v28 = vadd.f32 %v499_v15, %v416_v30 }
 0x272   :  { %v442_v31 = vadd.f32 %v434_v26, %v417_v28 }
 0x274   :  { %451 = vst.msk [vmem:[%s886_s12 + $0x18] sm:$0xff] %vm447_vm7, %v442_v31 }
 0x277   :  { %v419_v33 = vpop.f32.mrf.mxu2 }
 0x278   :  { %v420_v35 = vadd.f32 %v499_v15, %v419_v33 }
 0x27a   :  { %v443_v37 = vadd.f32 %v435_v34, %v420_v35 }
 0x27c   :  { %452 = vst.msk [vmem:[%s886_s12 + $0x20] sm:$0xff] %vm447_vm7, %v443_v37 }
 0x27f   :  { %v422_v38 = vpop.f32.mrf.mxu2 }
 0x280   :  { %v423_v39 = vadd.f32 %v499_v15, %v422_v38 }
 0x282   :  { %v444_v41 = vadd.f32 %v436_v32, %v423_v39 }
 0x284   :  { %453 = vst.msk [vmem:[%s886_s12 + $0x28] sm:$0xff] %vm447_vm7, %v444_v41 }
 0x287   :  { %v425_v43 = vpop.f32.mrf.mxu2 }
 0x288   :  { %v426_v45 = vadd.f32 %v499_v15, %v425_v43 }
 0x28a   :  { %v445_v46 = vadd.f32 %v437_v44, %v426_v45 }
 0x28c   :  { %454 = vst.msk [vmem:[%s886_s12 + $0x30] sm:$0xff] %vm447_vm7, %v445_v46 }
 0x28f   :  { %v428_v36 = vpop.f32.mrf.mxu2 }
 0x290   :  { %v429_v48 = vadd.f32 %v499_v15, %v428_v36 }
 0x292   :  { %v446_v49 = vadd.f32 %v438_v47, %v429_v48 }
 0x294   :  { %455 = vst.msk [vmem:[%s886_s12 + $0x38] sm:$0xff] %vm447_vm7, %v446_v49 }

</bundles_post_ra>
